<compile_context>
chip_gen: v6e
topology: v6e:2x2x1
jax: 0.10.0
libtpu: 0.0.40
codegen_flags: <defaults>
</compile_context>

<pallas_src>
import jax
import jax.numpy as jnp
from jax.experimental import pallas as pl
from jax.experimental.pallas import tpu as pltpu


def _round_up(x, m):
    return ((x + m - 1) // m) * m


def ncf_kernel(gmf_u_ref, gmf_i_ref, mlp_u_ref, mlp_i_ref,
               w1u_ref, w1i_ref, b1_ref,
               w2_ref, b2_ref, w3_ref, b3_ref,
               wfg_ref, wfm_ref, bf_ref,
               out_ref):
    bf16 = jnp.bfloat16

    # ---- GMF branch: elementwise product (VPU, f32). ----------------------
    gmf = gmf_u_ref[...] * gmf_i_ref[...]                            # (TB, F)

    # ---- MLP branch. concat(u, i) @ W1 == u @ W1u + i @ W1i  (no concat). --
    # mlp_* activations are streamed in bf16 (cast done once at init time).
    h = (jnp.dot(mlp_u_ref[...], w1u_ref[...],
                 preferred_element_type=jnp.float32)
         + jnp.dot(mlp_i_ref[...], w1i_ref[...],
                   preferred_element_type=jnp.float32)
         + b1_ref[...])
    h = jnp.maximum(h, 0.0)                                          # (TB, F)
    h = jnp.maximum(
        jnp.dot(h.astype(bf16), w2_ref[...],
                preferred_element_type=jnp.float32) + b2_ref[...], 0.0)  # (TB, F/2)
    h = jnp.maximum(
        jnp.dot(h.astype(bf16), w3_ref[...],
                preferred_element_type=jnp.float32) + b3_ref[...], 0.0)  # (TB, F/4)

    # ---- Final FC on concat(GMF, MLP) as VPU multiply + lane reduction. ----
    score = (jnp.sum(gmf * wfg_ref[...], axis=-1)
             + jnp.sum(h * wfm_ref[...], axis=-1))                   # (TB,)
    # Lane-dense store: batch along the 128-lane axis.
    out_ref[...] = score[None, :] + bf_ref[...]                      # (1, TB)


def _choose_tile(B, block_b):
    """Batch tile: as large as possible (HBM roofline), multiple of 128 when
    actually tiling, and chosen so the grid has >= 2 steps when B allows it
    (so both v7x TensorCores get work via dimension_semantics='parallel')."""
    if B <= 256:
        return _round_up(B, 8)          # single full-extent tile, no grid split
    tb = min(block_b, _round_up(pl.cdiv(B, 2), 128))
    return _round_up(tb, 128)


def ncf_forward(params, user, item, *, block_b=1024):
    """GMF_and_MLP.forward — returns shape (B,) float32, like out.view(-1)."""
    F = params["gmf_user_emb"].shape[1]
    B = user.shape[0]

    tb = _choose_tile(B, block_b)
    b_pad = _round_up(B, tb)
    grid_b = b_pad // tb

    if b_pad != B:
        pad = b_pad - B
        user = jnp.concatenate([user, jnp.zeros((pad,), user.dtype)])
        item = jnp.concatenate([item, jnp.zeros((pad,), item.dtype)])

    # Embedding lookups (nn.Embedding) as plain-JAX gathers (see TODO above).
    gmf_u = jnp.take(params["gmf_user_emb"], user, axis=0)           # (Bp, F) f32
    gmf_i = jnp.take(params["gmf_item_emb"], item, axis=0)           # (Bp, F) f32
    mlp_u = jnp.take(params["mlp_user_emb"], user, axis=0)           # (Bp, F) bf16
    mlp_i = jnp.take(params["mlp_item_emb"], item, axis=0)           # (Bp, F) bf16

    act_spec = pl.BlockSpec((tb, F), lambda i: (i, 0))

    def const_spec(shape):
        # Full-extent block, constant index -> stays VMEM-resident across steps.
        return pl.BlockSpec(shape, lambda i: (0, 0))

    out = pl.pallas_call(
        ncf_kernel,
        out_shape=jax.ShapeDtypeStruct((1, b_pad), jnp.float32),
        grid=(grid_b,),
        in_specs=[act_spec, act_spec, act_spec, act_spec,
                  const_spec(params["w1u"].shape),
                  const_spec(params["w1i"].shape),
                  const_spec(params["b1"].shape),
                  const_spec(params["w2"].shape),
                  const_spec(params["b2"].shape),
                  const_spec(params["w3"].shape),
                  const_spec(params["b3"].shape),
                  const_spec(params["wf_gmf_row"].shape),
                  const_spec(params["wf_mlp_row"].shape),
                  const_spec(params["bf"].shape)],
        out_specs=pl.BlockSpec((1, tb), lambda i: (0, i)),
        compiler_params=pltpu.CompilerParams(
            dimension_semantics=("parallel",)),
    )(gmf_u, gmf_i, mlp_u, mlp_i,
      params["w1u"], params["w1i"], params["b1"],
      params["w2"], params["b2"], params["w3"], params["b3"],
      params["wf_gmf_row"], params["wf_mlp_row"], params["bf"])

    return out.reshape(-1)[:B]


def init_params(key, user_num, item_num, factor_num):
    """Deterministic parameter init mirroring GMF_and_MLP.__init__ shapes."""
    F = factor_num
    ks = jax.random.split(key, 12)

    def xavier(k, fan_in, fan_out):
        limit = (6.0 / (fan_in + fan_out)) ** 0.5
        return jax.random.uniform(k, (fan_in, fan_out), jnp.float32, -limit, limit)

    def bias(k, fan_in, n):
        bound = 1.0 / (fan_in ** 0.5)
        return jax.random.uniform(k, (1, n), jnp.float32, -bound, bound)

    # MLP_layers: Linear(2F->F), Linear(F->F/2), Linear(F/2->F/4), xavier_uniform.
    w1 = xavier(ks[4], 2 * F, F)
    params = {
        # embeddings: normal(std=0.01), as in _init_weight_
        "gmf_user_emb": 0.01 * jax.random.normal(ks[0], (user_num, F), jnp.float32),
        "gmf_item_emb": 0.01 * jax.random.normal(ks[1], (item_num, F), jnp.float32),
        # MLP tables stored in bf16: they feed the bf16 MXU dot directly.
        "mlp_user_emb": (0.01 * jax.random.normal(ks[2], (user_num, F),
                                                  jnp.float32)).astype(jnp.bfloat16),
        "mlp_item_emb": (0.01 * jax.random.normal(ks[3], (item_num, F),
                                                  jnp.float32)).astype(jnp.bfloat16),
        # W1 pre-split so the kernel needs no concat; MLP weights kept in bf16.
        "w1u": w1[:F, :].astype(jnp.bfloat16),
        "w1i": w1[F:, :].astype(jnp.bfloat16),
        "b1": bias(ks[8], 2 * F, F),
        "w2": xavier(ks[5], F, F // 2).astype(jnp.bfloat16),
        "b2": bias(ks[9], F, F // 2),
        "w3": xavier(ks[6], F // 2, F // 4).astype(jnp.bfloat16),
        "b3": bias(ks[10], F // 2, F // 4),
    }
    # FC_layer: Linear(F + F/4 -> 1), split + transposed into row vectors.
    wf = xavier(ks[7], F + F // 4, 1)
    params["wf_gmf_row"] = wf[:F, :].T        # (1, F)    f32 (VPU path)
    params["wf_mlp_row"] = wf[F:, :].T        # (1, F/4)  f32
    params["bf"] = bias(ks[11], F + F // 4, 1)
    return params


def reference_forward(params, user, item):
    """Pure-JAX reference mirroring the PyTorch forward (same bf16 weights)."""
    f32 = jnp.float32
    gmf = (jnp.take(params["gmf_user_emb"], user, axis=0)
           * jnp.take(params["gmf_item_emb"], item, axis=0))
    h = jnp.concatenate([jnp.take(params["mlp_user_emb"], user, axis=0),
                         jnp.take(params["mlp_item_emb"], item, axis=0)], -1)
    w1 = jnp.concatenate([params["w1u"], params["w1i"]], axis=0)
    h = jnp.maximum(jnp.dot(h.astype(jnp.bfloat16), w1,
                            preferred_element_type=f32) + params["b1"], 0.0)
    h = jnp.maximum(jnp.dot(h.astype(jnp.bfloat16), params["w2"],
                            preferred_element_type=f32) + params["b2"], 0.0)
    h = jnp.maximum(jnp.dot(h.astype(jnp.bfloat16), params["w3"],
                            preferred_element_type=f32) + params["b3"], 0.0)
    cat = jnp.concatenate([gmf, h], -1)
    wf = jnp.concatenate([params["wf_gmf_row"], params["wf_mlp_row"]], axis=1).T
    out = jnp.dot(cat, wf, precision=jax.lax.Precision.HIGHEST) + params["bf"]
    return out.reshape(-1)


if __name__ == "__main__":
    user_num, item_num, factor_num = 600, 900, 32
    batch = 2000        # -> tb=1024, b_pad=2048, grid=2 (exercises grid + padding)

    key = jax.random.PRNGKey(0)
    k_params, k_user, k_item = jax.random.split(key, 3)
    params = init_params(k_params, user_num, item_num, factor_num)

    user = jax.random.randint(k_user, (batch,), 0, user_num, dtype=jnp.int32)
    item = jax.random.randint(k_item, (batch,), 0, item_num, dtype=jnp.int32)

    out = jax.jit(ncf_forward)(params, user, item)
    jax.block_until_ready(out)

    ref = reference_forward(params, user, item)
    assert out.shape == (batch,)
    assert jnp.allclose(out, ref, atol=1e-5, rtol=1e-4), (
        float(jnp.max(jnp.abs(out - ref))))

    print("KERNEL_OK")
</pallas_src>

<mosaic_0001>
module attributes {stable_mosaic.version = 11 : i64} {
  func.func @ncf_kernel(%arg0: i32, %arg1: memref<1024x32xf32, #tpu.memory_space<vmem>>, %arg2: memref<1024x32xf32, #tpu.memory_space<vmem>>, %arg3: memref<1024x32xbf16, #tpu.memory_space<vmem>>, %arg4: memref<1024x32xbf16, #tpu.memory_space<vmem>>, %arg5: memref<32x32xbf16, #tpu.memory_space<vmem>>, %arg6: memref<32x32xbf16, #tpu.memory_space<vmem>>, %arg7: memref<1x32xf32, #tpu.memory_space<vmem>>, %arg8: memref<32x16xbf16, #tpu.memory_space<vmem>>, %arg9: memref<1x16xf32, #tpu.memory_space<vmem>>, %arg10: memref<16x8xbf16, #tpu.memory_space<vmem>>, %arg11: memref<1x8xf32, #tpu.memory_space<vmem>>, %arg12: memref<1x32xf32, #tpu.memory_space<vmem>>, %arg13: memref<1x8xf32, #tpu.memory_space<vmem>>, %arg14: memref<1x1xf32, #tpu.memory_space<vmem>>, %arg15: memref<1x1024xf32, #tpu.memory_space<vmem>>) attributes {dimension_semantics = [#tpu.dimension_semantics<parallel>], iteration_bounds = array<i64: 2>, scalar_prefetch = 0 : i64, scratch_operands = 0 : i64, tpu.core_type = #tpu.core_type<tc>, window_params = [{transform_indices = @transform_0, window_bounds = array<i64: 1024, 32>}, {transform_indices = @transform_1, window_bounds = array<i64: 1024, 32>}, {transform_indices = @transform_2, window_bounds = array<i64: 1024, 32>}, {transform_indices = @transform_3, window_bounds = array<i64: 1024, 32>}, {pipeline_mode = #tpu.pipeline_mode<synchronous>, transform_indices = @transform_4, window_bounds = array<i64: 32, 32>}, {pipeline_mode = #tpu.pipeline_mode<synchronous>, transform_indices = @transform_5, window_bounds = array<i64: 32, 32>}, {pipeline_mode = #tpu.pipeline_mode<synchronous>, transform_indices = @transform_6, window_bounds = array<i64: 1, 32>}, {pipeline_mode = #tpu.pipeline_mode<synchronous>, transform_indices = @transform_7, window_bounds = array<i64: 32, 16>}, {pipeline_mode = #tpu.pipeline_mode<synchronous>, transform_indices = @transform_8, window_bounds = array<i64: 1, 16>}, {pipeline_mode = #tpu.pipeline_mode<synchronous>, transform_indices = @transform_9, window_bounds = array<i64: 16, 8>}, {pipeline_mode = #tpu.pipeline_mode<synchronous>, transform_indices = @transform_10, window_bounds = array<i64: 1, 8>}, {pipeline_mode = #tpu.pipeline_mode<synchronous>, transform_indices = @transform_11, window_bounds = array<i64: 1, 32>}, {pipeline_mode = #tpu.pipeline_mode<synchronous>, transform_indices = @transform_12, window_bounds = array<i64: 1, 8>}, {pipeline_mode = #tpu.pipeline_mode<synchronous>, transform_indices = @transform_13, window_bounds = array<i64: 1, 1>}, {transform_indices = @transform_14, window_bounds = array<i64: 1, 1024>}]} {
    %c0 = arith.constant 0 : index
    %c0_0 = arith.constant 0 : index
    %0 = vector.load %arg1[%c0, %c0_0] : memref<1024x32xf32, #tpu.memory_space<vmem>>, vector<1024x32xf32>
    %c0_1 = arith.constant 0 : index
    %c0_2 = arith.constant 0 : index
    %1 = vector.load %arg2[%c0_1, %c0_2] : memref<1024x32xf32, #tpu.memory_space<vmem>>, vector<1024x32xf32>
    %2 = arith.mulf %0, %1 : vector<1024x32xf32>
    %c0_3 = arith.constant 0 : index
    %c0_4 = arith.constant 0 : index
    %3 = vector.load %arg3[%c0_3, %c0_4] : memref<1024x32xbf16, #tpu.memory_space<vmem>>, vector<1024x32xbf16>
    %c0_5 = arith.constant 0 : index
    %c0_6 = arith.constant 0 : index
    %4 = vector.load %arg5[%c0_5, %c0_6] : memref<32x32xbf16, #tpu.memory_space<vmem>>, vector<32x32xbf16>
    %cst = arith.constant dense<0.000000e+00> : vector<1024x32xf32>
    %5 = tpu.matmul %3, %4, %cst {dimension_numbers = #tpu.dot_dimension_numbers<[1], [0], [0], [1], [0, 0, 1, 1], [], []>} : vector<1024x32xbf16>, vector<32x32xbf16>, vector<1024x32xf32> -> vector<1024x32xf32>
    %c0_7 = arith.constant 0 : index
    %c0_8 = arith.constant 0 : index
    %6 = vector.load %arg4[%c0_7, %c0_8] : memref<1024x32xbf16, #tpu.memory_space<vmem>>, vector<1024x32xbf16>
    %c0_9 = arith.constant 0 : index
    %c0_10 = arith.constant 0 : index
    %7 = vector.load %arg6[%c0_9, %c0_10] : memref<32x32xbf16, #tpu.memory_space<vmem>>, vector<32x32xbf16>
    %cst_11 = arith.constant dense<0.000000e+00> : vector<1024x32xf32>
    %8 = tpu.matmul %6, %7, %cst_11 {dimension_numbers = #tpu.dot_dimension_numbers<[1], [0], [0], [1], [0, 0, 1, 1], [], []>} : vector<1024x32xbf16>, vector<32x32xbf16>, vector<1024x32xf32> -> vector<1024x32xf32>
    %9 = arith.addf %5, %8 : vector<1024x32xf32>
    %c0_12 = arith.constant 0 : index
    %c0_13 = arith.constant 0 : index
    %10 = vector.load %arg7[%c0_12, %c0_13] : memref<1x32xf32, #tpu.memory_space<vmem>>, vector<1x32xf32>
    %11 = vector.broadcast %10 : vector<1x32xf32> to vector<1024x32xf32>
    %12 = arith.addf %9, %11 : vector<1024x32xf32>
    %cst_14 = arith.constant 0.000000e+00 : f32
    %13 = vector.broadcast %cst_14 : f32 to vector<1024x32xf32>
    %14 = arith.maximumf %12, %13 : vector<1024x32xf32>
    %15 = arith.truncf %14 : vector<1024x32xf32> to vector<1024x32xbf16>
    %c0_15 = arith.constant 0 : index
    %c0_16 = arith.constant 0 : index
    %16 = vector.load %arg8[%c0_15, %c0_16] : memref<32x16xbf16, #tpu.memory_space<vmem>>, vector<32x16xbf16>
    %cst_17 = arith.constant dense<0.000000e+00> : vector<1024x16xf32>
    %17 = tpu.matmul %15, %16, %cst_17 {dimension_numbers = #tpu.dot_dimension_numbers<[1], [0], [0], [1], [0, 0, 1, 1], [], []>} : vector<1024x32xbf16>, vector<32x16xbf16>, vector<1024x16xf32> -> vector<1024x16xf32>
    %c0_18 = arith.constant 0 : index
    %c0_19 = arith.constant 0 : index
    %18 = vector.load %arg9[%c0_18, %c0_19] : memref<1x16xf32, #tpu.memory_space<vmem>>, vector<1x16xf32>
    %19 = vector.broadcast %18 : vector<1x16xf32> to vector<1024x16xf32>
    %20 = arith.addf %17, %19 : vector<1024x16xf32>
    %cst_20 = arith.constant 0.000000e+00 : f32
    %21 = vector.broadcast %cst_20 : f32 to vector<1024x16xf32>
    %22 = arith.maximumf %20, %21 : vector<1024x16xf32>
    %23 = arith.truncf %22 : vector<1024x16xf32> to vector<1024x16xbf16>
    %c0_21 = arith.constant 0 : index
    %c0_22 = arith.constant 0 : index
    %24 = vector.load %arg10[%c0_21, %c0_22] : memref<16x8xbf16, #tpu.memory_space<vmem>>, vector<16x8xbf16>
    %cst_23 = arith.constant dense<0.000000e+00> : vector<1024x8xf32>
    %25 = tpu.matmul %23, %24, %cst_23 {dimension_numbers = #tpu.dot_dimension_numbers<[1], [0], [0], [1], [0, 0, 1, 1], [], []>} : vector<1024x16xbf16>, vector<16x8xbf16>, vector<1024x8xf32> -> vector<1024x8xf32>
    %c0_24 = arith.constant 0 : index
    %c0_25 = arith.constant 0 : index
    %26 = vector.load %arg11[%c0_24, %c0_25] : memref<1x8xf32, #tpu.memory_space<vmem>>, vector<1x8xf32>
    %27 = vector.broadcast %26 : vector<1x8xf32> to vector<1024x8xf32>
    %28 = arith.addf %25, %27 : vector<1024x8xf32>
    %cst_26 = arith.constant 0.000000e+00 : f32
    %29 = vector.broadcast %cst_26 : f32 to vector<1024x8xf32>
    %30 = arith.maximumf %28, %29 : vector<1024x8xf32>
    %c0_27 = arith.constant 0 : index
    %c0_28 = arith.constant 0 : index
    %31 = vector.load %arg12[%c0_27, %c0_28] : memref<1x32xf32, #tpu.memory_space<vmem>>, vector<1x32xf32>
    %32 = vector.broadcast %31 : vector<1x32xf32> to vector<1024x32xf32>
    %33 = arith.mulf %2, %32 : vector<1024x32xf32>
    %cst_29 = arith.constant dense<0.000000e+00> : vector<1024xf32>
    %34 = vector.multi_reduction <add>, %33, %cst_29 [1] : vector<1024x32xf32> to vector<1024xf32>
    %c0_30 = arith.constant 0 : index
    %c0_31 = arith.constant 0 : index
    %35 = vector.load %arg13[%c0_30, %c0_31] : memref<1x8xf32, #tpu.memory_space<vmem>>, vector<1x8xf32>
    %36 = vector.broadcast %35 : vector<1x8xf32> to vector<1024x8xf32>
    %37 = arith.mulf %30, %36 : vector<1024x8xf32>
    %cst_32 = arith.constant dense<0.000000e+00> : vector<1024xf32>
    %38 = vector.multi_reduction <add>, %37, %cst_32 [1] : vector<1024x8xf32> to vector<1024xf32>
    %39 = arith.addf %34, %38 : vector<1024xf32>
    %40 = vector.shape_cast %39 : vector<1024xf32> to vector<1x1024xf32>
    %c0_33 = arith.constant 0 : index
    %c0_34 = arith.constant 0 : index
    %41 = vector.load %arg14[%c0_33, %c0_34] : memref<1x1xf32, #tpu.memory_space<vmem>>, vector<1x1xf32>
    %42 = vector.broadcast %41 : vector<1x1xf32> to vector<1x1024xf32>
    %43 = arith.addf %40, %42 : vector<1x1024xf32>
    %c0_35 = arith.constant 0 : index
    %c0_36 = arith.constant 0 : index
    %44 = vector.load %arg15[%c0_35, %c0_36] : memref<1x1024xf32, #tpu.memory_space<vmem>>, vector<1x1024xf32>
    tpu.vector_store %arg15[%c0_35, %c0_36], %43 {strides = array<i32>} : memref<1x1024xf32, #tpu.memory_space<vmem>>, vector<1x1024xf32>,
    return
  }
  func.func @transform_0(%arg0: i32) -> (i32, i32) {
    %c0_i32 = arith.constant 0 : i32
    %c0_i32_0 = arith.constant 0 : i32
    return %arg0, %c0_i32 : i32, i32
  }
  func.func @transform_1(%arg0: i32) -> (i32, i32) {
    %c0_i32 = arith.constant 0 : i32
    %c0_i32_0 = arith.constant 0 : i32
    return %arg0, %c0_i32 : i32, i32
  }
  func.func @transform_2(%arg0: i32) -> (i32, i32) {
    %c0_i32 = arith.constant 0 : i32
    %c0_i32_0 = arith.constant 0 : i32
    return %arg0, %c0_i32 : i32, i32
  }
  func.func @transform_3(%arg0: i32) -> (i32, i32) {
    %c0_i32 = arith.constant 0 : i32
    %c0_i32_0 = arith.constant 0 : i32
    return %arg0, %c0_i32 : i32, i32
  }
  func.func @transform_4(%arg0: i32) -> (i32, i32) {
    %c0_i32 = arith.constant 0 : i32
    %c0_i32_0 = arith.constant 0 : i32
    %c0_i32_1 = arith.constant 0 : i32
    return %c0_i32, %c0_i32_0 : i32, i32
  }
  func.func @transform_5(%arg0: i32) -> (i32, i32) {
    %c0_i32 = arith.constant 0 : i32
    %c0_i32_0 = arith.constant 0 : i32
    %c0_i32_1 = arith.constant 0 : i32
    return %c0_i32, %c0_i32_0 : i32, i32
  }
  func.func @transform_6(%arg0: i32) -> (i32, i32) {
    %c0_i32 = arith.constant 0 : i32
    %c0_i32_0 = arith.constant 0 : i32
    %c0_i32_1 = arith.constant 0 : i32
    return %c0_i32, %c0_i32_0 : i32, i32
  }
  func.func @transform_7(%arg0: i32) -> (i32, i32) {
    %c0_i32 = arith.constant 0 : i32
    %c0_i32_0 = arith.constant 0 : i32
    %c0_i32_1 = arith.constant 0 : i32
    return %c0_i32, %c0_i32_0 : i32, i32
  }
  func.func @transform_8(%arg0: i32) -> (i32, i32) {
    %c0_i32 = arith.constant 0 : i32
    %c0_i32_0 = arith.constant 0 : i32
    %c0_i32_1 = arith.constant 0 : i32
    return %c0_i32, %c0_i32_0 : i32, i32
  }
  func.func @transform_9(%arg0: i32) -> (i32, i32) {
    %c0_i32 = arith.constant 0 : i32
    %c0_i32_0 = arith.constant 0 : i32
    %c0_i32_1 = arith.constant 0 : i32
    return %c0_i32, %c0_i32_0 : i32, i32
  }
  func.func @transform_10(%arg0: i32) -> (i32, i32) {
    %c0_i32 = arith.constant 0 : i32
    %c0_i32_0 = arith.constant 0 : i32
    %c0_i32_1 = arith.constant 0 : i32
    return %c0_i32, %c0_i32_0 : i32, i32
  }
  func.func @transform_11(%arg0: i32) -> (i32, i32) {
    %c0_i32 = arith.constant 0 : i32
    %c0_i32_0 = arith.constant 0 : i32
    %c0_i32_1 = arith.constant 0 : i32
    return %c0_i32, %c0_i32_0 : i32, i32
  }
  func.func @transform_12(%arg0: i32) -> (i32, i32) {
    %c0_i32 = arith.constant 0 : i32
    %c0_i32_0 = arith.constant 0 : i32
    %c0_i32_1 = arith.constant 0 : i32
    return %c0_i32, %c0_i32_0 : i32, i32
  }
  func.func @transform_13(%arg0: i32) -> (i32, i32) {
    %c0_i32 = arith.constant 0 : i32
    %c0_i32_0 = arith.constant 0 : i32
    %c0_i32_1 = arith.constant 0 : i32
    return %c0_i32, %c0_i32_0 : i32, i32
  }
  func.func @transform_14(%arg0: i32) -> (i32, i32) {
    %c0_i32 = arith.constant 0 : i32
    %c0_i32_0 = arith.constant 0 : i32
    return %c0_i32, %arg0 : i32, i32
  }
}

</mosaic_0001>

<bundles_post_ra>
// kernel: ncf_forward.1
= control target key start
LH: loop header
LB: loop body
LE: loop exit
PB: predicated region body
PF: predicated region fallthrough
CT: control target
= control target key end

     0   :  { %s27324_s0 = inlined_call_operand.vmem [shape: f32[2048,32], index: 0, kind: input, shape index: {}]   ;;  %s27325_s1 = inlined_call_operand.vmem [shape: f32[2048,32], index: 1, kind: input, shape index: {}]   ;;  %s27326_s2 = inlined_call_operand.vmem [shape: bf16[2048,32], index: 2, kind: input, shape index: {}]   ;;  %s27327_s3 = inlined_call_operand.vmem [shape: bf16[2048,32], index: 3, kind: input, shape index: {}]   ;;  %s27328_s4 = inlined_call_operand.vmem [shape: bf16[32,32], index: 4, kind: input, shape index: {}]   ;;  %s27329_s5 = inlined_call_operand.vmem [shape: bf16[32,32], index: 5, kind: input, shape index: {}]   ;;  %s27330_s6 = inlined_call_operand.vmem [shape: f32[1,32], index: 6, kind: input, shape index: {}]   ;;  %s27331_s7 = inlined_call_operand.vmem [shape: bf16[32,16], index: 7, kind: input, shape index: {}]   ;;  %s27332_s8 = inlined_call_operand.vmem [shape: f32[1,16], index: 8, kind: input, shape index: {}]   ;;  %s27333_s9 = inlined_call_operand.vmem [shape: bf16[16,8], index: 9, kind: input, shape index: {}]   ;;  %s27334_s10 = inlined_call_operand.vmem [shape: f32[1,8], index: 10, kind: input, shape index: {}]   ;;  %s27335_s11 = inlined_call_operand.vmem [shape: f32[1,32], index: 11, kind: input, shape index: {}]   ;;  %s27336_s12 = inlined_call_operand.vmem [shape: f32[1,8], index: 12, kind: input, shape index: {}]   ;;  %s27337_s13 = inlined_call_operand.<no memory space> [shape: f32[1,1], index: 13, kind: input, shape index: {}]   ;;  %s27338_s14 = inlined_call_operand.hbm [shape: f32[1,2048], index: 14, kind: output, shape index: {}]  }
   0x1   :  { %27432 = sst [smem:[#allocation130_spill]] %s27324_s0  ;;  %v19_v0 = vstv %s27337_s13 }
   0x2   :  { %27433 = sst [smem:[#allocation131_spill]] %s27325_s1  ;;  %20 = vst [vmem:[#allocation2] sm:$0x1] %v19_v0 }
   0x3   :  { %27434 = sst [smem:[#allocation132_spill]] %s27328_s4 }
   0x4   :  { %21 = vsyncpa [#allocation4], 0 }
   0x5   :  { %23 = vsyncpa [#allocation4 + $0x1], 0  ;;  %s20032_s15 = smov 0   ;;  %s20034_s16 = smov 0  }
   0x6   :  { %s20036_s17 = smov 0   ;;  %s20038_s18 = smov 0  }
   0x7 LB: > { %s18494_s13 = sadd.s32 4294967295, %s19949_s18   ;;  %s18495_s19 = sadd.s32 4294967294, %s19949_s18   ;;  %s19949_s18 = sphi %s20038_s18, %s28112_s18   ;;  %s19945_s17 = sphi %s20036_s17, %s28111_s17   ;;  %s19941_s16 = sphi %s20034_s16, %s28110_s16   ;;  %s19937_s15 = sphi %s20032_s15, %s28109_s15  }
   0x8   : > { %s20055_s20 = sadd.s32 1, %s19949_s18   ;;  %s350_s21 = sadd.s32 1, %s19945_s17 }
   0x9   : > { %s347_s22 = ssub.s32 %s19949_s18, %s20055_s20  ;;  %p360_p0 = scmp.ne.s32.totalorder %s19945_s17, %s19941_s16 }
   0xa   : > { %p348_p1 = scmp.eq.s32.totalorder %s347_s22, 0  ;;  %p361_p2 = scmp.eq.s32.totalorder %s18494_s13, 1 }
   0xb   : > { %p366_p3 = scmp.ne.s32.totalorder %s19941_s16, %s19937_s15  ;;  %p367_p4 = scmp.eq.s32.totalorder %s18495_s19, 1 }
   0xc   : > { %s20065_s23 = scalar_select %p348_p1, %s19945_s17, %s350_s21  }
   0xd   : > { %p20067_p5 = por %p361_p2, %p360_p0  ;;  %p20071_p6 = por %p367_p4, %p366_p3 }
   0xe   : > { %27435 = sst [smem:[#allocation6_spill]] %s20065_s23  ;;  %p18498_p7 = scmp.ge.s32.totalorder %s19949_s18, 1 }
   0xf   : > { %p451_p8 = scmp.lt.s32.totalorder %s19949_s18, 3 }
  0x11   : > { %p452_p9 = pnand %p18498_p7, %p451_p8 }
  0x13   : > { %455 = sbr.rel (%p452_p9) target bundleno = 2066 (0x812), region = 76 }
  0x18   : > { %v19742_v1 = vld [vmem:[%s27329_s5 + $0x8] sm:$0xff]   ;;  %s20080_s28 = sshll.u32 %s18494_s13, 7  ;;  %s27438_s4 = sld [smem:[#allocation132_spill]]  ;;  %v19744_v3 = vld [vmem:[%s27329_s5] sm:$0xff]   ;;  %vm1518_vm0 = vcmask 261120   ;;  %vm4619_vm1 = vcmask 130048  }
  0x19   : > { %p513_p10 = scmp.lt.s32.totalorder %s20080_s28, 255  ;;  %19173 = vmatprep.subr.bf16.mxu0 %v19742_v1  ;;  %v19750_v5 = vld [vmem:[%s27331_s7 + $0x8] sm:$0xff]   ;;  %v19815_v44 = vld [vmem:[%s27331_s7] sm:$0xff]   ;;  %s27439_s0 = sld [smem:[#allocation130_spill]]  ;;  %vm6139_vm2 = vcmask 64512   ;;  %vm17681_vm3 = vcmask 130112  }
  0x1a   : > { %19174 = vmatpush3.bf16.msra.mxu0 %v19742_v1  ;;  %v19852_v63 = vld [vmem:[%s27333_s9] sm:$0xff]   ;;  %s27440_s1 = sld [smem:[#allocation131_spill]]  ;;  %vm17688_vm4 = vcmask 195712   ;;  %vm17695_vm5 = vcmask 261312   ;;  %vm17702_vm6 = vcmask 326912   ;;  %vm17709_vm7 = vcmask 392512   ;;  %s18398_s23 = scalar_lea.hbm %s27338_s14, %s20080_s28 }
  0x1b   : > { %s20093_s13 = scalar_select %p513_p10, %s20080_s28, 255  ;;  %19175 = vmatprep.subr.bf16.mxu0 %v19744_v3  ;;  %vm17716_vm8 = vcmask 458112   ;;  %vm17723_vm9 = vcmask 523712   ;;  %vm17730_vm10 = vcmask 589312   ;;  %vm17737_vm11 = vcmask 654912  }
  0x1c   : > { %vm17744_vm12 = vcmask 720512   ;;  %vm17751_vm13 = vcmask 786112   ;;  %vm17758_vm14 = vcmask 851712   ;;  %vm17765_vm15 = vcmask 917312   ;;  %s509_s27 = sand.u32 1, %s19941_s16  }
  0x1d   : > { %s18505_s29 = sshll.u32 %s20093_s13, 2  ;;  %s18501_s19 = sshll.u32 %s20093_s13, 3 }
  0x1e   : > { %v19743_v2 = vld [vmem:[%s27438_s4 + $0x8] sm:$0xff]   ;;  %v19745_v4 = vld [vmem:[%s27438_s4] sm:$0xff]   ;;  %s20102_s21 = scalar_lea.vmem %s27327_s3, %s18505_s29  ;;  %s20107_s4 = scalar_lea.vmem %s27326_s2, %s18505_s29  ;;  %19176 = vmatpush3.bf16.msra.mxu0 %v19744_v3 }
  0x1f   : > { %19305 = vmatprep.subr.bf16.mxu1 %v19743_v2  ;;  %v19746_v6 = vld [vmem:[%s20102_s21] sm:$0xff]   ;;  %19437 = vmatprep.subr.bf16.mxu0 %v19750_v5  ;;  %v19748_v8 = vld [vmem:[%s20102_s21 + $0x8] sm:$0xff]   ;;  %v19751_v10 = vld [vmem:[%s20102_s21 + $0x10] sm:$0xff]   ;;  %s20415_s26 = scalar_lea.vmem %s27439_s0, %s18501_s19  ;;  %s18499_s29 = sshll.u32 %s509_s27, 3 }
  0x20   : > { %19306 = vmatpush3.bf16.msra.mxu1 %v19743_v2  ;;  %v19747_v7 = vld [vmem:[%s20107_s4] sm:$0xff]   ;;  %19177 = vmatprep.mubr.msk.bf16.mxu0 %vm1518_vm0, %v19746_v6  ;;  %v19749_v9 = vld [vmem:[%s20107_s4 + $0x8] sm:$0xff]   ;;  %v19752_v11 = vld [vmem:[%s20107_s4 + $0x10] sm:$0xff]   ;;  %s20420_s30 = scalar_lea.vmem %s27440_s1, %s18501_s19  ;;  %s18386_s22 = scalar_lea.sflag [#allocation4], %s509_s27 }
  0x21   : > { %19307 = vmatprep.subr.bf16.mxu1 %v19745_v4  ;;  %19309 = vmatprep.mubr.msk.bf16.mxu1 %vm1518_vm0, %v19747_v7  ;;  %v19753_v12 = vld [vmem:[%s20102_s21 + $0x18] sm:$0xff]   ;;  %v19755_v14 = vld [vmem:[%s20102_s21 + $0x20] sm:$0xff]   ;;  %v19757_v16 = vld [vmem:[%s20102_s21 + $0x28] sm:$0xff]  }
  0x22   : > { %19178 = vmatmul.mubr.msk.bf16.vlgmr.msra.gmra.mxu0 %vm1518_vm0, %v19748_v8  ;;  %v19754_v13 = vld [vmem:[%s20107_s4 + $0x18] sm:$0xff]   ;;  %v19756_v15 = vld [vmem:[%s20107_s4 + $0x20] sm:$0xff]   ;;  %v19758_v17 = vld [vmem:[%s20107_s4 + $0x28] sm:$0xff]  }
  0x23   : > { %19438 = vmatpush3.bf16.msra.mxu0 %v19750_v5  ;;  %19181 = vmatprep.mubr.msk.bf16.mxu0 %vm1518_vm0, %v19751_v10  ;;  %v19759_v18 = vld [vmem:[%s20102_s21 + $0x30] sm:$0xff]   ;;  %v19761_v20 = vld [vmem:[%s20102_s21 + $0x38] sm:$0xff]   ;;  %v19763_v22 = vld [vmem:[%s20102_s21 + $0x40] sm:$0xff]  }
  0x24   : > { %19308 = vmatpush3.bf16.msra.mxu1 %v19745_v4  ;;  %v19760_v19 = vld [vmem:[%s20107_s4 + $0x30] sm:$0xff]   ;;  %v19762_v21 = vld [vmem:[%s20107_s4 + $0x38] sm:$0xff]   ;;  %v19764_v23 = vld [vmem:[%s20107_s4 + $0x40] sm:$0xff]   ;;  %19439 = vmatprep.subr.bf16.mxu0 %v19815_v44 }
  0x25   : > { %v19765_v24 = vld [vmem:[%s20102_s21 + $0x48] sm:$0xff]   ;;  %v19767_v26 = vld [vmem:[%s20102_s21 + $0x50] sm:$0xff]   ;;  %v19769_v28 = vld [vmem:[%s20102_s21 + $0x58] sm:$0xff]   ;;  %19569 = vmatprep.subr.bf16.mxu1 %v19852_v63 }
  0x26   : > { %v19766_v25 = vld [vmem:[%s20107_s4 + $0x48] sm:$0xff]   ;;  %v19768_v27 = vld [vmem:[%s20107_s4 + $0x50] sm:$0xff]   ;;  %v19770_v29 = vld [vmem:[%s20107_s4 + $0x58] sm:$0xff]  }
  0x27   : > { %19310 = vmatmul.mubr.msk.bf16.vlgmr.msra.gmra.mxu1 %vm1518_vm0, %v19749_v9  ;;  %v19771_v30 = vld [vmem:[%s20102_s21 + $0x60] sm:$0xff]   ;;  %v19773_v32 = vld [vmem:[%s20102_s21 + $0x68] sm:$0xff]   ;;  %v19775_v34 = vld [vmem:[%s20102_s21 + $0x70] sm:$0xff]   ;;  %19440 = vmatpush3.bf16.msra.mxu0 %v19815_v44 }
  0x28   : > { %19313 = vmatprep.mubr.msk.bf16.mxu1 %vm1518_vm0, %v19752_v11  ;;  %v19772_v31 = vld [vmem:[%s20107_s4 + $0x60] sm:$0xff]   ;;  %v19774_v33 = vld [vmem:[%s20107_s4 + $0x68] sm:$0xff]   ;;  %v19776_v35 = vld [vmem:[%s20107_s4 + $0x70] sm:$0xff]   ;;  %19570 = vmatpush3.bf16.msra.mxu1 %v19852_v63 }
  0x29   : > { %v19777_v36 = vld [vmem:[%s20102_s21 + $0x78] sm:$0xff]   ;;  %v19779_v38 = vld [vmem:[%s20102_s21 + $0x80] sm:$0xff]   ;;  %v19781_v40 = vld [vmem:[%s20102_s21 + $0x88] sm:$0xff]  }
  0x2a   : > { %19182 = vmatmul.mubr.msk.bf16.gmra.mxu0 %vm1518_vm0, %v19753_v12  ;;  %v19778_v37 = vld [vmem:[%s20107_s4 + $0x78] sm:$0xff]   ;;  %v19780_v39 = vld [vmem:[%s20107_s4 + $0x80] sm:$0xff]   ;;  %v19782_v41 = vld [vmem:[%s20107_s4 + $0x88] sm:$0xff]  }
  0x2b   : > { %19185 = vmatprep.mubr.msk.bf16.mxu0 %vm1518_vm0, %v19755_v14  ;;  %v19783_v42 = vld [vmem:[%s20102_s21 + $0x90] sm:$0xff]   ;;  %v19785_v45 = vld [vmem:[%s20102_s21 + $0x98] sm:$0xff]   ;;  %v19787_v47 = vld [vmem:[%s20102_s21 + $0xa0] sm:$0xff]  }
  0x2c   : > { %v19784_v43 = vld [vmem:[%s20107_s4 + $0x90] sm:$0xff]   ;;  %v19786_v46 = vld [vmem:[%s20107_s4 + $0x98] sm:$0xff]   ;;  %v19788_v48 = vld [vmem:[%s20107_s4 + $0xa0] sm:$0xff]  }
  0x2d   : > { %v19789_v49 = vld [vmem:[%s20102_s21 + $0xa8] sm:$0xff]   ;;  %v19791_v51 = vld [vmem:[%s20102_s21 + $0xb0] sm:$0xff]   ;;  %v19793_v53 = vld [vmem:[%s20102_s21 + $0xb8] sm:$0xff]  }
  0x2e   : > { %v19790_v50 = vld [vmem:[%s20107_s4 + $0xa8] sm:$0xff]   ;;  %v19792_v52 = vld [vmem:[%s20107_s4 + $0xb0] sm:$0xff]   ;;  %v19794_v54 = vld [vmem:[%s20107_s4 + $0xb8] sm:$0xff]  }
  0x2f   : > { %19314 = vmatmul.mubr.msk.bf16.gmra.mxu1 %vm1518_vm0, %v19754_v13  ;;  %v19795_v55 = vld [vmem:[%s20102_s21 + $0xc0] sm:$0xff]   ;;  %v19797_v57 = vld [vmem:[%s20102_s21 + $0xc8] sm:$0xff]   ;;  %v19799_v59 = vld [vmem:[%s20102_s21 + $0xd0] sm:$0xff]  }
  0x30   : > { %19317 = vmatprep.mubr.msk.bf16.mxu1 %vm1518_vm0, %v19756_v15  ;;  %v19796_v56 = vld [vmem:[%s20107_s4 + $0xc0] sm:$0xff]   ;;  %v19798_v58 = vld [vmem:[%s20107_s4 + $0xc8] sm:$0xff]   ;;  %v19800_v60 = vld [vmem:[%s20107_s4 + $0xd0] sm:$0xff]  }
  0x31   : > { %v19801_v61 = vld [vmem:[%s20102_s21 + $0xd8] sm:$0xff]   ;;  %v19803_v0 = vld [vmem:[%s20102_s21 + $0xe0] sm:$0xff]   ;;  %v19805_v2 = vld [vmem:[%s20102_s21 + $0xe8] sm:$0xff]  }
  0x32   : > { %19186 = vmatmul.mubr.msk.bf16.gmra.mxu0 %vm1518_vm0, %v19757_v16  ;;  %v19802_v62 = vld [vmem:[%s20107_s4 + $0xd8] sm:$0xff]   ;;  %v19804_v1 = vld [vmem:[%s20107_s4 + $0xe0] sm:$0xff]   ;;  %v19806_v3 = vld [vmem:[%s20107_s4 + $0xe8] sm:$0xff]  }
  0x33   : > { %19189 = vmatprep.mubr.msk.bf16.mxu0 %vm1518_vm0, %v19759_v18  ;;  %v19807_v4 = vld [vmem:[%s20102_s21 + $0xf0] sm:$0xff]   ;;  %v19809_v6 = vld [vmem:[%s20102_s21 + $0xf8] sm:$0xff]   ;;  %v19811_v8 = vld [vmem:[%s20102_s21 + $0x100] sm:$0xff]  }
  0x34   : > { %v19808_v5 = vld [vmem:[%s20107_s4 + $0xf0] sm:$0xff]   ;;  %v19810_v7 = vld [vmem:[%s20107_s4 + $0xf8] sm:$0xff]   ;;  %v19812_v9 = vld [vmem:[%s20107_s4 + $0x100] sm:$0xff]  }
  0x35   : > { %v19813_v10 = vld [vmem:[%s20102_s21 + $0x108] sm:$0xff]   ;;  %v19816_v12 = vld [vmem:[%s20102_s21 + $0x110] sm:$0xff]   ;;  %v19818_v14 = vld [vmem:[%s20102_s21 + $0x118] sm:$0xff]  }
  0x36   : > { %v19814_v11 = vld [vmem:[%s20107_s4 + $0x108] sm:$0xff]   ;;  %v19817_v13 = vld [vmem:[%s20107_s4 + $0x110] sm:$0xff]   ;;  %v19819_v15 = vld [vmem:[%s20107_s4 + $0x118] sm:$0xff]  }
  0x37   : > { %19318 = vmatmul.mubr.msk.bf16.gmra.mxu1 %vm1518_vm0, %v19758_v17  ;;  %v19820_v16 = vld [vmem:[%s20102_s21 + $0x120] sm:$0xff]   ;;  %v19822_v18 = vld [vmem:[%s20102_s21 + $0x128] sm:$0xff]   ;;  %v19848_v44 = vld [vmem:[%s20102_s21 + $0x190] sm:$0xff]  }
  0x38   : > { %19321 = vmatprep.mubr.msk.bf16.mxu1 %vm1518_vm0, %v19760_v19  ;;  %v19821_v17 = vld [vmem:[%s20107_s4 + $0x120] sm:$0xff]   ;;  %v19823_v19 = vld [vmem:[%s20107_s4 + $0x128] sm:$0xff]  }
  0x39   : > { %v19855_v63 = vld [vmem:[%s20102_s21 + $0x1a8] sm:$0xff]  }
  0x3a   : > { %19190 = vmatmul.mubr.msk.bf16.gmra.mxu0 %vm1518_vm0, %v19761_v20  ;;  %v19824_v20 = vld [vmem:[%s20102_s21 + $0x130] sm:$0xff]  }
  0x3b   : > { %19193 = vmatprep.mubr.msk.bf16.mxu0 %vm1518_vm0, %v19763_v22  ;;  %v19826_v22 = vld [vmem:[%s20102_s21 + $0x138] sm:$0xff]  }
  0x3f   : > { %19322 = vmatmul.mubr.msk.bf16.gmra.mxu1 %vm1518_vm0, %v19762_v21  ;;  %v19825_v21 = vld [vmem:[%s20107_s4 + $0x130] sm:$0xff]  }
  0x40   : > { %19325 = vmatprep.mubr.msk.bf16.mxu1 %vm1518_vm0, %v19764_v23  ;;  %v19827_v23 = vld [vmem:[%s20107_s4 + $0x138] sm:$0xff]  }
  0x42   : > { %19194 = vmatmul.mubr.msk.bf16.gmra.mxu0 %vm1518_vm0, %v19765_v24  ;;  %v19828_v24 = vld [vmem:[%s20102_s21 + $0x140] sm:$0xff]  }
  0x43   : > { %19197 = vmatprep.mubr.msk.bf16.mxu0 %vm1518_vm0, %v19767_v26  ;;  %v19830_v26 = vld [vmem:[%s20102_s21 + $0x148] sm:$0xff]  }
  0x47   : > { %19326 = vmatmul.mubr.msk.bf16.gmra.mxu1 %vm1518_vm0, %v19766_v25  ;;  %v19829_v25 = vld [vmem:[%s20107_s4 + $0x140] sm:$0xff]  }
  0x48   : > { %19329 = vmatprep.mubr.msk.bf16.mxu1 %vm1518_vm0, %v19768_v27  ;;  %v19831_v27 = vld [vmem:[%s20107_s4 + $0x148] sm:$0xff]  }
  0x4a   : > { %19198 = vmatmul.mubr.msk.bf16.gmra.mxu0 %vm1518_vm0, %v19769_v28  ;;  %v19832_v28 = vld [vmem:[%s20102_s21 + $0x150] sm:$0xff]  }
  0x4b   : > { %19201 = vmatprep.mubr.msk.bf16.mxu0 %vm1518_vm0, %v19771_v30  ;;  %v19834_v30 = vld [vmem:[%s20102_s21 + $0x158] sm:$0xff]  }
  0x4f   : > { %19330 = vmatmul.mubr.msk.bf16.gmra.mxu1 %vm1518_vm0, %v19770_v29  ;;  %v19833_v29 = vld [vmem:[%s20107_s4 + $0x150] sm:$0xff]  }
  0x50   : > { %19333 = vmatprep.mubr.msk.bf16.mxu1 %vm1518_vm0, %v19772_v31  ;;  %v19835_v31 = vld [vmem:[%s20107_s4 + $0x158] sm:$0xff]  }
  0x52   : > { %19202 = vmatmul.mubr.msk.bf16.gmra.mxu0 %vm1518_vm0, %v19773_v32  ;;  %v19836_v32 = vld [vmem:[%s20102_s21 + $0x160] sm:$0xff]  }
  0x53   : > { %19205 = vmatprep.mubr.msk.bf16.mxu0 %vm1518_vm0, %v19775_v34  ;;  %v19838_v34 = vld [vmem:[%s20102_s21 + $0x168] sm:$0xff]  }
  0x57   : > { %19334 = vmatmul.mubr.msk.bf16.gmra.mxu1 %vm1518_vm0, %v19774_v33  ;;  %v19837_v33 = vld [vmem:[%s20107_s4 + $0x160] sm:$0xff]  }
  0x58   : > { %19337 = vmatprep.mubr.msk.bf16.mxu1 %vm1518_vm0, %v19776_v35  ;;  %v19839_v35 = vld [vmem:[%s20107_s4 + $0x168] sm:$0xff]  }
  0x5a   : > { %19206 = vmatmul.mubr.msk.bf16.gmra.mxu0 %vm1518_vm0, %v19777_v36  ;;  %v19840_v36 = vld [vmem:[%s20102_s21 + $0x170] sm:$0xff]  }
  0x5b   : > { %19209 = vmatprep.mubr.msk.bf16.mxu0 %vm1518_vm0, %v19779_v38  ;;  %v19842_v38 = vld [vmem:[%s20102_s21 + $0x178] sm:$0xff]  }
  0x5f   : > { %19338 = vmatmul.mubr.msk.bf16.gmra.mxu1 %vm1518_vm0, %v19778_v37  ;;  %v19841_v37 = vld [vmem:[%s20107_s4 + $0x170] sm:$0xff]  }
  0x60   : > { %19341 = vmatprep.mubr.msk.bf16.mxu1 %vm1518_vm0, %v19780_v39  ;;  %v19843_v39 = vld [vmem:[%s20107_s4 + $0x178] sm:$0xff]  }
  0x62   : > { %19210 = vmatmul.mubr.msk.bf16.gmra.mxu0 %vm1518_vm0, %v19781_v40  ;;  %v19844_v40 = vld [vmem:[%s20102_s21 + $0x180] sm:$0xff]  }
  0x63   : > { %19213 = vmatprep.mubr.msk.bf16.mxu0 %vm1518_vm0, %v19783_v42  ;;  %v19846_v42 = vld [vmem:[%s20102_s21 + $0x188] sm:$0xff]  }
  0x67   : > { %19342 = vmatmul.mubr.msk.bf16.gmra.mxu1 %vm1518_vm0, %v19782_v41  ;;  %v19845_v41 = vld [vmem:[%s20107_s4 + $0x180] sm:$0xff]  }
  0x68   : > { %19345 = vmatprep.mubr.msk.bf16.mxu1 %vm1518_vm0, %v19784_v43  ;;  %v19847_v43 = vld [vmem:[%s20107_s4 + $0x188] sm:$0xff]  }
  0x6a   : > { %19214 = vmatmul.mubr.msk.bf16.gmra.mxu0 %vm1518_vm0, %v19785_v45  ;;  %v19849_v45 = vld [vmem:[%s20107_s4 + $0x190] sm:$0xff]  }
  0x6b   : > { %19217 = vmatprep.mubr.msk.bf16.mxu0 %vm1518_vm0, %v19787_v47 }
  0x6f   : > { %19346 = vmatmul.mubr.msk.bf16.gmra.mxu1 %vm1518_vm0, %v19786_v46 }
  0x70   : > { %19349 = vmatprep.mubr.msk.bf16.mxu1 %vm1518_vm0, %v19788_v48 }
  0x72   : > { %19218 = vmatmul.mubr.msk.bf16.gmra.mxu0 %vm1518_vm0, %v19789_v49 }
  0x73   : > { %19221 = vmatprep.mubr.msk.bf16.mxu0 %vm1518_vm0, %v19791_v51  ;;  %v19850_v51 = vld [vmem:[%s20102_s21 + $0x198] sm:$0xff]  }
  0x77   : > { %19350 = vmatmul.mubr.msk.bf16.gmra.mxu1 %vm1518_vm0, %v19790_v50 }
  0x78   : > { %19353 = vmatprep.mubr.msk.bf16.mxu1 %vm1518_vm0, %v19792_v52 }
  0x7a   : > { %19222 = vmatmul.mubr.msk.bf16.gmra.mxu0 %vm1518_vm0, %v19793_v53  ;;  %v19851_v53 = vld [vmem:[%s20107_s4 + $0x198] sm:$0xff]  }
  0x7b   : > { %19225 = vmatprep.mubr.msk.bf16.mxu0 %vm1518_vm0, %v19795_v55 }
  0x7f   : > { %19354 = vmatmul.mubr.msk.bf16.gmra.mxu1 %vm1518_vm0, %v19794_v54  ;;  %v19853_v54 = vld [vmem:[%s20102_s21 + $0x1a0] sm:$0xff]  }
  0x80   : > { %19357 = vmatprep.mubr.msk.bf16.mxu1 %vm1518_vm0, %v19796_v56  ;;  %v19854_v56 = vld [vmem:[%s20107_s4 + $0x1a0] sm:$0xff]  }
  0x82   : > { %19226 = vmatmul.mubr.msk.bf16.gmra.mxu0 %vm1518_vm0, %v19797_v57 }
  0x83   : > { %19229 = vmatprep.mubr.msk.bf16.mxu0 %vm1518_vm0, %v19799_v59 }
  0x87   : > { %19358 = vmatmul.mubr.msk.bf16.gmra.mxu1 %vm1518_vm0, %v19798_v58 }
  0x88   : > { %19361 = vmatprep.mubr.msk.bf16.mxu1 %vm1518_vm0, %v19800_v60 }
  0x8a   : > { %19230 = vmatmul.mubr.msk.bf16.gmra.mxu0 %vm1518_vm0, %v19801_v61 }
  0x8b   : > { %19233 = vmatprep.mubr.msk.bf16.mxu0 %vm1518_vm0, %v19803_v0 }
  0x8f   : > { %19362 = vmatmul.mubr.msk.bf16.gmra.mxu1 %vm1518_vm0, %v19802_v62 }
  0x90   : > { %19365 = vmatprep.mubr.msk.bf16.mxu1 %vm1518_vm0, %v19804_v1  ;;  %v19856_v1 = vld [vmem:[%s20107_s4 + $0x1a8] sm:$0xff]  }
  0x92   : > { %19234 = vmatmul.mubr.msk.bf16.gmra.mxu0 %vm1518_vm0, %v19805_v2  ;;  %v19857_v2 = vld [vmem:[%s20102_s21 + $0x1b0] sm:$0xff]  }
  0x93   : > { %19237 = vmatprep.mubr.msk.bf16.mxu0 %vm1518_vm0, %v19807_v4  ;;  %v19858_v4 = vld [vmem:[%s20107_s4 + $0x1b0] sm:$0xff]  }
  0x97   : > { %19366 = vmatmul.mubr.msk.bf16.gmra.mxu1 %vm1518_vm0, %v19806_v3 }
  0x98   : > { %19369 = vmatprep.mubr.msk.bf16.mxu1 %vm1518_vm0, %v19808_v5 }
  0x9a   : > { %19238 = vmatmul.mubr.msk.bf16.gmra.mxu0 %vm1518_vm0, %v19809_v6 }
  0x9b   : > { %19241 = vmatprep.mubr.msk.bf16.mxu0 %vm1518_vm0, %v19811_v8 }
  0x9f   : > { %19370 = vmatmul.mubr.msk.bf16.gmra.mxu1 %vm1518_vm0, %v19810_v7 }
  0xa0   : > { %19373 = vmatprep.mubr.msk.bf16.mxu1 %vm1518_vm0, %v19812_v9 }
  0xa2   : > { %19242 = vmatmul.mubr.msk.bf16.gmra.mxu0 %vm1518_vm0, %v19813_v10 }
  0xa3   : > { %19245 = vmatprep.mubr.msk.bf16.mxu0 %vm1518_vm0, %v19816_v12 }
  0xa7   : > { %19374 = vmatmul.mubr.msk.bf16.gmra.mxu1 %vm1518_vm0, %v19814_v11  ;;  %v19859_v11 = vld [vmem:[%s20102_s21 + $0x1b8] sm:$0xff]  }
  0xa8   : > { %19377 = vmatprep.mubr.msk.bf16.mxu1 %vm1518_vm0, %v19817_v13  ;;  %v19860_v13 = vld [vmem:[%s20107_s4 + $0x1b8] sm:$0xff]  }
  0xaa   : > { %19246 = vmatmul.mubr.msk.bf16.gmra.mxu0 %vm1518_vm0, %v19818_v14  ;;  %v19861_v14 = vld [vmem:[%s20102_s21 + $0x1c0] sm:$0xff]  }
  0xab   : > { %19249 = vmatprep.mubr.msk.bf16.mxu0 %vm1518_vm0, %v19820_v16  ;;  %v19862_v16 = vld [vmem:[%s20107_s4 + $0x1c0] sm:$0xff]  }
  0xaf   : > { %19378 = vmatmul.mubr.msk.bf16.gmra.mxu1 %vm1518_vm0, %v19819_v15 }
  0xb0   : > { %19381 = vmatprep.mubr.msk.bf16.mxu1 %vm1518_vm0, %v19821_v17 }
  0xb2   : > { %19250 = vmatmul.mubr.msk.bf16.gmra.mxu0 %vm1518_vm0, %v19822_v18 }
  0xb3   : > { %19253 = vmatprep.mubr.msk.bf16.mxu0 %vm1518_vm0, %v19824_v20 }
  0xb7   : > { %19382 = vmatmul.mubr.msk.bf16.gmra.mxu1 %vm1518_vm0, %v19823_v19 }
  0xb8   : > { %19385 = vmatprep.mubr.msk.bf16.mxu1 %vm1518_vm0, %v19825_v21 }
  0xba   : > { %19254 = vmatmul.mubr.msk.bf16.gmra.mxu0 %vm1518_vm0, %v19826_v22 }
  0xbb   : > { %19257 = vmatprep.mubr.msk.bf16.mxu0 %vm1518_vm0, %v19828_v24 }
  0xbf   : > { %19386 = vmatmul.mubr.msk.bf16.gmra.mxu1 %vm1518_vm0, %v19827_v23  ;;  %v19863_v23 = vld [vmem:[%s20102_s21 + $0x1c8] sm:$0xff]  }
  0xc0   : > { %19389 = vmatprep.mubr.msk.bf16.mxu1 %vm1518_vm0, %v19829_v25  ;;  %v19864_v25 = vld [vmem:[%s20107_s4 + $0x1c8] sm:$0xff]  }
  0xc2   : > { %19258 = vmatmul.mubr.msk.bf16.gmra.mxu0 %vm1518_vm0, %v19830_v26  ;;  %v19865_v26 = vld [vmem:[%s20102_s21 + $0x1d0] sm:$0xff]  }
  0xc3   : > { %19261 = vmatprep.mubr.msk.bf16.mxu0 %vm1518_vm0, %v19832_v28  ;;  %v19866_v28 = vld [vmem:[%s20107_s4 + $0x1d0] sm:$0xff]  }
  0xc7   : > { %19390 = vmatmul.mubr.msk.bf16.gmra.mxu1 %vm1518_vm0, %v19831_v27 }
  0xc8   : > { %19393 = vmatprep.mubr.msk.bf16.mxu1 %vm1518_vm0, %v19833_v29 }
  0xca   : > { %19262 = vmatmul.mubr.msk.bf16.gmra.mxu0 %vm1518_vm0, %v19834_v30 }
  0xcb   : > { %19265 = vmatprep.mubr.msk.bf16.mxu0 %vm1518_vm0, %v19836_v32  ;;  %v666_v32 = vld [vmem:[%s20420_s30] sm:$0xff] }
  0xcf   : > { %19394 = vmatmul.mubr.msk.bf16.gmra.mxu1 %vm1518_vm0, %v19835_v31  ;;  %v538_v31 = vld [vmem:[%s20415_s26] sm:$0xff] }
  0xd0   : > { %19397 = vmatprep.mubr.msk.bf16.mxu1 %vm1518_vm0, %v19837_v33 }
  0xd2   : > { %19266 = vmatmul.mubr.msk.bf16.gmra.mxu0 %vm1518_vm0, %v19838_v34  ;;  %v794_v34 = vmul.f32 %v666_v32, %v538_v31  ;;  %v19871_v32 = vld [vmem:[%s20102_s21 + $0x1e8] sm:$0xff]  }
  0xd3   : > { %19269 = vmatprep.mubr.msk.bf16.mxu0 %vm1518_vm0, %v19840_v36  ;;  %v20437_v36 = vld [vmem:[%s27335_s11] ss:$0 sm:$0xff] }
  0xd7   : > { %19398 = vmatmul.mubr.msk.bf16.gmra.mxu1 %vm1518_vm0, %v19839_v35 }
  0xd8   : > { %19401 = vmatprep.mubr.msk.bf16.mxu1 %vm1518_vm0, %v19841_v37 }
  0xda   : > { %19270 = vmatmul.mubr.msk.bf16.gmra.mxu0 %vm1518_vm0, %v19842_v38  ;;  %v5492_v38 = vmul.f32 %v20437_v36, %v794_v34  ;;  %v544_v34 = vld [vmem:[%s20415_s26 + $0x30] sm:$0xff] }
  0xdb   : > { %19273 = vmatprep.mubr.msk.bf16.mxu0 %vm1518_vm0, %v19844_v40  ;;  %v19867_v40 = vld [vmem:[%s20102_s21 + $0x1d8] sm:$0xff]  }
  0xdf   : > { %19402 = vmatmul.mubr.msk.bf16.gmra.mxu1 %vm1518_vm0, %v19843_v39 }
  0xe0   : > { %19405 = vmatprep.mubr.msk.bf16.mxu1 %vm1518_vm0, %v19845_v41  ;;  %v539_v41 = vld [vmem:[%s20415_s26 + $0x8] sm:$0xff] }
  0xe2   : > { %v20315_v46 = vpop.f32.mrf.mxu0  ;;  %19274 = vmatmul.mubr.msk.bf16.gmra.mxu0 %vm1518_vm0, %v19846_v42  ;;  %v667_v42 = vld [vmem:[%s20420_s30 + $0x8] sm:$0xff] }
  0xe3   : > { %19277 = vmatprep.mubr.msk.bf16.mxu0 %vm1518_vm0, %v19848_v44  ;;  %v19868_v44 = vld [vmem:[%s20107_s4 + $0x1d8] sm:$0xff]  }
  0xe4   : > { %v20322_v48 = vpop.f32.mrf.mxu0 }
  0xe6   : > { %v20327_v50 = vpop.f32.mrf.mxu0 }
  0xe7   : > { %v20318_v47 = vpop.f32.mrf.mxu1  ;;  %19406 = vmatmul.mubr.msk.bf16.gmra.mxu1 %vm1518_vm0, %v19847_v43 }
  0xe8   : > { %19409 = vmatprep.mubr.msk.bf16.mxu1 %vm1518_vm0, %v19849_v45  ;;  %v20334_v55 = vpop.f32.mrf.mxu0  ;;  %v19869_v45 = vld [vmem:[%s20102_s21 + $0x1e0] sm:$0xff]  }
  0xe9   : > { %v20325_v49 = vpop.f32.mrf.mxu1 }
  0xea   : > { %v20339_v58 = vpop.f32.mrf.mxu0  ;;  %19278 = vmatmul.mubr.msk.bf16.gmra.mxu0 %vm1518_vm0, %v19850_v51  ;;  %v5620_v51 = vsel %vm1518_vm0, %v5492_v38, 0.0  ;;  %v672_v38 = vld [vmem:[%s20420_s30 + $0x30] sm:$0xff] }
  0xeb   : > { %v20330_v52 = vpop.f32.mrf.mxu1  ;;  %19281 = vmatprep.mubr.msk.bf16.mxu0 %vm1518_vm0, %v19853_v54  ;;  %5621 = vadd.xlane.f32.xlu0 %v5620_v51 }
  0xec   : > { %v20346_v60 = vpop.f32.mrf.mxu0 }
  0xed   : > { %v20337_v57 = vpop.f32.mrf.mxu1 }
  0xee   : > { %v20351_v62 = vpop.f32.mrf.mxu0 }
  0xef   : > { %v20342_v59 = vpop.f32.mrf.mxu1  ;;  %19410 = vmatmul.mubr.msk.bf16.gmra.mxu1 %vm1518_vm0, %v19851_v53  ;;  %v795_v53 = vmul.f32 %v667_v42, %v539_v41  ;;  %v19872_v42 = vld [vmem:[%s20107_s4 + $0x1e8] sm:$0xff]  }
  0xf0   : > { %19413 = vmatprep.mubr.msk.bf16.mxu1 %vm1518_vm0, %v19854_v56  ;;  %v20358_v3 = vpop.f32.mrf.mxu0  ;;  %v19870_v56 = vld [vmem:[%s20107_s4 + $0x1e0] sm:$0xff]  }
  0xf1   : > { %v20349_v61 = vpop.f32.mrf.mxu1 }
  0xf2   : > { %v20363_v6 = vpop.f32.mrf.mxu0  ;;  %19282 = vmatmul.mubr.msk.bf16.gmra.mxu0 %vm1518_vm0, %v19855_v63 }
  0xf3   : > { %v20354_v0 = vpop.f32.mrf.mxu1  ;;  %19285 = vmatprep.mubr.msk.bf16.mxu0 %vm1518_vm0, %v19857_v2 }
  0xf4   : > { %v20370_v8 = vpop.f32.mrf.mxu0 }
  0xf5   : > { %v20361_v5 = vpop.f32.mrf.mxu1 }
  0xf6   : > { %v20375_v10 = vpop.f32.mrf.mxu0 }
  0xf7   : > { %v20366_v7 = vpop.f32.mrf.mxu1  ;;  %19414 = vmatmul.mubr.msk.bf16.gmra.mxu1 %vm1518_vm0, %v19856_v1  ;;  %v5493_v1 = vmul.f32 %v20437_v36, %v795_v53  ;;  %v19874_v53 = vld [vmem:[%s20107_s4 + $0x1f0] sm:$0xff]  }
  0xf8   : > { %19417 = vmatprep.mubr.msk.bf16.mxu1 %vm1518_vm0, %v19858_v4  ;;  %v20382_v15 = vpop.f32.mrf.mxu0  ;;  %v542_v4 = vld [vmem:[%s20415_s26 + $0x20] sm:$0xff] }
  0xf9   : > { %v20373_v9 = vpop.f32.mrf.mxu1 }
  0xfa   : > { %v20387_v18 = vpop.f32.mrf.mxu0  ;;  %19286 = vmatmul.mubr.msk.bf16.gmra.mxu0 %vm1518_vm0, %v19859_v11  ;;  %v670_v11 = vld [vmem:[%s20420_s30 + $0x20] sm:$0xff] }
  0xfb   : > { %v20378_v12 = vpop.f32.mrf.mxu1  ;;  %19289 = vmatprep.mubr.msk.bf16.mxu0 %vm1518_vm0, %v19861_v14  ;;  %v5623_v14 = vsel %vm1518_vm0, %v5493_v1, 0.0 }
  0xfc   : > { %v20394_v20 = vpop.f32.mrf.mxu0  ;;  %5624 = vadd.xlane.f32.xlu0 %v5623_v14 }
  0xfd   : > { %v20385_v17 = vpop.f32.mrf.mxu1 }
  0xfe   : > { %v20399_v22 = vpop.f32.mrf.mxu0 }
  0xff   : > { %v20390_v19 = vpop.f32.mrf.mxu1  ;;  %19418 = vmatmul.mubr.msk.bf16.gmra.mxu1 %vm1518_vm0, %v19860_v13 }
 0x100   : > { %19421 = vmatprep.mubr.msk.bf16.mxu1 %vm1518_vm0, %v19862_v16  ;;  %v20406_v27 = vpop.f32.mrf.mxu0  ;;  %v798_v16 = vmul.f32 %v670_v11, %v542_v4  ;;  %v546_v4 = vld [vmem:[%s20415_s26 + $0x40] sm:$0xff] }
 0x101   : > { %v20397_v21 = vpop.f32.mrf.mxu1  ;;  %v674_v11 = vld [vmem:[%s20420_s30 + $0x40] sm:$0xff] }
 0x102   : > { %v20422_v30 = vpop.f32.mrf.mxu0  ;;  %19290 = vmatmul.mubr.msk.bf16.gmra.mxu0 %vm1518_vm0, %v19863_v23 }
 0x103   : > { %v20402_v24 = vpop.f32.mrf.mxu1  ;;  %19293 = vmatprep.mubr.msk.bf16.mxu0 %vm1518_vm0, %v19865_v26 }
 0x104   : > { %v20431_v35 = vpop.f32.mrf.mxu0 }
 0x105   : > { %v20410_v29 = vpop.f32.mrf.mxu1 }
 0x106   : > { %v20442_v39 = vpop.f32.mrf.mxu0 }
 0x107   : > { %v20427_v33 = vpop.f32.mrf.mxu1  ;;  %19422 = vmatmul.mubr.msk.bf16.gmra.mxu1 %vm1518_vm0, %v19864_v25  ;;  %v2818_v25 = vadd.f32 %v20337_v57, %v20334_v55  ;;  %v800_v57 = vmul.f32 %v672_v38, %v544_v34  ;;  %v2826_v34 = vadd.f32 %v20330_v52, %v20327_v50  ;;  %v19875_v50 = vld [vmem:[%s20102_s21 + $0x1f8] sm:$0xff]   ;;  %v548_v52 = vld [vmem:[%s20415_s26 + $0x50] sm:$0xff] }
 0x108   : > { %19425 = vmatprep.mubr.msk.bf16.mxu1 %vm1518_vm0, %v19866_v28  ;;  %v20452_v54 = vpop.f32.mrf.mxu0  ;;  %v5496_v28 = vmul.f32 %v20437_v36, %v798_v16 }
 0x109   : > { %v20439_v37 = vpop.f32.mrf.mxu1 }
 0x10a   : > { %v20458_v2 = vpop.f32.mrf.mxu0  ;;  %19294 = vmatmul.mubr.msk.bf16.gmra.mxu0 %vm1518_vm0, %v19867_v40  ;;  %v2815_v40 = vadd.f32 %v20325_v49, %v20322_v48  ;;  %v5632_v55 = vsel %vm1518_vm0, %v5496_v28, 0.0  ;;  %v5498_v49 = vmul.f32 %v20437_v36, %v800_v57  ;;  %v802_v28 = vmul.f32 %v674_v11, %v546_v4 }
 0x10b   : > { %v20447_v43 = vpop.f32.mrf.mxu1  ;;  %19297 = vmatprep.mubr.msk.bf16.mxu0 %vm1518_vm0, %v19869_v45  ;;  %v20491_v45 = vld [vmem:[%s27330_s6] ss:$0 sm:$0xff]  ;;  %5633 = vadd.xlane.f32.xlu0 %v5632_v55  ;;  %v2823_v55 = vadd.f32 %v20318_v47, %v20315_v46 }
 0x10c   : > { %v20468_v23 = vpop.f32.mrf.mxu0  ;;  %v3332_v14 = vadd.f32 %v20491_v45, %v2815_v40  ;;  %v2834_v40 = vadd.f32 %v20361_v5, %v20358_v3  ;;  %v19876_v3 = vld [vmem:[%s20107_s4 + $0x1f8] sm:$0xff]  }
 0x10d   : > { %v20455_v63 = vpop.f32.mrf.mxu1 }
 0x10e   : > { %v20476_v31 = vpop.f32.mrf.mxu0  ;;  %v3460_v4 = vmax.f32 %v3332_v14, 0.0 }
 0x10f   : > { %v20463_v13 = vpop.f32.mrf.mxu1  ;;  %19426 = vmatmul.mubr.msk.bf16.gmra.mxu1 %vm1518_vm0, %v19868_v44  ;;  %v19873_v44 = vld [vmem:[%s20102_s21 + $0x1f0] sm:$0xff]   ;;  %s19953_s21 = smov [#allocation3]  }
 0x110   : > { %19429 = vmatprep.mubr.msk.bf16.mxu1 %vm1518_vm0, %v19870_v56  ;;  %v20493_v51 = vpop.f32.mrf.mxu0  ;;  %v3333_v56 = vadd.f32 %v20491_v45, %v2818_v25  ;;  %v5638_v25 = vsel %vm1518_vm0, %v5498_v49, 0.0  ;;  %v676_v49 = vld [vmem:[%s20420_s30 + $0x50] sm:$0xff] }
 0x111   : > { %v20473_v26 = vpop.f32.mrf.mxu1  ;;  %5639 = vadd.xlane.f32.xlu0 %v5638_v25  ;;  %v804_v11 = vmul.f32 %v676_v49, %v548_v52  ;;  %v3335_v25 = vadd.f32 %v20491_v45, %v2826_v34  ;;  %v678_v52 = vld [vmem:[%s20420_s30 + $0x60] sm:$0xff] }
 0x112   : > { %v20500_v1 = vpop.f32.mrf.mxu0  ;;  %19298 = vmatmul.mubr.msk.bf16.gmra.mxu0 %vm1518_vm0, %v19871_v32  ;;  %v3461_v38 = vmax.f32 %v3333_v56, 0.0 }
 0x113   : > { %v20483_v41 = vpop.f32.mrf.mxu1  ;;  %19301 = vmatprep.mubr.msk.bf16.mxu0 %vm1518_vm0, %v19873_v44  ;;  %v5500_v44 = vmul.f32 %v20437_v36, %v802_v28  ;;  %v3337_v28 = vadd.f32 %v20491_v45, %v2834_v40 }
 0x114   : > { %v20513_v32 = vpop.f32.mrf.mxu0  ;;  %v3588_v47 = vpack.c.bf16 %v3461_v38, %v3460_v4  ;;  %v2842_v4 = vadd.f32 %v20354_v0, %v20351_v62  ;;  %v2847_v0 = vadd.f32 %v20373_v9, %v20370_v8 }
 0x115   : > { %v20497_v48 = vpop.f32.mrf.mxu1  ;;  %v5644_v5 = vsel %vm1518_vm0, %v5500_v44, 0.0  ;;  %v550_v44 = vld [vmem:[%s20415_s26 + $0x60] sm:$0xff] }
 0x116   : > { %v20523_v57 = vpop.f32.mrf.mxu0  ;;  %5645 = vadd.xlane.f32.xlu0 %v5644_v5  ;;  %v806_v40 = vmul.f32 %v678_v52, %v550_v44  ;;  %v3465_v5 = vmax.f32 %v3337_v28, 0.0  ;;  %v680_v44 = vld [vmem:[%s20420_s30 + $0x70] sm:$0xff] }
 0x117   : > { %v20506_v16 = vpop.f32.mrf.mxu1  ;;  %19430 = vmatmul.mubr.msk.bf16.gmra.mxu1 %vm1518_vm0, %v19872_v42 }
 0x118   : > { %27441 = vst [vmem:[#allocation7_spill] sm:$0xff] %v20506_v16  ;;  %19433 = vmatprep.mubr.msk.bf16.mxu1 %vm1518_vm0, %v19874_v53  ;;  %v2831_v53 = vadd.f32 %v20349_v61, %v20346_v60  ;;  %v20535_v46 = vpop.f32.mrf.mxu0  ;;  %v5502_v16 = vmul.f32 %v20437_v36, %v804_v11  ;;  %v3334_v60 = vadd.f32 %v20491_v45, %v2823_v55  ;;  %v3463_v55 = vmax.f32 %v3335_v25, 0.0  ;;  %v552_v25 = vld [vmem:[%s20415_s26 + $0x70] sm:$0xff] }
 0x119   : > { %v20518_v42 = vpop.f32.mrf.mxu1 }
 0x11a   : > { %v20542_v61 = vpop.f32.mrf.mxu0  ;;  %19302 = vmatmul.mubr.msk.bf16.gmra.mxu0 %vm1518_vm0, %v19875_v50  ;;  %v3336_v34 = vadd.f32 %v20491_v45, %v2831_v53  ;;  %v5650_v38 = vsel %vm1518_vm0, %v5502_v16, 0.0  ;;  %v2850_v53 = vadd.f32 %v20385_v17, %v20382_v15  ;;  %v2839_v16 = vadd.f32 %v20342_v59, %v20339_v58 }
 0x11b   : > { %v20530_v56 = vpop.f32.mrf.mxu1  ;;  %19441 = vmatprep.mubr.msk.bf16.mxu0 %vm1518_vm0, %v3588_v47  ;;  %5651 = vadd.xlane.f32.xlu0 %v5650_v38  ;;  %v808_v17 = vmul.f32 %v680_v44, %v552_v25 }
 0x11c   : > { %v20555_v50 = vpop.f32.mrf.mxu0  ;;  %v3464_v62 = vmax.f32 %v3336_v34, 0.0  ;;  %v3341_v59 = vadd.f32 %v20491_v45, %v2850_v53  ;;  %v3338_v8 = vadd.f32 %v20491_v45, %v2839_v16  ;;  %v2858_v16 = vadd.f32 %v20378_v12, %v20375_v10 }
 0x11d   : > { %v20538_v14 = vpop.f32.mrf.mxu1  ;;  %v2863_v12 = vadd.f32 %v20397_v21, %v20394_v20 }
 0x11e   : > { %v20564_v47 = vpop.f32.mrf.mxu0  ;;  %v3590_v58 = vpack.c.bf16 %v3465_v5, %v3464_v62  ;;  %v3469_v62 = vmax.f32 %v3341_v59, 0.0 }
 0x11f   : > { %v20548_v49 = vpop.f32.mrf.mxu1  ;;  %19434 = vmatmul.mubr.msk.bf16.gmra.mxu1 %vm1518_vm0, %v19876_v3  ;;  %v5504_v3 = vmul.f32 %v20437_v36, %v806_v40  ;;  %v5506_v40 = vmul.f32 %v20437_v36, %v808_v17 }
 0x120   : > { %27442 = vst [vmem:[#allocation8_spill] sm:$0xff] %v20548_v49  ;;  %v3462_v49 = vmax.f32 %v3334_v60, 0.0  ;;  %v3339_v60 = vadd.f32 %v20491_v45, %v2842_v4  ;;  %v20574_v38 = vpop.f32.mrf.mxu0 }
 0x121   : > { %v20559_v11 = vpop.f32.mrf.mxu1  ;;  %v5656_v15 = vsel %vm1518_vm0, %v5504_v3, 0.0  ;;  %v554_v3 = vld [vmem:[%s20415_s26 + $0x80] sm:$0xff]  ;;  %v5662_v5 = vsel %vm1518_vm0, %v5506_v40, 0.0 }
 0x122   : > { %v3589_v52 = vpack.c.bf16 %v3463_v55, %v3462_v49  ;;  %5657 = vadd.xlane.f32.xlu0 %v5656_v15  ;;  %v20581_v9 = vpop.f32.mrf.mxu0  ;;  %v682_v49 = vld [vmem:[%s20420_s30 + $0x80] sm:$0xff]  ;;  %v3340_v55 = vadd.f32 %v20491_v45, %v2847_v0  ;;  %v3467_v25 = vmax.f32 %v3339_v60, 0.0  ;;  %v2866_v0 = vadd.f32 %v20410_v29, %v20406_v27  ;;  %v556_v60 = vld [vmem:[%s20415_s26 + $0x90] sm:$0xff] }
 0x123   : > { %v20570_v28 = vpop.f32.mrf.mxu1  ;;  %v810_v53 = vmul.f32 %v682_v49, %v554_v3  ;;  %v684_v3 = vld [vmem:[%s20420_s30 + $0x90] sm:$0xff] }
 0x124   : > { %19442 = vmatmul.mubr.msk.bf16.vlgmr.msra.gmra.mxu0 %vm1518_vm0, %v3589_v52  ;;  %v20593_v44 = vpop.f32.mrf.mxu0  ;;  %v3466_v52 = vmax.f32 %v3338_v8, 0.0  ;;  %v3468_v10 = vmax.f32 %v3340_v55, 0.0  ;;  %v812_v29 = vmul.f32 %v684_v3, %v556_v60  ;;  %v3343_v8 = vadd.f32 %v20491_v45, %v2858_v16 }
 0x125   : > { %v20577_v34 = vpop.f32.mrf.mxu1  ;;  %19445 = vmatprep.mubr.msk.bf16.mxu0 %vm1518_vm0, %v3590_v58  ;;  %v5508_v17 = vmul.f32 %v20437_v36, %v810_v53  ;;  %v2855_v58 = vadd.f32 %v20366_v7, %v20363_v6  ;;  %v3345_v7 = vadd.f32 %v20491_v45, %v2866_v0  ;;  %v3344_v16 = vadd.f32 %v20491_v45, %v2863_v12 }
 0x126   : > { %5663 = vadd.xlane.f32.xlu0 %v5662_v5  ;;  %v20602_v40 = vpop.f32.mrf.mxu0  ;;  %v3591_v49 = vpack.c.bf16 %v3467_v25, %v3466_v52  ;;  %v3592_v6 = vpack.c.bf16 %v3469_v62, %v3468_v10  ;;  %v5510_v53 = vmul.f32 %v20437_v36, %v812_v29  ;;  %v686_v25 = vld [vmem:[%s20420_s30 + $0xa0] sm:$0xff]  ;;  %v3471_v60 = vmax.f32 %v3343_v8, 0.0  ;;  %v560_v8 = vld [vmem:[%s20415_s26 + $0xb0] sm:$0xff] }
 0x127   : > { %v20587_v4 = vpop.f32.mrf.mxu1  ;;  %v5668_v27 = vsel %vm1518_vm0, %v5508_v17, 0.0  ;;  %v3342_v20 = vadd.f32 %v20491_v45, %v2855_v58  ;;  %v558_v17 = vld [vmem:[%s20415_s26 + $0xa0] sm:$0xff]  ;;  %v2874_v58 = vadd.f32 %v20402_v24, %v20399_v22  ;;  %v3473_v10 = vmax.f32 %v3345_v7, 0.0 }
 0x128   : > { %v20612_v5 = vpop.f32.mrf.mxu0  ;;  %v5674_v62 = vsel %vm1518_vm0, %v5510_v53, 0.0  ;;  %v814_v0 = vmul.f32 %v686_v25, %v558_v17  ;;  %v2882_v12 = vadd.f32 %v20455_v63, %v20452_v54  ;;  %v688_v17 = vld [vmem:[%s20420_s30 + $0xb0] sm:$0xff]  ;;  %v3472_v22 = vmax.f32 %v3344_v16, 0.0 }
 0x129   : > { %v20597_v15 = vpop.f32.mrf.mxu1  ;;  %v2879_v24 = vadd.f32 %v20439_v37, %v20431_v35  ;;  %v816_v63 = vmul.f32 %v688_v17, %v560_v8 }
 0x12a   : > { %5669 = vadd.xlane.f32.xlu0 %v5668_v27  ;;  %v20619_v21 = vpop.f32.mrf.mxu0  ;;  %v5512_v29 = vmul.f32 %v20437_v36, %v814_v0 }
 0x12b   : > { %v20608_v59 = vpop.f32.mrf.mxu1  ;;  %v5514_v0 = vmul.f32 %v20437_v36, %v816_v63 }
 0x12c   : > { %19446 = vmatmul.mubr.msk.bf16.gmra.mxu0 %vm1518_vm0, %v3591_v49  ;;  %v20631_v3 = vpop.f32.mrf.mxu0  ;;  %v3470_v49 = vmax.f32 %v3342_v20, 0.0  ;;  %v5680_v54 = vsel %vm1518_vm0, %v5512_v29, 0.0  ;;  %v3347_v20 = vadd.f32 %v20491_v45, %v2874_v58  ;;  %v562_v29 = vld [vmem:[%s20415_s26 + $0xc0] sm:$0xff]  ;;  %v3348_v58 = vadd.f32 %v20491_v45, %v2879_v24 }
 0x12d   : > { %v20615_v55 = vpop.f32.mrf.mxu1  ;;  %19449 = vmatprep.mubr.msk.bf16.mxu0 %vm1518_vm0, %v3592_v6  ;;  %v2871_v6 = vadd.f32 %v20390_v19, %v20387_v18  ;;  %v3594_v18 = vpack.c.bf16 %v3473_v10, %v3472_v22  ;;  %v3349_v19 = vadd.f32 %v20491_v45, %v2882_v12  ;;  %v5686_v10 = vsel %vm1518_vm0, %v5514_v0, 0.0 }
 0x12e   : > { %5675 = vadd.xlane.f32.xlu0 %v5674_v62  ;;  %v20640_v53 = vpop.f32.mrf.mxu0  ;;  %v3593_v25 = vpack.c.bf16 %v3471_v60, %v3470_v49  ;;  %v690_v60 = vld [vmem:[%s20420_s30 + $0xc0] sm:$0xff]  ;;  %v3475_v8 = vmax.f32 %v3347_v20, 0.0  ;;  %v2898_v24 = vadd.f32 %v20497_v48, %v20493_v51  ;;  %v2887_v20 = vadd.f32 %v20427_v33, %v20422_v30 }
 0x12f   : > { %v20625_v52 = vpop.f32.mrf.mxu1  ;;  %v3346_v35 = vadd.f32 %v20491_v45, %v2871_v6  ;;  %v818_v12 = vmul.f32 %v690_v60, %v562_v29  ;;  %v2890_v6 = vadd.f32 %v20447_v43, %v20442_v39  ;;  %v3477_v22 = vmax.f32 %v3349_v19, 0.0  ;;  %v564_v39 = vld [vmem:[%s20415_s26 + $0xd0] sm:$0xff] }
 0x130   : > { %v20650_v62 = vpop.f32.mrf.mxu0  ;;  %v692_v43 = vld [vmem:[%s20420_s30 + $0xd0] sm:$0xff]  ;;  %v3476_v0 = vmax.f32 %v3348_v58, 0.0  ;;  %v2895_v29 = vadd.f32 %v20473_v26, %v20468_v23  ;;  %v3353_v58 = vadd.f32 %v20491_v45, %v2898_v24 }
 0x131   : > { %v20635_v27 = vpop.f32.mrf.mxu1  ;;  %v5516_v63 = vmul.f32 %v20437_v36, %v818_v12  ;;  %v820_v48 = vmul.f32 %v692_v43, %v564_v39  ;;  %v540_v60 = vld [vmem:[%s20415_s26 + $0x10] sm:$0xff]  ;;  %v3351_v30 = vadd.f32 %v20491_v45, %v2890_v6  ;;  %v3350_v39 = vadd.f32 %v20491_v45, %v2887_v20  ;;  %v694_v6 = vld [vmem:[%s20420_s30 + $0xe0] sm:$0xff] }
 0x132   : > { %5681 = vadd.xlane.f32.xlu0 %v5680_v54  ;;  %v20657_v37 = vpop.f32.mrf.mxu0  ;;  %v3596_v12 = vpack.c.bf16 %v3477_v22, %v3476_v0 }
 0x133   : > { %v20646_v7 = vpop.f32.mrf.mxu1  ;;  %v5692_v51 = vsel %vm1518_vm0, %v5516_v63, 0.0  ;;  %v5518_v26 = vmul.f32 %v20437_v36, %v820_v48  ;;  %v541_v48 = vld [vmem:[%s20415_s26 + $0x18] sm:$0xff]  ;;  %v3479_v20 = vmax.f32 %v3351_v30, 0.0 }
 0x134   : > { %19450 = vmatmul.mubr.msk.bf16.gmra.mxu0 %vm1518_vm0, %v3593_v25  ;;  %v20669_v17 = vpop.f32.mrf.mxu0  ;;  %v3474_v25 = vmax.f32 %v3346_v35, 0.0  ;;  %v668_v35 = vld [vmem:[%s20420_s30 + $0x10] sm:$0xff] }
 0x135   : > { %v20653_v16 = vpop.f32.mrf.mxu1  ;;  %19453 = vmatprep.mubr.msk.bf16.mxu0 %vm1518_vm0, %v3594_v18  ;;  %v796_v63 = vmul.f32 %v668_v35, %v540_v60  ;;  %v5698_v24 = vsel %vm1518_vm0, %v5518_v26, 0.0  ;;  %v669_v60 = vld [vmem:[%s20420_s30 + $0x18] sm:$0xff]  ;;  %v2906_v35 = vadd.f32 %v20483_v41, %v20476_v31  ;;  %v2903_v31 = vadd.f32 %v20463_v13, %v20458_v2 }
 0x136   : > { %5687 = vadd.xlane.f32.xlu0 %v5686_v10  ;;  %v20678_v18 = vpop.f32.mrf.mxu0  ;;  %v3595_v10 = vpack.c.bf16 %v3475_v8, %v3474_v25  ;;  %v566_v8 = vld [vmem:[%s20415_s26 + $0xe0] sm:$0xff]  ;;  %v3352_v25 = vadd.f32 %v20491_v45, %v2895_v29  ;;  %v2914_v29 = vadd.f32 %v20538_v14, %v20535_v46  ;;  %v2911_v41 = vadd.f32 %v20518_v42, %v20513_v32  ;;  %v568_v14 = vld [vmem:[%s20415_s26 + $0xf0] sm:$0xff] }
 0x137   : > { %v20663_v49 = vpop.f32.mrf.mxu1  ;;  %v5494_v0 = vmul.f32 %v20437_v36, %v796_v63  ;;  %v3355_v13 = vadd.f32 %v20491_v45, %v2906_v35 }
 0x138   : > { %v20690_v33 = vpop.f32.mrf.mxu0  ;;  %v3357_v32 = vadd.f32 %v20491_v45, %v2914_v29  ;;  %v570_v29 = vld [vmem:[%s20415_s26 + $0x100] sm:$0xff] }
 0x139   : > { %v20673_v54 = vpop.f32.mrf.mxu1  ;;  %v5626_v63 = vsel %vm1518_vm0, %v5494_v0, 0.0 }
 0x13a   : > { %5693 = vadd.xlane.f32.xlu0 %v5692_v51  ;;  %v20697_v43 = vpop.f32.mrf.mxu0  ;;  %v822_v51 = vmul.f32 %v694_v6, %v566_v8  ;;  %v3478_v8 = vmax.f32 %v3350_v39, 0.0  ;;  %5627 = vadd.xlane.f32.xlu1 %v5626_v63  ;;  %v3480_v6 = vmax.f32 %v3352_v25, 0.0  ;;  %v543_v39 = vld [vmem:[%s20415_s26 + $0x28] sm:$0xff] }
 0x13b   : > { %v20684_v19 = vpop.f32.mrf.mxu1 }
 0x13c   : > { %19454 = vmatmul.mubr.msk.bf16.gmra.mxu0 %vm1518_vm0, %v3595_v10  ;;  %v20714_v10 = vpop.f32.mrf.mxu0  ;;  %v5520_v30 = vmul.f32 %v20437_v36, %v822_v51  ;;  %v3597_v2 = vpack.c.bf16 %v3479_v20, %v3478_v8  ;;  %v3354_v20 = vadd.f32 %v20491_v45, %v2903_v31  ;;  %v3356_v8 = vadd.f32 %v20491_v45, %v2911_v41  ;;  %v673_v31 = vld [vmem:[%s20420_s30 + $0x38] sm:$0xff] }
 0x13d   : > { %v20693_v23 = vpop.f32.mrf.mxu1  ;;  %19457 = vmatprep.mubr.msk.bf16.mxu0 %vm1518_vm0, %v3596_v12  ;;  %v797_v12 = vmul.f32 %v669_v60, %v541_v48  ;;  %v671_v60 = vld [vmem:[%s20420_s30 + $0x28] sm:$0xff]  ;;  %v3483_v41 = vmax.f32 %v3355_v13, 0.0 }
 0x13e   : > { %5699 = vadd.xlane.f32.xlu0 %v5698_v24  ;;  %v20724_v46 = vpop.f32.mrf.mxu0  ;;  %v5704_v48 = vsel %vm1518_vm0, %v5520_v30, 0.0 }
 0x13f   : > { %v20703_v22 = vpop.f32.mrf.mxu1  ;;  %v5495_v0 = vmul.f32 %v20437_v36, %v797_v12 }
 0x140   : > { %27443 = vst [vmem:[#allocation9_spill] sm:$0xff] %v20703_v22  ;;  %v3481_v22 = vmax.f32 %v3353_v58, 0.0  ;;  %v696_v58 = vld [vmem:[%s20420_s30 + $0xf0] sm:$0xff]  ;;  %v20736_v42 = vpop.f32.mrf.mxu0 }
 0x141   : > { %v20716_v26 = vpop.f32.mrf.mxu1  ;;  %v824_v51 = vmul.f32 %v696_v58, %v568_v14  ;;  %v5629_v30 = vsel %vm1518_vm0, %v5495_v0, 0.0  ;;  %v799_v14 = vmul.f32 %v671_v60, %v543_v39  ;;  %v2922_v39 = vadd.f32 %v20530_v56, %v20523_v57 }
 0x142   : > { %5705 = vadd.xlane.f32.xlu0 %v5704_v48  ;;  %v3598_v25 = vpack.c.bf16 %v3481_v22, %v3480_v6  ;;  %v20744_v35 = vpop.f32.mrf.mxu0  ;;  %5630 = vadd.xlane.f32.xlu1 %v5629_v30  ;;  %v698_v22 = vld [vmem:[%s20420_s30 + $0x100] sm:$0xff]  ;;  %v3485_v60 = vmax.f32 %v3357_v32, 0.0  ;;  %v3484_v56 = vmax.f32 %v3356_v8, 0.0 }
 0x143   : > { %v20728_v24 = vpop.f32.mrf.mxu1  ;;  %v5522_v12 = vmul.f32 %v20437_v36, %v824_v51  ;;  %v5497_v48 = vmul.f32 %v20437_v36, %v799_v14  ;;  %v826_v0 = vmul.f32 %v698_v22, %v570_v29  ;;  %v545_v51 = vld [vmem:[%s20415_s26 + $0x38] sm:$0xff]  ;;  %v3482_v29 = vmax.f32 %v3354_v20, 0.0  ;;  %v547_v20 = vld [vmem:[%s20415_s26 + $0x48] sm:$0xff] }
 0x144   : > { %19458 = vmatmul.mubr.msk.bf16.gmra.mxu0 %vm1518_vm0, %v3597_v2  ;;  %v20758_v2 = vpop.f32.mrf.mxu0  ;;  %v801_v30 = vmul.f32 %v673_v31, %v545_v51  ;;  %v27445_v22 = vld [vmem:[#allocation7_spill] sm:$0xff]  ;;  %v3359_v8 = vadd.f32 %v20491_v45, %v2922_v39  ;;  %v574_v39 = vld [vmem:[%s20415_s26 + $0x120] sm:$0xff] }
 0x145   : > { %v20738_v63 = vpop.f32.mrf.mxu1  ;;  %19461 = vmatprep.mubr.msk.bf16.mxu0 %vm1518_vm0, %v3598_v25  ;;  %v5710_v6 = vsel %vm1518_vm0, %v5522_v12, 0.0  ;;  %v2930_v25 = vadd.f32 %v20577_v34, %v20574_v38  ;;  %v5635_v14 = vsel %vm1518_vm0, %v5497_v48, 0.0  ;;  %v5524_v13 = vmul.f32 %v20437_v36, %v826_v0  ;;  %v700_v51 = vld [vmem:[%s20420_s30 + $0x110] sm:$0xff] }
 0x146   : > { %5711 = vadd.xlane.f32.xlu0 %v5710_v6  ;;  %v2919_v57 = vadd.f32 %v27445_v22, %v20500_v1  ;;  %v20768_v32 = vpop.f32.mrf.mxu0  ;;  %5636 = vadd.xlane.f32.xlu1 %v5635_v14  ;;  %v572_v6 = vld [vmem:[%s20415_s26 + $0x110] sm:$0xff]  ;;  %v2927_v38 = vadd.f32 %v20559_v11, %v20555_v50  ;;  %v5499_v48 = vmul.f32 %v20437_v36, %v801_v30 }
 0x147   : > { %v20749_v58 = vpop.f32.mrf.mxu1  ;;  %v5716_v31 = vsel %vm1518_vm0, %v5524_v13, 0.0  ;;  %v828_v0 = vmul.f32 %v700_v51, %v572_v6  ;;  %v3599_v1 = vpack.c.bf16 %v3483_v41, %v3482_v29  ;;  %v3600_v14 = vpack.c.bf16 %v3485_v60, %v3484_v56  ;;  %v702_v60 = vld [vmem:[%s20420_s30 + $0x120] sm:$0xff] }
 0x148   : > { %27444 = vst [vmem:[#allocation10_spill] sm:$0xff] %v20749_v58  ;;  %v675_v58 = vld [vmem:[%s20420_s30 + $0x48] sm:$0xff]  ;;  %v20781_v22 = vpop.f32.mrf.mxu0  ;;  %v3361_v50 = vadd.f32 %v20491_v45, %v2930_v25  ;;  %v5641_v13 = vsel %vm1518_vm0, %v5499_v48, 0.0  ;;  %v3358_v51 = vadd.f32 %v20491_v45, %v2919_v57  ;;  %v3360_v25 = vadd.f32 %v20491_v45, %v2927_v38  ;;  %v549_v48 = vld [vmem:[%s20415_s26 + $0x58] sm:$0xff] }
 0x149   : > { %v20762_v12 = vpop.f32.mrf.mxu1  ;;  %v5526_v30 = vmul.f32 %v20437_v36, %v828_v0  ;;  %v803_v6 = vmul.f32 %v675_v58, %v547_v20  ;;  %v830_v58 = vmul.f32 %v702_v60, %v574_v39  ;;  %v677_v57 = vld [vmem:[%s20420_s30 + $0x58] sm:$0xff]  ;;  %v3487_v0 = vmax.f32 %v3359_v8, 0.0 }
 0x14a   : > { %5717 = vadd.xlane.f32.xlu0 %v5716_v31  ;;  %v20789_v41 = vpop.f32.mrf.mxu0  ;;  %5642 = vadd.xlane.f32.xlu1 %v5641_v13  ;;  %v2938_v20 = vadd.f32 %v20570_v28, %v20564_v47  ;;  %v2946_v38 = vadd.f32 %v20615_v55, %v20612_v5  ;;  %v3489_v13 = vmax.f32 %v3361_v50, 0.0  ;;  %v3486_v39 = vmax.f32 %v3358_v51, 0.0  ;;  %v27447_v60 = vld [vmem:[#allocation8_spill] sm:$0xff]  ;;  %v576_v55 = vld [vmem:[%s20415_s26 + $0x130] sm:$0xff]  ;;  %v551_v51 = vld [vmem:[%s20415_s26 + $0x68] sm:$0xff] }
 0x14b   : > { %v20774_v34 = vpop.f32.mrf.mxu1  ;;  %v5722_v56 = vsel %vm1518_vm0, %v5526_v30, 0.0  ;;  %v5501_v31 = vmul.f32 %v20437_v36, %v803_v6  ;;  %v5528_v8 = vmul.f32 %v20437_v36, %v830_v58  ;;  %v2935_v47 = vadd.f32 %v27447_v60, %v20542_v61  ;;  %v704_v50 = vld [vmem:[%s20420_s30 + $0x130] sm:$0xff] }
 0x14c   : > { %19462 = vmatmul.mubr.msk.bf16.gmra.mxu0 %vm1518_vm0, %v3599_v1  ;;  %v20806_v1 = vpop.f32.mrf.mxu0  ;;  %v2943_v28 = vadd.f32 %v20597_v15, %v20593_v44  ;;  %v832_v58 = vmul.f32 %v704_v50, %v576_v55  ;;  %v3601_v61 = vpack.c.bf16 %v3487_v0, %v3486_v39  ;;  %v3363_v44 = vadd.f32 %v20491_v45, %v2938_v20 }
 0x14d   : > { %v20784_v11 = vpop.f32.mrf.mxu1  ;;  %19465 = vmatprep.mubr.msk.bf16.mxu0 %vm1518_vm0, %v3600_v14  ;;  %v805_v14 = vmul.f32 %v677_v57, %v549_v48  ;;  %v5647_v6 = vsel %vm1518_vm0, %v5501_v31, 0.0  ;;  %v5728_v57 = vsel %vm1518_vm0, %v5528_v8, 0.0  ;;  %v3365_v15 = vadd.f32 %v20491_v45, %v2946_v38  ;;  %v578_v38 = vld [vmem:[%s20415_s26 + $0x140] sm:$0xff] }
 0x14e   : > { %5723 = vadd.xlane.f32.xlu0 %v5722_v56  ;;  %v20816_v5 = vpop.f32.mrf.mxu0  ;;  %5648 = vadd.xlane.f32.xlu1 %v5647_v6  ;;  %v3488_v56 = vmax.f32 %v3360_v25, 0.0  ;;  %v3362_v0 = vadd.f32 %v20491_v45, %v2935_v47  ;;  %v3364_v39 = vadd.f32 %v20491_v45, %v2943_v28  ;;  %v681_v47 = vld [vmem:[%s20420_s30 + $0x78] sm:$0xff]  ;;  %v3491_v28 = vmax.f32 %v3363_v44, 0.0 }
 0x14f   : > { %v20795_v29 = vpop.f32.mrf.mxu1  ;;  %v5503_v31 = vmul.f32 %v20437_v36, %v805_v14  ;;  %v5530_v14 = vmul.f32 %v20437_v36, %v832_v58  ;;  %v2954_v58 = vadd.f32 %v20608_v59, %v20602_v40  ;;  %v2951_v40 = vadd.f32 %v20587_v4, %v20581_v9 }
 0x150   : > { %27446 = vst [vmem:[#allocation7_spill] sm:$0xff] %v20795_v29  ;;  %v679_v29 = vld [vmem:[%s20420_s30 + $0x68] sm:$0xff]  ;;  %v20828_v6 = vpop.f32.mrf.mxu0  ;;  %v3602_v25 = vpack.c.bf16 %v3489_v13, %v3488_v56  ;;  %v706_v13 = vld [vmem:[%s20420_s30 + $0x140] sm:$0xff]  ;;  %v3492_v59 = vmax.f32 %v3364_v39, 0.0 }
 0x151   : > { %v20808_v30 = vpop.f32.mrf.mxu1  ;;  %v5653_v8 = vsel %vm1518_vm0, %v5503_v31, 0.0  ;;  %v807_v55 = vmul.f32 %v679_v29, %v551_v51  ;;  %v5734_v56 = vsel %vm1518_vm0, %v5530_v14, 0.0  ;;  %v834_v29 = vmul.f32 %v706_v13, %v578_v38  ;;  %v553_v31 = vld [vmem:[%s20415_s26 + $0x78] sm:$0xff]  ;;  %v580_v13 = vld [vmem:[%s20415_s26 + $0x150] sm:$0xff] }
 0x152   : > { %5729 = vadd.xlane.f32.xlu0 %v5728_v57  ;;  %v20836_v20 = vpop.f32.mrf.mxu0  ;;  %5654 = vadd.xlane.f32.xlu1 %v5653_v8  ;;  %v3493_v51 = vmax.f32 %v3365_v15, 0.0  ;;  %v809_v8 = vmul.f32 %v681_v47, %v553_v31  ;;  %v3490_v38 = vmax.f32 %v3362_v0, 0.0  ;;  %v555_v0 = vld [vmem:[%s20415_s26 + $0x88] sm:$0xff]  ;;  %v3367_v4 = vadd.f32 %v20491_v45, %v2954_v58  ;;  %v582_v58 = vld [vmem:[%s20415_s26 + $0x160] sm:$0xff] }
 0x153   : > { %v20820_v48 = vpop.f32.mrf.mxu1  ;;  %v5505_v57 = vmul.f32 %v20437_v36, %v807_v55  ;;  %v5532_v44 = vmul.f32 %v20437_v36, %v834_v29  ;;  %v683_v47 = vld [vmem:[%s20420_s30 + $0x88] sm:$0xff] }
 0x154   : > { %19466 = vmatmul.mubr.msk.bf16.gmra.mxu0 %vm1518_vm0, %v3601_v61  ;;  %v20850_v61 = vpop.f32.mrf.mxu0  ;;  %v3603_v9 = vpack.c.bf16 %v3491_v28, %v3490_v38  ;;  %v3604_v39 = vpack.c.bf16 %v3493_v51, %v3492_v59  ;;  %v710_v51 = vld [vmem:[%s20420_s30 + $0x160] sm:$0xff] }
 0x155   : > { %v20830_v60 = vpop.f32.mrf.mxu1  ;;  %19469 = vmatprep.mubr.msk.bf16.mxu0 %vm1518_vm0, %v3602_v25  ;;  %v2962_v25 = vadd.f32 %v20653_v16, %v20650_v62  ;;  %v5659_v55 = vsel %vm1518_vm0, %v5505_v57, 0.0  ;;  %v2959_v62 = vadd.f32 %v20635_v27, %v20631_v3  ;;  %v5740_v31 = vsel %vm1518_vm0, %v5532_v44, 0.0 }
 0x156   : > { %5735 = vadd.xlane.f32.xlu0 %v5734_v56  ;;  %v20860_v15 = vpop.f32.mrf.mxu0  ;;  %5660 = vadd.xlane.f32.xlu1 %v5659_v55  ;;  %v708_v56 = vld [vmem:[%s20420_s30 + $0x150] sm:$0xff]  ;;  %v5507_v57 = vmul.f32 %v20437_v36, %v809_v8 }
 0x157   : > { %v20841_v50 = vpop.f32.mrf.mxu1  ;;  %v836_v29 = vmul.f32 %v708_v56, %v580_v13  ;;  %v3369_v3 = vadd.f32 %v20491_v45, %v2962_v25  ;;  %v811_v13 = vmul.f32 %v683_v47, %v555_v0  ;;  %v3366_v56 = vadd.f32 %v20491_v45, %v2951_v40  ;;  %v685_v40 = vld [vmem:[%s20420_s30 + $0x98] sm:$0xff] }
 0x158   : > { %v20873_v55 = vpop.f32.mrf.mxu0  ;;  %v5665_v44 = vsel %vm1518_vm0, %v5507_v57, 0.0  ;;  %v3368_v25 = vadd.f32 %v20491_v45, %v2959_v62  ;;  %v838_v57 = vmul.f32 %v710_v51, %v582_v58  ;;  %v3495_v0 = vmax.f32 %v3367_v4, 0.0 }
 0x159   : > { %v20854_v14 = vpop.f32.mrf.mxu1  ;;  %v5534_v8 = vmul.f32 %v20437_v36, %v836_v29  ;;  %v557_v29 = vld [vmem:[%s20415_s26 + $0x98] sm:$0xff]  ;;  %v2970_v47 = vadd.f32 %v20646_v7, %v20640_v53  ;;  %v2978_v62 = vadd.f32 %v20693_v23, %v20690_v33  ;;  %v3494_v58 = vmax.f32 %v3366_v56, 0.0  ;;  %v584_v23 = vld [vmem:[%s20415_s26 + $0x170] sm:$0xff]  ;;  %v559_v56 = vld [vmem:[%s20415_s26 + $0xa8] sm:$0xff] }
 0x15a   : > { %5741 = vadd.xlane.f32.xlu0 %v5740_v31  ;;  %v20881_v28 = vpop.f32.mrf.mxu0  ;;  %5666 = vadd.xlane.f32.xlu1 %v5665_v44  ;;  %v5509_v31 = vmul.f32 %v20437_v36, %v811_v13  ;;  %v3497_v44 = vmax.f32 %v3369_v3, 0.0  ;;  %v5536_v4 = vmul.f32 %v20437_v36, %v838_v57  ;;  %v2967_v53 = vadd.f32 %v20625_v52, %v20619_v21  ;;  %v712_v3 = vld [vmem:[%s20420_s30 + $0x170] sm:$0xff] }
 0x15b   : > { %v20866_v16 = vpop.f32.mrf.mxu1  ;;  %v5746_v59 = vsel %vm1518_vm0, %v5534_v8, 0.0  ;;  %v2975_v7 = vadd.f32 %v20673_v54, %v20669_v17  ;;  %v3496_v51 = vmax.f32 %v3368_v25, 0.0  ;;  %v840_v57 = vmul.f32 %v712_v3, %v584_v23 }
 0x15c   : > { %19470 = vmatmul.mubr.msk.bf16.gmra.mxu0 %vm1518_vm0, %v3603_v9  ;;  %v20898_v9 = vpop.f32.mrf.mxu0  ;;  %v5671_v13 = vsel %vm1518_vm0, %v5509_v31, 0.0  ;;  %v3605_v21 = vpack.c.bf16 %v3495_v0, %v3494_v58  ;;  %v3371_v52 = vadd.f32 %v20491_v45, %v2970_v47  ;;  %v3373_v17 = vadd.f32 %v20491_v45, %v2978_v62  ;;  %v586_v62 = vld [vmem:[%s20415_s26 + $0x180] sm:$0xff] }
 0x15d   : > { %v20876_v27 = vpop.f32.mrf.mxu1  ;;  %19473 = vmatprep.mubr.msk.bf16.mxu0 %vm1518_vm0, %v3604_v39  ;;  %v813_v39 = vmul.f32 %v685_v40, %v557_v29  ;;  %v5752_v29 = vsel %vm1518_vm0, %v5536_v4, 0.0  ;;  %v687_v40 = vld [vmem:[%s20420_s30 + $0xa8] sm:$0xff]  ;;  %v3606_v25 = vpack.c.bf16 %v3497_v44, %v3496_v51  ;;  %v3370_v0 = vadd.f32 %v20491_v45, %v2967_v53  ;;  %v714_v44 = vld [vmem:[%s20420_s30 + $0x180] sm:$0xff]  ;;  %v689_v53 = vld [vmem:[%s20420_s30 + $0xb8] sm:$0xff] }
 0x15e   : > { %5747 = vadd.xlane.f32.xlu0 %v5746_v59  ;;  %v20908_v33 = vpop.f32.mrf.mxu0  ;;  %5672 = vadd.xlane.f32.xlu1 %v5671_v13  ;;  %v815_v23 = vmul.f32 %v687_v40, %v559_v56  ;;  %v3372_v58 = vadd.f32 %v20491_v45, %v2975_v7  ;;  %v3499_v7 = vmax.f32 %v3371_v52, 0.0  ;;  %v2986_v56 = vadd.f32 %v20684_v19, %v20678_v18 }
 0x15f   : > { %v20887_v38 = vpop.f32.mrf.mxu1  ;;  %v5511_v31 = vmul.f32 %v20437_v36, %v813_v39  ;;  %v5538_v39 = vmul.f32 %v20437_v36, %v840_v57  ;;  %v561_v57 = vld [vmem:[%s20415_s26 + $0xb8] sm:$0xff]  ;;  %v3501_v40 = vmax.f32 %v3373_v17, 0.0  ;;  %v2983_v18 = vadd.f32 %v20663_v49, %v20657_v37 }
 0x160   : > { %v20920_v54 = vpop.f32.mrf.mxu0  ;;  %v3500_v19 = vmax.f32 %v3372_v58, 0.0  ;;  %v3375_v49 = vadd.f32 %v20491_v45, %v2986_v56 }
 0x161   : > { %v20900_v8 = vpop.f32.mrf.mxu1  ;;  %v5677_v4 = vsel %vm1518_vm0, %v5511_v31, 0.0  ;;  %v5758_v51 = vsel %vm1518_vm0, %v5538_v39, 0.0  ;;  %v842_v31 = vmul.f32 %v714_v44, %v586_v62  ;;  %v3498_v62 = vmax.f32 %v3370_v0, 0.0  ;;  %v588_v44 = vld [vmem:[%s20415_s26 + $0x190] sm:$0xff]  ;;  %v563_v0 = vld [vmem:[%s20415_s26 + $0xc8] sm:$0xff] }
 0x162   : > { %5753 = vadd.xlane.f32.xlu0 %v5752_v29  ;;  %v20928_v47 = vpop.f32.mrf.mxu0  ;;  %5678 = vadd.xlane.f32.xlu1 %v5677_v4  ;;  %v5513_v29 = vmul.f32 %v20437_v36, %v815_v23  ;;  %v817_v4 = vmul.f32 %v689_v53, %v561_v57  ;;  %v691_v53 = vld [vmem:[%s20420_s30 + $0xc8] sm:$0xff]  ;;  %v3608_v58 = vpack.c.bf16 %v3501_v40, %v3500_v19 }
 0x163   : > { %v20912_v59 = vpop.f32.mrf.mxu1  ;;  %v5540_v52 = vmul.f32 %v20437_v36, %v842_v31  ;;  %v3607_v37 = vpack.c.bf16 %v3499_v7, %v3498_v62  ;;  %v819_v56 = vmul.f32 %v691_v53, %v563_v0  ;;  %v3374_v40 = vadd.f32 %v20491_v45, %v2983_v18  ;;  %v718_v62 = vld [vmem:[%s20420_s30 + $0x1a0] sm:$0xff]  ;;  %v693_v18 = vld [vmem:[%s20420_s30 + $0xd8] sm:$0xff] }
 0x164   : > { %19474 = vmatmul.mubr.msk.bf16.gmra.mxu0 %vm1518_vm0, %v3605_v21  ;;  %v20942_v21 = vpop.f32.mrf.mxu0  ;;  %v5683_v23 = vsel %vm1518_vm0, %v5513_v29, 0.0  ;;  %v5515_v29 = vmul.f32 %v20437_v36, %v817_v4  ;;  %v20974_v36 = vld [vmem:[%s27335_s11] ss:$0 sm:$0xff]  ;;  %v3503_v0 = vmax.f32 %v3375_v49, 0.0  ;;  %v3002_v53 = vadd.f32 %v20728_v24, %v20724_v46 }
 0x165   : > { %v20922_v13 = vpop.f32.mrf.mxu1  ;;  %19477 = vmatprep.mubr.msk.bf16.mxu0 %vm1518_vm0, %v3606_v25  ;;  %v2994_v25 = vadd.f32 %v20738_v63, %v20736_v42  ;;  %v2991_v42 = vadd.f32 %v20716_v26, %v20714_v10  ;;  %v5764_v57 = vsel %vm1518_vm0, %v5540_v52, 0.0  ;;  %v3007_v24 = vadd.f32 %v20762_v12, %v20758_v2 }
 0x166   : > { %5759 = vadd.xlane.f32.xlu0 %v5758_v51  ;;  %v20952_v17 = vpop.f32.mrf.mxu0  ;;  %5684 = vadd.xlane.f32.xlu1 %v5683_v23  ;;  %v716_v51 = vld [vmem:[%s20420_s30 + $0x190] sm:$0xff]  ;;  %v5689_v52 = vsel %vm1518_vm0, %v5515_v29, 0.0 }
 0x167   : > { %v20933_v3 = vpop.f32.mrf.mxu1  ;;  %v844_v31 = vmul.f32 %v716_v51, %v588_v44  ;;  %v3377_v10 = vadd.f32 %v20491_v45, %v2994_v25  ;;  %v590_v25 = vld [vmem:[%s20415_s26 + $0x1a0] sm:$0xff]  ;;  %v3376_v19 = vadd.f32 %v20491_v45, %v2991_v42  ;;  %v3010_v45 = vadd.f32 %v20784_v11, %v20781_v22  ;;  %v592_v11 = vld [vmem:[%s20415_s26 + $0x1b0] sm:$0xff] }
 0x168   : > { %v20965_v23 = vpop.f32.mrf.mxu0  ;;  %v846_v29 = vmul.f32 %v718_v62, %v590_v25  ;;  %v27449_v25 = vld [vmem:[#allocation9_spill] sm:$0xff] }
 0x169   : > { %v20946_v39 = vpop.f32.mrf.mxu1  ;;  %v5542_v7 = vmul.f32 %v20974_v36, %v844_v31  ;;  %v565_v31 = vld [vmem:[%s20415_s26 + $0xd8] sm:$0xff]  ;;  %v2999_v46 = vadd.f32 %v27449_v25, %v20697_v43  ;;  %v3504_v62 = vmax.f32 %v3376_v19, 0.0  ;;  %v21018_v43 = vld [vmem:[%s27330_s6] ss:$0 sm:$0xff] }
 0x16a   : > { %5765 = vadd.xlane.f32.xlu0 %v5764_v57  ;;  %v20978_v4 = vpop.f32.mrf.mxu0  ;;  %5690 = vadd.xlane.f32.xlu1 %v5689_v52  ;;  %v5517_v57 = vmul.f32 %v20974_v36, %v819_v56  ;;  %v5544_v49 = vmul.f32 %v20974_v36, %v846_v29  ;;  %v3502_v56 = vmax.f32 %v3374_v40, 0.0  ;;  %v567_v40 = vld [vmem:[%s20415_s26 + $0xe8] sm:$0xff]  ;;  %v3379_v2 = vadd.f32 %v21018_v43, %v3002_v53 }
 0x16b   : > { %v20958_v63 = vpop.f32.mrf.mxu1  ;;  %v5770_v51 = vsel %vm1518_vm0, %v5542_v7, 0.0  ;;  %v3381_v12 = vadd.f32 %v21018_v43, %v3010_v45  ;;  %v3378_v25 = vadd.f32 %v21018_v43, %v2999_v46  ;;  %v594_v45 = vld [vmem:[%s20415_s26 + $0x1c0] sm:$0xff]  ;;  %v697_v46 = vld [vmem:[%s20420_s30 + $0xf8] sm:$0xff] }
 0x16c   : > { %19478 = vmatmul.mubr.msk.bf16.gmra.mxu0 %vm1518_vm0, %v3607_v37  ;;  %v20995_v42 = vpop.f32.mrf.mxu0  ;;  %v821_v37 = vmul.f32 %v693_v18, %v565_v31  ;;  %v5695_v7 = vsel %vm1518_vm0, %v5517_v57, 0.0  ;;  %v5776_v31 = vsel %vm1518_vm0, %v5544_v49, 0.0  ;;  %v695_v18 = vld [vmem:[%s20420_s30 + $0xe8] sm:$0xff] }
 0x16d   : > { %v20968_v26 = vpop.f32.mrf.mxu1  ;;  %19481 = vmatprep.mubr.msk.bf16.mxu0 %vm1518_vm0, %v3608_v58  ;;  %v3505_v58 = vmax.f32 %v3377_v10, 0.0  ;;  %v720_v10 = vld [vmem:[%s20420_s30 + $0x1b0] sm:$0xff] }
 0x16e   : > { %5771 = vadd.xlane.f32.xlu0 %v5770_v51  ;;  %v21005_v22 = vpop.f32.mrf.mxu0  ;;  %5696 = vadd.xlane.f32.xlu1 %v5695_v7  ;;  %v5519_v57 = vmul.f32 %v20974_v36, %v821_v37  ;;  %v848_v29 = vmul.f32 %v720_v10, %v592_v11  ;;  %v3380_v11 = vadd.f32 %v21018_v43, %v3007_v24  ;;  %v3507_v24 = vmax.f32 %v3379_v2, 0.0 }
 0x16f   : > { %v20984_v44 = vpop.f32.mrf.mxu1  ;;  %v3610_v7 = vpack.c.bf16 %v3505_v58, %v3504_v62  ;;  %v722_v58 = vld [vmem:[%s20420_s30 + $0x1c0] sm:$0xff] }
 0x170   : > { %27448 = vst [vmem:[#allocation8_spill] sm:$0xff] %v20984_v44  ;;  %v3609_v44 = vpack.c.bf16 %v3503_v0, %v3502_v56  ;;  %v21022_v19 = vpop.f32.mrf.mxu0  ;;  %v5701_v0 = vsel %vm1518_vm0, %v5519_v57, 0.0  ;;  %v5546_v49 = vmul.f32 %v20974_v36, %v848_v29  ;;  %v823_v56 = vmul.f32 %v695_v18, %v567_v40  ;;  %v569_v29 = vld [vmem:[%s20415_s26 + $0xf8] sm:$0xff] }
 0x171   : > { %v20997_v52 = vpop.f32.mrf.mxu1  ;;  %v850_v57 = vmul.f32 %v722_v58, %v594_v45  ;;  %v3509_v40 = vmax.f32 %v3381_v12, 0.0  ;;  %v3506_v45 = vmax.f32 %v3378_v25, 0.0  ;;  %v27451_v58 = vld [vmem:[#allocation10_spill] sm:$0xff] }
 0x172   : > { %5777 = vadd.xlane.f32.xlu0 %v5776_v31  ;;  %v21030_v53 = vpop.f32.mrf.mxu0  ;;  %5702 = vadd.xlane.f32.xlu1 %v5701_v0  ;;  %v5782_v62 = vsel %vm1518_vm0, %v5546_v49, 0.0  ;;  %v5521_v31 = vmul.f32 %v20974_v36, %v823_v56  ;;  %v825_v0 = vmul.f32 %v697_v46, %v569_v29  ;;  %v724_v29 = vld [vmem:[%s20420_s30 + $0x1d0] sm:$0xff]  ;;  %v571_v25 = vld [vmem:[%s20415_s26 + $0x108] sm:$0xff] }
 0x173   : > { %v21009_v51 = vpop.f32.mrf.mxu1  ;;  %v5548_v2 = vmul.f32 %v20974_v36, %v850_v57 }
 0x174   : > { %19482 = vmatmul.mubr.msk.bf16.gmra.mxu0 %vm1518_vm0, %v3609_v44  ;;  %v3018_v44 = vadd.f32 %v20774_v34, %v20768_v32  ;;  %v21044_v18 = vpop.f32.mrf.mxu0  ;;  %v5707_v56 = vsel %vm1518_vm0, %v5521_v31, 0.0  ;;  %v3015_v32 = vadd.f32 %v27451_v58, %v20744_v35  ;;  %v3508_v34 = vmax.f32 %v3380_v11, 0.0 }
 0x175   : > { %v21024_v37 = vpop.f32.mrf.mxu1  ;;  %19485 = vmatprep.mubr.msk.bf16.mxu0 %vm1518_vm0, %v3610_v7  ;;  %v3026_v7 = vadd.f32 %v20830_v60, %v20828_v6  ;;  %v3023_v6 = vadd.f32 %v20808_v30, %v20806_v1  ;;  %v5788_v46 = vsel %vm1518_vm0, %v5548_v2, 0.0  ;;  %v5523_v31 = vmul.f32 %v20974_v36, %v825_v0 }
 0x176   : > { %5783 = vadd.xlane.f32.xlu0 %v5782_v62  ;;  %v21054_v12 = vpop.f32.mrf.mxu0  ;;  %5708 = vadd.xlane.f32.xlu1 %v5707_v56  ;;  %v596_v62 = vld [vmem:[%s20415_s26 + $0x1d0] sm:$0xff]  ;;  %v3611_v35 = vpack.c.bf16 %v3507_v24, %v3506_v45  ;;  %v3383_v11 = vadd.f32 %v21018_v43, %v3018_v44  ;;  %v3612_v56 = vpack.c.bf16 %v3509_v40, %v3508_v34  ;;  %v598_v44 = vld [vmem:[%s20415_s26 + $0x1e0] sm:$0xff] }
 0x177   : > { %v21035_v10 = vpop.f32.mrf.mxu1  ;;  %v852_v57 = vmul.f32 %v724_v29, %v596_v62  ;;  %v3385_v1 = vadd.f32 %v21018_v43, %v3026_v7  ;;  %v5713_v2 = vsel %vm1518_vm0, %v5523_v31, 0.0  ;;  %v3382_v29 = vadd.f32 %v21018_v43, %v3015_v32  ;;  %v726_v40 = vld [vmem:[%s20420_s30 + $0x1e0] sm:$0xff]  ;;  %v573_v31 = vld [vmem:[%s20415_s26 + $0x118] sm:$0xff] }
 0x178   : > { %27450 = vst [vmem:[#allocation9_spill] sm:$0xff] %v21035_v10  ;;  %v699_v10 = vld [vmem:[%s20420_s30 + $0x108] sm:$0xff]  ;;  %v21067_v58 = vpop.f32.mrf.mxu0  ;;  %v3384_v7 = vadd.f32 %v21018_v43, %v3023_v6  ;;  %v701_v32 = vld [vmem:[%s20420_s30 + $0x118] sm:$0xff]  ;;  %v3042_v6 = vadd.f32 %v20876_v27, %v20873_v55  ;;  %v600_v27 = vld [vmem:[%s20415_s26 + $0x1f0] sm:$0xff] }
 0x179   : > { %v21048_v49 = vpop.f32.mrf.mxu1  ;;  %v5550_v0 = vmul.f32 %v20974_v36, %v852_v57  ;;  %v827_v62 = vmul.f32 %v699_v10, %v571_v25  ;;  %v854_v10 = vmul.f32 %v726_v40, %v598_v44  ;;  %v3511_v57 = vmax.f32 %v3383_v11, 0.0  ;;  %v27453_v40 = vld [vmem:[#allocation7_spill] sm:$0xff] }
 0x17a   : > { %5789 = vadd.xlane.f32.xlu0 %v5788_v46  ;;  %v21075_v24 = vpop.f32.mrf.mxu0  ;;  %5714 = vadd.xlane.f32.xlu1 %v5713_v2  ;;  %v3034_v25 = vadd.f32 %v20820_v48, %v20816_v5  ;;  %v3513_v2 = vmax.f32 %v3385_v1, 0.0  ;;  %v3510_v44 = vmax.f32 %v3382_v29, 0.0  ;;  %v3031_v5 = vadd.f32 %v27453_v40, %v20789_v41  ;;  %v728_v1 = vld [vmem:[%s20420_s30 + $0x1f0] sm:$0xff]  ;;  %v575_v29 = vld [vmem:[%s20415_s26 + $0x128] sm:$0xff] }
 0x17b   : > { %v21060_v60 = vpop.f32.mrf.mxu1  ;;  %v5794_v34 = vsel %vm1518_vm0, %v5550_v0, 0.0  ;;  %v5525_v46 = vmul.f32 %v20974_v36, %v827_v62  ;;  %v5552_v11 = vmul.f32 %v20974_v36, %v854_v10  ;;  %v3039_v48 = vadd.f32 %v20854_v14, %v20850_v61 }
 0x17c   : > { %19486 = vmatmul.mubr.msk.bf16.gmra.mxu0 %vm1518_vm0, %v3611_v35  ;;  %v21092_v35 = vpop.f32.mrf.mxu0  ;;  %v856_v10 = vmul.f32 %v728_v1, %v600_v27  ;;  %v3613_v41 = vpack.c.bf16 %v3511_v57, %v3510_v44  ;;  %v3387_v61 = vadd.f32 %v21018_v43, %v3034_v25  ;;  %v3389_v14 = vadd.f32 %v21018_v43, %v3042_v6  ;;  %v602_v6 = vld [vmem:[%s20415_s26 + $0x200] sm:$0xff] }
 0x17d   : > { %v21070_v30 = vpop.f32.mrf.mxu1  ;;  %19489 = vmatprep.mubr.msk.bf16.mxu0 %vm1518_vm0, %v3612_v56  ;;  %v829_v56 = vmul.f32 %v701_v32, %v573_v31  ;;  %v5719_v62 = vsel %vm1518_vm0, %v5525_v46, 0.0  ;;  %v5800_v32 = vsel %vm1518_vm0, %v5552_v11, 0.0  ;;  %v3386_v57 = vadd.f32 %v21018_v43, %v3031_v5  ;;  %v705_v5 = vld [vmem:[%s20420_s30 + $0x138] sm:$0xff] }
 0x17e   : > { %5795 = vadd.xlane.f32.xlu0 %v5794_v34  ;;  %v21102_v55 = vpop.f32.mrf.mxu0  ;;  %5720 = vadd.xlane.f32.xlu1 %v5719_v62  ;;  %v3512_v34 = vmax.f32 %v3384_v7, 0.0  ;;  %v3388_v44 = vadd.f32 %v21018_v43, %v3039_v48  ;;  %v3515_v48 = vmax.f32 %v3387_v61, 0.0 }
 0x17f   : > { %v21081_v45 = vpop.f32.mrf.mxu1  ;;  %v5527_v46 = vmul.f32 %v20974_v36, %v829_v56  ;;  %v5554_v56 = vmul.f32 %v20974_v36, %v856_v10  ;;  %v3050_v10 = vadd.f32 %v20866_v16, %v20860_v15  ;;  %v3047_v15 = vadd.f32 %v20841_v50, %v20836_v20 }
 0x180   : > { %27452 = vst [vmem:[#allocation10_spill] sm:$0xff] %v21081_v45  ;;  %v703_v45 = vld [vmem:[%s20420_s30 + $0x128] sm:$0xff]  ;;  %v21114_v62 = vpop.f32.mrf.mxu0  ;;  %v3614_v7 = vpack.c.bf16 %v3513_v2, %v3512_v34  ;;  %v730_v2 = vld [vmem:[%s20420_s30 + $0x200] sm:$0xff]  ;;  %v3516_v16 = vmax.f32 %v3388_v44, 0.0 }
 0x181   : > { %v21094_v0 = vpop.f32.mrf.mxu1  ;;  %v5725_v11 = vsel %vm1518_vm0, %v5527_v46, 0.0  ;;  %v831_v27 = vmul.f32 %v703_v45, %v575_v29  ;;  %v5806_v34 = vsel %vm1518_vm0, %v5554_v56, 0.0  ;;  %v858_v45 = vmul.f32 %v730_v2, %v602_v6  ;;  %v577_v46 = vld [vmem:[%s20415_s26 + $0x138] sm:$0xff]  ;;  %v604_v2 = vld [vmem:[%s20415_s26 + $0x210] sm:$0xff] }
 0x182   : > { %5801 = vadd.xlane.f32.xlu0 %v5800_v32  ;;  %v21122_v25 = vpop.f32.mrf.mxu0  ;;  %5726 = vadd.xlane.f32.xlu1 %v5725_v11  ;;  %v3517_v29 = vmax.f32 %v3389_v14, 0.0  ;;  %v833_v11 = vmul.f32 %v705_v5, %v577_v46  ;;  %v3514_v6 = vmax.f32 %v3386_v57, 0.0  ;;  %v579_v57 = vld [vmem:[%s20415_s26 + $0x148] sm:$0xff]  ;;  %v3391_v50 = vadd.f32 %v21018_v43, %v3050_v10  ;;  %v606_v10 = vld [vmem:[%s20415_s26 + $0x220] sm:$0xff] }
 0x183   : > { %v21106_v31 = vpop.f32.mrf.mxu1  ;;  %v5529_v32 = vmul.f32 %v20974_v36, %v831_v27  ;;  %v5556_v61 = vmul.f32 %v20974_v36, %v858_v45  ;;  %v707_v5 = vld [vmem:[%s20420_s30 + $0x148] sm:$0xff] }
 0x184   : > { %19490 = vmatmul.mubr.msk.bf16.gmra.mxu0 %vm1518_vm0, %v3613_v41  ;;  %v21136_v41 = vpop.f32.mrf.mxu0  ;;  %v3615_v20 = vpack.c.bf16 %v3515_v48, %v3514_v6  ;;  %v3616_v44 = vpack.c.bf16 %v3517_v29, %v3516_v16  ;;  %v734_v29 = vld [vmem:[%s20420_s30 + $0x220] sm:$0xff] }
 0x185   : > { %v21116_v40 = vpop.f32.mrf.mxu1  ;;  %19493 = vmatprep.mubr.msk.bf16.mxu0 %vm1518_vm0, %v3614_v7  ;;  %v3058_v7 = vadd.f32 %v20922_v13, %v20920_v54  ;;  %v5731_v27 = vsel %vm1518_vm0, %v5529_v32, 0.0  ;;  %v3055_v54 = vadd.f32 %v20900_v8, %v20898_v9  ;;  %v5812_v46 = vsel %vm1518_vm0, %v5556_v61, 0.0 }
 0x186   : > { %5807 = vadd.xlane.f32.xlu0 %v5806_v34  ;;  %v21146_v14 = vpop.f32.mrf.mxu0  ;;  %5732 = vadd.xlane.f32.xlu1 %v5731_v27  ;;  %v732_v34 = vld [vmem:[%s20420_s30 + $0x210] sm:$0xff]  ;;  %v5531_v32 = vmul.f32 %v20974_v36, %v833_v11 }
 0x187   : > { %v21127_v1 = vpop.f32.mrf.mxu1  ;;  %v860_v45 = vmul.f32 %v732_v34, %v604_v2  ;;  %v3393_v9 = vadd.f32 %v21018_v43, %v3058_v7  ;;  %v835_v2 = vmul.f32 %v707_v5, %v579_v57  ;;  %v3390_v34 = vadd.f32 %v21018_v43, %v3047_v15  ;;  %v709_v15 = vld [vmem:[%s20420_s30 + $0x158] sm:$0xff] }
 0x188   : > { %v21159_v27 = vpop.f32.mrf.mxu0  ;;  %v5737_v61 = vsel %vm1518_vm0, %v5531_v32, 0.0  ;;  %v3392_v7 = vadd.f32 %v21018_v43, %v3055_v54  ;;  %v862_v32 = vmul.f32 %v734_v29, %v606_v10  ;;  %v3519_v57 = vmax.f32 %v3391_v50, 0.0 }
 0x189   : > { %v21140_v56 = vpop.f32.mrf.mxu1  ;;  %v5558_v11 = vmul.f32 %v20974_v36, %v860_v45  ;;  %v581_v45 = vld [vmem:[%s20415_s26 + $0x158] sm:$0xff]  ;;  %v3066_v5 = vadd.f32 %v20912_v59, %v20908_v33  ;;  %v3074_v54 = vadd.f32 %v20968_v26, %v20965_v23  ;;  %v3518_v10 = vmax.f32 %v3390_v34, 0.0  ;;  %v608_v26 = vld [vmem:[%s20415_s26 + $0x230] sm:$0xff]  ;;  %v583_v34 = vld [vmem:[%s20415_s26 + $0x168] sm:$0xff] }
 0x18a   : > { %5813 = vadd.xlane.f32.xlu0 %v5812_v46  ;;  %v21167_v48 = vpop.f32.mrf.mxu0  ;;  %5738 = vadd.xlane.f32.xlu1 %v5737_v61  ;;  %v5533_v46 = vmul.f32 %v20974_v36, %v835_v2  ;;  %v3521_v61 = vmax.f32 %v3393_v9, 0.0  ;;  %v5560_v50 = vmul.f32 %v20974_v36, %v862_v32  ;;  %v3063_v33 = vadd.f32 %v20887_v38, %v20881_v28  ;;  %v736_v9 = vld [vmem:[%s20420_s30 + $0x230] sm:$0xff] }
 0x18b   : > { %v21152_v13 = vpop.f32.mrf.mxu1  ;;  %v5818_v16 = vsel %vm1518_vm0, %v5558_v11, 0.0  ;;  %v3071_v59 = vadd.f32 %v20946_v39, %v20942_v21  ;;  %v3520_v29 = vmax.f32 %v3392_v7, 0.0  ;;  %v864_v32 = vmul.f32 %v736_v9, %v608_v26 }
 0x18c   : > { %19494 = vmatmul.mubr.msk.bf16.gmra.mxu0 %vm1518_vm0, %v3615_v20  ;;  %v21184_v20 = vpop.f32.mrf.mxu0  ;;  %v5743_v2 = vsel %vm1518_vm0, %v5533_v46, 0.0  ;;  %v3617_v28 = vpack.c.bf16 %v3519_v57, %v3518_v10  ;;  %v3395_v38 = vadd.f32 %v21018_v43, %v3066_v5  ;;  %v3397_v21 = vadd.f32 %v21018_v43, %v3074_v54  ;;  %v610_v54 = vld [vmem:[%s20415_s26 + $0x240] sm:$0xff] }
 0x18d   : > { %v21162_v8 = vpop.f32.mrf.mxu1  ;;  %19497 = vmatprep.mubr.msk.bf16.mxu0 %vm1518_vm0, %v3616_v44  ;;  %v837_v44 = vmul.f32 %v709_v15, %v581_v45  ;;  %v5824_v45 = vsel %vm1518_vm0, %v5560_v50, 0.0  ;;  %v711_v15 = vld [vmem:[%s20420_s30 + $0x168] sm:$0xff]  ;;  %v3618_v7 = vpack.c.bf16 %v3521_v61, %v3520_v29  ;;  %v3394_v57 = vadd.f32 %v21018_v43, %v3063_v33  ;;  %v738_v61 = vld [vmem:[%s20420_s30 + $0x240] sm:$0xff]  ;;  %v713_v33 = vld [vmem:[%s20420_s30 + $0x178] sm:$0xff] }
 0x18e   : > { %5819 = vadd.xlane.f32.xlu0 %v5818_v16  ;;  %v21194_v23 = vpop.f32.mrf.mxu0  ;;  %5744 = vadd.xlane.f32.xlu1 %v5743_v2  ;;  %v839_v26 = vmul.f32 %v711_v15, %v583_v34  ;;  %v3396_v10 = vadd.f32 %v21018_v43, %v3071_v59  ;;  %v3523_v59 = vmax.f32 %v3395_v38, 0.0  ;;  %v3082_v34 = vadd.f32 %v20958_v63, %v20952_v17 }
 0x18f   : > { %v21173_v6 = vpop.f32.mrf.mxu1  ;;  %v5535_v46 = vmul.f32 %v20974_v36, %v837_v44  ;;  %v5562_v44 = vmul.f32 %v20974_v36, %v864_v32  ;;  %v585_v32 = vld [vmem:[%s20415_s26 + $0x178] sm:$0xff]  ;;  %v3525_v15 = vmax.f32 %v3397_v21, 0.0  ;;  %v3079_v17 = vadd.f32 %v20933_v3, %v20928_v47 }
 0x190   : > { %v21206_v39 = vpop.f32.mrf.mxu0  ;;  %v3524_v63 = vmax.f32 %v3396_v10, 0.0  ;;  %v3399_v3 = vadd.f32 %v21018_v43, %v3082_v34  ;;  %v614_v34 = vld [vmem:[%s20415_s26 + $0x260] sm:$0xff] }
 0x191   : > { %v21186_v11 = vpop.f32.mrf.mxu1  ;;  %v5749_v50 = vsel %vm1518_vm0, %v5535_v46, 0.0  ;;  %v5830_v29 = vsel %vm1518_vm0, %v5562_v44, 0.0  ;;  %v866_v46 = vmul.f32 %v738_v61, %v610_v54  ;;  %v3522_v54 = vmax.f32 %v3394_v57, 0.0  ;;  %v612_v61 = vld [vmem:[%s20415_s26 + $0x250] sm:$0xff]  ;;  %v587_v57 = vld [vmem:[%s20415_s26 + $0x188] sm:$0xff] }
 0x192   : > { %5825 = vadd.xlane.f32.xlu0 %v5824_v45  ;;  %v21214_v5 = vpop.f32.mrf.mxu0  ;;  %5750 = vadd.xlane.f32.xlu1 %v5749_v50  ;;  %v5537_v45 = vmul.f32 %v20974_v36, %v839_v26  ;;  %v841_v50 = vmul.f32 %v713_v33, %v585_v32  ;;  %v715_v33 = vld [vmem:[%s20420_s30 + $0x188] sm:$0xff]  ;;  %v3620_v10 = vpack.c.bf16 %v3525_v15, %v3524_v63  ;;  %v742_v15 = vld [vmem:[%s20420_s30 + $0x260] sm:$0xff] }
 0x193   : > { %v21198_v16 = vpop.f32.mrf.mxu1  ;;  %v5564_v38 = vmul.f32 %v20974_v36, %v866_v46  ;;  %v3619_v47 = vpack.c.bf16 %v3523_v59, %v3522_v54 }
 0x194   : > { %19498 = vmatmul.mubr.msk.bf16.gmra.mxu0 %vm1518_vm0, %v3617_v28  ;;  %v21228_v28 = vpop.f32.mrf.mxu0  ;;  %v5755_v26 = vsel %vm1518_vm0, %v5537_v45, 0.0  ;;  %v5539_v45 = vmul.f32 %v20974_v36, %v841_v50 }
 0x195   : > { %v21208_v2 = vpop.f32.mrf.mxu1  ;;  %19501 = vmatprep.mubr.msk.bf16.mxu0 %vm1518_vm0, %v3618_v7  ;;  %v3090_v7 = vadd.f32 %v21024_v37, %v21022_v19  ;;  %v3087_v19 = vadd.f32 %v20997_v52, %v20995_v42  ;;  %v5836_v32 = vsel %vm1518_vm0, %v5564_v38, 0.0 }
 0x196   : > { %5831 = vadd.xlane.f32.xlu0 %v5830_v29  ;;  %v21238_v21 = vpop.f32.mrf.mxu0  ;;  %5756 = vadd.xlane.f32.xlu1 %v5755_v26  ;;  %v740_v29 = vld [vmem:[%s20420_s30 + $0x250] sm:$0xff]  ;;  %v5761_v38 = vsel %vm1518_vm0, %v5539_v45, 0.0  ;;  %v870_v45 = vmul.f32 %v742_v15, %v614_v34  ;;  %v27455_v15 = vld [vmem:[#allocation8_spill] sm:$0xff] }
 0x197   : > { %v21219_v9 = vpop.f32.mrf.mxu1  ;;  %v868_v46 = vmul.f32 %v740_v29, %v612_v61  ;;  %v3401_v42 = vadd.f32 %v21018_v43, %v3090_v7  ;;  %v843_v61 = vmul.f32 %v715_v33, %v587_v57  ;;  %v3398_v29 = vadd.f32 %v21018_v43, %v3079_v17  ;;  %v717_v17 = vld [vmem:[%s20420_s30 + $0x198] sm:$0xff] }
 0x198   : > { %v21251_v26 = vpop.f32.mrf.mxu0  ;;  %v3400_v7 = vadd.f32 %v21018_v43, %v3087_v19  ;;  %v3527_v57 = vmax.f32 %v3399_v3, 0.0  ;;  %v3098_v33 = vadd.f32 %v21009_v51, %v21005_v22  ;;  %v3106_v19 = vadd.f32 %v21070_v30, %v21067_v58  ;;  %v616_v30 = vld [vmem:[%s20415_s26 + $0x270] sm:$0xff] }
 0x199   : > { %v21232_v44 = vpop.f32.mrf.mxu1  ;;  %v5566_v50 = vmul.f32 %v20974_v36, %v868_v46  ;;  %v589_v46 = vld [vmem:[%s20415_s26 + $0x198] sm:$0xff]  ;;  %v5568_v3 = vmul.f32 %v20974_v36, %v870_v45  ;;  %v3526_v34 = vmax.f32 %v3398_v29, 0.0  ;;  %v3095_v22 = vadd.f32 %v27455_v15, %v20978_v4  ;;  %v591_v29 = vld [vmem:[%s20415_s26 + $0x1a8] sm:$0xff] }
 0x19a   : > { %5837 = vadd.xlane.f32.xlu0 %v5836_v32  ;;  %v21259_v59 = vpop.f32.mrf.mxu0  ;;  %5762 = vadd.xlane.f32.xlu1 %v5761_v38  ;;  %v5541_v32 = vmul.f32 %v20974_v36, %v843_v61  ;;  %v3529_v38 = vmax.f32 %v3401_v42, 0.0  ;;  %v3103_v51 = vadd.f32 %v21048_v49, %v21044_v18  ;;  %v744_v42 = vld [vmem:[%s20420_s30 + $0x270] sm:$0xff]  ;;  %v3403_v18 = vadd.f32 %v21018_v43, %v3098_v33 }
 0x19b   : > { %v21244_v37 = vpop.f32.mrf.mxu1  ;;  %v5842_v63 = vsel %vm1518_vm0, %v5566_v50, 0.0  ;;  %v872_v45 = vmul.f32 %v744_v42, %v616_v30  ;;  %v3621_v4 = vpack.c.bf16 %v3527_v57, %v3526_v34  ;;  %v3405_v49 = vadd.f32 %v21018_v43, %v3106_v19  ;;  %v618_v19 = vld [vmem:[%s20415_s26 + $0x280] sm:$0xff] }
 0x19c   : > { %19502 = vmatmul.mubr.msk.bf16.gmra.mxu0 %vm1518_vm0, %v3619_v47  ;;  %v21276_v47 = vpop.f32.mrf.mxu0  ;;  %v5767_v61 = vsel %vm1518_vm0, %v5541_v32, 0.0  ;;  %v3402_v57 = vadd.f32 %v21018_v43, %v3095_v22  ;;  %v3404_v34 = vadd.f32 %v21018_v43, %v3103_v51  ;;  %v721_v22 = vld [vmem:[%s20420_s30 + $0x1b8] sm:$0xff]  ;;  %v3531_v51 = vmax.f32 %v3403_v18, 0.0 }
 0x19d   : > { %v21254_v52 = vpop.f32.mrf.mxu1  ;;  %19505 = vmatprep.mubr.msk.bf16.mxu0 %vm1518_vm0, %v3620_v10  ;;  %v845_v10 = vmul.f32 %v717_v17, %v589_v46  ;;  %v5848_v17 = vsel %vm1518_vm0, %v5568_v3, 0.0 }
 0x19e   : > { %5843 = vadd.xlane.f32.xlu0 %v5842_v63  ;;  %v21286_v58 = vpop.f32.mrf.mxu0  ;;  %5768 = vadd.xlane.f32.xlu1 %v5767_v61  ;;  %v3528_v63 = vmax.f32 %v3400_v7, 0.0 }
 0x19f   : > { %v21265_v54 = vpop.f32.mrf.mxu1  ;;  %v5543_v32 = vmul.f32 %v20974_v36, %v845_v10  ;;  %v5570_v10 = vmul.f32 %v20974_v36, %v872_v45  ;;  %v3114_v45 = vadd.f32 %v21060_v60, %v21054_v12  ;;  %v3532_v60 = vmax.f32 %v3404_v34, 0.0 }
 0x1a0   : > { %27454 = vst [vmem:[#allocation7_spill] sm:$0xff] %v21265_v54  ;;  %v719_v54 = vld [vmem:[%s20420_s30 + $0x1a8] sm:$0xff]  ;;  %v21298_v61 = vpop.f32.mrf.mxu0  ;;  %v3622_v7 = vpack.c.bf16 %v3529_v38, %v3528_v63  ;;  %v746_v38 = vld [vmem:[%s20420_s30 + $0x280] sm:$0xff] }
 0x1a1   : > { %v21278_v50 = vpop.f32.mrf.mxu1  ;;  %v5773_v3 = vsel %vm1518_vm0, %v5543_v32, 0.0  ;;  %v847_v30 = vmul.f32 %v719_v54, %v591_v29  ;;  %v5854_v63 = vsel %vm1518_vm0, %v5570_v10, 0.0  ;;  %v874_v54 = vmul.f32 %v746_v38, %v618_v19  ;;  %v593_v32 = vld [vmem:[%s20415_s26 + $0x1b8] sm:$0xff]  ;;  %v27457_v38 = vld [vmem:[#allocation9_spill] sm:$0xff] }
 0x1a2   : > { %5849 = vadd.xlane.f32.xlu0 %v5848_v17  ;;  %v21306_v33 = vpop.f32.mrf.mxu0  ;;  %5774 = vadd.xlane.f32.xlu1 %v5773_v3  ;;  %v3533_v29 = vmax.f32 %v3405_v49, 0.0  ;;  %v849_v3 = vmul.f32 %v721_v22, %v593_v32  ;;  %v3530_v19 = vmax.f32 %v3402_v57, 0.0  ;;  %v3111_v12 = vadd.f32 %v27457_v38, %v21030_v53  ;;  %v748_v32 = vld [vmem:[%s20420_s30 + $0x290] sm:$0xff]  ;;  %v595_v57 = vld [vmem:[%s20415_s26 + $0x1c8] sm:$0xff] }
 0x1a3   : > { %v21290_v46 = vpop.f32.mrf.mxu1  ;;  %v5545_v17 = vmul.f32 %v20974_v36, %v847_v30  ;;  %v5572_v18 = vmul.f32 %v20974_v36, %v874_v54  ;;  %v3407_v34 = vadd.f32 %v21018_v43, %v3114_v45  ;;  %v622_v45 = vld [vmem:[%s20415_s26 + $0x2a0] sm:$0xff] }
 0x1a4   : > { %19506 = vmatmul.mubr.msk.bf16.gmra.mxu0 %vm1518_vm0, %v3621_v4  ;;  %v21320_v4 = vpop.f32.mrf.mxu0  ;;  %v3623_v53 = vpack.c.bf16 %v3531_v51, %v3530_v19 }
 0x1a5   : > { %v21300_v15 = vpop.f32.mrf.mxu1  ;;  %19509 = vmatprep.mubr.msk.bf16.mxu0 %vm1518_vm0, %v3622_v7  ;;  %v3122_v7 = vadd.f32 %v21116_v40, %v21114_v62  ;;  %v5779_v30 = vsel %vm1518_vm0, %v5545_v17, 0.0  ;;  %v3119_v62 = vadd.f32 %v21094_v0, %v21092_v35  ;;  %v5860_v22 = vsel %vm1518_vm0, %v5572_v18, 0.0 }
 0x1a6   : > { %5855 = vadd.xlane.f32.xlu0 %v5854_v63  ;;  %v21330_v49 = vpop.f32.mrf.mxu0  ;;  %5780 = vadd.xlane.f32.xlu1 %v5779_v30  ;;  %v620_v63 = vld [vmem:[%s20415_s26 + $0x290] sm:$0xff]  ;;  %v5547_v17 = vmul.f32 %v20974_v36, %v849_v3  ;;  %v3624_v30 = vpack.c.bf16 %v3533_v29, %v3532_v60  ;;  %v750_v29 = vld [vmem:[%s20420_s30 + $0x2a0] sm:$0xff] }
 0x1a7   : > { %v21311_v42 = vpop.f32.mrf.mxu1  ;;  %v876_v54 = vmul.f32 %v748_v32, %v620_v63  ;;  %v3409_v35 = vadd.f32 %v21018_v43, %v3122_v7  ;;  %v3406_v32 = vadd.f32 %v21018_v43, %v3111_v12  ;;  %v3408_v7 = vadd.f32 %v21018_v43, %v3119_v62  ;;  %v725_v12 = vld [vmem:[%s20420_s30 + $0x1d8] sm:$0xff] }
 0x1a8   : > { %27456 = vst [vmem:[#allocation8_spill] sm:$0xff] %v21311_v42  ;;  %v723_v42 = vld [vmem:[%s20420_s30 + $0x1c8] sm:$0xff]  ;;  %v21343_v38 = vpop.f32.mrf.mxu0  ;;  %v5785_v18 = vsel %vm1518_vm0, %v5547_v17, 0.0  ;;  %v597_v17 = vld [vmem:[%s20415_s26 + $0x1d8] sm:$0xff]  ;;  %v3138_v62 = vadd.f32 %v21162_v8, %v21159_v27  ;;  %v624_v8 = vld [vmem:[%s20415_s26 + $0x2b0] sm:$0xff] }
 0x1a9   : > { %v21324_v10 = vpop.f32.mrf.mxu1  ;;  %v5574_v3 = vmul.f32 %v20974_v36, %v876_v54  ;;  %v851_v63 = vmul.f32 %v723_v42, %v595_v57  ;;  %v878_v42 = vmul.f32 %v750_v29, %v622_v45  ;;  %v3535_v54 = vmax.f32 %v3407_v34, 0.0  ;;  %v27460_v29 = vld [vmem:[#allocation10_spill] sm:$0xff] }
 0x1aa   : > { %5861 = vadd.xlane.f32.xlu0 %v5860_v22  ;;  %v21351_v51 = vpop.f32.mrf.mxu0  ;;  %5786 = vadd.xlane.f32.xlu1 %v5785_v18  ;;  %v3130_v57 = vadd.f32 %v21106_v31, %v21102_v55  ;;  %v3537_v18 = vmax.f32 %v3409_v35, 0.0  ;;  %v3534_v45 = vmax.f32 %v3406_v32, 0.0  ;;  %v3127_v55 = vadd.f32 %v27460_v29, %v21075_v24  ;;  %v752_v35 = vld [vmem:[%s20420_s30 + $0x2b0] sm:$0xff]  ;;  %v599_v32 = vld [vmem:[%s20415_s26 + $0x1e8] sm:$0xff]  ;;  %v21394_v29 = vpop.xlane.xlu0 %5621 }
 0x1ab   : > { %v21336_v40 = vpop.f32.mrf.mxu1  ;;  %27458 = vst [vmem:[#allocation9_spill] sm:$0xff] %v21351_v51  ;;  %v5866_v60 = vsel %vm1518_vm0, %v5574_v3, 0.0  ;;  %v5549_v22 = vmul.f32 %v20974_v36, %v851_v63  ;;  %v5576_v34 = vmul.f32 %v20974_v36, %v878_v42  ;;  %v3135_v31 = vadd.f32 %v21140_v56, %v21136_v41  ;;  %27461 = vst [vmem:[#allocation10_spill] sm:$0xff] %v21394_v29 }
 0x1ac   : > { %19510 = vmatmul.mubr.msk.bf16.gmra.mxu0 %vm1518_vm0, %v3623_v53  ;;  %v21368_v53 = vpop.f32.mrf.mxu0  ;;  %v880_v42 = vmul.f32 %v752_v35, %v624_v8  ;;  %v3625_v51 = vpack.c.bf16 %v3535_v54, %v3534_v45  ;;  %v3411_v24 = vadd.f32 %v21018_v43, %v3130_v57  ;;  %v3413_v41 = vadd.f32 %v21018_v43, %v3138_v62  ;;  %v754_v8 = vld [vmem:[%s20420_s30 + $0x2c0] sm:$0xff] }
 0x1ad   : > { %v21346_v0 = vpop.f32.mrf.mxu1  ;;  %19513 = vmatprep.mubr.msk.bf16.mxu0 %vm1518_vm0, %v3624_v30  ;;  %v853_v30 = vmul.f32 %v725_v12, %v597_v17  ;;  %v5791_v63 = vsel %vm1518_vm0, %v5549_v22, 0.0  ;;  %v5872_v12 = vsel %vm1518_vm0, %v5576_v34, 0.0  ;;  %v3410_v57 = vadd.f32 %v21018_v43, %v3127_v55  ;;  %v729_v55 = vld [vmem:[%s20420_s30 + $0x1f8] sm:$0xff] }
 0x1ae   : > { %5867 = vadd.xlane.f32.xlu0 %v5866_v60  ;;  %v21378_v27 = vpop.f32.mrf.mxu0  ;;  %5792 = vadd.xlane.f32.xlu1 %v5791_v63  ;;  %v3536_v60 = vmax.f32 %v3408_v7, 0.0  ;;  %v5578_v54 = vmul.f32 %v20974_v36, %v880_v42  ;;  %v3412_v45 = vadd.f32 %v21018_v43, %v3135_v31  ;;  %v3539_v42 = vmax.f32 %v3411_v24, 0.0 }
 0x1af   : > { %v21357_v19 = vpop.f32.mrf.mxu1  ;;  %v5551_v22 = vmul.f32 %v20974_v36, %v853_v30  ;;  %v3146_v31 = vadd.f32 %v21152_v13, %v21146_v14  ;;  %v3143_v14 = vadd.f32 %v21127_v1, %v21122_v25  ;;  %v731_v25 = vld [vmem:[%s20420_s30 + $0x208] sm:$0xff] }
 0x1b0   : > { %27459 = vst [vmem:[#allocation11_spill] sm:$0xff] %v21357_v19  ;;  %v727_v19 = vld [vmem:[%s20420_s30 + $0x1e8] sm:$0xff]  ;;  %v21390_v56 = vpop.f32.mrf.mxu0  ;;  %v3626_v7 = vpack.c.bf16 %v3537_v18, %v3536_v60  ;;  %v626_v18 = vld [vmem:[%s20415_s26 + $0x2c0] sm:$0xff]  ;;  %v5878_v60 = vsel %vm1518_vm0, %v5578_v54, 0.0  ;;  %v3540_v13 = vmax.f32 %v3412_v45, 0.0 }
 0x1b1   : > { %v21370_v3 = vpop.f32.mrf.mxu1  ;;  %v5797_v30 = vsel %vm1518_vm0, %v5551_v22, 0.0  ;;  %v855_v34 = vmul.f32 %v727_v19, %v599_v32  ;;  %v882_v19 = vmul.f32 %v754_v8, %v626_v18  ;;  %v601_v22 = vld [vmem:[%s20415_s26 + $0x1f8] sm:$0xff]  ;;  %v3538_v18 = vmax.f32 %v3410_v57, 0.0 }
 0x1b2   : > { %5873 = vadd.xlane.f32.xlu0 %v5872_v12  ;;  %v21400_v62 = vpop.f32.mrf.mxu0  ;;  %5798 = vadd.xlane.f32.xlu1 %v5797_v30  ;;  %v857_v30 = vmul.f32 %v729_v55, %v601_v22  ;;  %v21432_v22 = vpop.xlane.xlu0 %5624  ;;  %v603_v55 = vld [vmem:[%s20415_s26 + $0x208] sm:$0xff] }
 0x1b3   : > { %v21382_v17 = vpop.f32.mrf.mxu1  ;;  %v5553_v12 = vmul.f32 %v20974_v36, %v855_v34  ;;  %v5580_v24 = vmul.f32 %v20974_v36, %v882_v19  ;;  %v3627_v1 = vpack.c.bf16 %v3539_v42, %v3538_v18  ;;  %v3414_v42 = vadd.f32 %v21018_v43, %v3143_v14 }
 0x1b4   : > { %19514 = vmatmul.mubr.msk.bf16.gmra.mxu0 %vm1518_vm0, %v3625_v51  ;;  %v3541_v51 = vmax.f32 %v3413_v41, 0.0  ;;  %v21414_v32 = vpop.f32.mrf.mxu0  ;;  %v3151_v41 = vadd.f32 %v21186_v11, %v21184_v20  ;;  %v5555_v57 = vmul.f32 %v20974_v36, %v857_v30  ;;  %v3415_v20 = vadd.f32 %v21018_v43, %v3146_v31 }
 0x1b5   : > { %v21392_v63 = vpop.f32.mrf.mxu1  ;;  %19517 = vmatprep.mubr.msk.bf16.mxu0 %vm1518_vm0, %v3626_v7  ;;  %v3154_v7 = vadd.f32 %v21208_v2, %v21206_v39  ;;  %v5803_v34 = vsel %vm1518_vm0, %v5553_v12, 0.0  ;;  %v628_v39 = vld [vmem:[%s20415_s26 + $0x2d0] sm:$0xff]  ;;  %v5884_v12 = vsel %vm1518_vm0, %v5580_v24, 0.0 }
 0x1b6   : > { %5879 = vadd.xlane.f32.xlu0 %v5878_v60  ;;  %v21426_v8 = vpop.f32.mrf.mxu0  ;;  %5804 = vadd.xlane.f32.xlu1 %v5803_v34  ;;  %v756_v2 = vld [vmem:[%s20420_s30 + $0x2d0] sm:$0xff]  ;;  %v3628_v11 = vpack.c.bf16 %v3541_v51, %v3540_v13  ;;  %v5809_v24 = vsel %vm1518_vm0, %v5555_v57, 0.0  ;;  %v3416_v18 = vadd.f32 %v21018_v43, %v3151_v41  ;;  %v630_v51 = vld [vmem:[%s20415_s26 + $0x2e0] sm:$0xff]  ;;  %v3162_v13 = vadd.f32 %v21198_v16, %v21194_v23  ;;  %v605_v41 = vld [vmem:[%s20415_s26 + $0x218] sm:$0xff] }
 0x1b7   : > { %v21405_v35 = vpop.f32.mrf.mxu1  ;;  %v884_v19 = vmul.f32 %v756_v2, %v628_v39  ;;  %v3417_v34 = vadd.f32 %v21018_v43, %v3154_v7  ;;  %v859_v39 = vmul.f32 %v731_v25, %v603_v55  ;;  %v758_v7 = vld [vmem:[%s20420_s30 + $0x2e0] sm:$0xff]  ;;  %v3543_v55 = vmax.f32 %v3415_v20, 0.0 }
 0x1b8   : > { %v21439_v45 = vpop.f32.mrf.mxu0  ;;  %v886_v57 = vmul.f32 %v758_v7, %v630_v51  ;;  %v3170_v25 = vadd.f32 %v21254_v52, %v21251_v26  ;;  %v3542_v20 = vmax.f32 %v3414_v42, 0.0  ;;  %v3159_v26 = vadd.f32 %v21173_v6, %v21167_v48  ;;  %v21487_v42 = vld [vmem:[%s27335_s11] ss:$0 sm:$0xff] }
 0x1b9   : > { %v21418_v54 = vpop.f32.mrf.mxu1  ;;  %v5582_v30 = vmul.f32 %v20974_v36, %v884_v19  ;;  %v5557_v14 = vmul.f32 %v20974_v36, %v859_v39  ;;  %v733_v19 = vld [vmem:[%s20420_s30 + $0x218] sm:$0xff]  ;;  %v3545_v16 = vmax.f32 %v3417_v34, 0.0  ;;  %v3544_v52 = vmax.f32 %v3416_v18, 0.0  ;;  %v632_v34 = vld [vmem:[%s20415_s26 + $0x2f0] sm:$0xff] }
 0x1ba   : > { %5885 = vadd.xlane.f32.xlu0 %v5884_v12  ;;  %v21448_v31 = vpop.f32.mrf.mxu0  ;;  %5810 = vadd.xlane.f32.xlu1 %v5809_v24  ;;  %v861_v23 = vmul.f32 %v733_v19, %v605_v41  ;;  %v5584_v39 = vmul.f32 %v20974_v36, %v886_v57  ;;  %v3167_v51 = vadd.f32 %v21232_v44, %v21228_v28  ;;  %v607_v28 = vld [vmem:[%s20415_s26 + $0x228] sm:$0xff] }
 0x1bb   : > { %v21430_v60 = vpop.f32.mrf.mxu1  ;;  %v5890_v12 = vsel %vm1518_vm0, %v5582_v30, 0.0  ;;  %v5815_v30 = vsel %vm1518_vm0, %v5557_v14, 0.0  ;;  %v3419_v41 = vadd.f32 %v21018_v43, %v3162_v13  ;;  %v735_v44 = vld [vmem:[%s20420_s30 + $0x228] sm:$0xff]  ;;  %v3629_v18 = vpack.c.bf16 %v3543_v55, %v3542_v20 }
 0x1bc   : > { %19518 = vmatmul.mubr.msk.bf16.gmra.mxu0 %vm1518_vm0, %v3627_v1  ;;  %v21464_v1 = vpop.f32.mrf.mxu0  ;;  %v5896_v36 = vsel %vm1518_vm0, %v5584_v39, 0.0  ;;  %v5559_v48 = vmul.f32 %v21487_v42, %v861_v23  ;;  %v3421_v57 = vadd.f32 %v21018_v43, %v3170_v25  ;;  %v3630_v19 = vpack.c.bf16 %v3545_v16, %v3544_v52  ;;  %v634_v25 = vld [vmem:[%s20415_s26 + $0x300] sm:$0xff] }
 0x1bd   : > { %v21442_v29 = vpop.f32.mrf.mxu1  ;;  %19521 = vmatprep.mubr.msk.bf16.mxu0 %vm1518_vm0, %v3628_v11  ;;  %v21468_v11 = vpop.xlane.xlu0 %5633  ;;  %v3418_v23 = vadd.f32 %v21018_v43, %v3159_v26  ;;  %v762_v16 = vld [vmem:[%s20420_s30 + $0x300] sm:$0xff]  ;;  %v3547_v20 = vmax.f32 %v3419_v41, 0.0 }
 0x1be   : > { %5891 = vadd.xlane.f32.xlu0 %v5890_v12  ;;  %27462 = vst [vmem:[#allocation12_spill] sm:$0xff] %v21468_v11  ;;  %v21476_v7 = vpop.f32.mrf.mxu0  ;;  %5816 = vadd.xlane.f32.xlu1 %v5815_v30  ;;  %v760_v12 = vld [vmem:[%s20420_s30 + $0x2f0] sm:$0xff]  ;;  %v5821_v30 = vsel %vm1518_vm0, %v5559_v48, 0.0  ;;  %v863_v11 = vmul.f32 %v735_v44, %v607_v28  ;;  %v890_v48 = vmul.f32 %v762_v16, %v634_v25  ;;  %v3549_v41 = vmax.f32 %v3421_v57, 0.0 }
 0x1bf   : > { %v21455_v2 = vpop.f32.mrf.mxu1  ;;  %v888_v6 = vmul.f32 %v760_v12, %v632_v34  ;;  %v3420_v34 = vadd.f32 %v21018_v43, %v3167_v51  ;;  %v609_v43 = vld [vmem:[%s20415_s26 + $0x238] sm:$0xff]  ;;  %v3178_v28 = vadd.f32 %v21244_v37, %v21238_v21  ;;  %v636_v57 = vld [vmem:[%s20415_s26 + $0x310] sm:$0xff] }
 0x1c0   : > { %v21493_v13 = vpop.f32.mrf.mxu0  ;;  %v5561_v26 = vmul.f32 %v21487_v42, %v863_v11  ;;  %v737_v51 = vld [vmem:[%s20420_s30 + $0x238] sm:$0xff]  ;;  %v3186_v11 = vadd.f32 %v21300_v15, %v21298_v61  ;;  %v764_v25 = vld [vmem:[%s20420_s30 + $0x310] sm:$0xff] }
 0x1c1   : > { %v21466_v24 = vpop.f32.mrf.mxu1  ;;  %v5586_v39 = vmul.f32 %v21487_v42, %v888_v6  ;;  %v21507_v52 = vpop.xlane.xlu0 %5639  ;;  %v3175_v6 = vadd.f32 %v21219_v9, %v21214_v5  ;;  %v3548_v5 = vmax.f32 %v3420_v34, 0.0  ;;  %v3183_v9 = vadd.f32 %v21278_v50, %v21276_v47 }
 0x1c2   : > { %5897 = vadd.xlane.f32.xlu0 %v5896_v36  ;;  %v21501_v55 = vpop.f32.mrf.mxu0  ;;  %5822 = vadd.xlane.f32.xlu1 %v5821_v30  ;;  %27463 = vst [vmem:[#allocation13_spill] sm:$0xff] %v21507_v52  ;;  %v5588_v30 = vmul.f32 %v21487_v42, %v890_v48  ;;  %v892_v15 = vmul.f32 %v764_v25, %v636_v57 }
 0x1c3   : > { %v21481_v14 = vpop.f32.mrf.mxu1  ;;  %v5902_v36 = vsel %vm1518_vm0, %v5586_v39, 0.0  ;;  %v3546_v39 = vmax.f32 %v3418_v23, 0.0  ;;  %v21538_v23 = vld [vmem:[%s27330_s6] ss:$0 sm:$0xff]  ;;  %v3632_v34 = vpack.c.bf16 %v3549_v41, %v3548_v5 }
 0x1c4   : > { %19522 = vmatmul.mubr.msk.bf16.gmra.mxu0 %vm1518_vm0, %v3629_v18  ;;  %v21517_v44 = vpop.f32.mrf.mxu0  ;;  %v865_v18 = vmul.f32 %v737_v51, %v609_v43  ;;  %v5908_v16 = vsel %vm1518_vm0, %v5588_v30, 0.0  ;;  %v3422_v47 = vadd.f32 %v21538_v23, %v3175_v6  ;;  %v3423_v50 = vadd.f32 %v21538_v23, %v3178_v28  ;;  %v766_v5 = vld [vmem:[%s20420_s30 + $0x320] sm:$0xff] }
 0x1c5   : > { %v21499_v12 = vpop.f32.mrf.mxu1  ;;  %19525 = vmatprep.mubr.msk.bf16.mxu0 %vm1518_vm0, %v3630_v19  ;;  %v5827_v19 = vsel %vm1518_vm0, %v5561_v26, 0.0  ;;  %v739_v26 = vld [vmem:[%s20420_s30 + $0x248] sm:$0xff]  ;;  %v3631_v48 = vpack.c.bf16 %v3547_v20, %v3546_v39  ;;  %v3425_v51 = vadd.f32 %v21538_v23, %v3186_v11  ;;  %v3424_v6 = vadd.f32 %v21538_v23, %v3183_v9  ;;  %v638_v11 = vld [vmem:[%s20415_s26 + $0x320] sm:$0xff]  ;;  %v613_v9 = vld [vmem:[%s20415_s26 + $0x258] sm:$0xff] }
 0x1c6   : > { %5903 = vadd.xlane.f32.xlu0 %v5902_v36  ;;  %v21527_v37 = vpop.f32.mrf.mxu0  ;;  %5828 = vadd.xlane.f32.xlu1 %v5827_v19  ;;  %v5563_v61 = vmul.f32 %v21487_v42, %v865_v18  ;;  %v611_v36 = vld [vmem:[%s20415_s26 + $0x248] sm:$0xff]  ;;  %v21545_v18 = vpop.xlane.xlu0 %5645  ;;  %v5590_v19 = vmul.f32 %v21487_v42, %v892_v15  ;;  %v3194_v28 = vadd.f32 %v21290_v46, %v21286_v58  ;;  %v3551_v15 = vmax.f32 %v3423_v50, 0.0  ;;  %v27464_v58 = vld [vmem:[#allocation7_spill] sm:$0xff] }
 0x1c7   : > { %v21525_v21 = vpop.f32.mrf.mxu1  ;;  %v867_v30 = vmul.f32 %v739_v26, %v611_v36  ;;  %v3191_v46 = vadd.f32 %v27464_v58, %v21259_v59  ;;  %v3202_v36 = vadd.f32 %v21346_v0, %v21343_v38  ;;  %v3552_v50 = vmax.f32 %v3424_v6, 0.0 }
 0x1c8   : > { %v21542_v43 = vpop.f32.mrf.mxu0  ;;  %v5833_v20 = vsel %vm1518_vm0, %v5563_v61, 0.0  ;;  %v5914_v57 = vsel %vm1518_vm0, %v5590_v19, 0.0  ;;  %v741_v61 = vld [vmem:[%s20420_s30 + $0x258] sm:$0xff]  ;;  %v3427_v59 = vadd.f32 %v21538_v23, %v3194_v28  ;;  %v3210_v38 = vadd.f32 %v21336_v40, %v21330_v49 }
 0x1c9   : > { %v21552_v41 = vpop.f32.mrf.mxu1  ;;  %v5565_v25 = vmul.f32 %v21487_v42, %v867_v30  ;;  %v3426_v40 = vadd.f32 %v21538_v23, %v3191_v46 }
 0x1ca   : > { %5909 = vadd.xlane.f32.xlu0 %v5908_v16  ;;  %v21554_v39 = vpop.f32.mrf.mxu0  ;;  %5834 = vadd.xlane.f32.xlu1 %v5833_v20  ;;  %v894_v16 = vmul.f32 %v766_v5, %v638_v11  ;;  %v3553_v20 = vmax.f32 %v3425_v51, 0.0  ;;  %v3199_v11 = vadd.f32 %v21324_v10, %v21320_v4  ;;  %v768_v51 = vld [vmem:[%s20420_s30 + $0x330] sm:$0xff]  ;;  %v615_v10 = vld [vmem:[%s20415_s26 + $0x268] sm:$0xff] }
 0x1cb   : > { %v5839_v19 = vsel %vm1518_vm0, %v5565_v25, 0.0  ;;  %v21577_v0 = vpop.f32.mrf.mxu1 }
 0x1cc   : > { %19526 = vmatmul.mubr.msk.bf16.gmra.mxu0 %vm1518_vm0, %v3631_v48  ;;  %v21568_v26 = vpop.f32.mrf.mxu0  ;;  %v869_v48 = vmul.f32 %v741_v61, %v613_v9  ;;  %v5592_v30 = vmul.f32 %v21487_v42, %v894_v16  ;;  %v21585_v16 = vpop.xlane.xlu0 %5651  ;;  %v743_v9 = vld [vmem:[%s20420_s30 + $0x268] sm:$0xff]  ;;  %v3429_v61 = vadd.f32 %v21538_v23, %v3202_v36  ;;  %v642_v36 = vld [vmem:[%s20415_s26 + $0x340] sm:$0xff] }
 0x1cd   : > { %19529 = vmatprep.mubr.msk.bf16.mxu0 %vm1518_vm0, %v3632_v34  ;;  %v3550_v34 = vmax.f32 %v3422_v47, 0.0  ;;  %v640_v47 = vld [vmem:[%s20415_s26 + $0x330] sm:$0xff]  ;;  %v21599_v46 = vpop.f32.mrf.mxu1 }
 0x1ce   : > { %5915 = vadd.xlane.f32.xlu0 %v5914_v57  ;;  %v21579_v5 = vpop.f32.mrf.mxu0  ;;  %5840 = vadd.xlane.f32.xlu1 %v5839_v19  ;;  %v27465_v57 = vld [vmem:[#allocation8_spill] sm:$0xff]  ;;  %v5920_v6 = vsel %vm1518_vm0, %v5592_v30, 0.0  ;;  %v5567_v28 = vmul.f32 %v21487_v42, %v869_v48  ;;  %v896_v4 = vmul.f32 %v768_v51, %v640_v47  ;;  %v871_v48 = vmul.f32 %v743_v9, %v615_v10 }
 0x1cf   : > { %v3207_v25 = vadd.f32 %v27465_v57, %v21306_v33  ;;  %v3633_v49 = vpack.c.bf16 %v3551_v15, %v3550_v34  ;;  %v3634_v33 = vpack.c.bf16 %v3553_v20, %v3552_v50  ;;  %v3555_v47 = vmax.f32 %v3427_v59, 0.0  ;;  %v770_v20 = vld [vmem:[%s20420_s30 + $0x340] sm:$0xff] }
 0x1d0   : > { %v21593_v58 = vpop.f32.mrf.mxu0  ;;  %v5845_v19 = vsel %vm1518_vm0, %v5567_v28, 0.0  ;;  %v5594_v30 = vmul.f32 %v21487_v42, %v896_v4  ;;  %v3428_v15 = vadd.f32 %v21538_v23, %v3199_v11  ;;  %v3431_v34 = vadd.f32 %v21538_v23, %v3210_v38  ;;  %v745_v38 = vld [vmem:[%s20420_s30 + $0x278] sm:$0xff] }
 0x1d1   : > { %v3430_v50 = vadd.f32 %v21538_v23, %v3207_v25  ;;  %v5569_v59 = vmul.f32 %v21487_v42, %v871_v48  ;;  %v898_v11 = vmul.f32 %v770_v20, %v642_v36  ;;  %v3554_v28 = vmax.f32 %v3426_v40, 0.0  ;;  %v21622_v36 = vpop.f32.mrf.mxu1  ;;  %v772_v20 = vld [vmem:[%s20420_s30 + $0x350] sm:$0xff] }
 0x1d2   : > { %5921 = vadd.xlane.f32.xlu0 %v5920_v6  ;;  %v21601_v51 = vpop.f32.mrf.mxu0  ;;  %5846 = vadd.xlane.f32.xlu1 %v5845_v19  ;;  %v5926_v57 = vsel %vm1518_vm0, %v5594_v30, 0.0  ;;  %v617_v6 = vld [vmem:[%s20415_s26 + $0x278] sm:$0xff]  ;;  %v3557_v4 = vmax.f32 %v3429_v61, 0.0  ;;  %v3218_v10 = vadd.f32 %v21392_v63, %v21390_v56  ;;  %v3556_v40 = vmax.f32 %v3428_v15, 0.0  ;;  %v644_v63 = vld [vmem:[%s20415_s26 + $0x350] sm:$0xff] }
 0x1d3   : > { %v873_v25 = vmul.f32 %v745_v38, %v617_v6  ;;  %v5596_v19 = vmul.f32 %v21487_v42, %v898_v11  ;;  %v3635_v30 = vpack.c.bf16 %v3555_v47, %v3554_v28  ;;  %v3559_v48 = vmax.f32 %v3431_v34, 0.0  ;;  %v619_v11 = vld [vmem:[%s20415_s26 + $0x288] sm:$0xff]  ;;  %v27467_v28 = vld [vmem:[#allocation11_spill] sm:$0xff] }
 0x1d4   : > { %19530 = vmatmul.mubr.msk.bf16.gmra.mxu0 %vm1518_vm0, %v3633_v49  ;;  %v21614_v9 = vpop.f32.mrf.mxu0  ;;  %v21616_v49 = vpop.xlane.xlu0 %5657  ;;  %v3215_v61 = vadd.f32 %v21370_v3, %v21368_v53  ;;  %v900_v38 = vmul.f32 %v772_v20, %v644_v63  ;;  %v747_v47 = vld [vmem:[%s20420_s30 + $0x288] sm:$0xff]  ;;  %v3636_v15 = vpack.c.bf16 %v3557_v4, %v3556_v40  ;;  %v3226_v53 = vadd.f32 %v21382_v17, %v21378_v27 }
 0x1d5   : > { %19533 = vmatprep.mubr.msk.bf16.mxu0 %vm1518_vm0, %v3634_v33  ;;  %v5851_v33 = vsel %vm1518_vm0, %v5569_v59, 0.0  ;;  %v5932_v6 = vsel %vm1518_vm0, %v5596_v19, 0.0  ;;  %v5571_v59 = vmul.f32 %v21487_v42, %v873_v25  ;;  %v27466_v34 = vld [vmem:[#allocation9_spill] sm:$0xff]  ;;  %v3433_v3 = vadd.f32 %v21538_v23, %v3218_v10  ;;  %v21646_v17 = vpop.f32.mrf.mxu1 }
 0x1d6   : > { %5927 = vadd.xlane.f32.xlu0 %v5926_v57  ;;  %v21624_v56 = vpop.f32.mrf.mxu0  ;;  %5852 = vadd.xlane.f32.xlu1 %v5851_v33  ;;  %v3558_v57 = vmax.f32 %v3430_v50, 0.0  ;;  %v3223_v52 = vadd.f32 %v27467_v28, %v27466_v34  ;;  %v3242_v50 = vadd.f32 %v21430_v60, %v21426_v8  ;;  %v5598_v4 = vmul.f32 %v21487_v42, %v900_v38  ;;  %v646_v8 = vld [vmem:[%s20415_s26 + $0x360] sm:$0xff] }
 0x1d7   : > { %v5857_v25 = vsel %vm1518_vm0, %v5571_v59, 0.0  ;;  %v875_v19 = vmul.f32 %v747_v47, %v619_v11  ;;  %v3432_v63 = vadd.f32 %v21538_v23, %v3215_v61  ;;  %v3234_v27 = vadd.f32 %v21442_v29, %v21439_v45  ;;  %v774_v60 = vld [vmem:[%s20420_s30 + $0x360] sm:$0xff] }
 0x1d8   : > { %v21637_v33 = vpop.f32.mrf.mxu0  ;;  %v3637_v40 = vpack.c.bf16 %v3559_v48, %v3558_v57  ;;  %v3239_v20 = vadd.f32 %v21405_v35, %v21400_v62  ;;  %v21656_v48 = vpop.xlane.xlu0 %5663  ;;  %v5938_v61 = vsel %vm1518_vm0, %v5598_v4, 0.0  ;;  %v902_v45 = vmul.f32 %v774_v60, %v646_v8  ;;  %v621_v57 = vld [vmem:[%s20415_s26 + $0x298] sm:$0xff]  ;;  %v623_v8 = vld [vmem:[%s20415_s26 + $0x2a8] sm:$0xff] }
 0x1d9   : > { %v5573_v29 = vmul.f32 %v21487_v42, %v875_v19  ;;  %v3435_v59 = vadd.f32 %v21538_v23, %v3226_v53  ;;  %v3231_v38 = vadd.f32 %v21418_v54, %v21414_v32  ;;  %v3434_v11 = vadd.f32 %v21538_v23, %v3223_v52  ;;  %v751_v60 = vld [vmem:[%s20420_s30 + $0x2a8] sm:$0xff] }
 0x1da   : > { %5933 = vadd.xlane.f32.xlu0 %v5932_v6  ;;  %v21648_v10 = vpop.f32.mrf.mxu0  ;;  %5858 = vadd.xlane.f32.xlu1 %v5857_v25  ;;  %v749_v6 = vld [vmem:[%s20420_s30 + $0x298] sm:$0xff]  ;;  %v3439_v47 = vadd.f32 %v21538_v23, %v3242_v50  ;;  %v5600_v34 = vmul.f32 %v21487_v42, %v902_v45  ;;  %v3560_v28 = vmax.f32 %v3432_v63, 0.0  ;;  %v3437_v53 = vadd.f32 %v21538_v23, %v3234_v27  ;;  %v648_v50 = vld [vmem:[%s20415_s26 + $0x370] sm:$0xff] }
 0x1db   : > { %v877_v35 = vmul.f32 %v749_v6, %v621_v57  ;;  %v3255_v32 = vadd.f32 %v21455_v2, %v21448_v31  ;;  %v3258_v54 = vadd.f32 %v21481_v14, %v21476_v7  ;;  %v776_v25 = vld [vmem:[%s20420_s30 + $0x370] sm:$0xff]  ;;  %v3438_v4 = vadd.f32 %v21538_v23, %v3239_v20 }
 0x1dc   : > { %19534 = vmatmul.mubr.msk.bf16.gmra.mxu0 %vm1518_vm0, %v3635_v30  ;;  %v3561_v30 = vmax.f32 %v3433_v3, 0.0  ;;  %v21665_v62 = vpop.f32.mrf.mxu0  ;;  %v21676_v3 = vpop.f32.mrf.mxu1  ;;  %v5944_v19 = vsel %vm1518_vm0, %v5600_v34, 0.0  ;;  %v904_v27 = vmul.f32 %v776_v25, %v648_v50  ;;  %v3563_v31 = vmax.f32 %v3435_v59, 0.0  ;;  %v625_v50 = vld [vmem:[%s20415_s26 + $0x2b8] sm:$0xff] }
 0x1dd   : > { %19537 = vmatprep.mubr.msk.bf16.mxu0 %vm1518_vm0, %v3636_v15  ;;  %v5863_v15 = vsel %vm1518_vm0, %v5573_v29, 0.0  ;;  %v5575_v63 = vmul.f32 %v21487_v42, %v877_v35  ;;  %v3436_v7 = vadd.f32 %v21538_v23, %v3231_v38  ;;  %v3247_v14 = vadd.f32 %v21466_v24, %v21464_v1  ;;  %v21692_v29 = vpop.xlane.xlu0 %5669 }
 0x1de   : > { %5939 = vadd.xlane.f32.xlu0 %v5938_v61  ;;  %v21678_v52 = vpop.f32.mrf.mxu0  ;;  %5864 = vadd.xlane.f32.xlu1 %v5863_v15  ;;  %v3638_v2 = vpack.c.bf16 %v3561_v30, %v3560_v28  ;;  %v3567_v20 = vmax.f32 %v3439_v47, 0.0  ;;  %v5602_v57 = vmul.f32 %v21487_v42, %v904_v27  ;;  %v879_v6 = vmul.f32 %v751_v60, %v623_v8  ;;  %v21698_v24 = vpop.f32.mrf.mxu1  ;;  %v650_v47 = vld [vmem:[%s20415_s26 + $0x380] sm:$0xff] }
 0x1df   : > { %v5869_v45 = vsel %vm1518_vm0, %v5575_v63, 0.0  ;;  %v3562_v59 = vmax.f32 %v3434_v11, 0.0  ;;  %v3565_v30 = vmax.f32 %v3437_v53, 0.0  ;;  %v3442_v38 = vadd.f32 %v21538_v23, %v3255_v32  ;;  %v778_v15 = vld [vmem:[%s20420_s30 + $0x380] sm:$0xff]  ;;  %v753_v32 = vld [vmem:[%s20420_s30 + $0x2b8] sm:$0xff]  ;;  %v21720_v60 = vpop.xlane.xlu1 %5627 }
 0x1e0   : > { %v21690_v61 = vpop.f32.mrf.mxu0  ;;  %v3443_v1 = vadd.f32 %v21538_v23, %v3258_v54  ;;  %v3566_v34 = vmax.f32 %v3438_v4, 0.0  ;;  %v5950_v28 = vsel %vm1518_vm0, %v5602_v57, 0.0  ;;  %v5577_v11 = vmul.f32 %v21487_v42, %v879_v6  ;;  %v21718_v8 = vld [vmem:[%s27332_s8] ss:$0 sm:$0xff]  ;;  %v780_v6 = vld [vmem:[%s20420_s30 + $0x390] sm:$0xff] }
 0x1e1   : > { %v906_v53 = vmul.f32 %v778_v15, %v650_v47  ;;  %v3639_v25 = vpack.c.bf16 %v3563_v31, %v3562_v59  ;;  %v3564_v54 = vmax.f32 %v3436_v7, 0.0  ;;  %v3250_v27 = vadd.f32 %v21499_v12, %v21493_v13  ;;  %v652_v12 = vld [vmem:[%s20415_s26 + $0x390] sm:$0xff]  ;;  %v21731_v15 = vpop.xlane.xlu0 %5675 }
 0x1e2   : > { %5945 = vadd.xlane.f32.xlu0 %v5944_v19  ;;  %5870 = vadd.xlane.f32.xlu1 %v5869_v45  ;;  %v21709_v19 = vadd.f32 %v21538_v23, %v3247_v14  ;;  %v21711_v4 = vpack.c.bf16 %v3567_v20, %v3566_v34  ;;  %v5875_v31 = vsel %vm1518_vm0, %v5577_v11, 0.0  ;;  %v3570_v14 = vmax.f32 %v3442_v38, 0.0  ;;  %v21724_v45 = vpop.f32.mrf.mxu1  ;;  %v755_v38 = vld [vmem:[%s20420_s30 + $0x2c8] sm:$0xff] }
 0x1e3   : > { %v3640_v7 = vpack.c.bf16 %v3565_v30, %v3564_v54  ;;  %v3571_v20 = vmax.f32 %v3443_v1, 0.0  ;;  %v627_v30 = vld [vmem:[%s20415_s26 + $0x2c8] sm:$0xff]  ;;  %v3441_v54 = vadd.f32 %v21538_v23, %v3250_v27  ;;  %v782_v27 = vld [vmem:[%s20420_s30 + $0x3a0] sm:$0xff] }
 0x1e4   : > { %v19443_v35 = vpop.f32.mrf.mxu0  ;;  %19538 = vmatmul.mubr.msk.bf16.gmra.mxu0 %vm1518_vm0, %v3637_v40  ;;  %v881_v40 = vmul.f32 %v753_v32, %v625_v50  ;;  %v3568_v1 = vmax.f32 %v21709_v19, 0.0  ;;  %v883_v32 = vmul.f32 %v755_v38, %v627_v30  ;;  %v21748_v19 = vpop.f32.mrf.mxu1 }
 0x1e5   : > { %19541 = vmatprep.mubr.msk.bf16.mxu0 %vm1518_vm0, %v3638_v2  ;;  %v5604_v2 = vmul.f32 %v21487_v42, %v906_v53  ;;  %v3910_v11 = vadd.f32 %v19443_v35, %v21718_v8  ;;  %v3263_v35 = vadd.f32 %v21552_v41, %v21517_v44  ;;  %v21757_v44 = vpop.xlane.xlu1 %5630 }
 0x1e6   : > { %v3901_v63 = vpop.f32.mrf.mxu0  ;;  %5951 = vadd.xlane.f32.xlu0 %v5950_v28  ;;  %5876 = vadd.xlane.f32.xlu1 %v5875_v31  ;;  %v5579_v13 = vmul.f32 %v21487_v42, %v881_v40  ;;  %v908_v28 = vmul.f32 %v780_v6, %v652_v12  ;;  %v629_v6 = vld [vmem:[%s20415_s26 + $0x2d8] sm:$0xff] }
 0x1e7   : > { %v3902_v59 = vadd.f32 %v21718_v8, %v3901_v63  ;;  %v5956_v34 = vsel %vm1518_vm0, %v5604_v2, 0.0  ;;  %v3271_v63 = vadd.f32 %v21525_v21, %v21501_v55  ;;  %v21744_v2 = vpack.c.bf16 %v3571_v20, %v3570_v14  ;;  %v654_v21 = vld [vmem:[%s20415_s26 + $0x3a0] sm:$0xff] }
 0x1e8   : > { %v19444_v57 = vpop.f32.mrf.mxu0  ;;  %v5881_v50 = vsel %vm1518_vm0, %v5579_v13, 0.0  ;;  %v5606_v31 = vmul.f32 %v21487_v42, %v908_v28  ;;  %v5581_v55 = vmul.f32 %v21487_v42, %v883_v32  ;;  %v3266_v14 = vadd.f32 %v21599_v46, %v21542_v43 }
 0x1e9   : > { %v3913_v47 = vadd.f32 %v19444_v57, %v21718_v8  ;;  %v4412_v20 = vmax.f32 %v3902_v59, 0.0  ;;  %v910_v30 = vmul.f32 %v782_v27, %v654_v21  ;;  %v3569_v43 = vmax.f32 %v3441_v54, 0.0  ;;  %v631_v27 = vld [vmem:[%s20415_s26 + $0x2e8] sm:$0xff] }
 0x1ea   : > { %v3904_v53 = vpop.f32.mrf.mxu0  ;;  %5957 = vadd.xlane.f32.xlu0 %v5956_v34  ;;  %5882 = vadd.xlane.f32.xlu1 %v5881_v50  ;;  %v5962_v41 = vsel %vm1518_vm0, %v5606_v31, 0.0  ;;  %v4414_v34 = vmax.f32 %v3910_v11, 0.0  ;;  %v5887_v28 = vsel %vm1518_vm0, %v5581_v55, 0.0  ;;  %v21764_v46 = vadd.f32 %v21538_v23, %v3271_v63  ;;  %v21773_v50 = vpop.f32.mrf.mxu1  ;;  %v656_v31 = vld [vmem:[%s20415_s26 + $0x3b0] sm:$0xff] }
 0x1eb   : > { %v3905_v40 = vadd.f32 %v21718_v8, %v3904_v53  ;;  %v4415_v57 = vmax.f32 %v3913_v47, 0.0  ;;  %v757_v47 = vld [vmem:[%s20420_s30 + $0x2d8] sm:$0xff]  ;;  %v21768_v53 = vpop.xlane.xlu0 %5681  ;;  %v21771_v11 = vadd.f32 %v21538_v23, %v3263_v35  ;;  %v5608_v54 = vmul.f32 %v21487_v42, %v910_v30  ;;  %v784_v55 = vld [vmem:[%s20420_s30 + $0x3b0] sm:$0xff] }
 0x1ec   : > { %v19447_v13 = vpop.f32.mrf.mxu0  ;;  %19542 = vmatmul.mubr.msk.bf16.gmra.mxu0 %vm1518_vm0, %v3639_v25  ;;  %v885_v38 = vmul.f32 %v757_v47, %v629_v6  ;;  %v912_v35 = vmul.f32 %v784_v55, %v656_v31  ;;  %v3642_v47 = vpack.c.bf16 %v3569_v43, %v3568_v1  ;;  %v3574_v30 = vmax.f32 %v21764_v46, 0.0  ;;  %v633_v55 = vld [vmem:[%s20415_s26 + $0x2f8] sm:$0xff] }
 0x1ed   : > { %v4413_v12 = vmax.f32 %v3905_v40, 0.0  ;;  %19545 = vmatprep.mubr.msk.bf16.mxu0 %vm1518_vm0, %v3640_v7  ;;  %v3274_v7 = vadd.f32 %v21577_v0, %v21527_v37  ;;  %v4541_v32 = vpack.c.bf16 %v4415_v57, %v4414_v34  ;;  %v3445_v37 = vadd.f32 %v21538_v23, %v3266_v14 }
 0x1ee   : > { %v3917_v25 = vpop.f32.mrf.mxu0  ;;  %5963 = vadd.xlane.f32.xlu0 %v5962_v41  ;;  %5888 = vadd.xlane.f32.xlu1 %v5887_v28  ;;  %v5583_v63 = vmul.f32 %v21487_v42, %v885_v38  ;;  %v3926_v57 = vadd.f32 %v19447_v13, %v21718_v8  ;;  %v5968_v41 = vsel %vm1518_vm0, %v5608_v54, 0.0  ;;  %v21793_v28 = vpop.xlane.xlu1 %5636  ;;  %v5610_v13 = vmul.f32 %v21487_v42, %v912_v35 }
 0x1ef   : > { %v4540_v59 = vpack.c.bf16 %v4413_v12, %v4412_v20  ;;  %v3918_v0 = vadd.f32 %v21718_v8, %v3917_v25  ;;  %v759_v20 = vld [vmem:[%s20420_s30 + $0x2e8] sm:$0xff]  ;;  %v21790_v34 = vadd.f32 %v21538_v23, %v3274_v7  ;;  %v3572_v38 = vmax.f32 %v21771_v11, 0.0  ;;  %v658_v7 = vld [vmem:[%s20415_s26 + $0x3c0] sm:$0xff]  ;;  %v21806_v46 = vpop.xlane.xlu0 %5687 }
 0x1f0   : > { %v19448_v40 = vpop.f32.mrf.mxu0  ;;  %v5893_v6 = vsel %vm1518_vm0, %v5583_v63, 0.0  ;;  %v887_v14 = vmul.f32 %v759_v20, %v631_v27  ;;  %v3573_v54 = vmax.f32 %v3445_v37, 0.0  ;;  %v5974_v11 = vsel %vm1518_vm0, %v5610_v13, 0.0 }
 0x1f1   : > { %v3929_v21 = vadd.f32 %v19448_v40, %v21718_v8  ;;  %19571 = vmatprep.mubr.msk.bf16.mxu1 %vm4619_vm1, %v4540_v59  ;;  %v21798_v59 = vpop.f32.mrf.mxu1  ;;  %v786_v40 = vld [vmem:[%s20420_s30 + $0x3c0] sm:$0xff]  ;;  %v4416_v63 = vmax.f32 %v3918_v0, 0.0  ;;  %v4418_v35 = vmax.f32 %v3926_v57, 0.0  ;;  %v3575_v37 = vmax.f32 %v21790_v34, 0.0 }
 0x1f2   : > { %v3920_v12 = vpop.f32.mrf.mxu0  ;;  %19572 = vmatmul.mubr.msk.bf16.vlgmr.msra.gmra.mxu1 %vm4619_vm1, %v4541_v32  ;;  %5969 = vadd.xlane.f32.xlu0 %v5968_v41  ;;  %v5585_v43 = vmul.f32 %v21487_v42, %v887_v14  ;;  %v914_v20 = vmul.f32 %v786_v40, %v658_v7  ;;  %v3279_v0 = vadd.f32 %v21646_v17, %v21568_v26  ;;  %v660_v26 = vld [vmem:[%s20415_s26 + $0x3d0] sm:$0xff]  ;;  %v635_v7 = vld [vmem:[%s20415_s26 + $0x308] sm:$0xff] }
 0x1f3   : > { %v3921_v25 = vadd.f32 %v21718_v8, %v3920_v12  ;;  %v4419_v32 = vmax.f32 %v3929_v21, 0.0  ;;  %5894 = vadd.xlane.f32.xlu1 %v5893_v6  ;;  %v761_v21 = vld [vmem:[%s20420_s30 + $0x2f8] sm:$0xff]  ;;  %v3282_v41 = vadd.f32 %v21698_v24, %v21593_v58  ;;  %v3287_v57 = vadd.f32 %v21622_v36, %v21554_v39  ;;  %v21819_v14 = vpop.f32.mrf.mxu1  ;;  %v788_v17 = vld [vmem:[%s20420_s30 + $0x3d0] sm:$0xff]  ;;  %v21828_v39 = vpop.xlane.xlu1 %5642 }
 0x1f4   : > { %v19451_v1 = vpop.f32.mrf.mxu0  ;;  %19546 = vmatmul.mubr.msk.bf16.gmra.mxu0 %vm1518_vm0, %v21711_v4  ;;  %v5899_v4 = vsel %vm1518_vm0, %v5585_v43, 0.0  ;;  %v889_v12 = vmul.f32 %v761_v21, %v633_v55  ;;  %v5612_v34 = vmul.f32 %v21487_v42, %v914_v20  ;;  %v3644_v43 = vpack.c.bf16 %v3573_v54, %v3572_v38 }
 0x1f5   : > { %v4417_v31 = vmax.f32 %v3921_v25, 0.0  ;;  %19549 = vmatprep.mubr.msk.bf16.mxu0 %vm1518_vm0, %v3642_v47  ;;  %v4543_v47 = vpack.c.bf16 %v4419_v32, %v4418_v35  ;;  %v916_v36 = vmul.f32 %v788_v17, %v660_v26  ;;  %v763_v32 = vld [vmem:[%s20420_s30 + $0x308] sm:$0xff]  ;;  %v3942_v40 = vadd.f32 %v19451_v1, %v21718_v8  ;;  %v21839_v35 = vpop.xlane.xlu0 %5693  ;;  %v21844_v20 = vpop.f32.mrf.mxu1 }
 0x1f6   : > { %v3933_v27 = vpop.f32.mrf.mxu0  ;;  %5975 = vadd.xlane.f32.xlu0 %v5974_v11  ;;  %v5587_v13 = vmul.f32 %v21487_v42, %v889_v12  ;;  %v891_v54 = vmul.f32 %v763_v32, %v635_v7  ;;  %v3448_v11 = vadd.f32 %v21538_v23, %v3279_v0  ;;  %v3449_v55 = vadd.f32 %v21538_v23, %v3282_v41  ;;  %v662_v41 = vld [vmem:[%s20415_s26 + $0x3e0] sm:$0xff] }
 0x1f7   : > { %v4542_v6 = vpack.c.bf16 %v4417_v31, %v4416_v63  ;;  %5900 = vadd.xlane.f32.xlu1 %v5899_v4  ;;  %v3934_v58 = vadd.f32 %v21718_v8, %v3933_v27  ;;  %v5980_v31 = vsel %vm1518_vm0, %v5612_v34, 0.0  ;;  %v5614_v1 = vmul.f32 %v21487_v42, %v916_v36  ;;  %v765_v34 = vld [vmem:[%s20420_s30 + $0x318] sm:$0xff]  ;;  %v21861_v32 = vpop.xlane.xlu1 %5648 }
 0x1f8   : > { %v19452_v25 = vpop.f32.mrf.mxu0  ;;  %v5905_v38 = vsel %vm1518_vm0, %v5587_v13, 0.0  ;;  %v3645_v27 = vpack.c.bf16 %v3575_v37, %v3574_v30  ;;  %v3290_v4 = vadd.f32 %v21676_v3, %v21579_v5  ;;  %v5589_v0 = vmul.f32 %v21487_v42, %v891_v54  ;;  %v637_v3 = vld [vmem:[%s20415_s26 + $0x318] sm:$0xff] }
 0x1f9   : > { %v3945_v24 = vadd.f32 %v19452_v25, %v21718_v8  ;;  %19575 = vmatprep.mubr.msk.bf16.mxu1 %vm4619_vm1, %v4542_v6  ;;  %v21852_v25 = vadd.f32 %v21538_v23, %v3287_v57  ;;  %v4420_v30 = vmax.f32 %v3934_v58, 0.0  ;;  %v5986_v5 = vsel %vm1518_vm0, %v5614_v1, 0.0  ;;  %v21875_v1 = vpop.xlane.xlu0 %5699 }
 0x1fa   : > { %v3936_v63 = vpop.f32.mrf.mxu0  ;;  %19576 = vmatmul.mubr.msk.bf16.gmra.mxu1 %vm4619_vm1, %v4543_v47  ;;  %5981 = vadd.xlane.f32.xlu0 %v5980_v31  ;;  %v790_v47 = vld [vmem:[%s20420_s30 + $0x3e0] sm:$0xff]  ;;  %v4422_v13 = vmax.f32 %v3942_v40, 0.0  ;;  %v3576_v36 = vmax.f32 %v3448_v11, 0.0  ;;  %v3577_v7 = vmax.f32 %v3449_v55, 0.0  ;;  %v3298_v57 = vadd.f32 %v21798_v59, %v21637_v33  ;;  %v21864_v40 = vpop.f32.mrf.mxu1  ;;  %v664_v11 = vld [vmem:[%s20415_s26 + $0x3f0] sm:$0xff] }
 0x1fb   : > { %v3937_v21 = vadd.f32 %v21718_v8, %v3936_v63  ;;  %v4423_v12 = vmax.f32 %v3945_v24, 0.0  ;;  %5906 = vadd.xlane.f32.xlu1 %v5905_v38  ;;  %v918_v17 = vmul.f32 %v790_v47, %v662_v41  ;;  %v893_v24 = vmul.f32 %v765_v34, %v637_v3  ;;  %v792_v55 = vld [vmem:[%s20420_s30 + $0x3f0] sm:$0xff] }
 0x1fc   : > { %v19455_v6 = vpop.f32.mrf.mxu0  ;;  %19550 = vmatmul.mubr.msk.bf16.gmra.mxu0 %vm1518_vm0, %v21744_v2  ;;  %v5911_v2 = vsel %vm1518_vm0, %v5589_v0, 0.0  ;;  %v3295_v33 = vadd.f32 %v21748_v19, %v21614_v9  ;;  %v767_v0 = vld [vmem:[%s20420_s30 + $0x328] sm:$0xff] }
 0x1fd   : > { %v4421_v37 = vmax.f32 %v3937_v21, 0.0  ;;  %19553 = vmatprep.mubr.msk.bf16.mxu0 %vm1518_vm0, %v3644_v43  ;;  %v3451_v43 = vadd.f32 %v21538_v23, %v3290_v4  ;;  %v4545_v63 = vpack.c.bf16 %v4423_v12, %v4422_v13  ;;  %v5616_v38 = vmul.f32 %v21487_v42, %v918_v17  ;;  %v639_v12 = vld [vmem:[%s20415_s26 + $0x328] sm:$0xff] }
 0x1fe   : > { %v3949_v26 = vpop.f32.mrf.mxu0  ;;  %5987 = vadd.xlane.f32.xlu0 %v5986_v5  ;;  %v5591_v54 = vmul.f32 %v21487_v42, %v893_v24  ;;  %v920_v4 = vmul.f32 %v792_v55, %v664_v11  ;;  %v3958_v41 = vadd.f32 %v19455_v6, %v21718_v8  ;;  %v895_v19 = vmul.f32 %v767_v0, %v639_v12 }
 0x1ff   : > { %v4544_v58 = vpack.c.bf16 %v4421_v37, %v4420_v30  ;;  %5912 = vadd.xlane.f32.xlu1 %v5911_v2  ;;  %v3950_v59 = vadd.f32 %v21718_v8, %v3949_v26  ;;  %v5992_v30 = vsel %vm1518_vm0, %v5616_v38, 0.0  ;;  %v3646_v37 = vpack.c.bf16 %v3577_v7, %v3576_v36  ;;  %v3313_v26 = vpop.f32.mrf.mxu1 }
 0x200   : > { %v19456_v31 = vpop.f32.mrf.mxu0  ;;  %v5917_v9 = vsel %vm1518_vm0, %v5591_v54, 0.0  ;;  %v3453_v5 = vadd.f32 %v21538_v23, %v3298_v57  ;;  %v5618_v34 = vmul.f32 %v21487_v42, %v920_v4  ;;  %v3578_v6 = vmax.f32 %v21852_v25, 0.0  ;;  %v21896_v54 = vpop.xlane.xlu1 %5654 }
 0x201   : > { %v3961_v21 = vadd.f32 %v19456_v31, %v21718_v8  ;;  %19579 = vmatprep.mubr.msk.bf16.mxu1 %vm4619_vm1, %v4544_v58  ;;  %v3579_v13 = vmax.f32 %v3451_v43, 0.0  ;;  %v5593_v24 = vmul.f32 %v21487_v42, %v895_v19  ;;  %v3452_v36 = vadd.f32 %v21538_v23, %v3295_v33  ;;  %v769_v31 = vld [vmem:[%s20420_s30 + $0x338] sm:$0xff]  ;;  %v771_v19 = vld [vmem:[%s20420_s30 + $0x348] sm:$0xff] }
 0x202   : > { %v3952_v47 = vpop.f32.mrf.mxu0  ;;  %19580 = vmatmul.mubr.msk.bf16.gmra.mxu1 %vm4619_vm1, %v4545_v63  ;;  %5993 = vadd.xlane.f32.xlu0 %v5992_v30  ;;  %v4424_v7 = vmax.f32 %v3950_v59, 0.0  ;;  %v5998_v58 = vsel %vm1518_vm0, %v5618_v34, 0.0  ;;  %v641_v63 = vld [vmem:[%s20415_s26 + $0x338] sm:$0xff]  ;;  %v3306_v25 = vadd.f32 %v21773_v50, %v21624_v56  ;;  %v4426_v43 = vmax.f32 %v3958_v41, 0.0 }
 0x203   : > { %v3953_v3 = vadd.f32 %v21718_v8, %v3952_v47  ;;  %v4427_v2 = vmax.f32 %v3961_v21, 0.0  ;;  %5918 = vadd.xlane.f32.xlu1 %v5917_v9  ;;  %v897_v11 = vmul.f32 %v769_v31, %v641_v63  ;;  %v3581_v55 = vmax.f32 %v3453_v5, 0.0  ;;  %v21900_v21 = vpop.xlane.xlu0 %5705  ;;  %v643_v9 = vld [vmem:[%s20415_s26 + $0x348] sm:$0xff]  ;;  %v773_v63 = vld [vmem:[%s20420_s30 + $0x358] sm:$0xff] }
 0x204   : > { %v19459_v17 = vpop.f32.mrf.mxu0  ;;  %19554 = vmatmul.mubr.msk.bf16.gmra.mxu0 %vm1518_vm0, %v3645_v27  ;;  %v5923_v27 = vsel %vm1518_vm0, %v5593_v24, 0.0  ;;  %v3314_v33 = vadd.f32 %v3313_v26, %v21690_v61  ;;  %v3647_v4 = vpack.c.bf16 %v3579_v13, %v3578_v6  ;;  %v3303_v56 = vadd.f32 %v21724_v45, %v21601_v51 }
 0x205   : > { %v4425_v57 = vmax.f32 %v3953_v3, 0.0  ;;  %19557 = vmatprep.mubr.msk.bf16.mxu0 %vm1518_vm0, %v3646_v37  ;;  %v4547_v50 = vpack.c.bf16 %v4427_v2, %v4426_v43  ;;  %v5595_v0 = vmul.f32 %v21487_v42, %v897_v11  ;;  %v3580_v41 = vmax.f32 %v3452_v36, 0.0  ;;  %v21920_v2 = vpop.xlane.xlu1 %5660 }
 0x206   : > { %v3965_v38 = vpop.f32.mrf.mxu0  ;;  %5999 = vadd.xlane.f32.xlu0 %v5998_v58  ;;  %v3311_v47 = vadd.f32 %v21844_v20, %v21665_v62  ;;  %v3455_v37 = vadd.f32 %v21538_v23, %v3306_v25  ;;  %v3974_v51 = vadd.f32 %v19459_v17, %v21718_v8  ;;  %v899_v3 = vmul.f32 %v771_v19, %v643_v9  ;;  %v645_v58 = vld [vmem:[%s20415_s26 + $0x358] sm:$0xff] }
 0x207   : > { %v4546_v59 = vpack.c.bf16 %v4425_v57, %v4424_v7  ;;  %5924 = vadd.xlane.f32.xlu1 %v5923_v27  ;;  %v3966_v61 = vadd.f32 %v21718_v8, %v3965_v38  ;;  %v5929_v5 = vsel %vm1518_vm0, %v5595_v0, 0.0  ;;  %v3648_v62 = vpack.c.bf16 %v3581_v55, %v3580_v41  ;;  %v775_v0 = vld [vmem:[%s20420_s30 + $0x368] sm:$0xff] }
 0x208   : > { %v19460_v12 = vpop.f32.mrf.mxu0  ;;  %v3457_v20 = vadd.f32 %v21538_v23, %v3314_v33  ;;  %v3454_v6 = vadd.f32 %v21538_v23, %v3303_v56  ;;  %v5597_v17 = vmul.f32 %v21487_v42, %v899_v3  ;;  %v3456_v24 = vadd.f32 %v21538_v23, %v3311_v47 }
 0x209   : > { %v3977_v30 = vadd.f32 %v19460_v12, %v21718_v8  ;;  %19583 = vmatprep.mubr.msk.bf16.mxu1 %vm4619_vm1, %v4546_v59  ;;  %v3322_v36 = vadd.f32 %v21864_v40, %v21678_v52  ;;  %v4428_v7 = vmax.f32 %v3966_v61, 0.0  ;;  %v3583_v31 = vmax.f32 %v3455_v37, 0.0  ;;  %v21935_v59 = vld [vmem:[%s27335_s11] ss:$0 sm:$0xff] }
 0x20a   : > { %v3968_v45 = vpop.f32.mrf.mxu0  ;;  %19584 = vmatmul.mubr.msk.bf16.gmra.mxu1 %vm4619_vm1, %v4547_v50  ;;  %v4430_v25 = vmax.f32 %v3974_v51, 0.0  ;;  %v5935_v38 = vsel %vm1518_vm0, %v5597_v17, 0.0  ;;  %v901_v27 = vmul.f32 %v773_v63, %v645_v58  ;;  %v3319_v42 = vadd.f32 %v21819_v14, %v21648_v10  ;;  %v647_v14 = vld [vmem:[%s20415_s26 + $0x368] sm:$0xff] }
 0x20b   : > { %v3969_v34 = vadd.f32 %v21718_v8, %v3968_v45  ;;  %v4431_v13 = vmax.f32 %v3977_v30, 0.0  ;;  %5930 = vadd.xlane.f32.xlu1 %v5929_v5  ;;  %v3585_v11 = vmax.f32 %v3457_v20, 0.0  ;;  %v3582_v52 = vmax.f32 %v3454_v6, 0.0  ;;  %v21946_v30 = vpop.xlane.xlu1 %5666 }
 0x20c   : > { %v19463_v26 = vpop.f32.mrf.mxu0  ;;  %19558 = vmatmul.mubr.msk.bf16.gmra.mxu0 %vm1518_vm0, %v3647_v4  ;;  %v5599_v4 = vmul.f32 %v21935_v59, %v901_v27  ;;  %v3584_v56 = vmax.f32 %v3456_v24, 0.0  ;;  %v3459_v50 = vadd.f32 %v21538_v23, %v3322_v36  ;;  %v903_v19 = vmul.f32 %v775_v0, %v647_v14 }
 0x20d   : > { %v4429_v57 = vmax.f32 %v3969_v34, 0.0  ;;  %19561 = vmatprep.mubr.msk.bf16.mxu0 %vm1518_vm0, %v3648_v62  ;;  %v4549_v40 = vpack.c.bf16 %v4431_v13, %v4430_v25  ;;  %v3649_v41 = vpack.c.bf16 %v3583_v31, %v3582_v52  ;;  %v3990_v47 = vadd.f32 %v19463_v26, %v21718_v8  ;;  %v649_v13 = vld [vmem:[%s20415_s26 + $0x378] sm:$0xff] }
 0x20e   : > { %v3981_v43 = vpop.f32.mrf.mxu0  ;;  %v5941_v9 = vsel %vm1518_vm0, %v5599_v4, 0.0  ;;  %v3458_v37 = vadd.f32 %v21538_v23, %v3319_v42  ;;  %v3650_v51 = vpack.c.bf16 %v3585_v11, %v3584_v56  ;;  %v5601_v62 = vmul.f32 %v21935_v59, %v903_v19  ;;  %v777_v26 = vld [vmem:[%s20420_s30 + $0x378] sm:$0xff]  ;;  %v651_v42 = vld [vmem:[%s20415_s26 + $0x388] sm:$0xff]  ;;  %v21969_v56 = vpop.xlane.xlu0 %5711 }
 0x20f   : > { %v4548_v55 = vpack.c.bf16 %v4429_v57, %v4428_v7  ;;  %5936 = vadd.xlane.f32.xlu1 %v5935_v38  ;;  %v3982_v12 = vadd.f32 %v21718_v8, %v3981_v43  ;;  %v3587_v20 = vmax.f32 %v3459_v50, 0.0  ;;  %v4434_v17 = vmax.f32 %v3990_v47, 0.0  ;;  %v21957_v31 = vpop.xlane.xlu1 %5672  ;;  %v779_v11 = vld [vmem:[%s20420_s30 + $0x388] sm:$0xff] }
 0x210   : > { %v19464_v33 = vpop.f32.mrf.mxu0  ;;  %v5947_v24 = vsel %vm1518_vm0, %v5601_v62, 0.0  ;;  %v905_v36 = vmul.f32 %v777_v26, %v649_v13  ;;  %v3586_v7 = vmax.f32 %v3458_v37, 0.0  ;;  %27468 = vst [vmem:[#allocation7_spill] sm:$0xff] %v21957_v31  ;;  %v19951_v50 = vmov 0  }
 0x211   : > { %v3993_v10 = vadd.f32 %v19464_v33, %v21718_v8  ;;  %19587 = vmatprep.mubr.msk.bf16.mxu1 %vm4619_vm1, %v4548_v55  ;;  %v4432_v34 = vmax.f32 %v3982_v12, 0.0  ;;  %v907_v33 = vmul.f32 %v779_v11, %v651_v42  ;;  %19740 = vset.pattern.permute.xlu0 %v19951_v50  ;;  %v6652_v12 = vld [vmem:[#allocation2] sm:$0x1]  ;;  %v657_v11 = vld [vmem:[%s20415_s26 + $0x3b8] sm:$0xff] }
 0x212   : > { %v3984_v61 = vpop.f32.mrf.mxu0  ;;  %19588 = vmatmul.mubr.msk.bf16.gmra.mxu1 %vm4619_vm1, %v4549_v40  ;;  %v5603_v25 = vmul.f32 %v21935_v59, %v905_v36  ;;  %v3651_v43 = vpack.c.bf16 %v3587_v20, %v3586_v7  ;;  %19741 = vset.pattern.permute.xlu1 %v19951_v50  ;;  %v21982_v26 = vpop.xlane.xlu0 %5717 }
 0x213   : > { %v3985_v45 = vadd.f32 %v21718_v8, %v3984_v61  ;;  %v4435_v5 = vmax.f32 %v3993_v10, 0.0  ;;  %5942 = vadd.xlane.f32.xlu1 %v5941_v9  ;;  %v5605_v0 = vmul.f32 %v21935_v59, %v907_v33  ;;  %v653_v61 = vld [vmem:[%s20415_s26 + $0x398] sm:$0xff] }
 0x214   : > { %v19467_v3 = vpop.f32.mrf.mxu0  ;;  %19562 = vmatmul.mubr.msk.bf16.gmra.mxu0 %vm1518_vm0, %v3649_v41  ;;  %v5953_v40 = vsel %vm1518_vm0, %v5603_v25, 0.0  ;;  %v781_v9 = vld [vmem:[%s20420_s30 + $0x398] sm:$0xff] }
 0x215   : > { %v4433_v6 = vmax.f32 %v3985_v45, 0.0  ;;  %19565 = vmatprep.mubr.msk.bf16.mxu0 %vm1518_vm0, %v3650_v51  ;;  %v4551_v58 = vpack.c.bf16 %v4435_v5, %v4434_v17  ;;  %v4006_v55 = vadd.f32 %v19467_v3, %v21718_v8  ;;  %v21975_v51 = vpop.xlane.xlu1 %5678  ;;  %v5959_v45 = vsel %vm1518_vm0, %v5605_v0, 0.0  ;;  %v655_v17 = vld [vmem:[%s20415_s26 + $0x3a8] sm:$0xff] }
 0x216   : > { %v3997_v23 = vpop.f32.mrf.mxu0  ;;  %27469 = vst [vmem:[#allocation8_spill] sm:$0xff] %v21975_v51  ;;  %v909_v5 = vmul.f32 %v781_v9, %v653_v61  ;;  %v659_v61 = vld [vmem:[%s20415_s26 + $0x3c8] sm:$0xff] }
 0x217   : > { %v4550_v57 = vpack.c.bf16 %v4433_v6, %v4432_v34  ;;  %5948 = vadd.xlane.f32.xlu1 %v5947_v24  ;;  %v3998_v38 = vadd.f32 %v21718_v8, %v3997_v23  ;;  %v4438_v19 = vmax.f32 %v4006_v55, 0.0  ;;  %v783_v23 = vld [vmem:[%s20420_s30 + $0x3a8] sm:$0xff]  ;;  %v785_v55 = vld [vmem:[%s20420_s30 + $0x3b8] sm:$0xff] }
 0x218   : > { %v19468_v63 = vpop.f32.mrf.mxu0  ;;  %v5607_v34 = vmul.f32 %v21935_v59, %v909_v5  ;;  %v787_v9 = vld [vmem:[%s20420_s30 + $0x3c8] sm:$0xff] }
 0x219   : > { %v4009_v27 = vadd.f32 %v19468_v63, %v21718_v8  ;;  %19591 = vmatprep.mubr.msk.bf16.mxu1 %vm4619_vm1, %v4550_v57  ;;  %v4436_v41 = vmax.f32 %v3998_v38, 0.0  ;;  %v911_v57 = vmul.f32 %v783_v23, %v655_v17 }
 0x21a   : > { %v4000_v52 = vpop.f32.mrf.mxu0  ;;  %19592 = vmatmul.mubr.msk.bf16.gmra.mxu1 %vm4619_vm1, %v4551_v58  ;;  %v5965_v7 = vsel %vm1518_vm0, %v5607_v34, 0.0 }
 0x21b   : > { %v4001_v4 = vadd.f32 %v21718_v8, %v4000_v52  ;;  %v4439_v10 = vmax.f32 %v4009_v27, 0.0  ;;  %5954 = vadd.xlane.f32.xlu1 %v5953_v40  ;;  %v5609_v38 = vmul.f32 %v21935_v59, %v911_v57 }
 0x21c   : > { %v19471_v14 = vpop.f32.mrf.mxu0  ;;  %19566 = vmatmul.mubr.msk.bf16.gmra.mxu0 %vm1518_vm0, %v3651_v43  ;;  %6655 = vperm.xlu0 %19740, %v6652_v12   ;;  %v21990_v43 = vpop.xlane.xlu1 %5684 }
 0x21d   : > { %v4437_v47 = vmax.f32 %v4001_v4, 0.0  ;;  %v4553_v62 = vpack.c.bf16 %v4439_v10, %v4438_v19  ;;  %v4022_v24 = vadd.f32 %v19471_v14, %v21718_v8  ;;  %27470 = vst [vmem:[#allocation9_spill] sm:$0xff] %v21990_v43  ;;  %v5971_v33 = vsel %vm1518_vm0, %v5609_v38, 0.0  ;;  %v21996_v12 = vpop.xlane.xlu0 %5723 }
 0x21e   : > { %v4013_v37 = vpop.f32.mrf.mxu0  ;;  %v913_v4 = vmul.f32 %v785_v55, %v657_v11 }
 0x21f   : > { %v4552_v3 = vpack.c.bf16 %v4437_v47, %v4436_v41  ;;  %5960 = vadd.xlane.f32.xlu1 %v5959_v45  ;;  %v4014_v6 = vadd.f32 %v21718_v8, %v4013_v37  ;;  %v4442_v52 = vmax.f32 %v4022_v24, 0.0  ;;  %v661_v24 = vld [vmem:[%s20415_s26 + $0x3d8] sm:$0xff] }
 0x220   : > { %v19472_v20 = vpop.f32.mrf.mxu0  ;;  %v5611_v0 = vmul.f32 %v21935_v59, %v913_v4  ;;  %v22006_v45 = vpop.xlane.xlu1 %5690 }
 0x221   : > { %v4025_v13 = vadd.f32 %v19472_v20, %v21718_v8  ;;  %19595 = vmatprep.mubr.msk.bf16.mxu1 %vm4619_vm1, %v4552_v3  ;;  %v4440_v27 = vmax.f32 %v4014_v6, 0.0  ;;  %27471 = vst [vmem:[#allocation11_spill] sm:$0xff] %v22006_v45  ;;  %v915_v3 = vmul.f32 %v787_v9, %v659_v61  ;;  %v22011_v23 = vpop.xlane.xlu0 %5729 }
 0x222   : > { %v4016_v36 = vpop.f32.mrf.mxu0  ;;  %19596 = vmatmul.mubr.msk.bf16.gmra.mxu1 %vm4619_vm1, %v4553_v62  ;;  %v5977_v5 = vsel %vm1518_vm0, %v5611_v0, 0.0  ;;  %27472 = vst [vmem:[#allocation14_spill] sm:$0xff] %v22011_v23 }
 0x223   : > { %v4017_v58 = vadd.f32 %v21718_v8, %v4016_v36  ;;  %v4443_v63 = vmax.f32 %v4025_v13, 0.0  ;;  %5966 = vadd.xlane.f32.xlu1 %v5965_v7  ;;  %v5613_v6 = vmul.f32 %v21935_v59, %v915_v3  ;;  %v789_v36 = vld [vmem:[%s20420_s30 + $0x3d8] sm:$0xff] }
 0x224   : > { %v19475_v25 = vpop.f32.mrf.mxu0  ;;  %v793_v3 = vld [vmem:[%s20420_s30 + $0x3f8] sm:$0xff] }
 0x225   : > { %v4441_v42 = vmax.f32 %v4017_v58, 0.0  ;;  %v4555_v10 = vpack.c.bf16 %v4443_v63, %v4442_v52  ;;  %v4038_v19 = vadd.f32 %v19475_v25, %v21718_v8  ;;  %v5983_v58 = vsel %vm1518_vm0, %v5613_v6, 0.0 }
 0x226   : > { %v4029_v40 = vpop.f32.mrf.mxu0  ;;  %v917_v63 = vmul.f32 %v789_v36, %v661_v24 }
 0x227   : > { %v4554_v50 = vpack.c.bf16 %v4441_v42, %v4440_v27  ;;  %5972 = vadd.xlane.f32.xlu1 %v5971_v33  ;;  %v4030_v41 = vadd.f32 %v21718_v8, %v4029_v40  ;;  %v4446_v7 = vmax.f32 %v4038_v19, 0.0  ;;  %v22016_v42 = vpop.xlane.xlu1 %5696  ;;  %v663_v40 = vld [vmem:[%s20415_s26 + $0x3e8] sm:$0xff] }
 0x228   : > { %v19476_v14 = vpop.f32.mrf.mxu0  ;;  %27473 = vst [vmem:[#allocation15_spill] sm:$0xff] %v22016_v42  ;;  %v5615_v11 = vmul.f32 %v21935_v59, %v917_v63  ;;  %v791_v33 = vld [vmem:[%s20420_s30 + $0x3e8] sm:$0xff] }
 0x229   : > { %v4041_v47 = vadd.f32 %v19476_v14, %v21718_v8  ;;  %19599 = vmatprep.mubr.msk.bf16.mxu1 %vm4619_vm1, %v4554_v50  ;;  %v4444_v13 = vmax.f32 %v4030_v41, 0.0  ;;  %v919_v14 = vmul.f32 %v791_v33, %v663_v40  ;;  %v22028_v41 = vpop.xlane.xlu0 %5735 }
 0x22a   : > { %v4032_v37 = vpop.f32.mrf.mxu0  ;;  %19600 = vmatmul.mubr.msk.bf16.gmra.mxu1 %vm4619_vm1, %v4555_v10  ;;  %v5989_v10 = vsel %vm1518_vm0, %v5615_v11, 0.0  ;;  %27474 = vst [vmem:[#allocation16_spill] sm:$0xff] %v22028_v41 }
 0x22b   : > { %v4033_v62 = vadd.f32 %v21718_v8, %v4032_v37  ;;  %v4447_v20 = vmax.f32 %v4041_v47, 0.0  ;;  %5978 = vadd.xlane.f32.xlu1 %v5977_v5  ;;  %v5617_v9 = vmul.f32 %v21935_v59, %v919_v14  ;;  %v665_v5 = vld [vmem:[%s20415_s26 + $0x3f8] sm:$0xff]  ;;  %s511_s26 = scalar_lea.vmem [#allocation3], %s18499_s29  ;;  %s19893_s29 = sshll.u32 %s19953_s21, 4  ;;  %s19894_s29 = int_to_ptr.vmem [resolvable:$false] %s19893_s29 }
 0x22c   : > { %v19479_v34 = vpop.f32.mrf.mxu0  ;;  %s18400_s30 = sshll.u32 %s511_s26, 4  ;;  %s19895_s0 = scalar_lea.vmem %s19894_s29, 256  ;;  %s18401_s30 = int_to_ptr.vmem [resolvable:$true] %s18400_s30 }
 0x22d   : > { %v4445_v17 = vmax.f32 %v4033_v62, 0.0  ;;  %v4557_v38 = vpack.c.bf16 %v4447_v20, %v4446_v7  ;;  %v4054_v4 = vadd.f32 %v19479_v34, %v21718_v8  ;;  %v22033_v34 = vpop.xlane.xlu1 %5702  ;;  %v5995_v6 = vsel %vm1518_vm0, %v5617_v9, 0.0  ;;  %v22040_v63 = vpop.xlane.xlu0 %5741  ;;  %s19889_s4 = scalar_lea.vmem %s18401_s30, 128  ;;  %p19896_p0 = scmp.lt.s32.totalorder %s18401_s30, %s19894_s29 }
 0x22e   : > { %v4045_v57 = vpop.f32.mrf.mxu0  ;;  %27475 = vst [vmem:[#allocation17_spill] sm:$0xff] %v22033_v34  ;;  %27476 = vst [vmem:[#allocation18_spill] sm:$0xff] %v22040_v63  ;;  %p19890_p11 = scmp.ne.s32.totalorder %s18401_s30, %s19889_s4  ;;  %p19897_p1 = scmp.lt.s32.totalorder %s19895_s0, %s19889_s4 }
 0x22f   : > { %v4556_v25 = vpack.c.bf16 %v4445_v17, %v4444_v13  ;;  %5984 = vadd.xlane.f32.xlu1 %v5983_v58  ;;  %v4046_v55 = vadd.f32 %v21718_v8, %v4045_v57  ;;  %v4450_v62 = vmax.f32 %v4054_v4, 0.0  ;;  %v921_v13 = vmul.f32 %v793_v3, %v665_v5 }
 0x230   : > { %v19480_v27 = vpop.f32.mrf.mxu0  ;;  %p19891_p12 = pnand %p19890_p11, %p20067_p5  ;;  %p19898_p2 = por %p19897_p1, %p19896_p0 }
 0x231   : > { %v4057_v52 = vadd.f32 %v19480_v27, %v21718_v8  ;;  %19603 = vmatprep.mubr.msk.bf16.mxu1 %vm4619_vm1, %v4556_v25  ;;  %v4448_v19 = vmax.f32 %v4046_v55, 0.0  ;;  %v5619_v7 = vmul.f32 %v21935_v59, %v921_v13  ;;  %v22046_v59 = vpop.xlane.xlu1 %5708  ;;  %v22048_v14 = vpop.xlane.xlu0 %5747 }
 0x232   : > { %v4048_v50 = vpop.f32.mrf.mxu0  ;;  %19604 = vmatmul.mubr.msk.bf16.gmra.mxu1 %vm4619_vm1, %v4557_v38  ;;  %27477 = vst [vmem:[#allocation19_spill] sm:$0xff] %v22046_v59  ;;  %27478 = vst [vmem:[#allocation20_spill] sm:$0xff] %v22048_v14  ;;  %p19892_p13 = pneg %p19891_p12 }
 0x233   : > { %v4049_v0 = vadd.f32 %v21718_v8, %v4048_v50  ;;  %v4451_v47 = vmax.f32 %v4057_v52, 0.0  ;;  %5990 = vadd.xlane.f32.xlu1 %v5989_v10  ;;  %v6001_v27 = vsel %vm1518_vm0, %v5619_v7, 0.0  ;;  %vm17772_vm0 = vcmask 982912  }
 0x234   : > { %v19483_v61 = vpop.f32.mrf.mxu0  ;;  %p19899_p3 = pnand %p19898_p2, %p19892_p13 }
 0x235   : > { %v4449_v37 = vmax.f32 %v4049_v0, 0.0  ;;  %v4559_v24 = vpack.c.bf16 %v4451_v47, %v4450_v62  ;;  %v4070_v25 = vadd.f32 %v19483_v61, %v21718_v8  ;;  %v22056_v13 = vpop.xlane.xlu0 %5753 }
 0x236   : > { %v4061_v20 = vpop.f32.mrf.mxu0  ;;  %27479 = vst [vmem:[#allocation21_spill] sm:$0xff] %v22056_v13 }
 0x237   : > { %v4558_v17 = vpack.c.bf16 %v4449_v37, %v4448_v19  ;;  %5996 = vadd.xlane.f32.xlu1 %v5995_v6  ;;  %v4062_v57 = vadd.f32 %v21718_v8, %v4061_v20  ;;  %v4454_v4 = vmax.f32 %v4070_v25, 0.0 }
 0x238   : > { %v19484_v36 = vpop.f32.mrf.mxu0 }
 0x239   : > { %v4073_v58 = vadd.f32 %v19484_v36, %v21718_v8  ;;  %19607 = vmatprep.mubr.msk.bf16.mxu1 %vm4619_vm1, %v4558_v17  ;;  %v4452_v40 = vmax.f32 %v4062_v57, 0.0 }
 0x23a   : > { %v4064_v38 = vpop.f32.mrf.mxu0  ;;  %19608 = vmatmul.mubr.msk.bf16.gmra.mxu1 %vm4619_vm1, %v4559_v24 }
 0x23b   : > { %v4065_v11 = vadd.f32 %v21718_v8, %v4064_v38  ;;  %v4455_v55 = vmax.f32 %v4073_v58, 0.0  ;;  %6002 = vadd.xlane.f32.xlu1 %v6001_v27 }
 0x23c   : > { %v19487_v52 = vpop.f32.mrf.mxu0 }
 0x23d   : > { %v4453_v33 = vmax.f32 %v4065_v11, 0.0  ;;  %v4561_v0 = vpack.c.bf16 %v4455_v55, %v4454_v4  ;;  %v4086_v19 = vadd.f32 %v19487_v52, %v21718_v8  ;;  %v22064_v55 = vpop.xlane.xlu0 %5759 }
 0x23e   : > { %v4077_v50 = vpop.f32.mrf.mxu0  ;;  %27480 = vst [vmem:[#allocation22_spill] sm:$0xff] %v22064_v55 }
 0x23f   : > { %v4560_v10 = vpack.c.bf16 %v4453_v33, %v4452_v40  ;;  %v4078_v61 = vadd.f32 %v21718_v8, %v4077_v50  ;;  %v4458_v17 = vmax.f32 %v4086_v19, 0.0 }
 0x240   : > { %v19488_v47 = vpop.f32.mrf.mxu0 }
 0x241   : > { %v4089_v9 = vadd.f32 %v19488_v47, %v21718_v8  ;;  %19611 = vmatprep.mubr.msk.bf16.mxu1 %vm4619_vm1, %v4560_v10  ;;  %v4456_v20 = vmax.f32 %v4078_v61, 0.0 }
 0x242   : > { %v4080_v37 = vpop.f32.mrf.mxu0  ;;  %19612 = vmatmul.mubr.msk.bf16.gmra.mxu1 %vm4619_vm1, %v4561_v0 }
 0x243   : > { %v4081_v5 = vadd.f32 %v21718_v8, %v4080_v37  ;;  %v4459_v3 = vmax.f32 %v4089_v9, 0.0  ;;  %v22069_v37 = vpop.xlane.xlu0 %5765 }
 0x244   : > { %v19491_v62 = vpop.f32.mrf.mxu0  ;;  %27481 = vst [vmem:[#allocation23_spill] sm:$0xff] %v22069_v37 }
 0x245   : > { %v4457_v6 = vmax.f32 %v4081_v5, 0.0  ;;  %v4563_v7 = vpack.c.bf16 %v4459_v3, %v4458_v17  ;;  %v4102_v38 = vadd.f32 %v19491_v62, %v21718_v8 }
 0x246   : > { %v4093_v24 = vpop.f32.mrf.mxu0 }
 0x247   : > { %v4562_v36 = vpack.c.bf16 %v4457_v6, %v4456_v20  ;;  %v4094_v58 = vadd.f32 %v21718_v8, %v4093_v24  ;;  %v4462_v50 = vmax.f32 %v4102_v38, 0.0 }
 0x248   : > { %v19492_v57 = vpop.f32.mrf.mxu0 }
 0x249   : > { %v4105_v25 = vadd.f32 %v19492_v57, %v21718_v8  ;;  %19615 = vmatprep.mubr.msk.bf16.mxu1 %vm4619_vm1, %v4562_v36  ;;  %v4460_v33 = vmax.f32 %v4094_v58, 0.0  ;;  %v22074_v58 = vpop.xlane.xlu0 %5771 }
 0x24a   : > { %v4096_v27 = vpop.f32.mrf.mxu0  ;;  %19616 = vmatmul.mubr.msk.bf16.gmra.mxu1 %vm4619_vm1, %v4563_v7  ;;  %27482 = vst [vmem:[#allocation24_spill] sm:$0xff] %v22074_v58 }
 0x24b   : > { %v4097_v11 = vadd.f32 %v21718_v8, %v4096_v27  ;;  %v4463_v52 = vmax.f32 %v4105_v25, 0.0  ;;  %v22079_v27 = vld [vmem:[%s27332_s8] ss:$0 sm:$0xff] }
 0x24c   : > { %v19495_v40 = vpop.f32.mrf.mxu0 }
 0x24d   : > { %v4461_v4 = vmax.f32 %v4097_v11, 0.0  ;;  %v4565_v47 = vpack.c.bf16 %v4463_v52, %v4462_v50  ;;  %v4118_v5 = vadd.f32 %v19495_v40, %v21718_v8 }
 0x24e   : > { %v4109_v10 = vpop.f32.mrf.mxu0 }
 0x24f   : > { %v4564_v0 = vpack.c.bf16 %v4461_v4, %v4460_v33  ;;  %v4110_v9 = vadd.f32 %v21718_v8, %v4109_v10  ;;  %v4466_v36 = vmax.f32 %v4118_v5, 0.0 }
 0x250   : > { %v19496_v61 = vpop.f32.mrf.mxu0 }
 0x251   : > { %v4121_v19 = vadd.f32 %v19496_v61, %v21718_v8  ;;  %19619 = vmatprep.mubr.msk.bf16.mxu1 %vm4619_vm1, %v4564_v0  ;;  %v4464_v17 = vmax.f32 %v4110_v9, 0.0 }
 0x252   : > { %v4112_v3 = vpop.f32.mrf.mxu0  ;;  %19620 = vmatmul.mubr.msk.bf16.gmra.mxu1 %vm4619_vm1, %v4565_v47  ;;  %v22087_v47 = vpop.xlane.xlu0 %5777 }
 0x253   : > { %v4113_v62 = vadd.f32 %v21718_v8, %v4112_v3  ;;  %v4467_v20 = vmax.f32 %v4121_v19, 0.0  ;;  %27483 = vst [vmem:[#allocation25_spill] sm:$0xff] %v22087_v47 }
 0x254   : > { %v19499_v6 = vpop.f32.mrf.mxu0 }
 0x255   : > { %v4465_v24 = vmax.f32 %v4113_v62, 0.0  ;;  %v4567_v25 = vpack.c.bf16 %v4467_v20, %v4466_v36  ;;  %v4134_v52 = vadd.f32 %v22079_v27, %v19499_v6 }
 0x256   : > { %v4125_v7 = vpop.f32.mrf.mxu0  ;;  %v22095_v36 = vpop.xlane.xlu0 %5783 }
 0x257   : > { %v4566_v57 = vpack.c.bf16 %v4465_v24, %v4464_v17  ;;  %v4126_v11 = vadd.f32 %v22079_v27, %v4125_v7  ;;  %v4470_v61 = vmax.f32 %v4134_v52, 0.0  ;;  %27484 = vst [vmem:[#allocation26_spill] sm:$0xff] %v22095_v36 }
 0x258   : > { %v19500_v38 = vpop.f32.mrf.mxu0 }
 0x259   : > { %v4137_v8 = vadd.f32 %v22079_v27, %v19500_v38  ;;  %19623 = vmatprep.mubr.msk.bf16.mxu1 %vm4619_vm1, %v4566_v57  ;;  %v4468_v10 = vmax.f32 %v4126_v11, 0.0 }
 0x25a   : > { %v4128_v40 = vpop.f32.mrf.mxu0  ;;  %19624 = vmatmul.mubr.msk.bf16.gmra.mxu1 %vm4619_vm1, %v4567_v25 }
 0x25b   : > { %v4129_v33 = vadd.f32 %v22079_v27, %v4128_v40  ;;  %v4471_v4 = vmax.f32 %v4137_v8, 0.0 }
 0x25c   : > { %v19503_v50 = vpop.f32.mrf.mxu0 }
 0x25d   : > { %v4469_v0 = vmax.f32 %v4129_v33, 0.0  ;;  %v4569_v5 = vpack.c.bf16 %v4471_v4, %v4470_v61  ;;  %v4150_v6 = vadd.f32 %v22079_v27, %v19503_v50 }
 0x25e   : > { %v4141_v9 = vpop.f32.mrf.mxu0 }
 0x25f   : > { %v4568_v19 = vpack.c.bf16 %v4469_v0, %v4468_v10  ;;  %v4142_v62 = vadd.f32 %v22079_v27, %v4141_v9  ;;  %v4474_v11 = vmax.f32 %v4150_v6, 0.0  ;;  %v22100_v10 = vpop.xlane.xlu0 %5789 }
 0x260   : > { %v19504_v3 = vpop.f32.mrf.mxu0  ;;  %27485 = vst [vmem:[#allocation27_spill] sm:$0xff] %v22100_v10 }
 0x261   : > { %v4153_v20 = vadd.f32 %v22079_v27, %v19504_v3  ;;  %19627 = vmatprep.mubr.msk.bf16.mxu1 %vm4619_vm1, %v4568_v19  ;;  %v4472_v25 = vmax.f32 %v4142_v62, 0.0 }
 0x262   : > { %v4144_v17 = vpop.f32.mrf.mxu0  ;;  %19628 = vmatmul.mubr.msk.bf16.gmra.mxu1 %vm4619_vm1, %v4569_v5 }
 0x263   : > { %v4145_v24 = vadd.f32 %v22079_v27, %v4144_v17  ;;  %v4475_v7 = vmax.f32 %v4153_v20, 0.0 }
 0x264   : > { %v19507_v57 = vpop.f32.mrf.mxu0 }
 0x265   : > { %v4473_v38 = vmax.f32 %v4145_v24, 0.0  ;;  %v4571_v40 = vpack.c.bf16 %v4475_v7, %v4474_v11  ;;  %v4166_v0 = vadd.f32 %v22079_v27, %v19507_v57  ;;  %v22105_v24 = vpop.xlane.xlu0 %5795 }
 0x266   : > { %v4157_v8 = vpop.f32.mrf.mxu0  ;;  %27486 = vst [vmem:[#allocation28_spill] sm:$0xff] %v22105_v24 }
 0x267   : > { %v4570_v52 = vpack.c.bf16 %v4473_v38, %v4472_v25  ;;  %v4158_v4 = vadd.f32 %v22079_v27, %v4157_v8  ;;  %v4478_v20 = vmax.f32 %v4166_v0, 0.0  ;;  %v22113_v0 = vpop.xlane.xlu1 %5714 }
 0x268   : > { %v19508_v33 = vpop.f32.mrf.mxu0  ;;  %27487 = vst [vmem:[#allocation29_spill] sm:$0xff] %v22113_v0 }
 0x269   : > { %v4169_v50 = vadd.f32 %v22079_v27, %v19508_v33  ;;  %19631 = vmatprep.mubr.msk.bf16.mxu1 %vm4619_vm1, %v4570_v52  ;;  %v4476_v3 = vmax.f32 %v4158_v4, 0.0 }
 0x26a   : > { %v4160_v61 = vpop.f32.mrf.mxu0  ;;  %19632 = vmatmul.mubr.msk.bf16.gmra.mxu1 %vm4619_vm1, %v4571_v40 }
 0x26b   : > { %v4161_v9 = vadd.f32 %v22079_v27, %v4160_v61  ;;  %v4479_v19 = vmax.f32 %v4169_v50, 0.0  ;;  %v22115_v61 = vpop.xlane.xlu0 %5801 }
 0x26c   : > { %v19511_v5 = vpop.f32.mrf.mxu0  ;;  %27488 = vst [vmem:[#allocation30_spill] sm:$0xff] %v22115_v61 }
 0x26d   : > { %v4477_v62 = vmax.f32 %v4161_v9, 0.0  ;;  %v4573_v7 = vpack.c.bf16 %v4479_v19, %v4478_v20  ;;  %v4182_v11 = vadd.f32 %v22079_v27, %v19511_v5 }
 0x26e   : > { %v4173_v6 = vpop.f32.mrf.mxu0 }
 0x26f   : > { %v4572_v17 = vpack.c.bf16 %v4477_v62, %v4476_v3  ;;  %v4174_v38 = vadd.f32 %v22079_v27, %v4173_v6  ;;  %v4482_v9 = vmax.f32 %v4182_v11, 0.0 }
 0x270   : > { %v19512_v25 = vpop.f32.mrf.mxu0 }
 0x271   : > { %v4185_v57 = vadd.f32 %v22079_v27, %v19512_v25  ;;  %19635 = vmatprep.mubr.msk.bf16.mxu1 %vm4619_vm1, %v4572_v17  ;;  %v4480_v4 = vmax.f32 %v4174_v38, 0.0  ;;  %v22123_v38 = vpop.xlane.xlu1 %5720 }
 0x272   : > { %v4176_v8 = vpop.f32.mrf.mxu0  ;;  %19636 = vmatmul.mubr.msk.bf16.gmra.mxu1 %vm4619_vm1, %v4573_v7  ;;  %27489 = vst [vmem:[#allocation31_spill] sm:$0xff] %v22123_v38 }
 0x273   : > { %v4177_v52 = vadd.f32 %v22079_v27, %v4176_v8  ;;  %v4483_v40 = vmax.f32 %v4185_v57, 0.0  ;;  %v22125_v57 = vpop.xlane.xlu0 %5807 }
 0x274   : > { %v19515_v33 = vpop.f32.mrf.mxu0  ;;  %27490 = vst [vmem:[#allocation32_spill] sm:$0xff] %v22125_v57 }
 0x275   : > { %v4481_v50 = vmax.f32 %v4177_v52, 0.0  ;;  %v4575_v62 = vpack.c.bf16 %v4483_v40, %v4482_v9  ;;  %v4198_v17 = vadd.f32 %v22079_v27, %v19515_v33 }
 0x276   : > { %v4189_v19 = vpop.f32.mrf.mxu0 }
 0x277   : > { %v4574_v3 = vpack.c.bf16 %v4481_v50, %v4480_v4  ;;  %v4190_v5 = vadd.f32 %v22079_v27, %v4189_v19  ;;  %v4486_v4 = vmax.f32 %v4198_v17, 0.0 }
 0x278   : > { %v19516_v20 = vpop.f32.mrf.mxu0 }
 0x279   : > { %v4201_v6 = vadd.f32 %v22079_v27, %v19516_v20  ;;  %19639 = vmatprep.mubr.msk.bf16.mxu1 %vm4619_vm1, %v4574_v3  ;;  %v4484_v52 = vmax.f32 %v4190_v5, 0.0 }
 0x27a   : > { %v4192_v7 = vpop.f32.mrf.mxu0  ;;  %19640 = vmatmul.mubr.msk.bf16.gmra.mxu1 %vm4619_vm1, %v4575_v62  ;;  %v22130_v62 = vpop.xlane.xlu1 %5726 }
 0x27b   : > { %v4193_v25 = vadd.f32 %v22079_v27, %v4192_v7  ;;  %v4487_v11 = vmax.f32 %v4201_v6, 0.0  ;;  %27491 = vst [vmem:[#allocation33_spill] sm:$0xff] %v22130_v62  ;;  %v22132_v7 = vpop.xlane.xlu0 %5813 }
 0x27c   : > { %v19519_v8 = vpop.f32.mrf.mxu0  ;;  %27492 = vst [vmem:[#allocation34_spill] sm:$0xff] %v22132_v7 }
 0x27d   : > { %v4485_v40 = vmax.f32 %v4193_v25, 0.0  ;;  %v4577_v19 = vpack.c.bf16 %v4487_v11, %v4486_v4  ;;  %v4214_v6 = vadd.f32 %v22079_v27, %v19519_v8 }
 0x27e   : > { %v4205_v50 = vpop.f32.mrf.mxu0 }
 0x27f   : > { %v4576_v9 = vpack.c.bf16 %v4485_v40, %v4484_v52  ;;  %v4206_v33 = vadd.f32 %v22079_v27, %v4205_v50  ;;  %v4490_v40 = vmax.f32 %v4214_v6, 0.0 }
 0x280   : > { %v19520_v3 = vpop.f32.mrf.mxu0 }
 0x281   : > { %v4217_v20 = vadd.f32 %v22079_v27, %v19520_v3  ;;  %19643 = vmatprep.mubr.msk.bf16.mxu1 %vm4619_vm1, %v4576_v9  ;;  %v4488_v11 = vmax.f32 %v4206_v33, 0.0  ;;  %v22137_v3 = vpop.xlane.xlu1 %5732  ;;  %v22139_v9 = vpop.xlane.xlu0 %5819 }
 0x282   : > { %v4208_v61 = vpop.f32.mrf.mxu0  ;;  %19644 = vmatmul.mubr.msk.bf16.gmra.mxu1 %vm4619_vm1, %v4577_v19  ;;  %27493 = vst [vmem:[#allocation35_spill] sm:$0xff] %v22137_v3  ;;  %27494 = vst [vmem:[#allocation36_spill] sm:$0xff] %v22139_v9 }
 0x283   : > { %v4209_v5 = vadd.f32 %v22079_v27, %v4208_v61  ;;  %v4491_v17 = vmax.f32 %v4217_v20, 0.0 }
 0x284   : > { %v19523_v25 = vpop.f32.mrf.mxu0 }
 0x285   : > { %v4489_v52 = vmax.f32 %v4209_v5, 0.0  ;;  %v4579_v57 = vpack.c.bf16 %v4491_v17, %v4490_v40  ;;  %v4230_v61 = vadd.f32 %v22079_v27, %v19523_v25  ;;  %v22149_v17 = vpop.xlane.xlu0 %5825 }
 0x286   : > { %v4221_v4 = vpop.f32.mrf.mxu0  ;;  %27496 = vst [vmem:[#allocation38_spill] sm:$0xff] %v22149_v17 }
 0x287   : > { %v4578_v50 = vpack.c.bf16 %v4489_v52, %v4488_v11  ;;  %v4222_v8 = vadd.f32 %v22079_v27, %v4221_v4  ;;  %v22147_v52 = vpop.xlane.xlu1 %5738  ;;  %v4494_v40 = vmax.f32 %v4230_v61, 0.0 }
 0x288   : > { %v19524_v7 = vpop.f32.mrf.mxu0  ;;  %27495 = vst [vmem:[#allocation37_spill] sm:$0xff] %v22147_v52 }
 0x289   : > { %v4233_v10 = vadd.f32 %v22079_v27, %v19524_v7  ;;  %19647 = vmatprep.mubr.msk.bf16.mxu1 %vm4619_vm1, %v4578_v50  ;;  %v4492_v5 = vmax.f32 %v4222_v8, 0.0  ;;  %v22159_v61 = vpop.xlane.xlu0 %5831 }
 0x28a   : > { %v4224_v19 = vpop.f32.mrf.mxu0  ;;  %19648 = vmatmul.mubr.msk.bf16.gmra.mxu1 %vm4619_vm1, %v4579_v57  ;;  %27498 = vst [vmem:[#allocation40_spill] sm:$0xff] %v22159_v61 }
 0x28b   : > { %v4225_v33 = vadd.f32 %v22079_v27, %v4224_v19  ;;  %v4495_v20 = vmax.f32 %v4233_v10, 0.0  ;;  %v22157_v19 = vpop.xlane.xlu1 %5744 }
 0x28c   : > { %v19527_v6 = vpop.f32.mrf.mxu0  ;;  %27497 = vst [vmem:[#allocation39_spill] sm:$0xff] %v22157_v19 }
 0x28d   : > { %v4493_v11 = vmax.f32 %v4225_v33, 0.0  ;;  %v4581_v9 = vpack.c.bf16 %v4495_v20, %v4494_v40  ;;  %v4246_v10 = vadd.f32 %v22079_v27, %v19527_v6 }
 0x28e   : > { %v4237_v4 = vpop.f32.mrf.mxu0 }
 0x28f   : > { %v4580_v7 = vpack.c.bf16 %v4493_v11, %v4492_v5  ;;  %v4238_v25 = vadd.f32 %v22079_v27, %v4237_v4  ;;  %v4498_v40 = vmax.f32 %v4246_v10, 0.0 }
 0x290   : > { %v19528_v50 = vpop.f32.mrf.mxu0 }
 0x291   : > { %v4249_v24 = vadd.f32 %v22079_v27, %v19528_v50  ;;  %19651 = vmatprep.mubr.msk.bf16.mxu1 %vm4619_vm1, %v4580_v7  ;;  %v4496_v5 = vmax.f32 %v4238_v25, 0.0 }
 0x292   : > { %v4240_v57 = vpop.f32.mrf.mxu0  ;;  %19652 = vmatmul.mubr.msk.bf16.gmra.mxu1 %vm4619_vm1, %v4581_v9  ;;  %v22164_v9 = vpop.xlane.xlu1 %5750 }
 0x293   : > { %v4241_v8 = vadd.f32 %v22079_v27, %v4240_v57  ;;  %v4499_v33 = vmax.f32 %v4249_v24, 0.0  ;;  %27499 = vst [vmem:[#allocation41_spill] sm:$0xff] %v22164_v9  ;;  %v22166_v57 = vpop.xlane.xlu0 %5837 }
 0x294   : > { %v19531_v20 = vpop.f32.mrf.mxu0  ;;  %27500 = vst [vmem:[#allocation42_spill] sm:$0xff] %v22166_v57 }
 0x295   : > { %v4497_v11 = vmax.f32 %v4241_v8, 0.0  ;;  %v4583_v17 = vpack.c.bf16 %v4499_v33, %v4498_v40  ;;  %v4262_v24 = vadd.f32 %v22079_v27, %v19531_v20 }
 0x296   : > { %v4253_v4 = vpop.f32.mrf.mxu0 }
 0x297   : > { %v4582_v50 = vpack.c.bf16 %v4497_v11, %v4496_v5  ;;  %v4254_v6 = vadd.f32 %v22079_v27, %v4253_v4  ;;  %v4502_v11 = vmax.f32 %v4262_v24, 0.0 }
 0x298   : > { %v19532_v7 = vpop.f32.mrf.mxu0 }
 0x299   : > { %v4265_v47 = vadd.f32 %v22079_v27, %v19532_v7  ;;  %19655 = vmatprep.mubr.msk.bf16.mxu1 %vm4619_vm1, %v4582_v50  ;;  %v4500_v33 = vmax.f32 %v4254_v6, 0.0  ;;  %v22171_v7 = vpop.xlane.xlu1 %5756  ;;  %v22173_v50 = vpop.xlane.xlu0 %5843 }
 0x29a   : > { %v4256_v61 = vpop.f32.mrf.mxu0  ;;  %19656 = vmatmul.mubr.msk.bf16.gmra.mxu1 %vm4619_vm1, %v4583_v17  ;;  %27501 = vst [vmem:[#allocation43_spill] sm:$0xff] %v22171_v7  ;;  %27502 = vst [vmem:[#allocation44_spill] sm:$0xff] %v22173_v50 }
 0x29b   : > { %v4257_v25 = vadd.f32 %v22079_v27, %v4256_v61  ;;  %v4503_v10 = vmax.f32 %v4265_v47, 0.0 }
 0x29c   : > { %v19535_v8 = vpop.f32.mrf.mxu0 }
 0x29d   : > { %v4501_v5 = vmax.f32 %v4257_v25, 0.0  ;;  %v4585_v36 = vpack.c.bf16 %v4503_v10, %v4502_v11  ;;  %v4278_v47 = vadd.f32 %v22079_v27, %v19535_v8  ;;  %v22183_v10 = vpop.xlane.xlu0 %5849 }
 0x29e   : > { %v4269_v40 = vpop.f32.mrf.mxu0  ;;  %27504 = vst [vmem:[#allocation46_spill] sm:$0xff] %v22183_v10 }
 0x29f   : > { %v4584_v4 = vpack.c.bf16 %v4501_v5, %v4500_v33  ;;  %v4270_v20 = vadd.f32 %v22079_v27, %v4269_v40  ;;  %v22181_v5 = vpop.xlane.xlu1 %5762  ;;  %v4506_v11 = vmax.f32 %v4278_v47, 0.0 }
 0x2a0   : > { %v19536_v57 = vpop.f32.mrf.mxu0  ;;  %27503 = vst [vmem:[#allocation45_spill] sm:$0xff] %v22181_v5 }
 0x2a1   : > { %v4281_v37 = vadd.f32 %v22079_v27, %v19536_v57  ;;  %19659 = vmatprep.mubr.msk.bf16.mxu1 %vm4619_vm1, %v4584_v4  ;;  %v4504_v25 = vmax.f32 %v4270_v20, 0.0  ;;  %v22193_v47 = vpop.xlane.xlu0 %5855 }
 0x2a2   : > { %v4272_v17 = vpop.f32.mrf.mxu0  ;;  %19660 = vmatmul.mubr.msk.bf16.gmra.mxu1 %vm4619_vm1, %v4585_v36  ;;  %27506 = vst [vmem:[#allocation48_spill] sm:$0xff] %v22193_v47 }
 0x2a3   : > { %v4273_v61 = vadd.f32 %v22079_v27, %v4272_v17  ;;  %v4507_v6 = vmax.f32 %v4281_v37, 0.0  ;;  %v22190_v20 = vpop.xlane.xlu1 %5768 }
 0x2a4   : > { %v19539_v24 = vpop.f32.mrf.mxu0  ;;  %27505 = vst [vmem:[#allocation47_spill] sm:$0xff] %v22190_v20 }
 0x2a5   : > { %v4505_v33 = vmax.f32 %v4273_v61, 0.0  ;;  %v4587_v50 = vpack.c.bf16 %v4507_v6, %v4506_v11  ;;  %v4294_v37 = vadd.f32 %v22079_v27, %v19539_v24  ;;  %v22198_v24 = vld [vmem:[%s27334_s10] ss:$0 sm:$0xff] }
 0x2a6   : > { %v4285_v40 = vpop.f32.mrf.mxu0 }
 0x2a7   : > { %v4586_v57 = vpack.c.bf16 %v4505_v33, %v4504_v25  ;;  %v4286_v8 = vadd.f32 %v22079_v27, %v4285_v40  ;;  %v4510_v11 = vmax.f32 %v4294_v37, 0.0 }
 0x2a8   : > { %v19540_v4 = vpop.f32.mrf.mxu0 }
 0x2a9   : > { %v4297_v58 = vadd.f32 %v22079_v27, %v19540_v4  ;;  %19663 = vmatprep.mubr.msk.bf16.mxu1 %vm4619_vm1, %v4586_v57  ;;  %v4508_v25 = vmax.f32 %v4286_v8, 0.0 }
 0x2aa   : > { %v4288_v36 = vpop.f32.mrf.mxu0  ;;  %19664 = vmatmul.mubr.msk.bf16.gmra.mxu1 %vm4619_vm1, %v4587_v50  ;;  %v22200_v50 = vpop.xlane.xlu1 %5774 }
 0x2ab   : > { %v4289_v17 = vadd.f32 %v22079_v27, %v4288_v36  ;;  %v4511_v61 = vmax.f32 %v4297_v58, 0.0  ;;  %27507 = vst [vmem:[#allocation49_spill] sm:$0xff] %v22200_v50  ;;  %v22205_v58 = vpop.xlane.xlu0 %5861 }
 0x2ac   : > { %v19543_v6 = vpop.f32.mrf.mxu0  ;;  %27508 = vst [vmem:[#allocation50_spill] sm:$0xff] %v22205_v58 }
 0x2ad   : > { %v4509_v33 = vmax.f32 %v4289_v17, 0.0  ;;  %v4589_v10 = vpack.c.bf16 %v4511_v61, %v4510_v11  ;;  %v4310_v8 = vadd.f32 %v22079_v27, %v19543_v6  ;;  %v22214_v11 = vld [vmem:[%s27336_s12] ss:$0 sm:$0xff] }
 0x2ae   : > { %v4301_v40 = vpop.f32.mrf.mxu0 }
 0x2af   : > { %v4588_v4 = vpack.c.bf16 %v4509_v33, %v4508_v25  ;;  %v4302_v36 = vadd.f32 %v22079_v27, %v4301_v40  ;;  %v4514_v6 = vmax.f32 %v4310_v8, 0.0  ;;  %v22220_v13 = vpop.xlane.xlu0 %5867 }
 0x2b0   : > { %v19544_v57 = vpop.f32.mrf.mxu0  ;;  %27510 = vst [vmem:[#allocation52_spill] sm:$0xff] %v22220_v13 }
 0x2b1   : > { %v4313_v47 = vadd.f32 %v22079_v27, %v19544_v57  ;;  %19667 = vmatprep.mubr.msk.bf16.mxu1 %vm4619_vm1, %v4588_v4  ;;  %v4512_v57 = vmax.f32 %v4302_v36, 0.0 }
 0x2b2   : > { %v4304_v37 = vpop.f32.mrf.mxu0  ;;  %v19573_v17 = vpop.f32.mrf.mxu1  ;;  %19668 = vmatmul.mubr.msk.bf16.gmra.mxu1 %vm4619_vm1, %v4589_v10 }
 0x2b3   : > { %v4305_v61 = vadd.f32 %v22079_v27, %v4304_v37  ;;  %v4855_v25 = vadd.f32 %v19573_v17, %v22198_v24  ;;  %v4515_v33 = vmax.f32 %v4313_v47, 0.0  ;;  %v22217_v37 = vpop.xlane.xlu1 %5780  ;;  %v22237_v9 = vpop.xlane.xlu0 %5873 }
 0x2b4   : > { %v19547_v40 = vpop.f32.mrf.mxu0  ;;  %v4846_v4 = vpop.f32.mrf.mxu1  ;;  %27509 = vst [vmem:[#allocation51_spill] sm:$0xff] %v22217_v37  ;;  %27512 = vst [vmem:[#allocation54_spill] sm:$0xff] %v22237_v9 }
 0x2b5   : > { %v4513_v58 = vmax.f32 %v4305_v61, 0.0  ;;  %v5359_v20 = vmax.f32 %v4855_v25, 0.0  ;;  %v4847_v50 = vadd.f32 %v22198_v24, %v4846_v4  ;;  %v4591_v5 = vpack.c.bf16 %v4515_v33, %v4514_v6 }
 0x2b6   : > { %v4317_v7 = vpop.f32.mrf.mxu0  ;;  %v19574_v10 = vpop.f32.mrf.mxu1 }
 0x2b7   : > { %v4590_v17 = vpack.c.bf16 %v4513_v58, %v4512_v57  ;;  %v6013_v47 = vmul.f32 %v22214_v11, %v5359_v20  ;;  %v5357_v55 = vmax.f32 %v4847_v50, 0.0  ;;  %v4858_v19 = vadd.f32 %v19574_v10, %v22198_v24  ;;  %v22234_v37 = vpop.xlane.xlu1 %5786 }
 0x2b8   : > { %v19548_v36 = vpop.f32.mrf.mxu0  ;;  %v4849_v61 = vpop.f32.mrf.mxu1  ;;  %v4318_v8 = vadd.f32 %v22079_v27, %v4317_v7  ;;  %v4326_v20 = vadd.f32 %v22079_v27, %v19547_v40  ;;  %27511 = vst [vmem:[#allocation53_spill] sm:$0xff] %v22234_v37 }
 0x2b9   : > { %v4329_v25 = vadd.f32 %v22079_v27, %v19548_v36  ;;  %v4850_v4 = vadd.f32 %v22198_v24, %v4849_v61  ;;  %19671 = vmatprep.mubr.msk.bf16.mxu1 %vm4619_vm1, %v4590_v17  ;;  %v6146_v58 = vsel %vm6139_vm2, %v6013_v47, 0.0  ;;  %v6011_v57 = vmul.f32 %v22214_v11, %v5357_v55 }
 0x2ba   : > { %v5360_v33 = vmax.f32 %v4858_v19, 0.0  ;;  %v4320_v50 = vpop.f32.mrf.mxu0  ;;  %v19577_v6 = vpop.f32.mrf.mxu1  ;;  %19672 = vmatmul.mubr.msk.bf16.gmra.mxu1 %vm4619_vm1, %v4591_v5  ;;  %6147 = vadd.xlane.f32.xlu0 %v6146_v58  ;;  %v4516_v40 = vmax.f32 %v4318_v8, 0.0  ;;  %v4518_v5 = vmax.f32 %v4326_v20, 0.0 }
 0x2bb   : > { %v5358_v10 = vmax.f32 %v4850_v4, 0.0  ;;  %v4321_v7 = vadd.f32 %v22079_v27, %v4320_v50  ;;  %v4871_v36 = vadd.f32 %v19577_v6, %v22198_v24  ;;  %v4519_v17 = vmax.f32 %v4329_v25, 0.0 }
 0x2bc   : > { %v6014_v61 = vmul.f32 %v22214_v11, %v5360_v33  ;;  %v19551_v13 = vpop.f32.mrf.mxu0  ;;  %v4862_v47 = vpop.f32.mrf.mxu1  ;;  %v6140_v63 = vsel %vm6139_vm2, %v6011_v57, 0.0 }
 0x2bd   : > { %v4517_v55 = vmax.f32 %v4321_v7, 0.0  ;;  %v5363_v19 = vmax.f32 %v4871_v36, 0.0  ;;  %v4863_v4 = vadd.f32 %v22198_v24, %v4862_v47  ;;  %v6012_v25 = vmul.f32 %v22214_v11, %v5358_v10 }
 0x2be   : > { %v4333_v58 = vpop.f32.mrf.mxu0  ;;  %v19578_v50 = vpop.f32.mrf.mxu1  ;;  %v6149_v6 = vsel %vm6139_vm2, %v6014_v61, 0.0  ;;  %6141 = vadd.xlane.f32.xlu0 %v6140_v63  ;;  %v4593_v8 = vpack.c.bf16 %v4519_v17, %v4518_v5  ;;  %v4342_v10 = vadd.f32 %v22079_v27, %v19551_v13 }
 0x2bf   : > { %v4592_v33 = vpack.c.bf16 %v4517_v55, %v4516_v40  ;;  %v6017_v37 = vmul.f32 %v22214_v11, %v5363_v19  ;;  %6150 = vadd.xlane.f32.xlu1 %v6149_v6  ;;  %v5361_v7 = vmax.f32 %v4863_v4, 0.0  ;;  %v4874_v57 = vadd.f32 %v19578_v50, %v22198_v24  ;;  %v22253_v5 = vpop.xlane.xlu1 %5792 }
 0x2c0   : > { %v19552_v36 = vpop.f32.mrf.mxu0  ;;  %v4865_v9 = vpop.f32.mrf.mxu1  ;;  %v4334_v20 = vadd.f32 %v22079_v27, %v4333_v58  ;;  %v6143_v19 = vsel %vm6139_vm2, %v6012_v25, 0.0  ;;  %27513 = vst [vmem:[#allocation55_spill] sm:$0xff] %v22253_v5 }
 0x2c1   : > { %v4345_v47 = vadd.f32 %v22079_v27, %v19552_v36  ;;  %v4866_v14 = vadd.f32 %v22198_v24, %v4865_v9  ;;  %19675 = vmatprep.mubr.msk.bf16.mxu1 %vm4619_vm1, %v4592_v33  ;;  %v6158_v63 = vsel %vm6139_vm2, %v6017_v37, 0.0  ;;  %v6015_v61 = vmul.f32 %v22214_v11, %v5361_v7  ;;  %v22257_v37 = vpop.xlane.xlu0 %5879 }
 0x2c2   : > { %v5364_v17 = vmax.f32 %v4874_v57, 0.0  ;;  %v4336_v40 = vpop.f32.mrf.mxu0  ;;  %v19581_v55 = vpop.f32.mrf.mxu1  ;;  %19676 = vmatmul.mubr.msk.bf16.gmra.mxu1 %vm4619_vm1, %v4593_v8  ;;  %6159 = vadd.xlane.f32.xlu0 %v6158_v63  ;;  %27514 = vst [vmem:[#allocation56_spill] sm:$0xff] %v22257_v37  ;;  %v4520_v7 = vmax.f32 %v4334_v20, 0.0  ;;  %v4522_v36 = vmax.f32 %v4342_v10, 0.0 }
 0x2c3   : > { %v5362_v4 = vmax.f32 %v4866_v14, 0.0  ;;  %v4337_v9 = vadd.f32 %v22079_v27, %v4336_v40  ;;  %v4887_v58 = vadd.f32 %v19581_v55, %v22198_v24  ;;  %6144 = vadd.xlane.f32.xlu1 %v6143_v19  ;;  %v4523_v50 = vmax.f32 %v4345_v47, 0.0  ;;  %v22266_v10 = vpop.xlane.xlu1 %5798 }
 0x2c4   : > { %v6018_v13 = vmul.f32 %v22214_v11, %v5364_v17  ;;  %v19555_v6 = vpop.f32.mrf.mxu0  ;;  %v4878_v33 = vpop.f32.mrf.mxu1  ;;  %v6152_v25 = vsel %vm6139_vm2, %v6015_v61, 0.0  ;;  %27515 = vst [vmem:[#allocation57_spill] sm:$0xff] %v22266_v10 }
 0x2c5   : > { %v4521_v8 = vmax.f32 %v4337_v9, 0.0  ;;  %v5367_v57 = vmax.f32 %v4887_v58, 0.0  ;;  %v4879_v14 = vadd.f32 %v22198_v24, %v4878_v33  ;;  %v6016_v19 = vmul.f32 %v22214_v11, %v5362_v4 }
 0x2c6   : > { %v4349_v63 = vpop.f32.mrf.mxu0  ;;  %v19582_v40 = vpop.f32.mrf.mxu1  ;;  %v6161_v55 = vsel %vm6139_vm2, %v6018_v13, 0.0  ;;  %6153 = vadd.xlane.f32.xlu0 %v6152_v25  ;;  %v4595_v17 = vpack.c.bf16 %v4523_v50, %v4522_v36  ;;  %v4358_v50 = vadd.f32 %v22079_v27, %v19555_v6 }
 0x2c7   : > { %v4594_v37 = vpack.c.bf16 %v4521_v8, %v4520_v7  ;;  %v6021_v47 = vmul.f32 %v22214_v11, %v5367_v57  ;;  %6162 = vadd.xlane.f32.xlu1 %v6161_v55  ;;  %v5365_v20 = vmax.f32 %v4879_v14, 0.0  ;;  %v4890_v9 = vadd.f32 %v19582_v40, %v22198_v24  ;;  %v22273_v7 = vpop.xlane.xlu0 %5885 }
 0x2c8   : > { %v19556_v58 = vpop.f32.mrf.mxu0  ;;  %v4881_v61 = vpop.f32.mrf.mxu1  ;;  %v4350_v33 = vadd.f32 %v22079_v27, %v4349_v63  ;;  %27516 = vst [vmem:[#allocation58_spill] sm:$0xff] %v22273_v7  ;;  %v6155_v14 = vsel %vm6139_vm2, %v6016_v19, 0.0 }
 0x2c9   : > { %v4361_v5 = vadd.f32 %v22079_v27, %v19556_v58  ;;  %v4882_v13 = vadd.f32 %v22198_v24, %v4881_v61  ;;  %19679 = vmatprep.mubr.msk.bf16.mxu1 %vm4619_vm1, %v4594_v37  ;;  %v6170_v4 = vsel %vm6139_vm2, %v6021_v47, 0.0  ;;  %v6019_v8 = vmul.f32 %v22214_v11, %v5365_v20 }
 0x2ca   : > { %v5368_v57 = vmax.f32 %v4890_v9, 0.0  ;;  %v4352_v25 = vpop.f32.mrf.mxu0  ;;  %v19585_v36 = vpop.f32.mrf.mxu1  ;;  %19680 = vmatmul.mubr.msk.bf16.gmra.mxu1 %vm4619_vm1, %v4595_v17  ;;  %6171 = vadd.xlane.f32.xlu0 %v6170_v4  ;;  %v4524_v20 = vmax.f32 %v4350_v33, 0.0  ;;  %v4526_v17 = vmax.f32 %v4358_v50, 0.0 }
 0x2cb   : > { %v5366_v63 = vmax.f32 %v4882_v13, 0.0  ;;  %v4353_v40 = vadd.f32 %v22079_v27, %v4352_v25  ;;  %v4903_v37 = vadd.f32 %v19585_v36, %v22198_v24  ;;  %6156 = vadd.xlane.f32.xlu1 %v6155_v14  ;;  %v4527_v47 = vmax.f32 %v4361_v5, 0.0  ;;  %v22286_v14 = vpop.xlane.xlu1 %5804  ;;  %v22289_v33 = vpop.xlane.xlu0 %5891 }
 0x2cc   : > { %v6022_v55 = vmul.f32 %v22214_v11, %v5368_v57  ;;  %v19559_v6 = vpop.f32.mrf.mxu0  ;;  %v4894_v58 = vpop.f32.mrf.mxu1  ;;  %v6164_v7 = vsel %vm6139_vm2, %v6019_v8, 0.0  ;;  %27517 = vst [vmem:[#allocation59_spill] sm:$0xff] %v22286_v14  ;;  %27518 = vst [vmem:[#allocation60_spill] sm:$0xff] %v22289_v33 }
 0x2cd   : > { %v4525_v9 = vmax.f32 %v4353_v40, 0.0  ;;  %v5371_v61 = vmax.f32 %v4903_v37, 0.0  ;;  %v4895_v19 = vadd.f32 %v22198_v24, %v4894_v58  ;;  %v6020_v36 = vmul.f32 %v22214_v11, %v5366_v63 }
 0x2ce   : > { %v4365_v4 = vpop.f32.mrf.mxu0  ;;  %v19586_v13 = vpop.f32.mrf.mxu1  ;;  %v6173_v25 = vsel %vm6139_vm2, %v6022_v55, 0.0  ;;  %6165 = vadd.xlane.f32.xlu0 %v6164_v7  ;;  %v4597_v40 = vpack.c.bf16 %v4527_v47, %v4526_v17 }
 0x2cf   : > { %v4596_v5 = vpack.c.bf16 %v4525_v9, %v4524_v20  ;;  %v6025_v57 = vmul.f32 %v22214_v11, %v5371_v61  ;;  %6174 = vadd.xlane.f32.xlu1 %v6173_v25  ;;  %v5369_v8 = vmax.f32 %v4895_v19, 0.0  ;;  %v4906_v50 = vadd.f32 %v19586_v13, %v22198_v24 }
 0x2d0   : > { %v19560_v37 = vpop.f32.mrf.mxu0  ;;  %v4897_v58 = vpop.f32.mrf.mxu1  ;;  %v4366_v10 = vadd.f32 %v22079_v27, %v4365_v4  ;;  %v4374_v20 = vadd.f32 %v22079_v27, %v19559_v6  ;;  %v6167_v19 = vsel %vm6139_vm2, %v6020_v36, 0.0 }
 0x2d1   : > { %v4377_v7 = vadd.f32 %v22079_v27, %v19560_v37  ;;  %v4898_v63 = vadd.f32 %v22198_v24, %v4897_v58  ;;  %19683 = vmatprep.mubr.msk.bf16.mxu1 %vm4619_vm1, %v4596_v5  ;;  %v6182_v55 = vsel %vm6139_vm2, %v6025_v57, 0.0  ;;  %v6023_v9 = vmul.f32 %v22214_v11, %v5369_v8  ;;  %v22304_v8 = vpop.xlane.xlu1 %5810  ;;  %v22307_v36 = vpop.xlane.xlu0 %5897 }
 0x2d2   : > { %v5372_v47 = vmax.f32 %v4906_v50, 0.0  ;;  %v4368_v61 = vpop.f32.mrf.mxu0  ;;  %v19589_v17 = vpop.f32.mrf.mxu1  ;;  %19684 = vmatmul.mubr.msk.bf16.gmra.mxu1 %vm4619_vm1, %v4597_v40  ;;  %6183 = vadd.xlane.f32.xlu0 %v6182_v55  ;;  %27519 = vst [vmem:[#allocation61_spill] sm:$0xff] %v22304_v8  ;;  %v4528_v50 = vmax.f32 %v4366_v10, 0.0  ;;  %27520 = vst [vmem:[#allocation62_spill] sm:$0xff] %v22307_v36 }
 0x2d3   : > { %v5370_v4 = vmax.f32 %v4898_v63, 0.0  ;;  %v4369_v13 = vadd.f32 %v22079_v27, %v4368_v61  ;;  %v4919_v25 = vadd.f32 %v19589_v17, %v22198_v24  ;;  %6168 = vadd.xlane.f32.xlu1 %v6167_v19  ;;  %v4531_v57 = vmax.f32 %v4377_v7, 0.0 }
 0x2d4   : > { %v6026_v5 = vmul.f32 %v22214_v11, %v5372_v47  ;;  %v19563_v6 = vpop.f32.mrf.mxu0  ;;  %v4910_v37 = vpop.f32.mrf.mxu1  ;;  %v6176_v40 = vsel %vm6139_vm2, %v6023_v9, 0.0  ;;  %v4530_v63 = vmax.f32 %v4374_v20, 0.0 }
 0x2d5   : > { %v4529_v58 = vmax.f32 %v4369_v13, 0.0  ;;  %v5375_v33 = vmax.f32 %v4919_v25, 0.0  ;;  %v4911_v55 = vadd.f32 %v22198_v24, %v4910_v37  ;;  %v6024_v7 = vmul.f32 %v22214_v11, %v5370_v4 }
 0x2d6   : > { %v4381_v61 = vpop.f32.mrf.mxu0  ;;  %v19590_v17 = vpop.f32.mrf.mxu1  ;;  %v6185_v19 = vsel %vm6139_vm2, %v6026_v5, 0.0  ;;  %6177 = vadd.xlane.f32.xlu0 %v6176_v40  ;;  %v4599_v10 = vpack.c.bf16 %v4531_v57, %v4530_v63  ;;  %v4390_v5 = vadd.f32 %v22079_v27, %v19563_v6 }
 0x2d7   : > { %v4598_v47 = vpack.c.bf16 %v4529_v58, %v4528_v50  ;;  %v6029_v14 = vmul.f32 %v22214_v11, %v5375_v33  ;;  %6186 = vadd.xlane.f32.xlu1 %v6185_v19  ;;  %v5373_v13 = vmax.f32 %v4911_v55, 0.0  ;;  %v4922_v9 = vadd.f32 %v19590_v17, %v22198_v24  ;;  %v22323_v63 = vpop.xlane.xlu1 %5816 }
 0x2d8   : > { %v19564_v25 = vpop.f32.mrf.mxu0  ;;  %v4913_v36 = vpop.f32.mrf.mxu1  ;;  %v4382_v20 = vadd.f32 %v22079_v27, %v4381_v61  ;;  %v6179_v40 = vsel %vm6139_vm2, %v6024_v7, 0.0  ;;  %27521 = vst [vmem:[#allocation63_spill] sm:$0xff] %v22323_v63 }
 0x2d9   : > { %v4393_v37 = vadd.f32 %v22079_v27, %v19564_v25  ;;  %v4914_v8 = vadd.f32 %v22198_v24, %v4913_v36  ;;  %19687 = vmatprep.mubr.msk.bf16.mxu1 %vm4619_vm1, %v4598_v47  ;;  %v6194_v4 = vsel %vm6139_vm2, %v6029_v14, 0.0  ;;  %v6027_v33 = vmul.f32 %v22214_v11, %v5373_v13  ;;  %v22327_v14 = vpop.xlane.xlu0 %5903 }
 0x2da   : > { %v5376_v57 = vmax.f32 %v4922_v9, 0.0  ;;  %v4384_v50 = vpop.f32.mrf.mxu0  ;;  %v19593_v58 = vpop.f32.mrf.mxu1  ;;  %19688 = vmatmul.mubr.msk.bf16.gmra.mxu1 %vm4619_vm1, %v4599_v10  ;;  %6195 = vadd.xlane.f32.xlu0 %v6194_v4  ;;  %27522 = vst [vmem:[#allocation64_spill] sm:$0xff] %v22327_v14  ;;  %v4532_v13 = vmax.f32 %v4382_v20, 0.0  ;;  %v4534_v25 = vmax.f32 %v4390_v5, 0.0 }
 0x2db   : > { %v5374_v55 = vmax.f32 %v4914_v8, 0.0  ;;  %v4385_v36 = vadd.f32 %v22079_v27, %v4384_v50  ;;  %v4935_v61 = vadd.f32 %v19593_v58, %v22198_v24  ;;  %6180 = vadd.xlane.f32.xlu1 %v6179_v40  ;;  %v4535_v17 = vmax.f32 %v4393_v37, 0.0 }
 0x2dc   : > { %v6030_v6 = vmul.f32 %v22214_v11, %v5376_v57  ;;  %v19567_v19 = vpop.f32.mrf.mxu0  ;;  %v4926_v47 = vpop.f32.mrf.mxu1  ;;  %v6188_v7 = vsel %vm6139_vm2, %v6027_v33, 0.0 }
 0x2dd   : > { %v4533_v10 = vmax.f32 %v4385_v36, 0.0  ;;  %v5379_v9 = vmax.f32 %v4935_v61, 0.0  ;;  %v6028_v8 = vmul.f32 %v22214_v11, %v5374_v55  ;;  %v4927_v4 = vadd.f32 %v22198_v24, %v4926_v47  ;;  %v22337_v55 = vpop.xlane.xlu1 %5822 }
 0x2de   : > { %v4397_v50 = vpop.f32.mrf.mxu0  ;;  %v19594_v58 = vpop.f32.mrf.mxu1  ;;  %v6197_v40 = vsel %vm6139_vm2, %v6030_v6, 0.0  ;;  %6189 = vadd.xlane.f32.xlu0 %v6188_v7  ;;  %v4601_v20 = vpack.c.bf16 %v4535_v17, %v4534_v25  ;;  %v4406_v36 = vadd.f32 %v22079_v27, %v19567_v19  ;;  %27523 = vst [vmem:[#allocation65_spill] sm:$0xff] %v22337_v55 }
 0x2df   : > { %v4600_v14 = vpack.c.bf16 %v4533_v10, %v4532_v13  ;;  %v6033_v37 = vmul.f32 %v22214_v11, %v5379_v9  ;;  %v4938_v57 = vadd.f32 %v19594_v58, %v22198_v24  ;;  %6198 = vadd.xlane.f32.xlu1 %v6197_v40  ;;  %v5377_v33 = vmax.f32 %v4927_v4, 0.0  ;;  %v22343_v10 = vpop.xlane.xlu0 %5909 }
 0x2e0   : > { %v19568_v5 = vpop.f32.mrf.mxu0  ;;  %v4929_v61 = vpop.f32.mrf.mxu1  ;;  %v4398_v47 = vadd.f32 %v22079_v27, %v4397_v50  ;;  %27524 = vst [vmem:[#allocation66_spill] sm:$0xff] %v22343_v10  ;;  %v6191_v7 = vsel %vm6139_vm2, %v6028_v8, 0.0 }
 0x2e1   : > { %v5380_v63 = vmax.f32 %v4938_v57, 0.0  ;;  %v4409_v6 = vadd.f32 %v22079_v27, %v19568_v5  ;;  %v4930_v13 = vadd.f32 %v22198_v24, %v4929_v61  ;;  %19691 = vmatprep.mubr.msk.bf16.mxu1 %vm4619_vm1, %v4600_v14  ;;  %v6031_v17 = vmul.f32 %v22214_v11, %v5377_v33 }
 0x2e2   : > { %v4400_v9 = vpop.f32.mrf.mxu0  ;;  %v19597_v19 = vpop.f32.mrf.mxu1  ;;  %19692 = vmatmul.mubr.msk.bf16.gmra.mxu1 %vm4619_vm1, %v4601_v20  ;;  %v6206_v25 = vsel %vm6139_vm2, %v6033_v37, 0.0  ;;  %v4538_v33 = vmax.f32 %v4406_v36, 0.0  ;;  %v4536_v5 = vmax.f32 %v4398_v47, 0.0 }
 0x2e3   : > { %v6034_v4 = vmul.f32 %v22214_v11, %v5380_v63  ;;  %v5378_v50 = vmax.f32 %v4930_v13, 0.0  ;;  %v4401_v58 = vadd.f32 %v22079_v27, %v4400_v9  ;;  %6192 = vadd.xlane.f32.xlu1 %v6191_v7  ;;  %6207 = vadd.xlane.f32.xlu0 %v6206_v25  ;;  %v4539_v14 = vmax.f32 %v4409_v6, 0.0  ;;  %v22356_v27 = vpop.xlane.xlu1 %5828  ;;  %v22359_v36 = vpop.xlane.xlu0 %5915 }
 0x2e4   : > { %v4951_v40 = vadd.f32 %v19597_v19, %v22198_v24  ;;  %v4942_v57 = vpop.f32.mrf.mxu1  ;;  %v6200_v13 = vsel %vm6139_vm2, %v6031_v17, 0.0  ;;  %27525 = vst [vmem:[#allocation67_spill] sm:$0xff] %v22356_v27  ;;  %27526 = vst [vmem:[#allocation68_spill] sm:$0xff] %v22359_v36 }
 0x2e5   : > { %v4537_v61 = vmax.f32 %v4401_v58, 0.0  ;;  %v4943_v20 = vadd.f32 %v22198_v24, %v4942_v57  ;;  %v6032_v8 = vmul.f32 %v22214_v11, %v5378_v50  ;;  %v6209_v63 = vsel %vm6139_vm2, %v6034_v4, 0.0 }
 0x2e6   : > { %v5383_v10 = vmax.f32 %v4951_v40, 0.0  ;;  %v19598_v37 = vpop.f32.mrf.mxu1  ;;  %v4603_v47 = vpack.c.bf16 %v4539_v14, %v4538_v33 }
 0x2e7   : > { %v4602_v9 = vpack.c.bf16 %v4537_v61, %v4536_v5  ;;  %v5381_v6 = vmax.f32 %v4943_v20, 0.0  ;;  %v4954_v19 = vadd.f32 %v19598_v37, %v22198_v24  ;;  %6210 = vadd.xlane.f32.xlu1 %v6209_v63  ;;  %6201 = vadd.xlane.f32.xlu0 %v6200_v13  ;;  %v6203_v40 = vsel %vm6139_vm2, %v6032_v8, 0.0  ;;  %v22370_v61 = vpop.xlane.xlu1 %5834  ;;  %v22372_v37 = vpop.xlane.xlu0 %5921 }
 0x2e8   : > { %v6037_v7 = vmul.f32 %v22214_v11, %v5383_v10  ;;  %v4945_v25 = vpop.f32.mrf.mxu1  ;;  %27527 = vst [vmem:[#allocation69_spill] sm:$0xff] %v22370_v61  ;;  %27528 = vst [vmem:[#allocation70_spill] sm:$0xff] %v22372_v37 }
 0x2e9   : > { %v5384_v50 = vmax.f32 %v4954_v19, 0.0  ;;  %v4946_v58 = vadd.f32 %v22198_v24, %v4945_v25  ;;  %19695 = vmatprep.mubr.msk.bf16.mxu1 %vm4619_vm1, %v4602_v9  ;;  %v6035_v17 = vmul.f32 %v22214_v11, %v5381_v6 }
 0x2ea   : > { %v19601_v4 = vpop.f32.mrf.mxu1  ;;  %19696 = vmatmul.mubr.msk.bf16.gmra.mxu1 %vm4619_vm1, %v4603_v47  ;;  %v6218_v57 = vsel %vm6139_vm2, %v6037_v7, 0.0  ;;  %vm17779_vm1 = vcmask 1048512  }
 0x2eb   : > { %v6038_v5 = vmul.f32 %v22214_v11, %v5384_v50  ;;  %v5382_v14 = vmax.f32 %v4946_v58, 0.0  ;;  %v4967_v10 = vadd.f32 %v19601_v4, %v22198_v24  ;;  %6204 = vadd.xlane.f32.xlu1 %v6203_v40  ;;  %6219 = vadd.xlane.f32.xlu0 %v6218_v57  ;;  %v6212_v6 = vsel %vm6139_vm2, %v6035_v17, 0.0 }
 0x2ec   : > { %v4958_v33 = vpop.f32.mrf.mxu1 }
 0x2ed   : > { %v5387_v20 = vmax.f32 %v4967_v10, 0.0  ;;  %v4959_v63 = vadd.f32 %v22198_v24, %v4958_v33  ;;  %v6221_v13 = vsel %vm6139_vm2, %v6038_v5, 0.0  ;;  %v6036_v8 = vmul.f32 %v22214_v11, %v5382_v14  ;;  %v22384_v14 = vpop.xlane.xlu1 %5840  ;;  %v22387_v10 = vpop.xlane.xlu0 %5927 }
 0x2ee   : > { %v19602_v9 = vpop.f32.mrf.mxu1  ;;  %27529 = vst [vmem:[#allocation71_spill] sm:$0xff] %v22384_v14  ;;  %27530 = vst [vmem:[#allocation72_spill] sm:$0xff] %v22387_v10 }
 0x2ef   : > { %v6041_v19 = vmul.f32 %v22214_v11, %v5387_v20  ;;  %v5385_v47 = vmax.f32 %v4959_v63, 0.0  ;;  %v4970_v7 = vadd.f32 %v19602_v9, %v22198_v24  ;;  %6222 = vadd.xlane.f32.xlu1 %v6221_v13  ;;  %6213 = vadd.xlane.f32.xlu0 %v6212_v6  ;;  %v6215_v5 = vsel %vm6139_vm2, %v6036_v8, 0.0 }
 0x2f0   : > { %v4961_v25 = vpop.f32.mrf.mxu1 }
 0x2f1   : > { %v5388_v50 = vmax.f32 %v4970_v7, 0.0  ;;  %v4962_v58 = vadd.f32 %v22198_v24, %v4961_v25  ;;  %v6230_v4 = vsel %vm6139_vm2, %v6041_v19, 0.0  ;;  %v6039_v40 = vmul.f32 %v22214_v11, %v5385_v47 }
 0x2f2   : > { %v19605_v57 = vpop.f32.mrf.mxu1 }
 0x2f3   : > { %v6042_v17 = vmul.f32 %v22214_v11, %v5388_v50  ;;  %v5386_v33 = vmax.f32 %v4962_v58, 0.0  ;;  %v4983_v20 = vadd.f32 %v19605_v57, %v22198_v24  ;;  %6216 = vadd.xlane.f32.xlu1 %v6215_v5  ;;  %6231 = vadd.xlane.f32.xlu0 %v6230_v4  ;;  %v6224_v47 = vsel %vm6139_vm2, %v6039_v40, 0.0  ;;  %v22396_v4 = vpop.xlane.xlu1 %5846  ;;  %v22398_v57 = vpop.xlane.xlu0 %5933 }
 0x2f4   : > { %v4974_v63 = vpop.f32.mrf.mxu1  ;;  %27531 = vst [vmem:[#allocation73_spill] sm:$0xff] %v22396_v4  ;;  %27532 = vst [vmem:[#allocation74_spill] sm:$0xff] %v22398_v57 }
 0x2f5   : > { %v5391_v13 = vmax.f32 %v4983_v20, 0.0  ;;  %v4975_v9 = vadd.f32 %v22198_v24, %v4974_v63  ;;  %v6233_v6 = vsel %vm6139_vm2, %v6042_v17, 0.0  ;;  %v6040_v19 = vmul.f32 %v22214_v11, %v5386_v33 }
 0x2f6   : > { %v19606_v8 = vpop.f32.mrf.mxu1 }
 0x2f7   : > { %v6045_v7 = vmul.f32 %v22214_v11, %v5391_v13  ;;  %v5389_v25 = vmax.f32 %v4975_v9, 0.0  ;;  %v4986_v50 = vadd.f32 %v19606_v8, %v22198_v24  ;;  %6234 = vadd.xlane.f32.xlu1 %v6233_v6  ;;  %6225 = vadd.xlane.f32.xlu0 %v6224_v47  ;;  %v6227_v63 = vsel %vm6139_vm2, %v6040_v19, 0.0  ;;  %v22410_v37 = vpop.xlane.xlu1 %5852  ;;  %v22412_v19 = vpop.xlane.xlu0 %5939 }
 0x2f8   : > { %v4977_v58 = vpop.f32.mrf.mxu1  ;;  %27533 = vst [vmem:[#allocation75_spill] sm:$0xff] %v22410_v37  ;;  %27534 = vst [vmem:[#allocation76_spill] sm:$0xff] %v22412_v19 }
 0x2f9   : > { %v5392_v5 = vmax.f32 %v4986_v50, 0.0  ;;  %v4978_v17 = vadd.f32 %v22198_v24, %v4977_v58  ;;  %v6242_v33 = vsel %vm6139_vm2, %v6045_v7, 0.0  ;;  %v6043_v20 = vmul.f32 %v22214_v11, %v5389_v25 }
 0x2fa   : > { %v19609_v40 = vpop.f32.mrf.mxu1 }
 0x2fb   : > { %v6046_v13 = vmul.f32 %v22214_v11, %v5392_v5  ;;  %v5390_v9 = vmax.f32 %v4978_v17, 0.0  ;;  %v4999_v6 = vadd.f32 %v19609_v40, %v22198_v24  ;;  %6228 = vadd.xlane.f32.xlu1 %v6227_v63  ;;  %6243 = vadd.xlane.f32.xlu0 %v6242_v33  ;;  %v6236_v25 = vsel %vm6139_vm2, %v6043_v20, 0.0 }
 0x2fc   : > { %v4990_v8 = vpop.f32.mrf.mxu1 }
 0x2fd   : > { %v5395_v47 = vmax.f32 %v4999_v6, 0.0  ;;  %v4991_v50 = vadd.f32 %v22198_v24, %v4990_v8  ;;  %v6245_v58 = vsel %vm6139_vm2, %v6046_v13, 0.0  ;;  %v6044_v7 = vmul.f32 %v22214_v11, %v5390_v9 }
 0x2fe   : > { %v19610_v57 = vpop.f32.mrf.mxu1 }
 0x2ff   : > { %v6049_v5 = vmul.f32 %v22214_v11, %v5395_v47  ;;  %v5393_v17 = vmax.f32 %v4991_v50, 0.0  ;;  %v5002_v33 = vadd.f32 %v19610_v57, %v22198_v24  ;;  %6246 = vadd.xlane.f32.xlu1 %v6245_v58  ;;  %6237 = vadd.xlane.f32.xlu0 %v6236_v25  ;;  %v6239_v8 = vsel %vm6139_vm2, %v6044_v7, 0.0  ;;  %v22422_v50 = vpop.xlane.xlu1 %5858  ;;  %v22424_v58 = vpop.xlane.xlu0 %5945 }
 0x300   : > { %v4993_v40 = vpop.f32.mrf.mxu1  ;;  %27535 = vst [vmem:[#allocation77_spill] sm:$0xff] %v22422_v50  ;;  %27536 = vst [vmem:[#allocation78_spill] sm:$0xff] %v22424_v58 }
 0x301   : > { %v5396_v63 = vmax.f32 %v5002_v33, 0.0  ;;  %v4994_v13 = vadd.f32 %v22198_v24, %v4993_v40  ;;  %v6254_v9 = vsel %vm6139_vm2, %v6049_v5, 0.0  ;;  %v6047_v6 = vmul.f32 %v22214_v11, %v5393_v17 }
 0x302   : > { %v19613_v20 = vpop.f32.mrf.mxu1 }
 0x303   : > { %v6050_v19 = vmul.f32 %v22214_v11, %v5396_v63  ;;  %v5394_v10 = vmax.f32 %v4994_v13, 0.0  ;;  %v5015_v47 = vadd.f32 %v19613_v20, %v22198_v24  ;;  %6240 = vadd.xlane.f32.xlu1 %v6239_v8  ;;  %6255 = vadd.xlane.f32.xlu0 %v6254_v9  ;;  %v6248_v40 = vsel %vm6139_vm2, %v6047_v6, 0.0  ;;  %v22436_v36 = vpop.xlane.xlu1 %5864  ;;  %v22438_v6 = vpop.xlane.xlu0 %5951 }
 0x304   : > { %v5006_v57 = vpop.f32.mrf.mxu1  ;;  %27537 = vst [vmem:[#allocation79_spill] sm:$0xff] %v22436_v36  ;;  %27538 = vst [vmem:[#allocation80_spill] sm:$0xff] %v22438_v6 }
 0x305   : > { %v5399_v25 = vmax.f32 %v5015_v47, 0.0  ;;  %v5007_v5 = vadd.f32 %v22198_v24, %v5006_v57  ;;  %v6257_v17 = vsel %vm6139_vm2, %v6050_v19, 0.0  ;;  %v6048_v33 = vmul.f32 %v22214_v11, %v5394_v10 }
 0x306   : > { %v19614_v7 = vpop.f32.mrf.mxu1 }
 0x307   : > { %v6053_v63 = vmul.f32 %v22214_v11, %v5399_v25  ;;  %v5397_v13 = vmax.f32 %v5007_v5, 0.0  ;;  %v5018_v9 = vadd.f32 %v19614_v7, %v22198_v24  ;;  %6258 = vadd.xlane.f32.xlu1 %v6257_v17  ;;  %6249 = vadd.xlane.f32.xlu0 %v6248_v40  ;;  %v6251_v10 = vsel %vm6139_vm2, %v6048_v33, 0.0 }
 0x308   : > { %v5009_v20 = vpop.f32.mrf.mxu1 }
 0x309   : > { %v5400_v8 = vmax.f32 %v5018_v9, 0.0  ;;  %v5010_v47 = vadd.f32 %v22198_v24, %v5009_v20  ;;  %v6266_v57 = vsel %vm6139_vm2, %v6053_v63, 0.0  ;;  %v6051_v19 = vmul.f32 %v22214_v11, %v5397_v13 }
 0x30a   : > { %v19617_v58 = vpop.f32.mrf.mxu1 }
 0x30b   : > { %v6054_v25 = vmul.f32 %v22214_v11, %v5400_v8  ;;  %v5398_v5 = vmax.f32 %v5010_v47, 0.0  ;;  %v5031_v17 = vadd.f32 %v19617_v58, %v22198_v24  ;;  %6252 = vadd.xlane.f32.xlu1 %v6251_v10  ;;  %6267 = vadd.xlane.f32.xlu0 %v6266_v57  ;;  %v6260_v20 = vsel %vm6139_vm2, %v6051_v19, 0.0  ;;  %v22448_v47 = vpop.xlane.xlu1 %5870  ;;  %v22450_v57 = vpop.xlane.xlu0 %5957 }
 0x30c   : > { %v5022_v7 = vpop.f32.mrf.mxu1  ;;  %27539 = vst [vmem:[#allocation81_spill] sm:$0xff] %v22448_v47  ;;  %27540 = vst [vmem:[#allocation82_spill] sm:$0xff] %v22450_v57 }
 0x30d   : > { %v5403_v40 = vmax.f32 %v5031_v17, 0.0  ;;  %v5023_v63 = vadd.f32 %v22198_v24, %v5022_v7  ;;  %v6269_v13 = vsel %vm6139_vm2, %v6054_v25, 0.0  ;;  %v6052_v9 = vmul.f32 %v22214_v11, %v5398_v5 }
 0x30e   : > { %v19618_v33 = vpop.f32.mrf.mxu1 }
 0x30f   : > { %v6057_v6 = vmul.f32 %v22214_v11, %v5403_v40  ;;  %v5401_v36 = vmax.f32 %v5023_v63, 0.0  ;;  %v5034_v8 = vadd.f32 %v19618_v33, %v22198_v24  ;;  %6270 = vadd.xlane.f32.xlu1 %v6269_v13  ;;  %6261 = vadd.xlane.f32.xlu0 %v6260_v20  ;;  %v6263_v7 = vsel %vm6139_vm2, %v6052_v9, 0.0  ;;  %v22462_v47 = vpop.xlane.xlu1 %5876  ;;  %v22464_v9 = vpop.xlane.xlu0 %5963 }
 0x310   : > { %v5025_v58 = vpop.f32.mrf.mxu1  ;;  %27541 = vst [vmem:[#allocation83_spill] sm:$0xff] %v22462_v47  ;;  %27542 = vst [vmem:[#allocation84_spill] sm:$0xff] %v22464_v9 }
 0x311   : > { %v5404_v10 = vmax.f32 %v5034_v8, 0.0  ;;  %v5026_v25 = vadd.f32 %v22198_v24, %v5025_v58  ;;  %v6278_v5 = vsel %vm6139_vm2, %v6057_v6, 0.0  ;;  %v6055_v17 = vmul.f32 %v22214_v11, %v5401_v36 }
 0x312   : > { %v19621_v19 = vpop.f32.mrf.mxu1 }
 0x313   : > { %v6058_v40 = vmul.f32 %v22214_v11, %v5404_v10  ;;  %v5402_v63 = vmax.f32 %v5026_v25, 0.0  ;;  %v5047_v13 = vadd.f32 %v19621_v19, %v22198_v24  ;;  %6264 = vadd.xlane.f32.xlu1 %v6263_v7  ;;  %6279 = vadd.xlane.f32.xlu0 %v6278_v5  ;;  %v6272_v36 = vsel %vm6139_vm2, %v6055_v17, 0.0 }
 0x314   : > { %v5038_v33 = vpop.f32.mrf.mxu1 }
 0x315   : > { %v5407_v20 = vmax.f32 %v5047_v13, 0.0  ;;  %v5039_v8 = vadd.f32 %v22198_v24, %v5038_v33  ;;  %v6281_v58 = vsel %vm6139_vm2, %v6058_v40, 0.0  ;;  %v6056_v6 = vmul.f32 %v22214_v11, %v5402_v63 }
 0x316   : > { %v19622_v57 = vpop.f32.mrf.mxu1 }
 0x317   : > { %v6061_v10 = vmul.f32 %v22214_v11, %v5407_v20  ;;  %v5405_v25 = vmax.f32 %v5039_v8, 0.0  ;;  %v5050_v5 = vadd.f32 %v19622_v57, %v22198_v24  ;;  %6282 = vadd.xlane.f32.xlu1 %v6281_v58  ;;  %6273 = vadd.xlane.f32.xlu0 %v6272_v36  ;;  %v6275_v33 = vsel %vm6139_vm2, %v6056_v6, 0.0  ;;  %v22474_v8 = vpop.xlane.xlu1 %5882  ;;  %v22476_v58 = vpop.xlane.xlu0 %5969 }
 0x318   : > { %v5041_v19 = vpop.f32.mrf.mxu1  ;;  %27543 = vst [vmem:[#allocation85_spill] sm:$0xff] %v22474_v8  ;;  %27544 = vst [vmem:[#allocation86_spill] sm:$0xff] %v22476_v58 }
 0x319   : > { %v5408_v7 = vmax.f32 %v5050_v5, 0.0  ;;  %v5042_v40 = vadd.f32 %v22198_v24, %v5041_v19  ;;  %v6290_v63 = vsel %vm6139_vm2, %v6061_v10, 0.0  ;;  %v6059_v13 = vmul.f32 %v22214_v11, %v5405_v25 }
 0x31a   : > { %v19625_v17 = vpop.f32.mrf.mxu1 }
 0x31b   : > { %v6062_v9 = vmul.f32 %v22214_v11, %v5408_v7  ;;  %v5406_v47 = vmax.f32 %v5042_v40, 0.0  ;;  %v5063_v20 = vadd.f32 %v19625_v17, %v22198_v24  ;;  %6276 = vadd.xlane.f32.xlu1 %v6275_v33  ;;  %6291 = vadd.xlane.f32.xlu0 %v6290_v63  ;;  %v6284_v19 = vsel %vm6139_vm2, %v6059_v13, 0.0  ;;  %v22488_v8 = vpop.xlane.xlu1 %5888  ;;  %v22490_v13 = vpop.xlane.xlu0 %5975 }
 0x31c   : > { %v5054_v57 = vpop.f32.mrf.mxu1  ;;  %27545 = vst [vmem:[#allocation87_spill] sm:$0xff] %v22488_v8  ;;  %27546 = vst [vmem:[#allocation88_spill] sm:$0xff] %v22490_v13 }
 0x31d   : > { %v5411_v36 = vmax.f32 %v5063_v20, 0.0  ;;  %v5055_v10 = vadd.f32 %v22198_v24, %v5054_v57  ;;  %v6293_v25 = vsel %vm6139_vm2, %v6062_v9, 0.0  ;;  %v6060_v5 = vmul.f32 %v22214_v11, %v5406_v47 }
 0x31e   : > { %v19626_v6 = vpop.f32.mrf.mxu1 }
 0x31f   : > { %v6065_v7 = vmul.f32 %v22214_v11, %v5411_v36  ;;  %v5409_v40 = vmax.f32 %v5055_v10, 0.0  ;;  %v5066_v63 = vadd.f32 %v19626_v6, %v22198_v24  ;;  %6294 = vadd.xlane.f32.xlu1 %v6293_v25  ;;  %6285 = vadd.xlane.f32.xlu0 %v6284_v19  ;;  %v6287_v47 = vsel %vm6139_vm2, %v6060_v5, 0.0 }
 0x320   : > { %v5057_v17 = vpop.f32.mrf.mxu1 }
 0x321   : > { %v5412_v33 = vmax.f32 %v5066_v63, 0.0  ;;  %v5058_v20 = vadd.f32 %v22198_v24, %v5057_v17  ;;  %v6302_v57 = vsel %vm6139_vm2, %v6065_v7, 0.0  ;;  %v6063_v9 = vmul.f32 %v22214_v11, %v5409_v40 }
 0x322   : > { %v19629_v58 = vpop.f32.mrf.mxu1 }
 0x323   : > { %v6066_v36 = vmul.f32 %v22214_v11, %v5412_v33  ;;  %v5410_v10 = vmax.f32 %v5058_v20, 0.0  ;;  %v5079_v25 = vadd.f32 %v19629_v58, %v22198_v24  ;;  %6288 = vadd.xlane.f32.xlu1 %v6287_v47  ;;  %6303 = vadd.xlane.f32.xlu0 %v6302_v57  ;;  %v6296_v17 = vsel %vm6139_vm2, %v6063_v9, 0.0  ;;  %v22500_v20 = vpop.xlane.xlu1 %5894  ;;  %v22502_v57 = vpop.xlane.xlu0 %5981 }
 0x324   : > { %v5070_v6 = vpop.f32.mrf.mxu1  ;;  %27547 = vst [vmem:[#allocation89_spill] sm:$0xff] %v22500_v20  ;;  %27548 = vst [vmem:[#allocation90_spill] sm:$0xff] %v22502_v57 }
 0x325   : > { %v5415_v19 = vmax.f32 %v5079_v25, 0.0  ;;  %v5071_v7 = vadd.f32 %v22198_v24, %v5070_v6  ;;  %v6305_v40 = vsel %vm6139_vm2, %v6066_v36, 0.0  ;;  %v6064_v63 = vmul.f32 %v22214_v11, %v5410_v10 }
 0x326   : > { %v19630_v5 = vpop.f32.mrf.mxu1 }
 0x327   : > { %v6069_v8 = vmul.f32 %v22214_v11, %v5415_v19  ;;  %v5413_v13 = vmax.f32 %v5071_v7, 0.0  ;;  %v5082_v33 = vadd.f32 %v19630_v5, %v22198_v24  ;;  %6306 = vadd.xlane.f32.xlu1 %v6305_v40  ;;  %6297 = vadd.xlane.f32.xlu0 %v6296_v17  ;;  %v6299_v6 = vsel %vm6139_vm2, %v6064_v63, 0.0 }
 0x328   : > { %v5073_v58 = vpop.f32.mrf.mxu1 }
 0x329   : > { %v5416_v47 = vmax.f32 %v5082_v33, 0.0  ;;  %v5074_v36 = vadd.f32 %v22198_v24, %v5073_v58  ;;  %v6314_v10 = vsel %vm6139_vm2, %v6069_v8, 0.0  ;;  %v6067_v25 = vmul.f32 %v22214_v11, %v5413_v13  ;;  %v22513_v33 = vld [vmem:[%s27334_s10] ss:$0 sm:$0xff] }
 0x32a   : > { %v19633_v9 = vpop.f32.mrf.mxu1 }
 0x32b   : > { %v6070_v19 = vmul.f32 %v22214_v11, %v5416_v47  ;;  %v5414_v7 = vmax.f32 %v5074_v36, 0.0  ;;  %v5095_v40 = vadd.f32 %v19633_v9, %v22198_v24  ;;  %6300 = vadd.xlane.f32.xlu1 %v6299_v6  ;;  %6315 = vadd.xlane.f32.xlu0 %v6314_v10  ;;  %v6308_v47 = vsel %vm6139_vm2, %v6067_v25, 0.0  ;;  %v22519_v36 = vpop.xlane.xlu1 %5900  ;;  %v22521_v24 = vpop.xlane.xlu0 %5987  ;;  %v22530_v25 = vld [vmem:[%s27336_s12] ss:$0 sm:$0xff] }
 0x32c   : > { %v5086_v5 = vpop.f32.mrf.mxu1  ;;  %27549 = vst [vmem:[#allocation91_spill] sm:$0xff] %v22519_v36  ;;  %27550 = vst [vmem:[#allocation92_spill] sm:$0xff] %v22521_v24 }
 0x32d   : > { %v5419_v17 = vmax.f32 %v5095_v40, 0.0  ;;  %v5087_v8 = vadd.f32 %v22513_v33, %v5086_v5  ;;  %v6317_v13 = vsel %vm6139_vm2, %v6070_v19, 0.0  ;;  %v6068_v63 = vmul.f32 %v22214_v11, %v5414_v7 }
 0x32e   : > { %v19634_v58 = vpop.f32.mrf.mxu1 }
 0x32f   : > { %v6073_v10 = vmul.f32 %v22214_v11, %v5419_v17  ;;  %v5417_v9 = vmax.f32 %v5087_v8, 0.0  ;;  %v5098_v6 = vadd.f32 %v22513_v33, %v19634_v58  ;;  %6318 = vadd.xlane.f32.xlu1 %v6317_v13  ;;  %6309 = vadd.xlane.f32.xlu0 %v6308_v47  ;;  %v6311_v11 = vsel %vm6139_vm2, %v6068_v63, 0.0  ;;  %v22536_v47 = vpop.xlane.xlu1 %5906 }
 0x330   : > { %v5089_v40 = vpop.f32.mrf.mxu1  ;;  %27551 = vst [vmem:[#allocation93_spill] sm:$0xff] %v22536_v47  ;;  %v27339_v47 = vlaneseq }
 0x331   : > { %v5420_v5 = vmax.f32 %v5098_v6, 0.0  ;;  %v5090_v19 = vadd.f32 %v22513_v33, %v5089_v40  ;;  %v6326_v7 = vsel %vm6139_vm2, %v6073_v10, 0.0  ;;  %v6071_v24 = vmul.f32 %v22530_v25, %v5417_v9  ;;  %v22538_v10 = vpop.xlane.xlu0 %5993 }
 0x332   : > { %v19637_v36 = vpop.f32.mrf.mxu1  ;;  %27552 = vst [vmem:[#allocation94_spill] sm:$0xff] %v22538_v10 }
 0x333   : > { %v6074_v17 = vmul.f32 %v22530_v25, %v5420_v5  ;;  %v5418_v8 = vmax.f32 %v5090_v19, 0.0  ;;  %v5111_v13 = vadd.f32 %v22513_v33, %v19637_v36  ;;  %6312 = vadd.xlane.f32.xlu1 %v6311_v11  ;;  %6327 = vadd.xlane.f32.xlu0 %v6326_v7  ;;  %v6320_v5 = vsel %vm6139_vm2, %v6071_v24, 0.0  ;;  %v22550_v24 = vpop.xlane.xlu1 %5912 }
 0x334   : > { %v5102_v58 = vpop.f32.mrf.mxu1  ;;  %27553 = vst [vmem:[#allocation95_spill] sm:$0xff] %v22550_v24 }
 0x335   : > { %v5423_v6 = vmax.f32 %v5111_v13, 0.0  ;;  %v5103_v40 = vadd.f32 %v22513_v33, %v5102_v58  ;;  %v6329_v9 = vsel %vm6139_vm2, %v6074_v17, 0.0  ;;  %v6072_v20 = vmul.f32 %v22530_v25, %v5418_v8 }
 0x336   : > { %v19638_v63 = vpop.f32.mrf.mxu1 }
 0x337   : > { %v6077_v19 = vmul.f32 %v22530_v25, %v5423_v6  ;;  %v5421_v36 = vmax.f32 %v5103_v40, 0.0  ;;  %v5114_v7 = vadd.f32 %v22513_v33, %v19638_v63  ;;  %6330 = vadd.xlane.f32.xlu1 %v6329_v9  ;;  %6321 = vadd.xlane.f32.xlu0 %v6320_v5  ;;  %v6323_v57 = vsel %vm6139_vm2, %v6072_v20, 0.0  ;;  %v22552_v6 = vpop.xlane.xlu0 %5999 }
 0x338   : > { %v5105_v11 = vpop.f32.mrf.mxu1  ;;  %27554 = vst [vmem:[#allocation96_spill] sm:$0xff] %v22552_v6 }
 0x339   : > { %v5424_v10 = vmax.f32 %v5114_v7, 0.0  ;;  %v5106_v13 = vadd.f32 %v22513_v33, %v5105_v11  ;;  %v6338_v58 = vsel %vm6139_vm2, %v6077_v19, 0.0  ;;  %v6075_v17 = vmul.f32 %v22530_v25, %v5421_v36 }
 0x33a   : > { %v19641_v8 = vpop.f32.mrf.mxu1  ;;  %v22557_v7 = vshrl.u32 %v27339_v47, 7  ;;  %v22565_v47 = vpop.xlane.xlu1 %5918 }
 0x33b   : > { %v6078_v40 = vmul.f32 %v22530_v25, %v5424_v10  ;;  %v5422_v9 = vmax.f32 %v5106_v13, 0.0  ;;  %v5127_v63 = vadd.f32 %v22513_v33, %v19641_v8  ;;  %6324 = vadd.xlane.f32.xlu1 %v6323_v57  ;;  %6339 = vadd.xlane.f32.xlu0 %v6338_v58  ;;  %v6332_v6 = vsel %vm6139_vm2, %v6075_v17, 0.0  ;;  %v6656_v10 = vpop.permute.xlu0 %6655  ;;  %27556 = vst [vmem:[#allocation98_spill] sm:$0xff] %v22565_v47 }
 0x33c   : > { %v5118_v5 = vpop.f32.mrf.mxu1  ;;  %27555 = vst [vmem:[#allocation97_spill] sm:$0xff] %v22557_v7  ;;  %v22598_v14 = vsub.s32 3, %v22557_v7  ;;  %v22614_v27 = vsub.s32 7, %v22557_v7 }
 0x33d   : > { %v5427_v19 = vmax.f32 %v5127_v63, 0.0  ;;  %v5119_v36 = vadd.f32 %v22513_v33, %v5118_v5  ;;  %v6341_v20 = vsel %vm6139_vm2, %v6078_v40, 0.0  ;;  %v6076_v11 = vmul.f32 %v22530_v25, %v5422_v9 }
 0x33e   : > { %v19642_v24 = vpop.f32.mrf.mxu1  ;;  %v22568_v63 = vsub.s32 0, %v22557_v7  ;;  %27560 = vst [vmem:[#allocation102_spill] sm:$0xff] %v22614_v27 }
 0x33f   : > { %v6081_v13 = vmul.f32 %v22530_v25, %v5427_v19  ;;  %v5425_v8 = vmax.f32 %v5119_v36, 0.0  ;;  %v5130_v57 = vadd.f32 %v22513_v33, %v19642_v24  ;;  %6342 = vadd.xlane.f32.xlu1 %v6341_v20  ;;  %6333 = vadd.xlane.f32.xlu0 %v6332_v6  ;;  %v6335_v19 = vsel %vm6139_vm2, %v6076_v11, 0.0 }
 0x340   : > { %v5121_v58 = vpop.f32.mrf.mxu1 }
 0x341   : > { %v5428_v40 = vmax.f32 %v5130_v57, 0.0  ;;  %v5122_v9 = vadd.f32 %v22513_v33, %v5121_v58  ;;  %v6350_v5 = vsel %vm6139_vm2, %v6081_v13, 0.0  ;;  %v6079_v17 = vmul.f32 %v22530_v25, %v5425_v8 }
 0x342   : > { %v19645_v37 = vpop.f32.mrf.mxu1  ;;  %v22578_v58 = vrot.slane %v6656_v10, %v22568_v63 }
 0x343   : > { %v6082_v24 = vmul.f32 %v22530_v25, %v5428_v40  ;;  %v5426_v36 = vmax.f32 %v5122_v9, 0.0  ;;  %v5143_v6 = vadd.f32 %v22513_v33, %v19645_v37  ;;  %6336 = vadd.xlane.f32.xlu1 %v6335_v19  ;;  %6351 = vadd.xlane.f32.xlu0 %v6350_v5  ;;  %v6148_v20 = vpop.xlane.xlu0 %6147  ;;  %v6344_v9 = vsel %vm6139_vm2, %v6079_v17, 0.0 }
 0x344   : > { %v6526_v47 = vadd.f32 %v6148_v20, %v21720_v60  ;;  %v5134_v57 = vpop.f32.mrf.mxu1  ;;  %v22585_v37 = vsub.s32 1, %v22557_v7  ;;  %v19952_v5 = vmov 1966171168   ;;  %v22587_v60 = vpop.xlane.xlu1 %5924  ;;  %v22595_v17 = vsub.s32 2, %v22557_v7 }
 0x345   : > { %v5431_v13 = vmax.f32 %v5143_v6, 0.0  ;;  %v5135_v8 = vadd.f32 %v22513_v33, %v5134_v57  ;;  %v6353_v50 = vsel %vm6139_vm2, %v6082_v24, 0.0  ;;  %v6080_v11 = vmul.f32 %v22530_v25, %v5426_v36  ;;  %27557 = vst [vmem:[#allocation99_spill] sm:$0xff] %v22587_v60 }
 0x346   : > { %v19646_v40 = vpop.f32.mrf.mxu1  ;;  %v11019_v19 = vunpack.c.l.s4 %v19952_v5  ;;  %v6664_v6 = vadd.f32 %v22578_v58, %v6526_v47  ;;  %v22601_v5 = vsub.s32 4, %v22557_v7 }
 0x347   : > { %v6085_v10 = vmul.f32 %v22530_v25, %v5431_v13  ;;  %v5429_v20 = vmax.f32 %v5135_v8, 0.0  ;;  %v5146_v57 = vadd.f32 %v22513_v33, %v19646_v40  ;;  %6354 = vadd.xlane.f32.xlu1 %v6353_v50  ;;  %6345 = vadd.xlane.f32.xlu0 %v6344_v9  ;;  %v22592_v24 = vpop.xlane.xlu0 %6141  ;;  %v22604_v13 = vsub.s32 5, %v22557_v7 }
 0x348   : > { %v5137_v36 = vpop.f32.mrf.mxu1  ;;  %v22609_v40 = vsub.s32 6, %v22557_v7  ;;  %v6347_v60 = vsel %vm6139_vm2, %v6080_v11, 0.0  ;;  %v11020_v61 = vunpack.c.0.s8 %v11019_v19  ;;  %v6989_v52 = vrot.slane %v6664_v6, %v22585_v37  ;;  %v22623_v62 = vpop.xlane.xlu1 %5930 }
 0x349   : > { %27558 = vst [vmem:[#allocation100_spill] sm:$0xff] %v22604_v13  ;;  %v6083_v47 = vmul.f32 %v22530_v25, %v5429_v20  ;;  %v5432_v8 = vmax.f32 %v5146_v57, 0.0  ;;  %v5138_v50 = vadd.f32 %v22513_v33, %v5137_v36  ;;  %v6362_v4 = vsel %vm6139_vm2, %v6085_v10, 0.0  ;;  %27561 = vst [vmem:[#allocation103_spill] sm:$0xff] %v22623_v62 }
 0x34a   : > { %27559 = vst [vmem:[#allocation101_spill] sm:$0xff] %v22609_v40  ;;  %v19649_v9 = vpop.f32.mrf.mxu1  ;;  %v6985_v57 = vrot.slane %v6664_v6, %v22568_v63  ;;  %v6993_v11 = vrot.slane %v6664_v6, %v22595_v17  ;;  %v6997_v10 = vrot.slane %v6664_v6, %v22598_v14  ;;  %v7001_v38 = vrot.slane %v6664_v6, %v22601_v5 }
 0x34b   : > { %v6086_v55 = vmul.f32 %v22530_v25, %v5432_v8  ;;  %v5430_v3 = vmax.f32 %v5138_v50, 0.0  ;;  %v5159_v20 = vadd.f32 %v22513_v33, %v19649_v9  ;;  %6348 = vadd.xlane.f32.xlu1 %v6347_v60  ;;  %6363 = vadd.xlane.f32.xlu0 %v6362_v4  ;;  %v22626_v50 = vpop.xlane.xlu0 %6159  ;;  %v6356_v60 = vsel %vm6139_vm2, %v6083_v47, 0.0 }
 0x34c   : > { %v5150_v36 = vpop.f32.mrf.mxu1  ;;  %v7005_v0 = vrot.slane %v6664_v6, %v22604_v13  ;;  %v7009_v42 = vrot.slane %v6664_v6, %v22609_v40  ;;  %v7013_v23 = vrot.slane %v6664_v6, %v22614_v27  ;;  %v22641_v47 = vsub.s32 %v11020_v61, %v22557_v7 }
 0x34d   : > { %v6084_v19 = vmul.f32 %v22530_v25, %v5430_v3  ;;  %v5435_v8 = vmax.f32 %v5159_v20, 0.0  ;;  %v5151_v4 = vadd.f32 %v22513_v33, %v5150_v36  ;;  %v6365_v59 = vsel %vm6139_vm2, %v6086_v55, 0.0 }
 0x34e   : > { %v22630_v9 = vpop.f32.mrf.mxu1  ;;  %v11112_v34 = vcombine.low %v6985_v57, %v6989_v52  ;;  %v11113_v55 = vcombine.low %v6993_v11, %v6997_v10  ;;  %v11114_v6 = vcombine.low %v7001_v38, %v7005_v0  ;;  %v11115_v31 = vcombine.low %v7009_v42, %v7013_v23 }
 0x34f   : > { %v6089_v62 = vmul.f32 %v22530_v25, %v5435_v8  ;;  %v5433_v3 = vmax.f32 %v5151_v4, 0.0  ;;  %6366 = vadd.xlane.f32.xlu1 %v6365_v59  ;;  %6357 = vadd.xlane.f32.xlu0 %v6356_v60  ;;  %v6359_v36 = vsel %vm6139_vm2, %v6084_v19, 0.0  ;;  %v22645_v8 = vpop.xlane.xlu1 %5936  ;;  %v22647_v59 = vpop.xlane.xlu0 %6153 }
 0x350   : > { %v22637_v20 = vpop.f32.mrf.mxu1  ;;  %27562 = vst [vmem:[#allocation104_spill] sm:$0xff] %v22645_v8  ;;  %v11122_v57 = vrot.slane %v11112_v34, %v22641_v47  ;;  %v11129_v23 = vrot.slane %v11113_v55, %v22641_v47  ;;  %v11136_v42 = vrot.slane %v11114_v6, %v22641_v47  ;;  %v11143_v0 = vrot.slane %v11115_v31, %v22641_v47 }
 0x351   : > { %v6087_v43 = vmul.f32 %v22530_v25, %v5433_v3  ;;  %v6374_v41 = vsel %vm6139_vm2, %v6089_v62, 0.0 }
 0x352   : > { %v19653_v45 = vpop.f32.mrf.mxu1 }
 0x353   : > { %v5175_v4 = vadd.f32 %v22513_v33, %v19653_v45  ;;  %6360 = vadd.xlane.f32.xlu1 %v6359_v36  ;;  %6375 = vadd.xlane.f32.xlu0 %v6374_v41  ;;  %v6368_v62 = vsel %vm6139_vm2, %v6087_v43, 0.0  ;;  %v6172_v10 = vpop.xlane.xlu0 %6171  ;;  %v11144_v36 = vcombine.low %v11122_v57, %v11129_v23  ;;  %v11145_v43 = vcombine.low %v11136_v42, %v11143_v0 }
 0x354   : > { %v5166_v19 = vpop.f32.mrf.mxu1  ;;  %v6534_v6 = vadd.f32 %v6172_v10, %v21585_v16 }
 0x355   : > { %v5439_v61 = vmax.f32 %v5175_v4, 0.0  ;;  %v5167_v52 = vadd.f32 %v22513_v33, %v5166_v19 }
 0x356   : > { %v22652_v11 = vpop.f32.mrf.mxu1  ;;  %v6672_v57 = vadd.f32 %v22578_v58, %v6534_v6 }
 0x357   : > { %v6093_v45 = vmul.f32 %v22530_v25, %v5439_v61  ;;  %v5437_v38 = vmax.f32 %v5167_v52, 0.0  ;;  %6369 = vadd.xlane.f32.xlu0 %v6368_v62  ;;  %v11152_v52 = vrot.slane %v11144_v36, %v22641_v47  ;;  %v11159_v62 = vrot.slane %v11145_v43, %v22641_v47  ;;  %v6166_v23 = vpop.xlane.xlu0 %6165 }
 0x358   : > { %v22659_v41 = vpop.f32.mrf.mxu1  ;;  %v6532_v10 = vadd.f32 %v6166_v23, %v21545_v18  ;;  %v7249_v36 = vrot.slane %v6672_v57, %v22595_v17  ;;  %v7253_v43 = vrot.slane %v6672_v57, %v22598_v14  ;;  %v7261_v6 = vrot.slane %v6672_v57, %v22604_v13 }
 0x359   : > { %v6091_v60 = vmul.f32 %v22530_v25, %v5437_v38  ;;  %v6386_v3 = vsel %vm6139_vm2, %v6093_v45, 0.0  ;;  %v11160_v0 = vcombine.low %v11152_v52, %v11159_v62  ;;  %v7265_v18 = vrot.slane %v6672_v57, %v22609_v40 }
 0x35a   : > { %v19657_v34 = vpop.f32.mrf.mxu1  ;;  %v11505_v52 = vcombine.low %v7249_v36, %v7253_v43 }
 0x35b   : > { %v5191_v55 = vadd.f32 %v22513_v33, %v19657_v34  ;;  %6387 = vadd.xlane.f32.xlu0 %v6386_v3  ;;  %v6380_v61 = vsel %vm6139_vm2, %v6091_v60, 0.0  ;;  %v22674_v60 = vpop.xlane.xlu1 %5942  ;;  %v7241_v34 = vrot.slane %v6672_v57, %v22568_v63  ;;  %v7245_v3 = vrot.slane %v6672_v57, %v22585_v37 }
 0x35c   : > { %v5182_v31 = vpop.f32.mrf.mxu1  ;;  %27563 = vst [vmem:[#allocation105_spill] sm:$0xff] %v22674_v60 }
 0x35d   : > { %v5443_v4 = vmax.f32 %v5191_v55, 0.0  ;;  %v5183_v19 = vadd.f32 %v22513_v33, %v5182_v31  ;;  %v7257_v55 = vrot.slane %v6672_v57, %v22601_v5 }
 0x35f   : > { %v6097_v38 = vmul.f32 %v22530_v25, %v5443_v4  ;;  %v5441_v45 = vmax.f32 %v5183_v19, 0.0  ;;  %6381 = vadd.xlane.f32.xlu0 %v6380_v61  ;;  %v7269_v4 = vrot.slane %v6672_v57, %v22614_v27  ;;  %v6670_v19 = vadd.f32 %v22578_v58, %v6532_v10 }
 0x360   : > { %v11504_v61 = vcombine.low %v7241_v34, %v7245_v3  ;;  %v11506_v62 = vcombine.low %v7257_v55, %v7261_v6  ;;  %v11521_v10 = vrot.slane %v11505_v52, %v22641_v47 }
 0x361   : > { %v6095_v42 = vmul.f32 %v22530_v25, %v5441_v45  ;;  %v6398_v16 = vsel %vm6139_vm2, %v6097_v38, 0.0  ;;  %v11507_v38 = vcombine.low %v7265_v18, %v7269_v4  ;;  %v7177_v45 = vrot.slane %v6670_v19, %v22568_v63 }
 0x362   : > { %v7181_v23 = vrot.slane %v6670_v19, %v22585_v37  ;;  %v7193_v8 = vrot.slane %v6670_v19, %v22601_v5  ;;  %v11514_v57 = vrot.slane %v11504_v61, %v22641_v47  ;;  %v11528_v34 = vrot.slane %v11506_v62, %v22641_v47 }
 0x363   : > { %6399 = vadd.xlane.f32.xlu0 %v6398_v16  ;;  %v6392_v31 = vsel %vm6139_vm2, %v6095_v42, 0.0  ;;  %v22688_v16 = vpop.xlane.xlu1 %5948  ;;  %v7189_v42 = vrot.slane %v6670_v19, %v22598_v14  ;;  %v11535_v3 = vrot.slane %v11507_v38, %v22641_v47  ;;  %v7197_v36 = vrot.slane %v6670_v19, %v22604_v13 }
 0x364   : > { %17293 = vperm.xlu1 %19741, %v11160_v0   ;;  %27564 = vst [vmem:[#allocation106_spill] sm:$0xff] %v22688_v16  ;;  %v7185_v0 = vrot.slane %v6670_v19, %v22595_v17  ;;  %v7201_v43 = vrot.slane %v6670_v19, %v22609_v40  ;;  %v7205_v55 = vrot.slane %v6670_v19, %v22614_v27 }
 0x365   : > { %v11406_v6 = vcombine.low %v7177_v45, %v7181_v23  ;;  %v11408_v18 = vcombine.low %v7193_v8, %v7197_v36  ;;  %v11536_v60 = vcombine.low %v11514_v57, %v11521_v10  ;;  %v11537_v61 = vcombine.low %v11528_v34, %v11535_v3 }
 0x366   : > { %v11409_v4 = vcombine.low %v7201_v43, %v7205_v55 }
 0x367   : > { %6393 = vadd.xlane.f32.xlu0 %v6392_v31  ;;  %v11407_v31 = vcombine.low %v7185_v0, %v7189_v42  ;;  %v22700_v16 = vpop.xlane.xlu1 %5954  ;;  %v11416_v52 = vrot.slane %v11406_v6, %v22641_v47  ;;  %v11430_v38 = vrot.slane %v11408_v18, %v22641_v47  ;;  %v11544_v51 = vrot.slane %v11536_v60, %v22641_v47  ;;  %v27567_v42 = vld [vmem:[#allocation10_spill] sm:$0xff] }
 0x368   : > { %27565 = vst [vmem:[#allocation107_spill] sm:$0xff] %v22700_v16  ;;  %v11437_v7 = vrot.slane %v11409_v4, %v22641_v47  ;;  %v11551_v19 = vrot.slane %v11537_v61, %v22641_v47  ;;  %v5162_v0 = vadd.f32 %v22513_v33, %v22630_v9  ;;  %v6524_v57 = vadd.f32 %v22592_v24, %v27567_v42  ;;  %v27579_v16 = vld [vmem:[#allocation7_spill] sm:$0xff] }
 0x369   : > { %v11423_v62 = vrot.slane %v11407_v31, %v22641_v47 }
 0x36a   : > { %v11439_v23 = vcombine.low %v11430_v38, %v11437_v7  ;;  %v11552_v10 = vcombine.low %v11544_v51, %v11551_v19  ;;  %v5436_v36 = vmax.f32 %v5162_v0, 0.0  ;;  %v6662_v43 = vadd.f32 %v22578_v58, %v6524_v57  ;;  %v22731_v38 = vpop.f32.mrf.mxu1 }
 0x36b   : > { %v11438_v45 = vcombine.low %v11416_v52, %v11423_v62  ;;  %v22708_v8 = vpop.xlane.xlu1 %5960 }
 0x36c   : > { %27566 = vst [vmem:[#allocation108_spill] sm:$0xff] %v22708_v8  ;;  %v11453_v3 = vrot.slane %v11439_v23, %v22641_v47  ;;  %v6090_v55 = vmul.f32 %v22530_v25, %v5436_v36  ;;  %v6921_v9 = vrot.slane %v6662_v43, %v22568_v63  ;;  %v6925_v6 = vrot.slane %v6662_v43, %v22585_v37  ;;  %v22735_v57 = vpop.f32.mrf.mxu1 }
 0x36d   : > { %v11446_v34 = vrot.slane %v11438_v45, %v22641_v47  ;;  %v6929_v51 = vrot.slane %v6662_v43, %v22595_v17  ;;  %v6933_v24 = vrot.slane %v6662_v43, %v22598_v14  ;;  %v6937_v31 = vrot.slane %v6662_v43, %v22601_v5 }
 0x36e   : > { %v6941_v18 = vrot.slane %v6662_v43, %v22604_v13  ;;  %v6945_v4 = vrot.slane %v6662_v43, %v22609_v40  ;;  %v6949_v61 = vrot.slane %v6662_v43, %v22614_v27  ;;  %v6377_v62 = vsel %vm6139_vm2, %v6090_v55, 0.0  ;;  %v19661_v43 = vpop.f32.mrf.mxu1 }
 0x36f   : > { %v22716_v60 = vpop.xlane.xlu1 %5966  ;;  %v11454_v7 = vcombine.low %v11446_v34, %v11453_v3  ;;  %v11014_v19 = vcombine.low %v6921_v9, %v6925_v6  ;;  %v11015_v45 = vcombine.low %v6929_v51, %v6933_v24  ;;  %v5207_v6 = vadd.f32 %v22513_v33, %v19661_v43 }
 0x370   : > { %27568 = vst [vmem:[#allocation10_spill] sm:$0xff] %v22716_v60  ;;  %v11016_v23 = vcombine.low %v6937_v31, %v6941_v18  ;;  %v11017_v0 = vcombine.low %v6945_v4, %v6949_v61  ;;  %v5198_v51 = vpop.f32.mrf.mxu1  ;;  %v6184_v18 = vpop.xlane.xlu0 %6183 }
 0x371   : > { %v11031_v34 = vrot.slane %v11015_v45, %v22641_v47  ;;  %v5447_v61 = vmax.f32 %v5207_v6, 0.0 }
 0x372   : > { %v11038_v3 = vrot.slane %v11016_v23, %v22641_v47  ;;  %v11045_v36 = vrot.slane %v11017_v0, %v22641_v47 }
 0x373   : > { %v22728_v52 = vpop.xlane.xlu1 %5972  ;;  %v6101_v0 = vmul.f32 %v22530_v25, %v5447_v61 }
 0x374   : > { %27569 = vst [vmem:[#allocation109_spill] sm:$0xff] %v22728_v52  ;;  %v11047_v55 = vcombine.low %v11038_v3, %v11045_v36  ;;  %v6178_v23 = vpop.xlane.xlu0 %6177 }
 0x375   : > { %v6536_v36 = vadd.f32 %v6178_v23, %v21616_v49 }
 0x376   : > { %v11061_v31 = vrot.slane %v11047_v55, %v22641_v47 }
 0x377   : > { %v22733_v42 = vpop.xlane.xlu1 %5978  ;;  %v6674_v61 = vadd.f32 %v22578_v58, %v6536_v36 }
 0x378   : > { %27570 = vst [vmem:[#allocation110_spill] sm:$0xff] %v22733_v42  ;;  %v5154_v42 = vadd.f32 %v22513_v33, %v22637_v20 }
 0x379   : > { %v7325_v36 = vrot.slane %v6674_v61, %v22604_v13 }
 0x37b   : > { %v22741_v9 = vpop.xlane.xlu1 %5984 }
 0x37c   : > { %27571 = vst [vmem:[#allocation111_spill] sm:$0xff] %v22741_v9  ;;  %v7313_v9 = vrot.slane %v6674_v61, %v22595_v17 }
 0x37d   : > { %17317 = vperm.xlu0 %19740, %v11552_v10   ;;  %v11024_v10 = vrot.slane %v11014_v19, %v22641_v47  ;;  %v6538_v19 = vadd.f32 %v6184_v18, %v21656_v48 }
 0x37f   : > { %v22746_v4 = vpop.xlane.xlu1 %5990 }
 0x380   : > { %27572 = vst [vmem:[#allocation112_spill] sm:$0xff] %v22746_v4  ;;  %v7317_v4 = vrot.slane %v6674_v61, %v22598_v14 }
 0x381   : > { %17311 = vperm.xlu0 %19740, %v11454_v7   ;;  %v11046_v7 = vcombine.low %v11024_v10, %v11031_v34  ;;  %v6676_v34 = vadd.f32 %v22578_v58, %v6538_v19 }
 0x383   : > { %v11054_v24 = vrot.slane %v11046_v7, %v22641_v47  ;;  %v22752_v3 = vpop.xlane.xlu1 %5996  ;;  %v6410_v7 = vsel %vm6139_vm2, %v6101_v0, 0.0  ;;  %v7369_v55 = vrot.slane %v6676_v34, %v22568_v63  ;;  %v7373_v48 = vrot.slane %v6676_v34, %v22585_v37 }
 0x384   : > { %27573 = vst [vmem:[#allocation113_spill] sm:$0xff] %v22752_v3  ;;  %v7377_v6 = vrot.slane %v6676_v34, %v22595_v17  ;;  %v7393_v18 = vrot.slane %v6676_v34, %v22609_v40  ;;  %v7397_v49 = vrot.slane %v6676_v34, %v22614_v27  ;;  %v7309_v3 = vrot.slane %v6674_v61, %v22585_v37 }
 0x385   : > { %v11062_v45 = vcombine.low %v11054_v24, %v11061_v31  ;;  %v7385_v24 = vrot.slane %v6676_v34, %v22601_v5  ;;  %v7389_v31 = vrot.slane %v6676_v34, %v22604_v13 }
 0x387   : > { %v11702_v0 = vcombine.low %v7385_v24, %v7389_v31 }
 0x388   : > { %6378 = vadd.xlane.f32.xlu1 %v6377_v62  ;;  %v5199_v62 = vadd.f32 %v22513_v33, %v5198_v51  ;;  %v7381_v51 = vrot.slane %v6676_v34, %v22598_v14  ;;  %v7321_v34 = vrot.slane %v6674_v61, %v22601_v5 }
 0x38a   : > { %v5445_v10 = vmax.f32 %v5199_v62, 0.0  ;;  %v22766_v62 = vpop.xlane.xlu1 %6002  ;;  %v11701_v23 = vcombine.low %v7377_v6, %v7381_v51  ;;  %v11724_v51 = vrot.slane %v11702_v0, %v22641_v47 }
 0x38b   : > { %27574 = vst [vmem:[#allocation114_spill] sm:$0xff] %v22766_v62  ;;  %v7329_v62 = vrot.slane %v6674_v61, %v22609_v40 }
 0x38c   : > { %v6099_v43 = vmul.f32 %v22530_v25, %v5445_v10  ;;  %v11703_v10 = vcombine.low %v7393_v18, %v7397_v49  ;;  %v11717_v6 = vrot.slane %v11701_v23, %v22641_v47  ;;  %v11603_v18 = vcombine.low %v7313_v9, %v7317_v4 }
 0x38d   : > { %v11604_v49 = vcombine.low %v7321_v34, %v7325_v36 }
 0x38e   : > { %v6404_v19 = vsel %vm6139_vm2, %v6099_v43, 0.0  ;;  %v7333_v43 = vrot.slane %v6674_v61, %v22614_v27  ;;  %v11731_v24 = vrot.slane %v11703_v10, %v22641_v47  ;;  %v11619_v23 = vrot.slane %v11603_v18, %v22641_v47 }
 0x38f   : > { %v11626_v0 = vrot.slane %v11604_v49, %v22641_v47 }
 0x399   : > { %17287 = vperm.xlu1 %19741, %v11062_v45   ;;  %v11700_v45 = vcombine.low %v7369_v55, %v7373_v48  ;;  %v6151_v55 = vpop.xlane.xlu1 %6150 }
 0x39a   : > { %v6527_v52 = vadd.f32 %v6151_v55, %v21757_v44 }
 0x39b   : > { %v11710_v48 = vrot.slane %v11700_v45, %v22641_v47 }
 0x39c   : > { %v6665_v9 = vadd.f32 %v22578_v58, %v6527_v52 }
 0x39d   : > { %v11732_v8 = vcombine.low %v11710_v48, %v11717_v6  ;;  %v6145_v60 = vpop.xlane.xlu1 %6144 }
 0x39e   : > { %v6525_v4 = vadd.f32 %v6145_v60, %v21432_v22  ;;  %v7017_v34 = vrot.slane %v6665_v9, %v22568_v63  ;;  %v7021_v36 = vrot.slane %v6665_v9, %v22585_v37  ;;  %v7029_v55 = vrot.slane %v6665_v9, %v22598_v14 }
 0x39f   : > { %v11740_v44 = vrot.slane %v11732_v8, %v22641_v47  ;;  %v7033_v48 = vrot.slane %v6665_v9, %v22601_v5  ;;  %v7037_v52 = vrot.slane %v6665_v9, %v22604_v13  ;;  %v7041_v22 = vrot.slane %v6665_v9, %v22609_v40 }
 0x3a0   : > { %6411 = vadd.xlane.f32.xlu0 %v6410_v7  ;;  %v7305_v7 = vrot.slane %v6674_v61, %v22568_v63  ;;  %v11733_v61 = vcombine.low %v11724_v51, %v11731_v24  ;;  %v7045_v8 = vrot.slane %v6665_v9, %v22614_v27  ;;  %v6663_v60 = vadd.f32 %v22578_v58, %v6525_v4 }
 0x3a1   : > { %v11161_v49 = vcombine.low %v7017_v34, %v7021_v36 }
 0x3a2   : > { %v11602_v31 = vcombine.low %v7305_v7, %v7309_v3  ;;  %v5434_v3 = vmax.f32 %v5154_v42, 0.0  ;;  %v11747_v20 = vrot.slane %v11733_v61, %v22641_v47  ;;  %v27575_v42 = vld [vmem:[#allocation13_spill] sm:$0xff]  ;;  %v11163_v61 = vcombine.low %v7033_v48, %v7037_v52 }
 0x3a3   : > { %v6530_v6 = vadd.f32 %v22626_v50, %v27575_v42  ;;  %v6969_v50 = vrot.slane %v6663_v60, %v22601_v5  ;;  %v6973_v4 = vrot.slane %v6663_v60, %v22604_v13  ;;  %v11171_v34 = vrot.slane %v11161_v49, %v22641_v47 }
 0x3a4   : > { %6405 = vadd.xlane.f32.xlu0 %v6404_v19  ;;  %v11605_v19 = vcombine.low %v7329_v62, %v7333_v43  ;;  %v11612_v45 = vrot.slane %v11602_v31, %v22641_v47  ;;  %v7025_v43 = vrot.slane %v6665_v9, %v22595_v17  ;;  %v6088_v51 = vmul.f32 %v22530_v25, %v5434_v3 }
 0x3a5   : > { %v11748_v24 = vcombine.low %v11740_v44, %v11747_v20  ;;  %v6965_v9 = vrot.slane %v6663_v60, %v22598_v14  ;;  %v6977_v3 = vrot.slane %v6663_v60, %v22609_v40  ;;  %v6981_v44 = vrot.slane %v6663_v60, %v22614_v27 }
 0x3a6   : > { %v11633_v10 = vrot.slane %v11605_v19, %v22641_v47  ;;  %v11634_v62 = vcombine.low %v11612_v45, %v11619_v23  ;;  %v11162_v19 = vcombine.low %v7025_v43, %v7029_v55  ;;  %v11164_v45 = vcombine.low %v7041_v22, %v7045_v8 }
 0x3a7   : > { %v6953_v23 = vrot.slane %v6663_v60, %v22568_v63  ;;  %v6668_v20 = vadd.f32 %v22578_v58, %v6530_v6  ;;  %v11185_v43 = vrot.slane %v11163_v61, %v22641_v47  ;;  %v11065_v22 = vcombine.low %v6969_v50, %v6973_v4 }
 0x3a8   : > { %v11635_v7 = vcombine.low %v11626_v0, %v11633_v10  ;;  %v11642_v31 = vrot.slane %v11634_v62, %v22641_v47  ;;  %v6957_v0 = vrot.slane %v6663_v60, %v22585_v37  ;;  %v6961_v10 = vrot.slane %v6663_v60, %v22595_v17 }
 0x3a9   : > { %v6371_v62 = vsel %vm6139_vm2, %v6088_v51, 0.0  ;;  %v11178_v36 = vrot.slane %v11162_v19, %v22641_v47  ;;  %v11192_v55 = vrot.slane %v11164_v45, %v22641_v47  ;;  %v11066_v8 = vcombine.low %v6977_v3, %v6981_v44  ;;  %v22832_v44 = vpop.f32.mrf.mxu1 }
 0x3aa   : > { %v11649_v18 = vrot.slane %v11635_v7, %v22641_v47  ;;  %v11063_v48 = vcombine.low %v6953_v23, %v6957_v0  ;;  %v11064_v52 = vcombine.low %v6961_v10, %v6965_v9  ;;  %v7113_v60 = vrot.slane %v6668_v20, %v22568_v63 }
 0x3ab   : > { %v7117_v42 = vrot.slane %v6668_v20, %v22585_v37  ;;  %v7121_v6 = vrot.slane %v6668_v20, %v22595_v17  ;;  %v7125_v51 = vrot.slane %v6668_v20, %v22598_v14  ;;  %v7141_v49 = vrot.slane %v6668_v20, %v22614_v27 }
 0x3ac   : > { %v11650_v7 = vcombine.low %v11642_v31, %v11649_v18  ;;  %v7133_v31 = vrot.slane %v6668_v20, %v22604_v13  ;;  %v7137_v18 = vrot.slane %v6668_v20, %v22609_v40  ;;  %v11193_v19 = vcombine.low %v11171_v34, %v11178_v36 }
 0x3ad   : > { %v11194_v61 = vcombine.low %v11185_v43, %v11192_v55  ;;  %v11073_v45 = vrot.slane %v11063_v48, %v22641_v47  ;;  %v11080_v23 = vrot.slane %v11064_v52, %v22641_v47  ;;  %v11087_v0 = vrot.slane %v11065_v22, %v22641_v47  ;;  %v22840_v52 = vpop.f32.mrf.mxu1 }
 0x3ae   : > { %v11094_v10 = vrot.slane %v11066_v8, %v22641_v47  ;;  %v11308_v9 = vcombine.low %v7113_v60, %v7117_v42  ;;  %v11309_v50 = vcombine.low %v7121_v6, %v7125_v51  ;;  %v11311_v3 = vcombine.low %v7137_v18, %v7141_v49 }
 0x3af   : > { %v19665_v51 = vpop.f32.mrf.mxu1 }
 0x3b0   : > { %v11096_v34 = vcombine.low %v11087_v0, %v11094_v10  ;;  %v11318_v36 = vrot.slane %v11308_v9, %v22641_v47  ;;  %v11325_v43 = vrot.slane %v11309_v50, %v22641_v47  ;;  %v11339_v48 = vrot.slane %v11311_v3, %v22641_v47 }
 0x3b2   : > { %v11110_v60 = vrot.slane %v11096_v34, %v22641_v47  ;;  %v11340_v42 = vcombine.low %v11318_v36, %v11325_v43 }
 0x3b4   : > { %v11348_v18 = vrot.slane %v11340_v42, %v22641_v47 }
 0x3ba   : > { %17329 = vperm.xlu0 %19740, %v11748_v24   ;;  %v7129_v24 = vrot.slane %v6668_v20, %v22601_v5  ;;  %v11208_v20 = vrot.slane %v11194_v61, %v22641_v47  ;;  %v6196_v61 = vpop.xlane.xlu0 %6195 }
 0x3bb   : > { %v6542_v10 = vadd.f32 %v6196_v61, %v21731_v15 }
 0x3bc   : > { %v11310_v4 = vcombine.low %v7129_v24, %v7133_v31  ;;  %v5223_v24 = vadd.f32 %v22513_v33, %v19665_v51 }
 0x3bd   : > { %6372 = vadd.xlane.f32.xlu1 %v6371_v62  ;;  %v11201_v62 = vrot.slane %v11193_v19, %v22641_v47  ;;  %v5214_v19 = vpop.f32.mrf.mxu1  ;;  %v6680_v3 = vadd.f32 %v22578_v58, %v6542_v10 }
 0x3be   : > { %17323 = vperm.xlu0 %19740, %v11650_v7   ;;  %v11095_v7 = vcombine.low %v11073_v45, %v11080_v23  ;;  %v11332_v55 = vrot.slane %v11310_v4, %v22641_v47  ;;  %v5451_v45 = vmax.f32 %v5223_v24, 0.0  ;;  %v5215_v23 = vadd.f32 %v22513_v33, %v5214_v19  ;;  %v6190_v4 = vpop.xlane.xlu0 %6189 }
 0x3bf   : > { %v11209_v22 = vcombine.low %v11201_v62, %v11208_v20  ;;  %v6540_v62 = vadd.f32 %v6190_v4, %v21692_v29  ;;  %v7497_v34 = vrot.slane %v6680_v3, %v22568_v63  ;;  %v7501_v36 = vrot.slane %v6680_v3, %v22585_v37 }
 0x3c0   : > { %v11103_v8 = vrot.slane %v11095_v7, %v22641_v47  ;;  %v11341_v6 = vcombine.low %v11332_v55, %v11339_v48  ;;  %v6105_v9 = vmul.f32 %v22530_v25, %v5451_v45  ;;  %v5449_v50 = vmax.f32 %v5215_v23, 0.0 }
 0x3c1   : > { %v7505_v15 = vrot.slane %v6680_v3, %v22595_v17  ;;  %v7509_v43 = vrot.slane %v6680_v3, %v22598_v14  ;;  %v7513_v55 = vrot.slane %v6680_v3, %v22601_v5  ;;  %v7517_v48 = vrot.slane %v6680_v3, %v22604_v13 }
 0x3c2   : > { %v11111_v31 = vcombine.low %v11103_v8, %v11110_v60  ;;  %v11355_v49 = vrot.slane %v11341_v6, %v22641_v47  ;;  %v6103_v20 = vmul.f32 %v22530_v25, %v5449_v50  ;;  %v6422_v7 = vsel %vm6139_vm2, %v6105_v9, 0.0 }
 0x3c3   : > { %v7525_v29 = vrot.slane %v6680_v3, %v22614_v27  ;;  %v6678_v8 = vadd.f32 %v22578_v58, %v6540_v62  ;;  %v11896_v42 = vcombine.low %v7497_v34, %v7501_v36  ;;  %v11897_v6 = vcombine.low %v7505_v15, %v7509_v43  ;;  %v27576_v34 = vld [vmem:[#allocation12_spill] sm:$0xff] }
 0x3c4   : > { %v11356_v0 = vcombine.low %v11348_v18, %v11355_v49  ;;  %v6416_v60 = vsel %vm6139_vm2, %v6103_v20, 0.0  ;;  %v11898_v51 = vcombine.low %v7513_v55, %v7517_v48  ;;  %v6528_v36 = vadd.f32 %v22647_v59, %v27576_v34 }
 0x3c5   : > { %v7437_v18 = vrot.slane %v6678_v8, %v22585_v37  ;;  %v7441_v49 = vrot.slane %v6678_v8, %v22595_v17  ;;  %v7445_v19 = vrot.slane %v6678_v8, %v22598_v14  ;;  %v7449_v61 = vrot.slane %v6678_v8, %v22601_v5 }
 0x3c6   : > { %v7453_v45 = vrot.slane %v6678_v8, %v22604_v13  ;;  %v7457_v23 = vrot.slane %v6678_v8, %v22609_v40  ;;  %v11906_v10 = vrot.slane %v11896_v42, %v22641_v47  ;;  %v11913_v9 = vrot.slane %v11897_v6, %v22641_v47 }
 0x3c7   : > { %v11920_v50 = vrot.slane %v11898_v51, %v22641_v47  ;;  %v11799_v62 = vcombine.low %v7441_v49, %v7445_v19  ;;  %v5178_v15 = vadd.f32 %v22513_v33, %v22652_v11 }
 0x3c8   : > { %v11800_v20 = vcombine.low %v7449_v61, %v7453_v45  ;;  %v11928_v43 = vcombine.low %v11906_v10, %v11913_v9 }
 0x3c9   : > { %v5440_v42 = vmax.f32 %v5178_v15, 0.0 }
 0x3ca   : > { %v11936_v6 = vrot.slane %v11928_v43, %v22641_v47  ;;  %v22903_v43 = vpop.f32.mrf.mxu1 }
 0x3cb   : > { %v6094_v33 = vmul.f32 %v22530_v25, %v5440_v42 }
 0x3cd   : > { %v6389_v9 = vsel %vm6139_vm2, %v6094_v33, 0.0 }
 0x3ce   : > { %17296 = vperm.xlu1 %19741, %v11209_v22   ;;  %v7521_v22 = vrot.slane %v6680_v3, %v22609_v40 }
 0x3d0   : > { %v11899_v24 = vcombine.low %v7521_v22, %v7525_v29  ;;  %v11815_v22 = vrot.slane %v11799_v62, %v22641_v47  ;;  %v11822_v29 = vrot.slane %v11800_v20, %v22641_v47 }
 0x3d2   : > { %17290 = vperm.xlu1 %19741, %v11111_v31   ;;  %v7433_v31 = vrot.slane %v6678_v8, %v22568_v63  ;;  %v11927_v4 = vrot.slane %v11899_v24, %v22641_v47 }
 0x3d4   : > { %v11798_v3 = vcombine.low %v7433_v31, %v7437_v18  ;;  %v11929_v55 = vcombine.low %v11920_v50, %v11927_v4 }
 0x3d6   : > { %17305 = vperm.xlu1 %19741, %v11356_v0   ;;  %v7461_v0 = vrot.slane %v6678_v8, %v22614_v27  ;;  %v11808_v48 = vrot.slane %v11798_v3, %v22641_v47  ;;  %v11943_v59 = vrot.slane %v11929_v55, %v22641_v47 }
 0x3d8   : > { %v11830_v51 = vcombine.low %v11808_v48, %v11815_v22  ;;  %v11944_v11 = vcombine.low %v11936_v6, %v11943_v59  ;;  %v22905_v22 = vpop.f32.mrf.mxu1  ;;  %v6208_v6 = vpop.xlane.xlu0 %6207  ;;  %v22912_v59 = vld [vmem:[%s27334_s10] ss:$0 sm:$0xff] }
 0x3dd   : > { %6423 = vadd.xlane.f32.xlu0 %v6422_v7  ;;  %v11801_v7 = vcombine.low %v7457_v23, %v7461_v0  ;;  %v11838_v23 = vrot.slane %v11830_v51, %v22641_v47 }
 0x3df   : > { %v11829_v8 = vrot.slane %v11801_v7, %v22641_v47 }
 0x3e1   : > { %6417 = vadd.xlane.f32.xlu0 %v6416_v60  ;;  %v6666_v60 = vadd.f32 %v22578_v58, %v6528_v36  ;;  %v11831_v24 = vcombine.low %v11822_v29, %v11829_v8 }
 0x3e3   : > { %v7049_v31 = vrot.slane %v6666_v60, %v22568_v63  ;;  %v7053_v18 = vrot.slane %v6666_v60, %v22585_v37  ;;  %v7057_v49 = vrot.slane %v6666_v60, %v22595_v17  ;;  %v7061_v19 = vrot.slane %v6666_v60, %v22598_v14 }
 0x3e4   : > { %v7065_v61 = vrot.slane %v6666_v60, %v22601_v5  ;;  %v7069_v45 = vrot.slane %v6666_v60, %v22604_v13  ;;  %v11845_v0 = vrot.slane %v11831_v24, %v22641_v47  ;;  %v7073_v10 = vrot.slane %v6666_v60, %v22609_v40 }
 0x3e5   : > { %v7077_v25 = vrot.slane %v6666_v60, %v22614_v27  ;;  %v11210_v50 = vcombine.low %v7049_v31, %v7053_v18  ;;  %v11211_v3 = vcombine.low %v7057_v49, %v7061_v19  ;;  %v19669_v60 = vpop.f32.mrf.mxu1  ;;  %v6546_v31 = vadd.f32 %v6208_v6, %v21806_v46  ;;  %v6202_v18 = vpop.xlane.xlu0 %6201  ;;  %v22921_v19 = vld [vmem:[%s27336_s12] ss:$0 sm:$0xff] }
 0x3e6   : > { %v11846_v4 = vcombine.low %v11838_v23, %v11845_v0  ;;  %v11212_v62 = vcombine.low %v7065_v61, %v7069_v45  ;;  %v5239_v51 = vadd.f32 %v22912_v59, %v19669_v60  ;;  %v6544_v49 = vadd.f32 %v6202_v18, %v21768_v53  ;;  %v6163_v46 = vpop.xlane.xlu1 %6162 }
 0x3e7   : > { %v11213_v20 = vcombine.low %v7073_v10, %v7077_v25  ;;  %v11220_v7 = vrot.slane %v11210_v50, %v22641_v47  ;;  %v11227_v34 = vrot.slane %v11211_v3, %v22641_v47  ;;  %v5230_v24 = vpop.f32.mrf.mxu1  ;;  %v6684_v23 = vadd.f32 %v22578_v58, %v6546_v31 }
 0x3e8   : > { %v11234_v36 = vrot.slane %v11212_v62, %v22641_v47  ;;  %v5455_v33 = vmax.f32 %v5239_v51, 0.0  ;;  %v6682_v0 = vadd.f32 %v22578_v58, %v6544_v49 }
 0x3e9   : > { %v11241_v15 = vrot.slane %v11213_v20, %v22641_v47  ;;  %v11242_v55 = vcombine.low %v11220_v7, %v11227_v34  ;;  %v7629_v53 = vrot.slane %v6684_v23, %v22585_v37  ;;  %v7633_v50 = vrot.slane %v6684_v23, %v22595_v17 }
 0x3ea   : > { %v6109_v61 = vmul.f32 %v22921_v19, %v5455_v33  ;;  %v7641_v3 = vrot.slane %v6684_v23, %v22601_v5  ;;  %v7645_v62 = vrot.slane %v6684_v23, %v22604_v13  ;;  %v7649_v20 = vrot.slane %v6684_v23, %v22609_v40 }
 0x3eb   : > { %v11243_v48 = vcombine.low %v11234_v36, %v11241_v15  ;;  %v11250_v29 = vrot.slane %v11242_v55, %v22641_v47  ;;  %v7653_v7 = vrot.slane %v6684_v23, %v22614_v27  ;;  %v6531_v34 = vadd.f32 %v6163_v46, %v21828_v39 }
 0x3ec   : > { %v6434_v25 = vsel %vm6139_vm2, %v6109_v61, 0.0  ;;  %v5170_v36 = vadd.f32 %v22912_v59, %v22659_v41  ;;  %v7561_v60 = vrot.slane %v6682_v0, %v22568_v63  ;;  %v7569_v6 = vrot.slane %v6682_v0, %v22595_v17 }
 0x3ed   : > { %v11257_v8 = vrot.slane %v11243_v48, %v22641_v47  ;;  %v7573_v51 = vrot.slane %v6682_v0, %v22598_v14  ;;  %v7577_v39 = vrot.slane %v6682_v0, %v22601_v5  ;;  %v7585_v41 = vrot.slane %v6682_v0, %v22609_v40 }
 0x3ee   : > { %v7589_v33 = vrot.slane %v6682_v0, %v22614_v27 }
 0x3ef   : > { %v11258_v42 = vcombine.low %v11250_v29, %v11257_v8  ;;  %v12094_v29 = vcombine.low %v7641_v3, %v7645_v62  ;;  %v12095_v8 = vcombine.low %v7649_v20, %v7653_v7 }
 0x3f1   : > { %v12116_v49 = vrot.slane %v12094_v29, %v22641_v47  ;;  %v12123_v61 = vrot.slane %v12095_v8, %v22641_v47 }
 0x3f7   : > { %17341 = vperm.xlu0 %19740, %v11944_v11   ;;  %v5231_v11 = vadd.f32 %v22912_v59, %v5230_v24  ;;  %v7581_v24 = vrot.slane %v6682_v0, %v22604_v13 }
 0x3f9   : > { %v5453_v45 = vmax.f32 %v5231_v11, 0.0  ;;  %v5438_v11 = vmax.f32 %v5170_v36, 0.0  ;;  %v11996_v46 = vcombine.low %v7577_v39, %v7581_v24 }
 0x3fa   : > { %6390 = vadd.xlane.f32.xlu1 %v6389_v9  ;;  %v7625_v9 = vrot.slane %v6684_v23, %v22568_v63 }
 0x3fb   : > { %17335 = vperm.xlu0 %19740, %v11846_v4   ;;  %v6107_v10 = vmul.f32 %v22921_v19, %v5453_v45  ;;  %v7637_v4 = vrot.slane %v6684_v23, %v22598_v14  ;;  %v6669_v45 = vadd.f32 %v22578_v58, %v6531_v34  ;;  %v6157_v23 = vpop.xlane.xlu1 %6156  ;;  %v12018_v20 = vrot.slane %v11996_v46, %v22641_v47 }
 0x3fc   : > { %v12092_v55 = vcombine.low %v7625_v9, %v7629_v53  ;;  %v11997_v9 = vcombine.low %v7585_v41, %v7589_v33  ;;  %v6529_v53 = vadd.f32 %v6157_v23, %v21793_v28 }
 0x3fd   : > { %v6428_v15 = vsel %vm6139_vm2, %v6107_v10, 0.0  ;;  %v12093_v48 = vcombine.low %v7633_v50, %v7637_v4  ;;  %v12125_v4 = vcombine.low %v12116_v49, %v12123_v61  ;;  %v7145_v7 = vrot.slane %v6669_v45, %v22568_v63 }
 0x3fe   : > { %v12102_v31 = vrot.slane %v12092_v55, %v22641_v47  ;;  %v12025_v34 = vrot.slane %v11997_v9, %v22641_v47  ;;  %v7149_v36 = vrot.slane %v6669_v45, %v22585_v37  ;;  %v7157_v28 = vrot.slane %v6669_v45, %v22598_v14 }
 0x3ff   : > { %v12109_v18 = vrot.slane %v12093_v48, %v22641_v47  ;;  %v7161_v55 = vrot.slane %v6669_v45, %v22601_v5  ;;  %v7165_v48 = vrot.slane %v6669_v45, %v22604_v13  ;;  %v7169_v29 = vrot.slane %v6669_v45, %v22609_v40 }
 0x400   : > { %v7173_v8 = vrot.slane %v6669_v45, %v22614_v27  ;;  %v12027_v24 = vcombine.low %v12018_v20, %v12025_v34  ;;  %v11357_v41 = vcombine.low %v7145_v7, %v7149_v36 }
 0x401   : > { %v12124_v50 = vcombine.low %v12102_v31, %v12109_v18 }
 0x402   : > { %v11360_v31 = vcombine.low %v7169_v29, %v7173_v8 }
 0x40b   : > { %17299 = vperm.xlu1 %19741, %v11258_v42   ;;  %v7565_v42 = vrot.slane %v6682_v0, %v22585_v37  ;;  %v6092_v0 = vmul.f32 %v22921_v19, %v5438_v11  ;;  %v11359_v11 = vcombine.low %v7161_v55, %v7165_v48 }
 0x40d   : > { %v11994_v10 = vcombine.low %v7561_v60, %v7565_v42  ;;  %v6667_v60 = vadd.f32 %v22578_v58, %v6529_v53  ;;  %v6383_v42 = vsel %vm6139_vm2, %v6092_v0, 0.0  ;;  %v12041_v0 = vrot.slane %v12027_v24, %v22641_v47  ;;  %v22991_v24 = vpop.f32.mrf.mxu1 }
 0x40f   : > { %v12004_v3 = vrot.slane %v11994_v10, %v22641_v47  ;;  %v7081_v18 = vrot.slane %v6667_v60, %v22568_v63  ;;  %v7085_v49 = vrot.slane %v6667_v60, %v22585_v37  ;;  %v7089_v61 = vrot.slane %v6667_v60, %v22595_v17 }
 0x410   : > { %v7097_v23 = vrot.slane %v6667_v60, %v22601_v5  ;;  %v7101_v10 = vrot.slane %v6667_v60, %v22604_v13  ;;  %v7109_v46 = vrot.slane %v6667_v60, %v22614_v27 }
 0x411   : > { %v11259_v20 = vcombine.low %v7081_v18, %v7085_v49 }
 0x412   : > { %v11261_v34 = vcombine.low %v7097_v23, %v7101_v10 }
 0x413   : > { %v11269_v48 = vrot.slane %v11259_v20, %v22641_v47 }
 0x414   : > { %v11283_v8 = vrot.slane %v11261_v34, %v22641_v47  ;;  %v6175_v34 = vpop.xlane.xlu1 %6174 }
 0x41a   : > { %6435 = vadd.xlane.f32.xlu0 %v6434_v25  ;;  %v11995_v25 = vcombine.low %v7569_v6, %v7573_v51  ;;  %v12132_v6 = vrot.slane %v12124_v50, %v22641_v47  ;;  %v12139_v51 = vrot.slane %v12125_v4, %v22641_v47  ;;  %v11367_v50 = vrot.slane %v11357_v41, %v22641_v47 }
 0x41c   : > { %v12011_v62 = vrot.slane %v11995_v25, %v22641_v47  ;;  %v7105_v25 = vrot.slane %v6667_v60, %v22609_v40  ;;  %v12140_v9 = vcombine.low %v12132_v6, %v12139_v51 }
 0x41e   : > { %6429 = vadd.xlane.f32.xlu0 %v6428_v15  ;;  %v7153_v15 = vrot.slane %v6669_v45, %v22595_v17  ;;  %v12026_v39 = vcombine.low %v12004_v3, %v12011_v62  ;;  %v7093_v45 = vrot.slane %v6667_v60, %v22598_v14  ;;  %v11381_v3 = vrot.slane %v11359_v11, %v22641_v47 }
 0x41f   : > { %v11388_v62 = vrot.slane %v11360_v31, %v22641_v47  ;;  %v11262_v36 = vcombine.low %v7105_v25, %v7109_v46  ;;  %v22995_v31 = vpop.f32.mrf.mxu1 }
 0x420   : > { %v11358_v33 = vcombine.low %v7153_v15, %v7157_v28  ;;  %v12034_v53 = vrot.slane %v12026_v39, %v22641_v47  ;;  %v11260_v7 = vcombine.low %v7089_v61, %v7093_v45  ;;  %v6220_v61 = vpop.xlane.xlu0 %6219 }
 0x421   : > { %v11390_v55 = vcombine.low %v11381_v3, %v11388_v62  ;;  %v11290_v60 = vrot.slane %v11262_v36, %v22641_v47  ;;  %v19673_v49 = vpop.f32.mrf.mxu1  ;;  %v6550_v10 = vadd.f32 %v6220_v61, %v21875_v1 }
 0x422   : > { %v11374_v4 = vrot.slane %v11358_v33, %v22641_v47  ;;  %v12042_v15 = vcombine.low %v12034_v53, %v12041_v0  ;;  %v11276_v29 = vrot.slane %v11260_v7, %v22641_v47  ;;  %v5255_v45 = vadd.f32 %v22912_v59, %v19673_v49 }
 0x423   : > { %v11404_v6 = vrot.slane %v11390_v55, %v22641_v47  ;;  %v11292_v39 = vcombine.low %v11283_v8, %v11290_v60  ;;  %v5246_v23 = vpop.f32.mrf.mxu1  ;;  %v6688_v0 = vadd.f32 %v22578_v58, %v6550_v10  ;;  %v5194_v8 = vadd.f32 %v22912_v59, %v22731_v38 }
 0x424   : > { %v11389_v28 = vcombine.low %v11367_v50, %v11374_v4  ;;  %v11291_v51 = vcombine.low %v11269_v48, %v11276_v29  ;;  %v6214_v25 = vpop.xlane.xlu0 %6213  ;;  %v5459_v46 = vmax.f32 %v5255_v45, 0.0  ;;  %v6535_v29 = vadd.f32 %v6175_v34, %v21896_v54 }
 0x425   : > { %v11306_v11 = vrot.slane %v11292_v39, %v22641_v47  ;;  %v6548_v53 = vadd.f32 %v6214_v25, %v21839_v35  ;;  %v7753_v7 = vrot.slane %v6688_v0, %v22568_v63  ;;  %v7757_v1 = vrot.slane %v6688_v0, %v22585_v37 }
 0x426   : > { %v11299_v33 = vrot.slane %v11291_v51, %v22641_v47  ;;  %v6113_v50 = vmul.f32 %v22921_v19, %v5459_v46  ;;  %v7761_v36 = vrot.slane %v6688_v0, %v22595_v17  ;;  %v7765_v35 = vrot.slane %v6688_v0, %v22598_v14 }
 0x427   : > { %v6686_v3 = vadd.f32 %v22578_v58, %v6548_v53  ;;  %v7777_v55 = vrot.slane %v6688_v0, %v22609_v40  ;;  %v7781_v48 = vrot.slane %v6688_v0, %v22614_v27  ;;  %v5186_v60 = vadd.f32 %v22912_v59, %v22735_v57 }
 0x428   : > { %v11307_v18 = vcombine.low %v11299_v33, %v11306_v11  ;;  %v6446_v20 = vsel %vm6139_vm2, %v6113_v50, 0.0  ;;  %v12289_v51 = vcombine.low %v7761_v36, %v7765_v35  ;;  %v6673_v45 = vadd.f32 %v22578_v58, %v6535_v29 }
 0x429   : > { %v12291_v33 = vcombine.low %v7777_v55, %v7781_v48  ;;  %v7693_v11 = vrot.slane %v6686_v3, %v22585_v37  ;;  %v7701_v54 = vrot.slane %v6686_v3, %v22598_v14  ;;  %v7705_v38 = vrot.slane %v6686_v3, %v22601_v5 }
 0x42a   : > { %v7709_v49 = vrot.slane %v6686_v3, %v22604_v13  ;;  %v7713_v57 = vrot.slane %v6686_v3, %v22609_v40  ;;  %v7717_v61 = vrot.slane %v6686_v3, %v22614_v27  ;;  %v5444_v10 = vmax.f32 %v5194_v8, 0.0 }
 0x42b   : > { %v5442_v25 = vmax.f32 %v5186_v60, 0.0  ;;  %v7273_v36 = vrot.slane %v6673_v45, %v22568_v63  ;;  %v7277_v55 = vrot.slane %v6673_v45, %v22585_v37  ;;  %v7285_v8 = vrot.slane %v6673_v45, %v22598_v14 }
 0x42c   : > { %v7289_v60 = vrot.slane %v6673_v45, %v22601_v5 }
 0x42f   : > { %6384 = vadd.xlane.f32.xlu1 %v6383_v42  ;;  %v11397_v42 = vrot.slane %v11389_v28, %v22641_v47  ;;  %v7773_v28 = vrot.slane %v6688_v0, %v22604_v13 }
 0x431   : > { %v11405_v41 = vcombine.low %v11397_v42, %v11404_v6  ;;  %v12288_v6 = vcombine.low %v7753_v7, %v7757_v1  ;;  %v6096_v1 = vmul.f32 %v22921_v19, %v5442_v25 }
 0x433   : > { %v12298_v46 = vrot.slane %v12288_v6, %v22641_v47  ;;  %v7297_v6 = vrot.slane %v6673_v45, %v22609_v40 }
 0x434   : > { %17353 = vperm.xlu0 %19740, %v12140_v9   ;;  %v5247_v9 = vadd.f32 %v22912_v59, %v5246_v23  ;;  %v6169_v23 = vpop.xlane.xlu1 %6168 }
 0x435   : > { %v6533_v7 = vadd.f32 %v6169_v23, %v21861_v32  ;;  %v7281_v32 = vrot.slane %v6673_v45, %v22595_v17 }
 0x436   : > { %v5457_v4 = vmax.f32 %v5247_v9, 0.0  ;;  %v12305_v9 = vrot.slane %v12289_v51, %v22641_v47  ;;  %v7301_v51 = vrot.slane %v6673_v45, %v22614_v27 }
 0x438   : > { %17347 = vperm.xlu0 %19740, %v12042_v15   ;;  %v6111_v62 = vmul.f32 %v22921_v19, %v5457_v4  ;;  %v7769_v15 = vrot.slane %v6688_v0, %v22601_v5  ;;  %v12319_v0 = vrot.slane %v12291_v33, %v22641_v47  ;;  %v12320_v34 = vcombine.low %v12298_v46, %v12305_v9 }
 0x439   : > { %v6395_v33 = vsel %vm6139_vm2, %v6096_v1, 0.0  ;;  %v11556_v23 = vcombine.low %v7297_v6, %v7301_v51 }
 0x43a   : > { %v6440_v42 = vsel %vm6139_vm2, %v6111_v62, 0.0  ;;  %v12290_v39 = vcombine.low %v7769_v15, %v7773_v28  ;;  %v12192_v62 = vcombine.low %v7705_v38, %v7709_v49  ;;  %v11553_v49 = vcombine.low %v7273_v36, %v7277_v55 }
 0x43c   : > { %v12312_v53 = vrot.slane %v12290_v39, %v22641_v47  ;;  %v12214_v48 = vrot.slane %v12192_v62, %v22641_v47  ;;  %v6671_v39 = vadd.f32 %v22578_v58, %v6533_v7  ;;  %v11563_v7 = vrot.slane %v11553_v49, %v22641_v47 }
 0x43e   : > { %v12321_v35 = vcombine.low %v12312_v53, %v12319_v0  ;;  %v7217_v25 = vrot.slane %v6671_v39, %v22595_v17  ;;  %v7221_v46 = vrot.slane %v6671_v39, %v22598_v14  ;;  %v7225_v9 = vrot.slane %v6671_v39, %v22601_v5 }
 0x43f   : > { %v7229_v53 = vrot.slane %v6671_v39, %v22604_v13  ;;  %v7233_v0 = vrot.slane %v6671_v39, %v22609_v40 }
 0x440   : > { %17308 = vperm.xlu1 %19741, %v11405_v41   ;;  %v7689_v41 = vrot.slane %v6686_v3, %v22568_v63 }
 0x442   : > { %v12190_v50 = vcombine.low %v7689_v41, %v7693_v11  ;;  %v12328_v11 = vrot.slane %v12320_v34, %v22641_v47  ;;  %v11584_v34 = vrot.slane %v11556_v23, %v22641_v47 }
 0x444   : > { %17302 = vperm.xlu1 %19741, %v11307_v18   ;;  %v7697_v18 = vrot.slane %v6686_v3, %v22595_v17  ;;  %v6098_v3 = vmul.f32 %v22921_v19, %v5444_v10  ;;  %v12200_v15 = vrot.slane %v12190_v50, %v22641_v47  ;;  %v7209_v10 = vrot.slane %v6671_v39, %v22568_v63 }
 0x445   : > { %v7237_v50 = vrot.slane %v6671_v39, %v22614_v27 }
 0x446   : > { %v12191_v4 = vcombine.low %v7697_v18, %v7701_v54  ;;  %v6401_v41 = vsel %vm6139_vm2, %v6098_v3, 0.0  ;;  %v12335_v18 = vrot.slane %v12321_v35, %v22641_v47  ;;  %v11456_v35 = vcombine.low %v7217_v25, %v7221_v46 }
 0x448   : > { %v12207_v28 = vrot.slane %v12191_v4, %v22641_v47  ;;  %v12336_v4 = vcombine.low %v12328_v11, %v12335_v18 }
 0x44a   : > { %v12222_v54 = vcombine.low %v12200_v15, %v12207_v28  ;;  %v11457_v15 = vcombine.low %v7225_v9, %v7229_v53  ;;  %v11458_v28 = vcombine.low %v7233_v0, %v7237_v50 }
 0x44c   : > { %v12230_v62 = vrot.slane %v12222_v54, %v22641_v47 }
 0x457   : > { %6447 = vadd.xlane.f32.xlu0 %v6446_v20  ;;  %v12193_v20 = vcombine.low %v7713_v57, %v7717_v61  ;;  %v11554_v57 = vcombine.low %v7281_v32, %v7285_v8  ;;  %v11472_v8 = vrot.slane %v11456_v35, %v22641_v47 }
 0x459   : > { %v12221_v29 = vrot.slane %v12193_v20, %v22641_v47  ;;  %v11570_v3 = vrot.slane %v11554_v57, %v22641_v47 }
 0x45b   : > { %6441 = vadd.xlane.f32.xlu0 %v6440_v42  ;;  %v7293_v42 = vrot.slane %v6673_v45, %v22604_v13  ;;  %v12223_v38 = vcombine.low %v12214_v48, %v12221_v29  ;;  %v7213_v45 = vrot.slane %v6671_v39, %v22585_v37  ;;  %v11585_v48 = vcombine.low %v11563_v7, %v11570_v3 }
 0x45d   : > { %v11555_v61 = vcombine.low %v7289_v60, %v7293_v42  ;;  %v12237_v20 = vrot.slane %v12223_v38, %v22641_v47  ;;  %v11455_v36 = vcombine.low %v7209_v10, %v7213_v45  ;;  %v11479_v60 = vrot.slane %v11457_v15, %v22641_v47  ;;  %v6232_v10 = vpop.xlane.xlu0 %6231  ;;  %v6187_v45 = vpop.xlane.xlu1 %6186 }
 0x45e   : > { %v11486_v42 = vrot.slane %v11458_v28, %v22641_v47  ;;  %v11593_v6 = vrot.slane %v11585_v48, %v22641_v47  ;;  %v6554_v9 = vadd.f32 %v6232_v10, %v21969_v56 }
 0x45f   : > { %v11577_v1 = vrot.slane %v11555_v61, %v22641_v47  ;;  %v12238_v55 = vcombine.low %v12230_v62, %v12237_v20  ;;  %v11465_v32 = vrot.slane %v11455_v36, %v22641_v47 }
 0x460   : > { %v6692_v62 = vadd.f32 %v22578_v58, %v6554_v9 }
 0x461   : > { %v11586_v29 = vcombine.low %v11577_v1, %v11584_v34  ;;  %v11487_v39 = vcombine.low %v11465_v32, %v11472_v8  ;;  %v6226_v53 = vpop.xlane.xlu0 %6225  ;;  %v5210_v32 = vadd.f32 %v22912_v59, %v22832_v44  ;;  %v5202_v8 = vadd.f32 %v22912_v59, %v22840_v52 }
 0x462   : > { %v6552_v20 = vadd.f32 %v6226_v53, %v21900_v21  ;;  %v7881_v1 = vrot.slane %v6692_v62, %v22568_v63  ;;  %v7885_v34 = vrot.slane %v6692_v62, %v22585_v37  ;;  %v7889_v36 = vrot.slane %v6692_v62, %v22595_v17 }
 0x463   : > { %v11600_v51 = vrot.slane %v11586_v29, %v22641_v47  ;;  %v11495_v18 = vrot.slane %v11487_v39, %v22641_v47  ;;  %v7893_v56 = vrot.slane %v6692_v62, %v22598_v14  ;;  %v7897_v35 = vrot.slane %v6692_v62, %v22601_v5 }
 0x464   : > { %v7901_v15 = vrot.slane %v6692_v62, %v22604_v13  ;;  %v7905_v28 = vrot.slane %v6692_v62, %v22609_v40  ;;  %v7909_v21 = vrot.slane %v6692_v62, %v22614_v27  ;;  %v6690_v48 = vadd.f32 %v22578_v58, %v6552_v20 }
 0x465   : > { %v11601_v11 = vcombine.low %v11593_v6, %v11600_v51  ;;  %v6539_v29 = vadd.f32 %v6187_v45, %v21946_v30  ;;  %v12485_v6 = vcombine.low %v7889_v36, %v7893_v56 }
 0x466   : > { %v12486_v51 = vcombine.low %v7897_v35, %v7901_v15  ;;  %v12487_v39 = vcombine.low %v7905_v28, %v7909_v21  ;;  %v7829_v30 = vrot.slane %v6690_v48, %v22598_v14  ;;  %v7833_v44 = vrot.slane %v6690_v48, %v22601_v5 }
 0x467   : > { %v7841_v52 = vrot.slane %v6690_v48, %v22609_v40  ;;  %v12501_v45 = vrot.slane %v12485_v6, %v22641_v47  ;;  %v6677_v9 = vadd.f32 %v22578_v58, %v6539_v29 }
 0x468   : > { %6402 = vadd.xlane.f32.xlu1 %v6401_v41  ;;  %v11488_v41 = vcombine.low %v11479_v60, %v11486_v42  ;;  %v12484_v42 = vcombine.low %v7881_v1, %v7885_v34  ;;  %v23122_v1 = vpop.xlane.xlu0 %6243 }
 0x469   : > { %v7401_v28 = vrot.slane %v6677_v9, %v22568_v63  ;;  %v7405_v21 = vrot.slane %v6677_v9, %v22585_v37  ;;  %v7413_v29 = vrot.slane %v6677_v9, %v22598_v14 }
 0x46a   : > { %v11502_v54 = vrot.slane %v11488_v41, %v22641_v47  ;;  %v7817_v41 = vrot.slane %v6690_v48, %v22568_v63  ;;  %v12494_v10 = vrot.slane %v12484_v42, %v22641_v47  ;;  %v7429_v42 = vrot.slane %v6677_v9, %v22614_v27 }
 0x46c   : > { %6396 = vadd.xlane.f32.xlu1 %v6395_v33  ;;  %v23073_v33 = vpop.f32.mrf.mxu1  ;;  %v11503_v49 = vcombine.low %v11495_v18, %v11502_v54  ;;  %v7825_v18 = vrot.slane %v6690_v48, %v22595_v17  ;;  %v7837_v54 = vrot.slane %v6690_v48, %v22604_v13  ;;  %v12516_v34 = vcombine.low %v12494_v10, %v12501_v45 }
 0x46e   : > { %v23077_v38 = vpop.f32.mrf.mxu1 }
 0x470   : > { %v19677_v57 = vpop.f32.mrf.mxu1 }
 0x471   : > { %17365 = vperm.xlu0 %19740, %v12336_v4   ;;  %v5271_v61 = vadd.f32 %v22912_v59, %v19677_v57  ;;  %v6181_v4 = vpop.xlane.xlu1 %6180  ;;  %v5448_v57 = vmax.f32 %v5210_v32, 0.0  ;;  %v7417_v32 = vrot.slane %v6677_v9, %v22601_v5 }
 0x472   : > { %v5262_v23 = vpop.f32.mrf.mxu1  ;;  %v6537_v20 = vadd.f32 %v6181_v4, %v21920_v2 }
 0x473   : > { %v5463_v25 = vmax.f32 %v5271_v61, 0.0  ;;  %v5263_v46 = vadd.f32 %v22912_v59, %v5262_v23  ;;  %v5446_v61 = vmax.f32 %v5202_v8, 0.0  ;;  %v7421_v8 = vrot.slane %v6677_v9, %v22604_v13 }
 0x474   : > { %v6675_v6 = vadd.f32 %v22578_v58, %v6537_v20 }
 0x475   : > { %17359 = vperm.xlu0 %19740, %v12238_v55   ;;  %v6117_v0 = vmul.f32 %v22921_v19, %v5463_v25  ;;  %v5461_v50 = vmax.f32 %v5263_v46, 0.0  ;;  %v23095_v55 = vpop.xlane.xlu1 %6198  ;;  %v12508_v25 = vrot.slane %v12486_v51, %v22641_v47  ;;  %v12515_v46 = vrot.slane %v12487_v39, %v22641_v47 }
 0x476   : > { %v7337_v10 = vrot.slane %v6675_v6, %v22568_v63  ;;  %v7341_v45 = vrot.slane %v6675_v6, %v22585_v37 }
 0x477   : > { %v6115_v7 = vmul.f32 %v22921_v19, %v5461_v50  ;;  %v6458_v3 = vsel %vm6139_vm2, %v6117_v0, 0.0  ;;  %v12387_v0 = vcombine.low %v7825_v18, %v7829_v30  ;;  %v12388_v50 = vcombine.low %v7833_v44, %v7837_v54 }
 0x478   : > { %v12517_v36 = vcombine.low %v12508_v25, %v12515_v46  ;;  %v7345_v25 = vrot.slane %v6675_v6, %v22595_v17  ;;  %v7349_v46 = vrot.slane %v6675_v6, %v22598_v14 }
 0x479   : > { %v6452_v60 = vsel %vm6139_vm2, %v6115_v7, 0.0  ;;  %v23112_v23 = vpop.xlane.xlu1 %6192  ;;  %v6102_v7 = vmul.f32 %v22921_v19, %v5448_v57  ;;  %v12403_v15 = vrot.slane %v12387_v0, %v22641_v47  ;;  %v12410_v2 = vrot.slane %v12388_v50, %v22641_v47 }
 0x47a   : > { %v12531_v18 = vrot.slane %v12517_v36, %v22641_v47  ;;  %v11751_v57 = vcombine.low %v7417_v32, %v7421_v8  ;;  %v7361_v0 = vrot.slane %v6675_v6, %v22609_v40  ;;  %v7365_v50 = vrot.slane %v6675_v6, %v22614_v27 }
 0x47b   : > { %v6413_v51 = vsel %vm6139_vm2, %v6102_v7, 0.0 }
 0x47d   : > { %17320 = vperm.xlu1 %19741, %v11601_v11   ;;  %v7821_v11 = vrot.slane %v6690_v48, %v22585_v37  ;;  %v23124_v56 = vpop.xlane.xlu1 %6210 }
 0x47f   : > { %v12386_v53 = vcombine.low %v7817_v41, %v7821_v11  ;;  %v23141_v41 = vpop.xlane.xlu0 %6237  ;;  %v12524_v11 = vrot.slane %v12516_v34, %v22641_v47 }
 0x481   : > { %17314 = vperm.xlu1 %19741, %v11503_v49   ;;  %v7845_v49 = vrot.slane %v6690_v48, %v22614_v27  ;;  %v12396_v35 = vrot.slane %v12386_v53, %v22641_v47  ;;  %v7409_v48 = vrot.slane %v6677_v9, %v22595_v17  ;;  %v23145_v54 = vpop.xlane.xlu1 %6204  ;;  %v7357_v53 = vrot.slane %v6675_v6, %v22604_v13 }
 0x483   : > { %v12389_v62 = vcombine.low %v7841_v52, %v7845_v49  ;;  %v12418_v30 = vcombine.low %v12396_v35, %v12403_v15  ;;  %v11749_v52 = vcombine.low %v7401_v28, %v7405_v21  ;;  %v11750_v49 = vcombine.low %v7409_v48, %v7413_v29 }
 0x484   : > { %v11773_v35 = vrot.slane %v11751_v57, %v22641_v47  ;;  %v11651_v21 = vcombine.low %v7337_v10, %v7341_v45  ;;  %v11654_v48 = vcombine.low %v7361_v0, %v7365_v50 }
 0x485   : > { %v12417_v4 = vrot.slane %v12389_v62, %v22641_v47  ;;  %v12532_v62 = vcombine.low %v12524_v11, %v12531_v18  ;;  %v12426_v20 = vrot.slane %v12418_v30, %v22641_v47  ;;  %v11759_v34 = vrot.slane %v11749_v52, %v22641_v47  ;;  %v23163_v28 = vpop.xlane.xlu1 %6222 }
 0x486   : > { %v11766_v36 = vrot.slane %v11750_v49, %v22641_v47  ;;  %v23175_v49 = vpop.f32.mrf.mxu1 }
 0x487   : > { %v12419_v44 = vcombine.low %v12410_v2, %v12417_v4  ;;  %v11652_v2 = vcombine.low %v7345_v25, %v7349_v46 }
 0x488   : > { %v11781_v32 = vcombine.low %v11759_v34, %v11766_v36  ;;  %v23183_v46 = vpop.f32.mrf.mxu1 }
 0x489   : > { %v12433_v7 = vrot.slane %v12419_v44, %v22641_v47  ;;  %v23171_v11 = vpop.xlane.xlu1 %6216 }
 0x48a   : > { %v11789_v18 = vrot.slane %v11781_v32, %v22641_v47  ;;  %v19681_v50 = vpop.f32.mrf.mxu1 }
 0x48b   : > { %v12434_v29 = vcombine.low %v12426_v20, %v12433_v7 }
 0x48c   : > { %v5278_v20 = vpop.f32.mrf.mxu1 }
 0x494   : > { %6459 = vadd.xlane.f32.xlu0 %v6458_v3  ;;  %v6100_v3 = vmul.f32 %v22921_v19, %v5446_v61 }
 0x496   : > { %v6407_v39 = vsel %vm6139_vm2, %v6100_v3, 0.0  ;;  %v23157_v3 = vpop.xlane.xlu0 %6255 }
 0x498   : > { %6453 = vadd.xlane.f32.xlu0 %v6452_v60  ;;  %v7425_v60 = vrot.slane %v6677_v9, %v22609_v40  ;;  %v7353_v9 = vrot.slane %v6675_v6, %v22601_v5 }
 0x49a   : > { %v11752_v61 = vcombine.low %v7425_v60, %v7429_v42  ;;  %v11653_v4 = vcombine.low %v7353_v9, %v7357_v53  ;;  %v11661_v60 = vrot.slane %v11651_v21, %v22641_v47  ;;  %v11668_v42 = vrot.slane %v11652_v2, %v22641_v47 }
 0x49b   : > { %v6556_v2 = vadd.f32 %v23141_v41, %v21982_v26 }
 0x49c   : > { %v11780_v15 = vrot.slane %v11752_v61, %v22641_v47  ;;  %v11675_v6 = vrot.slane %v11653_v4, %v22641_v47  ;;  %v11683_v44 = vcombine.low %v11661_v60, %v11668_v42  ;;  %v23179_v61 = vpop.xlane.xlu1 %6234 }
 0x49e   : > { %v11782_v8 = vcombine.low %v11773_v35, %v11780_v15  ;;  %v11691_v45 = vrot.slane %v11683_v44, %v22641_v47  ;;  %v5279_v35 = vadd.f32 %v22912_v59, %v5278_v20  ;;  %v6558_v15 = vadd.f32 %v23122_v1, %v21996_v12 }
 0x4a0   : > { %v11796_v30 = vrot.slane %v11782_v8, %v22641_v47  ;;  %v23187_v0 = vpop.xlane.xlu1 %6228  ;;  %v6696_v32 = vadd.f32 %v22578_v58, %v6558_v15  ;;  %v6694_v8 = vadd.f32 %v22578_v58, %v6556_v2 }
 0x4a2   : > { %v11797_v10 = vcombine.low %v11789_v18, %v11796_v30  ;;  %v8009_v12 = vrot.slane %v6696_v32, %v22568_v63  ;;  %v8013_v1 = vrot.slane %v6696_v32, %v22585_v37  ;;  %v8017_v26 = vrot.slane %v6696_v32, %v22595_v17 }
 0x4a3   : > { %v8021_v41 = vrot.slane %v6696_v32, %v22598_v14  ;;  %v8025_v18 = vrot.slane %v6696_v32, %v22601_v5  ;;  %v8029_v30 = vrot.slane %v6696_v32, %v22604_v13  ;;  %v8033_v44 = vrot.slane %v6696_v32, %v22609_v40 }
 0x4a4   : > { %v23192_v34 = vpop.xlane.xlu1 %6246  ;;  %v7945_v15 = vrot.slane %v6694_v8, %v22568_v63  ;;  %v7949_v2 = vrot.slane %v6694_v8, %v22585_v37 }
 0x4a5   : > { %6414 = vadd.xlane.f32.xlu1 %v6413_v51  ;;  %v11682_v51 = vrot.slane %v11654_v48, %v22641_v47  ;;  %v12681_v20 = vcombine.low %v8017_v26, %v8021_v41 }
 0x4a7   : > { %v11684_v52 = vcombine.low %v11675_v6, %v11682_v51  ;;  %v12697_v26 = vrot.slane %v12681_v20, %v22641_v47 }
 0x4a8   : > { %v23202_v48 = vpop.xlane.xlu1 %6240 }
 0x4a9   : > { %6408 = vadd.xlane.f32.xlu1 %v6407_v39  ;;  %v23169_v39 = vpop.xlane.xlu0 %6249  ;;  %v11698_v25 = vrot.slane %v11684_v52, %v22641_v47  ;;  %v8037_v52 = vrot.slane %v6696_v32, %v22614_v27  ;;  %v7969_v32 = vrot.slane %v6694_v8, %v22609_v40 }
 0x4ab   : > { %v11699_v9 = vcombine.low %v11691_v45, %v11698_v25  ;;  %v5226_v25 = vadd.f32 %v22912_v59, %v22903_v43  ;;  %v7957_v43 = vrot.slane %v6694_v8, %v22598_v14 }
 0x4ac   : > { %v23214_v51 = vpop.xlane.xlu1 %6258 }
 0x4ad   : > { %v23177_v57 = vpop.xlane.xlu0 %6267 }
 0x4ae   : > { %17377 = vperm.xlu0 %19740, %v12532_v62   ;;  %v5287_v62 = vadd.f32 %v22912_v59, %v19681_v50 }
 0x4b0   : > { %v5467_v36 = vmax.f32 %v5287_v62, 0.0  ;;  %v12680_v62 = vcombine.low %v8009_v12, %v8013_v1 }
 0x4b1   : > { %v23185_v53 = vpop.xlane.xlu0 %6261 }
 0x4b2   : > { %17371 = vperm.xlu0 %19740, %v12434_v29   ;;  %v6121_v4 = vmul.f32 %v22921_v19, %v5467_v36  ;;  %v5465_v29 = vmax.f32 %v5279_v35, 0.0  ;;  %v12682_v36 = vcombine.low %v8025_v18, %v8029_v30  ;;  %v12683_v35 = vcombine.low %v8033_v44, %v8037_v52 }
 0x4b3   : > { %v12690_v1 = vrot.slane %v12680_v62, %v22641_v47  ;;  %v12582_v44 = vcombine.low %v7945_v15, %v7949_v2 }
 0x4b4   : > { %v6119_v60 = vmul.f32 %v22921_v19, %v5465_v29  ;;  %v6470_v42 = vsel %vm6139_vm2, %v6121_v4, 0.0  ;;  %v7961_v29 = vrot.slane %v6694_v8, %v22601_v5  ;;  %v12704_v41 = vrot.slane %v12682_v36, %v22641_v47 }
 0x4b5   : > { %v23190_v7 = vpop.xlane.xlu0 %6279  ;;  %v12711_v18 = vrot.slane %v12683_v35, %v22641_v47  ;;  %v12712_v20 = vcombine.low %v12690_v1, %v12697_v26  ;;  %v12592_v35 = vrot.slane %v12582_v44, %v22641_v47 }
 0x4b6   : > { %v6464_v50 = vsel %vm6139_vm2, %v6119_v60, 0.0  ;;  %v7973_v60 = vrot.slane %v6694_v8, %v22614_v27 }
 0x4b7   : > { %v12713_v36 = vcombine.low %v12704_v41, %v12711_v18  ;;  %v12720_v41 = vrot.slane %v12712_v20, %v22641_v47 }
 0x4b9   : > { %v23197_v21 = vpop.xlane.xlu0 %6273  ;;  %v12727_v18 = vrot.slane %v12713_v36, %v22641_v47 }
 0x4ba   : > { %17332 = vperm.xlu1 %19741, %v11797_v10   ;;  %v27577_v10 = vld [vmem:[#allocation8_spill] sm:$0xff] }
 0x4bb   : > { %v6543_v45 = vadd.f32 %v23095_v55, %v27577_v10  ;;  %v7953_v55 = vrot.slane %v6694_v8, %v22595_v17 }
 0x4bd   : > { %v23208_v6 = vpop.xlane.xlu0 %6291  ;;  %v6681_v30 = vadd.f32 %v22578_v58, %v6543_v45  ;;  %v12583_v52 = vcombine.low %v7953_v55, %v7957_v43 }
 0x4be   : > { %17326 = vperm.xlu1 %19741, %v11699_v9   ;;  %v5218_v9 = vadd.f32 %v22912_v59, %v22905_v22  ;;  %v7965_v22 = vrot.slane %v6694_v8, %v22604_v13  ;;  %v23235_v59 = vpop.xlane.xlu1 %6252 }
 0x4bf   : > { %v12599_v45 = vrot.slane %v12583_v52, %v22641_v47  ;;  %v7529_v2 = vrot.slane %v6681_v30, %v22568_v63  ;;  %v7537_v55 = vrot.slane %v6681_v30, %v22595_v17  ;;  %v7545_v43 = vrot.slane %v6681_v30, %v22601_v5 }
 0x4c0   : > { %v5450_v12 = vmax.f32 %v5218_v9, 0.0  ;;  %v12584_v10 = vcombine.low %v7961_v29, %v7965_v22  ;;  %v7549_v29 = vrot.slane %v6681_v30, %v22604_v13  ;;  %v7553_v22 = vrot.slane %v6681_v30, %v22609_v40 }
 0x4c1   : > { %v23229_v4 = vpop.xlane.xlu0 %6285  ;;  %v12614_v44 = vcombine.low %v12592_v35, %v12599_v45 }
 0x4c2   : > { %27578 = vst [vmem:[#allocation13_spill] sm:$0xff] %v23229_v4  ;;  %v6541_v4 = vadd.f32 %v23112_v23, %v27579_v16  ;;  %v6104_v9 = vmul.f32 %v22921_v19, %v5450_v12  ;;  %v23250_v62 = vpop.xlane.xlu1 %6270  ;;  %v12606_v15 = vrot.slane %v12584_v10, %v22641_v47  ;;  %v7533_v23 = vrot.slane %v6681_v30, %v22585_v37 }
 0x4c4   : > { %v6419_v1 = vsel %vm6139_vm2, %v6104_v9, 0.0  ;;  %v11945_v10 = vcombine.low %v7529_v2, %v7533_v23  ;;  %v12622_v2 = vrot.slane %v12614_v44, %v22641_v47 }
 0x4c5   : > { %v23246_v8 = vpop.xlane.xlu0 %6303 }
 0x4c6   : > { %27580 = vst [vmem:[#allocation12_spill] sm:$0xff] %v23246_v8  ;;  %v23269_v26 = vpop.xlane.xlu1 %6264 }
 0x4ca   : > { %v23285_v23 = vpop.xlane.xlu1 %6282 }
 0x4d1   : > { %6471 = vadd.xlane.f32.xlu0 %v6470_v42  ;;  %v5452_v42 = vmax.f32 %v5226_v25, 0.0 }
 0x4d3   : > { %v6106_v25 = vmul.f32 %v22921_v19, %v5452_v42  ;;  %v7541_v19 = vrot.slane %v6681_v30, %v22598_v14  ;;  %v23265_v42 = vpop.xlane.xlu0 %6297 }
 0x4d4   : > { %27581 = vst [vmem:[#allocation8_spill] sm:$0xff] %v23265_v42 }
 0x4d5   : > { %6465 = vadd.xlane.f32.xlu0 %v6464_v50  ;;  %v12585_v50 = vcombine.low %v7969_v32, %v7973_v60  ;;  %v7557_v32 = vrot.slane %v6681_v30, %v22614_v27  ;;  %v6679_v60 = vadd.f32 %v22578_v58, %v6541_v4  ;;  %v6425_v12 = vsel %vm6139_vm2, %v6106_v25, 0.0 }
 0x4d6   : > { %v11947_v30 = vcombine.low %v7545_v43, %v7549_v29 }
 0x4d7   : > { %v12613_v16 = vrot.slane %v12585_v50, %v22641_v47  ;;  %v11946_v50 = vcombine.low %v7537_v55, %v7541_v19  ;;  %v11948_v8 = vcombine.low %v7553_v22, %v7557_v32  ;;  %v7465_v4 = vrot.slane %v6679_v60, %v22568_v63  ;;  %v23281_v45 = vpop.xlane.xlu0 %6315 }
 0x4d8   : > { %v7469_v42 = vrot.slane %v6679_v60, %v22585_v37  ;;  %v7473_v25 = vrot.slane %v6679_v60, %v22595_v17  ;;  %v7477_v9 = vrot.slane %v6679_v60, %v22598_v14  ;;  %v7485_v20 = vrot.slane %v6679_v60, %v22604_v13  ;;  %27582 = vst [vmem:[#allocation7_spill] sm:$0xff] %v23281_v45  ;;  %v23291_v45 = vpop.f32.mrf.mxu1 }
 0x4d9   : > { %v12615_v52 = vcombine.low %v12606_v15, %v12613_v16  ;;  %v7489_v36 = vrot.slane %v6679_v60, %v22609_v40  ;;  %v7493_v35 = vrot.slane %v6679_v60, %v22614_v27  ;;  %v12728_v15 = vcombine.low %v12720_v41, %v12727_v18 }
 0x4da   : > { %v11955_v55 = vrot.slane %v11945_v10, %v22641_v47  ;;  %v11962_v19 = vrot.slane %v11946_v50, %v22641_v47  ;;  %v11969_v43 = vrot.slane %v11947_v30, %v22641_v47  ;;  %v11976_v29 = vrot.slane %v11948_v8, %v22641_v47 }
 0x4db   : > { %v12629_v16 = vrot.slane %v12615_v52, %v22641_v47  ;;  %v11847_v22 = vcombine.low %v7465_v4, %v7469_v42  ;;  %v11848_v32 = vcombine.low %v7473_v25, %v7477_v9  ;;  %v23293_v52 = vpop.xlane.xlu0 %6309  ;;  %v23299_v42 = vpop.xlane.xlu1 %6276 }
 0x4dc   : > { %v11977_v18 = vcombine.low %v11955_v55, %v11962_v19  ;;  %v11978_v44 = vcombine.low %v11969_v43, %v11976_v29  ;;  %27583 = vst [vmem:[#allocation115_spill] sm:$0xff] %v23293_v52  ;;  %v23301_v4 = vpop.f32.mrf.mxu1 }
 0x4dd   : > { %v12630_v41 = vcombine.low %v12622_v2, %v12629_v16  ;;  %v11857_v10 = vrot.slane %v11847_v22, %v22641_v47  ;;  %v11864_v50 = vrot.slane %v11848_v32, %v22641_v47 }
 0x4de   : > { %v11985_v25 = vrot.slane %v11977_v18, %v22641_v47  ;;  %v11992_v9 = vrot.slane %v11978_v44, %v22641_v47 }
 0x4e0   : > { %v11993_v2 = vcombine.low %v11985_v25, %v11992_v9 }
 0x4e2   : > { %6426 = vadd.xlane.f32.xlu1 %v6425_v12  ;;  %v7481_v12 = vrot.slane %v6679_v60, %v22601_v5 }
 0x4e4   : > { %v11849_v60 = vcombine.low %v7481_v12, %v7485_v20  ;;  %v11879_v12 = vcombine.low %v11857_v10, %v11864_v50 }
 0x4e6   : > { %6420 = vadd.xlane.f32.xlu1 %v6419_v1  ;;  %v11850_v1 = vcombine.low %v7489_v36, %v7493_v35  ;;  %v11871_v30 = vrot.slane %v11849_v60, %v22641_v47  ;;  %v23305_v36 = vpop.xlane.xlu0 %6327  ;;  %v23307_v35 = vpop.xlane.xlu1 %6294  ;;  %v11887_v16 = vrot.slane %v11879_v12, %v22641_v47  ;;  %v27590_v12 = vld [vmem:[#allocation11_spill] sm:$0xff] }
 0x4e7   : > { %27584 = vst [vmem:[#allocation116_spill] sm:$0xff] %v23305_v36 }
 0x4e8   : > { %v11878_v8 = vrot.slane %v11850_v1, %v22641_v47  ;;  %v23322_v1 = vld [vmem:[%s27334_s10] ss:$0 sm:$0xff] }
 0x4e9   : > { %v5242_v44 = vadd.f32 %v23322_v1, %v22991_v24  ;;  %v5234_v50 = vadd.f32 %v23322_v1, %v22995_v31 }
 0x4ea   : > { %v11880_v20 = vcombine.low %v11871_v30, %v11878_v8  ;;  %v23311_v43 = vpop.xlane.xlu0 %6321  ;;  %v23313_v22 = vpop.xlane.xlu1 %6288  ;;  %v27589_v30 = vld [vmem:[#allocation16_spill] sm:$0xff] }
 0x4eb   : > { %17389 = vperm.xlu0 %19740, %v12728_v15   ;;  %v19685_v15 = vpop.f32.mrf.mxu1  ;;  %27585 = vst [vmem:[#allocation117_spill] sm:$0xff] %v23311_v43  ;;  %27586 = vst [vmem:[#allocation118_spill] sm:$0xff] %v23313_v22  ;;  %v6562_v8 = vadd.f32 %v23157_v3, %v27589_v30  ;;  %v5454_v31 = vmax.f32 %v5234_v50, 0.0  ;;  %v5258_v3 = vadd.f32 %v23322_v1, %v23073_v33 }
 0x4ec   : > { %v11894_v55 = vrot.slane %v11880_v20, %v22641_v47  ;;  %v6547_v20 = vadd.f32 %v23124_v56, %v27590_v12  ;;  %v5250_v56 = vadd.f32 %v23322_v1, %v23077_v38 }
 0x4ed   : > { %v5294_v19 = vpop.f32.mrf.mxu1 }
 0x4ee   : > { %v11895_v29 = vcombine.low %v11887_v16, %v11894_v55  ;;  %v23317_v60 = vpop.xlane.xlu0 %6339  ;;  %v23325_v18 = vpop.xlane.xlu1 %6306  ;;  %v5295_v9 = vadd.f32 %v23322_v1, %v5294_v19  ;;  %v5456_v16 = vmax.f32 %v5242_v44, 0.0  ;;  %v27592_v55 = vld [vmem:[#allocation17_spill] sm:$0xff]  ;;  %v27595_v19 = vld [vmem:[#allocation14_spill] sm:$0xff]  ;;  %v6700_v44 = vadd.f32 %v22578_v58, %v6562_v8 }
 0x4ef   : > { %17383 = vperm.xlu0 %19740, %v12630_v41   ;;  %v23315_v32 = vpop.f32.mrf.mxu1  ;;  %27587 = vst [vmem:[#allocation119_spill] sm:$0xff] %v23317_v60  ;;  %v5303_v41 = vadd.f32 %v23322_v1, %v19685_v15  ;;  %27588 = vst [vmem:[#allocation120_spill] sm:$0xff] %v23325_v18  ;;  %v27591_v15 = vld [vmem:[#allocation9_spill] sm:$0xff]  ;;  %v6551_v24 = vadd.f32 %v23163_v28, %v27592_v55  ;;  %v23358_v28 = vld [vmem:[%s27336_s12] ss:$0 sm:$0xff]  ;;  %v23362_v33 = vadd.f32 %v22578_v58, %v6547_v20 }
 0x4f0   : > { %v5469_v30 = vmax.f32 %v5295_v9, 0.0  ;;  %v23368_v38 = vmul.f32 %v23358_v28, %v5456_v16  ;;  %v27597_v55 = vld [vmem:[#allocation15_spill] sm:$0xff]  ;;  %v5460_v9 = vmax.f32 %v5258_v3, 0.0  ;;  %v27598_v20 = vld [vmem:[#allocation29_spill] sm:$0xff]  ;;  %v5274_v16 = vadd.f32 %v23322_v1, %v23175_v49 }
 0x4f1   : > { %v23329_v10 = vpop.f32.mrf.mxu1  ;;  %v5471_v25 = vmax.f32 %v5303_v41, 0.0  ;;  %v8137_v3 = vrot.slane %v6700_v44, %v22568_v63  ;;  %v8145_v49 = vrot.slane %v6700_v44, %v22595_v17  ;;  %v27606_v18 = vld [vmem:[#allocation33_spill] sm:$0xff] }
 0x4f2   : > { %v23344_v60 = vpop.xlane.xlu0 %6333  ;;  %v23348_v41 = vpop.xlane.xlu1 %6300  ;;  %v23410_v36 = vmul.f32 %v23358_v28, %v5460_v9 }
 0x4f3   : > { %27593 = vst [vmem:[#allocation16_spill] sm:$0xff] %v23344_v60  ;;  %27594 = vst [vmem:[#allocation11_spill] sm:$0xff] %v23348_v41  ;;  %v6125_v50 = vmul.f32 %v23358_v28, %v5471_v25  ;;  %v6549_v25 = vadd.f32 %v23171_v11, %v27597_v55  ;;  %v8157_v55 = vrot.slane %v6700_v44, %v22604_v13 }
 0x4f4   : > { %27603 = vst [vmem:[#allocation121_spill] sm:$0xff] %v23410_v36 }
 0x4f5   : > { %v6482_v11 = vsel %vm6139_vm2, %v6125_v50, 0.0  ;;  %v8161_v50 = vrot.slane %v6700_v44, %v22609_v40 }
 0x4f6   : > { %v23387_v60 = vpop.xlane.xlu0 %6351  ;;  %v23390_v43 = vpop.xlane.xlu1 %6318 }
 0x4f7   : > { %17344 = vperm.xlu1 %19741, %v11993_v2   ;;  %v6545_v2 = vadd.f32 %v23145_v54, %v27591_v15  ;;  %v6560_v54 = vadd.f32 %v23169_v39, %v27595_v19  ;;  %v23371_v39 = vadd.f32 %v22578_v58, %v6551_v24  ;;  %v23376_v15 = vmul.f32 %v23358_v28, %v5454_v31 }
 0x4f8   : > { %v6555_v19 = vadd.f32 %v23179_v61, %v27598_v20  ;;  %v5266_v24 = vadd.f32 %v23322_v1, %v23183_v46  ;;  %27599 = vst [vmem:[#allocation17_spill] sm:$0xff] %v23387_v60  ;;  %v6123_v31 = vmul.f32 %v23358_v28, %v5469_v30  ;;  %27600 = vst [vmem:[#allocation14_spill] sm:$0xff] %v23390_v43  ;;  %v27605_v43 = vld [vmem:[#allocation19_spill] sm:$0xff] }
 0x4f9   : > { %v23365_v12 = vadd.f32 %v22578_v58, %v6545_v2  ;;  %27596 = vst [vmem:[#allocation9_spill] sm:$0xff] %v23371_v39  ;;  %v5458_v2 = vmax.f32 %v5250_v56, 0.0  ;;  %v6698_v39 = vadd.f32 %v22578_v58, %v6560_v54  ;;  %v8141_v61 = vrot.slane %v6700_v44, %v22585_v37 }
 0x4fa   : > { %v8149_v46 = vrot.slane %v6700_v44, %v22598_v14  ;;  %v8153_v54 = vrot.slane %v6700_v44, %v22601_v5  ;;  %v23402_v30 = vadd.f32 %v22578_v58, %v6549_v25  ;;  %v23405_v20 = vadd.f32 %v22578_v58, %v6555_v19  ;;  %v23424_v9 = vpop.xlane.xlu0 %6345 }
 0x4fb   : > { %17338 = vperm.xlu1 %19741, %v11895_v29   ;;  %v23342_v29 = vpop.f32.mrf.mxu1  ;;  %v8165_v60 = vrot.slane %v6700_v44, %v22614_v27  ;;  %v23413_v52 = vmul.f32 %v23358_v28, %v5458_v2  ;;  %v6553_v41 = vadd.f32 %v23187_v0, %v27605_v43  ;;  %v6559_v25 = vadd.f32 %v23192_v34, %v27606_v18  ;;  %v23427_v0 = vpop.xlane.xlu1 %6312 }
 0x4fc   : > { %27601 = vst [vmem:[#allocation15_spill] sm:$0xff] %v23402_v30  ;;  %27602 = vst [vmem:[#allocation29_spill] sm:$0xff] %v23405_v20  ;;  %v5464_v30 = vmax.f32 %v5274_v16, 0.0  ;;  %v5462_v19 = vmax.f32 %v5266_v24, 0.0  ;;  %v6476_v20 = vsel %vm6139_vm2, %v6123_v31, 0.0  ;;  %v12876_v36 = vcombine.low %v8137_v3, %v8141_v61  ;;  %v27609_v61 = vld [vmem:[#allocation31_spill] sm:$0xff] }
 0x4fd   : > { %v23373_v8 = vpop.f32.mrf.mxu1  ;;  %27604 = vst [vmem:[#allocation122_spill] sm:$0xff] %v23413_v52  ;;  %27607 = vst [vmem:[#allocation19_spill] sm:$0xff] %v23424_v9  ;;  %v12877_v2 = vcombine.low %v8145_v49, %v8149_v46  ;;  %v12878_v52 = vcombine.low %v8153_v54, %v8157_v55  ;;  %v8073_v22 = vrot.slane %v6698_v39, %v22568_v63  ;;  %v27610_v54 = vld [vmem:[#allocation37_spill] sm:$0xff] }
 0x4fe   : > { %27608 = vst [vmem:[#allocation33_spill] sm:$0xff] %v23427_v0  ;;  %v12879_v34 = vcombine.low %v8161_v50, %v8165_v60  ;;  %v8077_v43 = vrot.slane %v6698_v39, %v22585_v37  ;;  %v8081_v18 = vrot.slane %v6698_v39, %v22595_v17  ;;  %v8089_v16 = vrot.slane %v6698_v39, %v22601_v5 }
 0x4ff   : > { %v23395_v56 = vpop.f32.mrf.mxu1  ;;  %v8093_v24 = vrot.slane %v6698_v39, %v22604_v13  ;;  %v8097_v31 = vrot.slane %v6698_v39, %v22609_v40  ;;  %v8101_v3 = vrot.slane %v6698_v39, %v22614_v27  ;;  %v6557_v49 = vadd.f32 %v23202_v48, %v27609_v61 }
 0x500   : > { %v6563_v60 = vadd.f32 %v23214_v51, %v27610_v54  ;;  %v5282_v55 = vadd.f32 %v23322_v1, %v23301_v4  ;;  %v23446_v50 = vadd.f32 %v22578_v58, %v6559_v25  ;;  %v12893_v0 = vrot.slane %v12877_v2, %v22641_v47  ;;  %v23460_v25 = vpop.xlane.xlu0 %6363 }
 0x501   : > { %v23422_v44 = vpop.f32.mrf.mxu1  ;;  %v12900_v48 = vrot.slane %v12878_v52, %v22641_v47  ;;  %v12778_v51 = vcombine.low %v8073_v22, %v8077_v43  ;;  %v23455_v4 = vmul.f32 %v23358_v28, %v5464_v30  ;;  %v12780_v54 = vcombine.low %v8089_v16, %v8093_v24  ;;  %v27618_v30 = vld [vmem:[#allocation35_spill] sm:$0xff]  ;;  %v27619_v43 = vld [vmem:[#allocation20_spill] sm:$0xff] }
 0x502   : > { %27612 = vst [vmem:[#allocation37_spill] sm:$0xff] %v23446_v50  ;;  %v12781_v50 = vcombine.low %v8097_v31, %v8101_v3  ;;  %v23469_v52 = vadd.f32 %v22578_v58, %v6563_v60  ;;  %v5466_v22 = vmax.f32 %v5282_v55, 0.0  ;;  %v7657_v24 = vrot.slane %v23362_v33, %v22568_v63 }
 0x503   : > { %v23448_v9 = vpop.f32.mrf.mxu1  ;;  %27613 = vst [vmem:[#allocation123_spill] sm:$0xff] %v23455_v4  ;;  %v12788_v3 = vrot.slane %v12778_v51, %v22641_v47  ;;  %v12802_v60 = vrot.slane %v12780_v54, %v22641_v47  ;;  %v7673_v55 = vrot.slane %v23362_v33, %v22601_v5  ;;  %v5306_v54 = vadd.f32 %v23322_v1, %v23315_v32 }
 0x504   : > { %27617 = vst [vmem:[#allocation127_spill] sm:$0xff] %v23469_v52  ;;  %v27622_v52 = vld [vmem:[#allocation41_spill] sm:$0xff]  ;;  %v7593_v4 = vrot.slane %v23365_v12, %v22568_v63 }
 0x50e   : > { %6483 = vadd.xlane.f32.xlu0 %v6482_v11  ;;  %v5290_v11 = vadd.f32 %v23322_v1, %v23291_v45  ;;  %v8085_v45 = vrot.slane %v6698_v39, %v22598_v14  ;;  %v12886_v39 = vrot.slane %v12876_v36, %v22641_v47  ;;  %v23463_v36 = vadd.f32 %v22578_v58, %v6557_v49 }
 0x510   : > { %v5468_v46 = vmax.f32 %v5290_v11, 0.0  ;;  %v12907_v11 = vrot.slane %v12879_v34, %v22641_v47  ;;  %v12779_v61 = vcombine.low %v8081_v18, %v8085_v45  ;;  %27615 = vst [vmem:[#allocation125_spill] sm:$0xff] %v23463_v36  ;;  %v23471_v34 = vpop.xlane.xlu1 %6330  ;;  %v6566_v18 = vadd.f32 %v23177_v57, %v27619_v43  ;;  %v23477_v45 = vpop.f32.mrf.mxu1 }
 0x511   : > { %v12908_v16 = vcombine.low %v12886_v39, %v12893_v0  ;;  %v7665_v57 = vrot.slane %v23362_v33, %v22595_v17  ;;  %v7669_v0 = vrot.slane %v23362_v33, %v22598_v14  ;;  %v7677_v39 = vrot.slane %v23362_v33, %v22604_v13  ;;  %v23512_v43 = vpop.xlane.xlu0 %6357 }
 0x512   : > { %6477 = vadd.xlane.f32.xlu0 %v6476_v20  ;;  %v23443_v20 = vadd.f32 %v22578_v58, %v6553_v41  ;;  %v23458_v41 = vmul.f32 %v23358_v28, %v5462_v19  ;;  %v23466_v2 = vmul.f32 %v23358_v28, %v5468_v46  ;;  %v6561_v19 = vadd.f32 %v23235_v59, %v27618_v30  ;;  %v23510_v30 = vpop.f32.mrf.mxu1 }
 0x513   : > { %v12909_v31 = vcombine.low %v12900_v48, %v12907_v11  ;;  %v12795_v49 = vrot.slane %v12779_v61, %v22641_v47  ;;  %v7661_v46 = vrot.slane %v23362_v33, %v22585_v37  ;;  %v12809_v59 = vrot.slane %v12781_v50, %v22641_v47 }
 0x514   : > { %27611 = vst [vmem:[#allocation31_spill] sm:$0xff] %v23443_v20  ;;  %27614 = vst [vmem:[#allocation124_spill] sm:$0xff] %v23458_v41  ;;  %v7681_v48 = vrot.slane %v23362_v33, %v22609_v40  ;;  %v7685_v11 = vrot.slane %v23362_v33, %v22614_v27  ;;  %v23500_v50 = vmul.f32 %v23358_v28, %v5466_v22  ;;  %v23518_v22 = vpop.xlane.xlu1 %6324 }
 0x515   : > { %27616 = vst [vmem:[#allocation126_spill] sm:$0xff] %v23466_v2  ;;  %v23503_v51 = vadd.f32 %v22578_v58, %v6561_v19  ;;  %v23506_v61 = vadd.f32 %v22578_v58, %v6566_v18  ;;  %v6567_v36 = vadd.f32 %v23250_v62, %v27622_v52  ;;  %v5298_v33 = vadd.f32 %v23322_v1, %v23329_v10  ;;  %v5329_v10 = vpop.f32.mrf.mxu1 }
 0x516   : > { %27620 = vst [vmem:[#allocation35_spill] sm:$0xff] %v23500_v50  ;;  %v6437_v19 = vsel %vm6139_vm2, %v23368_v38, 0.0  ;;  %v6431_v18 = vsel %vm6139_vm2, %v23376_v15, 0.0  ;;  %v12916_v32 = vrot.slane %v12908_v16, %v22641_v47  ;;  %v12810_v50 = vcombine.low %v12788_v3, %v12795_v49 }
 0x517   : > { %27621 = vst [vmem:[#allocation20_spill] sm:$0xff] %v23503_v51  ;;  %v12923_v51 = vrot.slane %v12909_v31, %v22641_v47  ;;  %v12811_v2 = vcombine.low %v12802_v60, %v12809_v59  ;;  %v12141_v20 = vcombine.low %v7657_v24, %v7661_v46  ;;  %v12142_v62 = vcombine.low %v7665_v57, %v7669_v0  ;;  %v27623_v60 = vld [vmem:[#allocation18_spill] sm:$0xff] }
 0x518   : > { %v12143_v52 = vcombine.low %v7673_v55, %v7677_v39  ;;  %v12144_v41 = vcombine.low %v7681_v48, %v7685_v11  ;;  %v7597_v38 = vrot.slane %v23365_v12, %v22585_v37  ;;  %v7601_v15 = vrot.slane %v23365_v12, %v22595_v17  ;;  %v23546_v55 = vpop.xlane.xlu0 %6375  ;;  %v23550_v48 = vpop.xlane.xlu1 %6342 }
 0x519   : > { %v7605_v16 = vrot.slane %v23365_v12, %v22598_v14  ;;  %v7609_v31 = vrot.slane %v23365_v12, %v22601_v5  ;;  %v7613_v24 = vrot.slane %v23365_v12, %v22604_v13  ;;  %v7617_v3 = vrot.slane %v23365_v12, %v22609_v40 }
 0x51a   : > { %v7621_v49 = vrot.slane %v23365_v12, %v22614_v27  ;;  %v5472_v46 = vmax.f32 %v5306_v54, 0.0  ;;  %v6564_v59 = vadd.f32 %v23185_v53, %v27623_v60  ;;  %v5470_v57 = vmax.f32 %v5298_v33, 0.0  ;;  %v19697_v54 = vpop.f32.mrf.mxu1 }
 0x51b   : > { %v5319_v0 = vadd.f32 %v23322_v1, %v23342_v29  ;;  %v5311_v39 = vadd.f32 %v23322_v1, %v23373_v8  ;;  %v12924_v11 = vcombine.low %v12916_v32, %v12923_v51  ;;  %v12825_v12 = vrot.slane %v12811_v2, %v22641_v47 }
 0x51c   : > { %v12151_v53 = vrot.slane %v12141_v20, %v22641_v47  ;;  %v12158_v33 = vrot.slane %v12142_v62, %v22641_v47  ;;  %v12165_v29 = vrot.slane %v12143_v52, %v22641_v47  ;;  %v12172_v60 = vrot.slane %v12144_v41, %v22641_v47  ;;  %v27626_v20 = vld [vmem:[#allocation39_spill] sm:$0xff] }
 0x51d   : > { %v12044_v27 = vcombine.low %v7601_v15, %v7605_v16  ;;  %v12045_v40 = vcombine.low %v7609_v31, %v7613_v24  ;;  %v12046_v8 = vcombine.low %v7617_v3, %v7621_v49  ;;  %v23559_v13 = vmul.f32 %v23358_v28, %v5472_v46  ;;  %v23576_v15 = vpop.xlane.xlu0 %6369  ;;  %v23578_v3 = vpop.xlane.xlu1 %6336 }
 0x51e   : > { %v23565_v2 = vadd.f32 %v22578_v58, %v6564_v59  ;;  %v6565_v51 = vadd.f32 %v23269_v26, %v27626_v20  ;;  %v23570_v32 = vmul.f32 %v23358_v28, %v5470_v57  ;;  %v5475_v41 = vmax.f32 %v5319_v0, 0.0  ;;  %v27630_v59 = vld [vmem:[#allocation45_spill] sm:$0xff] }
 0x51f   : > { %6438 = vadd.xlane.f32.xlu1 %v6437_v19  ;;  %v12818_v19 = vrot.slane %v12810_v50, %v22641_v47  ;;  %27624 = vst [vmem:[#allocation41_spill] sm:$0xff] %v23559_v13  ;;  %v23562_v50 = vadd.f32 %v22578_v58, %v6567_v36  ;;  %v5322_v52 = vadd.f32 %v23322_v1, %v23395_v56  ;;  %v5342_v36 = vpop.f32.mrf.mxu1  ;;  %v27631_v0 = vld [vmem:[#allocation21_spill] sm:$0xff]  ;;  %v27723_v13 = vld [vmem:[#allocation52_spill] sm:$0xff] }
 0x520   : > { %27627 = vst [vmem:[#allocation39_spill] sm:$0xff] %v23570_v32  ;;  %v12173_v31 = vcombine.low %v12151_v53, %v12158_v33  ;;  %v12174_v24 = vcombine.low %v12165_v29, %v12172_v60  ;;  %v12060_v49 = vrot.slane %v12044_v27, %v22641_v47  ;;  %v12067_v46 = vrot.slane %v12045_v40, %v22641_v47 }
 0x521   : > { %27625 = vst [vmem:[#allocation18_spill] sm:$0xff] %v23562_v50  ;;  %v12826_v16 = vcombine.low %v12818_v19, %v12825_v12  ;;  %v23585_v56 = vadd.f32 %v22578_v58, %v6565_v51  ;;  %v6571_v57 = vadd.f32 %v23285_v23, %v27630_v59  ;;  %v5476_v27 = vmax.f32 %v5322_v52, 0.0  ;;  %v19698_v33 = vpop.f32.mrf.mxu1  ;;  %v27633_v51 = vld [vmem:[#allocation43_spill] sm:$0xff] }
 0x522   : > { %v5335_v40 = vadd.f32 %v23322_v1, %v23448_v9  ;;  %v5327_v12 = vadd.f32 %v23322_v1, %v23477_v45  ;;  %v23601_v53 = vmul.f32 %v23358_v28, %v5475_v41  ;;  %v12181_v29 = vrot.slane %v12173_v31, %v22641_v47 }
 0x523   : > { %6432 = vadd.xlane.f32.xlu1 %v6431_v18  ;;  %v12043_v18 = vcombine.low %v7593_v4, %v7597_v38  ;;  %v27628_v4 = vld [vmem:[#allocation22_spill] sm:$0xff]  ;;  %v5473_v38 = vmax.f32 %v5311_v39, 0.0  ;;  %v6568_v39 = vadd.f32 %v23197_v21, %v27631_v0  ;;  %v5338_v21 = vadd.f32 %v23322_v1, %v23510_v30  ;;  %v23619_v30 = vpop.xlane.xlu0 %6387  ;;  %v5345_v59 = vpop.f32.mrf.mxu1 }
 0x524   : > { %v6570_v62 = vadd.f32 %v23190_v7, %v27628_v4  ;;  %v12074_v7 = vrot.slane %v12046_v8, %v22641_v47  ;;  %27629 = vst [vmem:[#allocation22_spill] sm:$0xff] %v23585_v56  ;;  %v12188_v9 = vrot.slane %v12174_v24, %v22641_v47  ;;  %v23612_v45 = vadd.f32 %v22578_v58, %v6571_v57  ;;  %v27636_v24 = vld [vmem:[#allocation49_spill] sm:$0xff] }
 0x525   : > { %v12053_v26 = vrot.slane %v12043_v18, %v22641_v47  ;;  %v23604_v23 = vmul.f32 %v23358_v28, %v5473_v38  ;;  %v23615_v8 = vadd.f32 %v22578_v58, %v6568_v39  ;;  %v6569_v41 = vadd.f32 %v23299_v42, %v27633_v51 }
 0x526   : > { %v23594_v19 = vadd.f32 %v22578_v58, %v6570_v62  ;;  %v12076_v18 = vcombine.low %v12067_v46, %v12074_v7  ;;  %27632 = vst [vmem:[#allocation45_spill] sm:$0xff] %v23612_v45  ;;  %v5479_v4 = vmax.f32 %v5335_v40, 0.0  ;;  %v27635_v62 = vld [vmem:[#allocation24_spill] sm:$0xff]  ;;  %v5477_v38 = vmax.f32 %v5327_v12, 0.0  ;;  %v27638_v46 = vld [vmem:[#allocation13_spill] sm:$0xff] }
 0x527   : > { %v12075_v60 = vcombine.low %v12053_v26, %v12060_v49  ;;  %v6574_v52 = vadd.f32 %v23208_v6, %v27635_v62  ;;  %v5480_v31 = vmax.f32 %v5338_v21, 0.0  ;;  %v6575_v26 = vadd.f32 %v23307_v35, %v27636_v24  ;;  %v27637_v49 = vld [vmem:[#allocation23_spill] sm:$0xff] }
 0x528   : > { %17401 = vperm.xlu0 %19740, %v12924_v11   ;;  %v5314_v11 = vadd.f32 %v23322_v1, %v23422_v44  ;;  %v5330_v44 = vadd.f32 %v23322_v1, %v5329_v10  ;;  %v23622_v10 = vmul.f32 %v23358_v28, %v5476_v27  ;;  %v6572_v7 = vadd.f32 %v27638_v46, %v27637_v49  ;;  %v27648_v49 = vld [vmem:[#allocation53_spill] sm:$0xff]  ;;  %v27649_v46 = vld [vmem:[#allocation120_spill] sm:$0xff] }
 0x529   : > { %v5351_v57 = vadd.f32 %v23322_v1, %v19697_v54  ;;  %v12189_v0 = vcombine.low %v12181_v29, %v12188_v9  ;;  %v12083_v39 = vrot.slane %v12075_v60, %v22641_v47  ;;  %v23639_v27 = vadd.f32 %v22578_v58, %v6569_v41  ;;  %v23663_v41 = vpop.xlane.xlu0 %6381 }
 0x52a   : > { %v5474_v20 = vmax.f32 %v5314_v11, 0.0  ;;  %27634 = vst [vmem:[#allocation21_spill] sm:$0xff] %v23622_v10  ;;  %v5478_v42 = vmax.f32 %v5330_v44, 0.0  ;;  %v12090_v11 = vrot.slane %v12076_v18, %v22641_v47  ;;  %v5343_v35 = vadd.f32 %v23322_v1, %v5342_v36  ;;  %v27642_v36 = vld [vmem:[#allocation47_spill] sm:$0xff]  ;;  %v27644_v18 = vld [vmem:[#allocation26_spill] sm:$0xff] }
 0x52b   : > { %27640 = vst [vmem:[#allocation24_spill] sm:$0xff] %v23639_v27  ;;  %v5354_v40 = vadd.f32 %v23322_v1, %v19698_v33  ;;  %v23644_v12 = vmul.f32 %v23358_v28, %v5479_v4  ;;  %v23647_v54 = vadd.f32 %v22578_v58, %v6574_v52  ;;  %v23650_v21 = vmul.f32 %v23358_v28, %v5477_v38  ;;  %v27643_v33 = vld [vmem:[#allocation118_spill] sm:$0xff]  ;;  %v27655_v27 = vld [vmem:[#allocation7_spill] sm:$0xff] }
 0x52c   : > { %17395 = vperm.xlu0 %19740, %v12826_v16   ;;  %v23626_v16 = vpop.xlane.xlu1 %6354  ;;  %v23636_v6 = vmul.f32 %v23358_v28, %v5474_v20  ;;  %v5346_v44 = vadd.f32 %v23322_v1, %v5345_v59  ;;  %v23654_v29 = vadd.f32 %v22578_v58, %v6575_v26  ;;  %v23657_v9 = vadd.f32 %v22578_v58, %v6572_v7  ;;  %v27645_v20 = vld [vmem:[#allocation12_spill] sm:$0xff]  ;;  %v27650_v59 = vld [vmem:[#allocation25_spill] sm:$0xff] }
 0x52d   : > { %v6573_v60 = vadd.f32 %v27643_v33, %v27642_v36  ;;  %v6578_v51 = vadd.f32 %v27645_v20, %v27644_v18  ;;  %v23666_v4 = vmul.f32 %v23358_v28, %v5480_v31  ;;  %v23669_v1 = vmul.f32 %v23358_v28, %v5478_v42  ;;  %v27652_v18 = vld [vmem:[#allocation51_spill] sm:$0xff]  ;;  %v27654_v31 = vld [vmem:[#allocation28_spill] sm:$0xff]  ;;  %v27656_v42 = vld [vmem:[#allocation57_spill] sm:$0xff] }
 0x52e   : > { %27639 = vst [vmem:[#allocation43_spill] sm:$0xff] %v23636_v6  ;;  %27641 = vst [vmem:[#allocation49_spill] sm:$0xff] %v23654_v29  ;;  %v5483_v62 = vmax.f32 %v5351_v57, 0.0  ;;  %v12091_v38 = vcombine.low %v12083_v39, %v12090_v11  ;;  %v5481_v24 = vmax.f32 %v5343_v35, 0.0  ;;  %v5484_v26 = vmax.f32 %v5354_v40, 0.0  ;;  %v27653_v20 = vld [vmem:[#allocation11_spill] sm:$0xff] }
 0x52f   : > { %27646 = vst [vmem:[#allocation23_spill] sm:$0xff] %v23666_v4  ;;  %27647 = vst [vmem:[#allocation13_spill] sm:$0xff] %v23669_v1  ;;  %v6579_v7 = vadd.f32 %v27649_v46, %v27648_v49  ;;  %v5482_v33 = vmax.f32 %v5346_v44, 0.0  ;;  %v6577_v29 = vadd.f32 %v27653_v20, %v27652_v18  ;;  %v6582_v45 = vadd.f32 %v27655_v27, %v27654_v31  ;;  %v27657_v1 = vld [vmem:[#allocation14_spill] sm:$0xff]  ;;  %v27659_v35 = vld [vmem:[#allocation27_spill] sm:$0xff] }
 0x530   : > { %v6349_v52 = vpop.xlane.xlu1 %6348  ;;  %v6583_v57 = vadd.f32 %v27657_v1, %v27656_v42  ;;  %v23682_v39 = vadd.f32 %v22578_v58, %v6573_v60  ;;  %v23685_v11 = vadd.f32 %v22578_v58, %v6578_v51  ;;  %v27660_v40 = vld [vmem:[#allocation115_spill] sm:$0xff]  ;;  %v27661_v44 = vlaneseq  ;;  %v27665_v1 = vld [vmem:[#allocation32_spill] sm:$0xff]  ;;  %v27667_v60 = vld [vmem:[#allocation61_spill] sm:$0xff] }
 0x531   : > { %v6580_v49 = vadd.f32 %v27660_v40, %v27659_v35  ;;  %v27663_v27 = vld [vmem:[#allocation55_spill] sm:$0xff]  ;;  %v6587_v31 = vadd.f32 %v23471_v34, %v27667_v60  ;;  %v23702_v51 = vmul.f32 %v23358_v28, %v5481_v24  ;;  %v23705_v42 = vmul.f32 %v23358_v28, %v5484_v26  ;;  %v23713_v40 = vpop.xlane.xlu0 %6399  ;;  %v27680_v60 = vld [vmem:[#allocation36_spill] sm:$0xff]  ;;  %v27699_v6 = vld [vmem:[#allocation42_spill] sm:$0xff] }
 0x532   : > { %27658 = vst [vmem:[#allocation47_spill] sm:$0xff] %v23682_v39  ;;  %v23690_v46 = vand.u32 127, %v27661_v44  ;;  %v23708_v35 = vadd.f32 %v22578_v58, %v6579_v7  ;;  %v23716_v44 = vmul.f32 %v23358_v28, %v5482_v33  ;;  %v23722_v34 = vadd.f32 %v22578_v58, %v6582_v45  ;;  %v27690_v4 = vld [vmem:[#allocation19_spill] sm:$0xff] }
 0x533   : > { %27668 = vst [vmem:[#allocation26_spill] sm:$0xff] %v23705_v42  ;;  %v23725_v24 = vadd.f32 %v22578_v58, %v6583_v57  ;;  %v23728_v7 = vadd.f32 %v22578_v58, %v6580_v49  ;;  %v23742_v57 = vadd.f32 %v22578_v58, %v6587_v31  ;;  %v27681_v49 = vld [vmem:[#allocation119_spill] sm:$0xff]  ;;  %v27688_v42 = vld [vmem:[#allocation69_spill] sm:$0xff] }
 0x534   : > { %17356 = vperm.xlu1 %19741, %v12189_v0   ;;  %v27651_v0 = vld [vmem:[#allocation8_spill] sm:$0xff]  ;;  %27662 = vst [vmem:[#allocation118_spill] sm:$0xff] %v23690_v46  ;;  %27669 = vst [vmem:[#allocation12_spill] sm:$0xff] %v23708_v35  ;;  %v6367_v26 = vpop.xlane.xlu1 %6366  ;;  %v17683_v33 = vadd.s32 4294967280, %v23690_v46  ;;  %v6595_v31 = vadd.f32 %v23626_v16, %v27688_v42  ;;  %v27698_v42 = vld [vmem:[#allocation73_spill] sm:$0xff] }
 0x535   : > { %v6576_v36 = vadd.f32 %v27651_v0, %v27650_v59  ;;  %v23693_v59 = vmul.f32 %v23358_v28, %v5483_v62  ;;  %v27664_v0 = vld [vmem:[#allocation33_spill] sm:$0xff]  ;;  %27670 = vst [vmem:[#allocation53_spill] sm:$0xff] %v23716_v44  ;;  %27672 = vst [vmem:[#allocation25_spill] sm:$0xff] %v23725_v24  ;;  %v6590_v24 = vadd.f32 %v27681_v49, %v27680_v60  ;;  %v27684_v35 = vld [vmem:[#allocation16_spill] sm:$0xff]  ;;  %v17725_v49 = vadd.s32 4294967232, %v23690_v46 }
 0x536   : > { %v6581_v18 = vadd.f32 %v27664_v0, %v27663_v27  ;;  %v23719_v27 = vadd.f32 %v22578_v58, %v6577_v29  ;;  %27673 = vst [vmem:[#allocation8_spill] sm:$0xff] %v23728_v7  ;;  %v27675_v0 = vld [vmem:[#allocation117_spill] sm:$0xff]  ;;  %27679 = vst [vmem:[#allocation28_spill] sm:$0xff] %v23742_v57  ;;  %v27689_v57 = vld [vmem:[#allocation38_spill] sm:$0xff] }
 0x537   : > { %v23711_v62 = vadd.f32 %v22578_v58, %v6576_v36  ;;  %v27674_v36 = vld [vmem:[#allocation30_spill] sm:$0xff]  ;;  %v6592_v60 = vadd.f32 %v27690_v4, %v27689_v57  ;;  %v27697_v16 = vld [vmem:[#allocation44_spill] sm:$0xff]  ;;  %v6599_v57 = vadd.f32 %v6367_v26, %v27698_v42  ;;  %v23794_v26 = vadd.f32 %v22578_v58, %v6595_v31 }
 0x538   : > { %17350 = vperm.xlu1 %19741, %v12091_v38   ;;  %v27666_v38 = vld [vmem:[#allocation116_spill] sm:$0xff]  ;;  %27671 = vst [vmem:[#allocation120_spill] sm:$0xff] %v23719_v27  ;;  %v23736_v29 = vadd.f32 %v22578_v58, %v6581_v18  ;;  %v27682_v27 = vld [vmem:[#allocation65_spill] sm:$0xff]  ;;  %v17739_v18 = vadd.s32 4294967216, %v23690_v46  ;;  %v6598_v4 = vadd.f32 %v23460_v25, %v27697_v16  ;;  %v6361_v56 = vpop.xlane.xlu1 %6360  ;;  %v8273_v42 = vrot.slane %v23506_v61, %v22595_v17 }
 0x539   : > { %v6586_v20 = vadd.f32 %v27666_v38, %v27665_v1  ;;  %v6584_v1 = vadd.f32 %v27675_v0, %v27674_v36  ;;  %v27676_v38 = vld [vmem:[#allocation59_spill] sm:$0xff]  ;;  %v6591_v36 = vadd.f32 %v23550_v48, %v27682_v27  ;;  %v27683_v0 = vld [vmem:[#allocation34_spill] sm:$0xff]  ;;  %27705 = vst [vmem:[#allocation61_spill] sm:$0xff] %v23794_v26  ;;  %v6494_v26 = vsel %vm6139_vm2, %v23601_v53, 0.0 }
 0x53a   : > { %v6585_v28 = vadd.f32 %v23518_v22, %v27676_v38  ;;  %27677 = vst [vmem:[#allocation51_spill] sm:$0xff] %v23736_v29  ;;  %v6588_v22 = vadd.f32 %v27684_v35, %v27683_v0  ;;  %v27685_v38 = vld [vmem:[#allocation63_spill] sm:$0xff]  ;;  %v27686_v29 = vld [vmem:[#allocation40_spill] sm:$0xff]  ;;  %v27694_v0 = vld [vmem:[#allocation97_spill] sm:$0xff]  ;;  %v23815_v31 = vadd.f32 %v22578_v58, %v6598_v4  ;;  %v8277_v4 = vrot.slane %v23506_v61, %v22598_v14 }
 0x53b   : > { %v23739_v45 = vadd.f32 %v22578_v58, %v6586_v20  ;;  %v6589_v39 = vadd.f32 %v23578_v3, %v27685_v38  ;;  %v27687_v20 = vld [vmem:[#allocation17_spill] sm:$0xff]  ;;  %v23761_v48 = vadd.f32 %v22578_v58, %v6584_v1  ;;  %v27693_v3 = vld [vmem:[#allocation67_spill] sm:$0xff]  ;;  %v23768_v38 = vsub.s32 %v17683_v33, %v27694_v0 }
 0x53c   : > { %v6594_v44 = vadd.f32 %v27687_v20, %v27686_v29  ;;  %v23764_v35 = vadd.f32 %v22578_v58, %v6585_v28  ;;  %v6593_v27 = vadd.f32 %v6349_v52, %v27693_v3  ;;  %v6394_v29 = vpop.xlane.xlu0 %6393  ;;  %v23771_v20 = vadd.f32 %v22578_v58, %v6590_v24  ;;  %v27710_v3 = vld [vmem:[#allocation48_spill] sm:$0xff]  ;;  %27713 = vst [vmem:[#allocation65_spill] sm:$0xff] %v23815_v31 }
 0x53d   : > { %27678 = vst [vmem:[#allocation11_spill] sm:$0xff] %v23739_v45  ;;  %27691 = vst [vmem:[#allocation7_spill] sm:$0xff] %v23761_v48  ;;  %v6596_v1 = vadd.f32 %v23512_v43, %v27699_v6  ;;  %v23779_v28 = vadd.f32 %v22578_v58, %v6591_v36  ;;  %v23782_v52 = vadd.f32 %v22578_v58, %v6588_v22 }
 0x53e   : > { %27692 = vst [vmem:[#allocation57_spill] sm:$0xff] %v23764_v35  ;;  %27695 = vst [vmem:[#allocation14_spill] sm:$0xff] %v23768_v38  ;;  %v23785_v33 = vadd.f32 %v22578_v58, %v6589_v39  ;;  %v23788_v24 = vsub.s32 %v17739_v18, %v27694_v0  ;;  %v23791_v25 = vadd.f32 %v22578_v58, %v6594_v44  ;;  %v27709_v39 = vld [vmem:[#allocation71_spill] sm:$0xff] }
 0x53f   : > { %27696 = vst [vmem:[#allocation27_spill] sm:$0xff] %v23771_v20  ;;  %27700 = vst [vmem:[#allocation115_spill] sm:$0xff] %v23779_v28  ;;  %v23797_v43 = vadd.f32 %v22578_v58, %v6592_v60  ;;  %v23800_v6 = vsub.s32 %v17725_v49, %v27694_v0  ;;  %v23803_v36 = vadd.f32 %v22578_v58, %v6593_v27 }
 0x540   : > { %27701 = vst [vmem:[#allocation55_spill] sm:$0xff] %v23782_v52  ;;  %27702 = vst [vmem:[#allocation33_spill] sm:$0xff] %v23785_v33  ;;  %v6597_v22 = vadd.f32 %v6361_v56, %v27709_v39  ;;  %v6602_v18 = vadd.f32 %v23546_v55, %v27710_v3  ;;  %v23808_v16 = vpop.permute.xlu0 %17317  ;;  %v23812_v44 = vsub.s32 %v23690_v46, %v27694_v0  ;;  %v17767_v56 = vadd.s32 4294967184, %v23690_v46  ;;  %v27716_v39 = vld [vmem:[#allocation100_spill] sm:$0xff]  ;;  %v27717_v3 = vld [vmem:[#allocation101_spill] sm:$0xff] }
 0x541   : > { %27703 = vst [vmem:[#allocation32_spill] sm:$0xff] %v23788_v24  ;;  %27704 = vst [vmem:[#allocation116_spill] sm:$0xff] %v23791_v25  ;;  %v23818_v60 = vadd.f32 %v22578_v58, %v6599_v57  ;;  %v23821_v49 = vadd.f32 %v22578_v58, %v6596_v1  ;;  %v8265_v55 = vrot.slane %v23506_v61, %v22568_v63  ;;  %v27718_v24 = vld [vmem:[#allocation102_spill] sm:$0xff] }
 0x542   : > { %27706 = vst [vmem:[#allocation30_spill] sm:$0xff] %v23797_v43  ;;  %27707 = vst [vmem:[#allocation117_spill] sm:$0xff] %v23800_v6  ;;  %v8269_v27 = vrot.slane %v23506_v61, %v22585_v37  ;;  %v8281_v57 = vrot.slane %v23506_v61, %v22601_v5  ;;  %v8285_v1 = vrot.slane %v23506_v61, %v27716_v39  ;;  %v17753_v43 = vadd.s32 4294967200, %v23690_v46  ;;  %v27726_v25 = vld [vmem:[#allocation54_spill] sm:$0xff] }
 0x543   : > { %27708 = vst [vmem:[#allocation59_spill] sm:$0xff] %v23803_v36  ;;  %27711 = vst [vmem:[#allocation36_spill] sm:$0xff] %v23808_v16  ;;  %v8289_v16 = vrot.slane %v23506_v61, %v27717_v3  ;;  %v8293_v6 = vrot.slane %v23506_v61, %v27718_v24  ;;  %v23844_v36 = vadd.f32 %v22578_v58, %v6602_v18 }
 0x544   : > { %27712 = vst [vmem:[#allocation119_spill] sm:$0xff] %v23812_v44  ;;  %27714 = vst [vmem:[#allocation34_spill] sm:$0xff] %v23818_v60  ;;  %v23841_v60 = vadd.f32 %v22578_v58, %v6597_v22  ;;  %v27721_v44 = vld [vmem:[#allocation46_spill] sm:$0xff]  ;;  %v8201_v33 = vrot.slane %v23565_v2, %v22568_v63  ;;  %v8205_v28 = vrot.slane %v23565_v2, %v22585_v37  ;;  %v23858_v18 = vpop.permute.xlu0 %17311 }
 0x545   : > { %27715 = vst [vmem:[#allocation16_spill] sm:$0xff] %v23821_v49  ;;  %27720 = vst [vmem:[#allocation40_spill] sm:$0xff] %v23844_v36  ;;  %v6600_v38 = vadd.f32 %v23576_v15, %v27721_v44  ;;  %v8209_v61 = vrot.slane %v23565_v2, %v22595_v17  ;;  %v8213_v22 = vrot.slane %v23565_v2, %v22598_v14  ;;  %v27725_v49 = vld [vmem:[#allocation56_spill] sm:$0xff] }
 0x546   : > { %27719 = vst [vmem:[#allocation63_spill] sm:$0xff] %v23841_v60  ;;  %27722 = vst [vmem:[#allocation17_spill] sm:$0xff] %v23858_v18  ;;  %v8217_v15 = vrot.slane %v23565_v2, %v22601_v5  ;;  %v8221_v53 = vrot.slane %v23565_v2, %v27716_v39  ;;  %v8225_v44 = vrot.slane %v23565_v2, %v27717_v3 }
 0x547   : > { %v8229_v60 = vrot.slane %v23565_v2, %v27718_v24  ;;  %v13072_v35 = vcombine.low %v8265_v55, %v8269_v27  ;;  %v13073_v10 = vcombine.low %v8273_v42, %v8277_v4  ;;  %v13074_v50 = vcombine.low %v8281_v57, %v8285_v1 }
 0x548   : > { %v13075_v32 = vcombine.low %v8289_v16, %v8293_v6  ;;  %v6606_v18 = vadd.f32 %v23619_v30, %v27723_v13  ;;  %v6610_v31 = vadd.f32 %v23713_v40, %v27725_v49  ;;  %v6608_v52 = vadd.f32 %v6394_v29, %v27726_v25  ;;  %v6412_v42 = vpop.xlane.xlu0 %6411 }
 0x549   : > { %v6488_v2 = vsel %vm6139_vm2, %v23604_v23, 0.0  ;;  %v12974_v55 = vcombine.low %v8201_v33, %v8205_v28  ;;  %v12975_v27 = vcombine.low %v8209_v61, %v8213_v22  ;;  %v23879_v6 = vsub.s32 %v17767_v56, %v27694_v0  ;;  %v23886_v23 = vpop.permute.xlu1 %17293 }
 0x54a   : > { %v17690_v13 = vadd.s32 4294967272, %v23690_v46  ;;  %v12976_v30 = vcombine.low %v8217_v15, %v8221_v53  ;;  %v13082_v40 = vrot.slane %v13072_v35, %v22641_v47  ;;  %v13089_v16 = vrot.slane %v13073_v10, %v22641_v47  ;;  %27728 = vst [vmem:[#allocation38_spill] sm:$0xff] %v23886_v23 }
 0x54b   : > { %6495 = vadd.xlane.f32.xlu0 %v6494_v26  ;;  %v27724_v26 = vld [vmem:[#allocation50_spill] sm:$0xff]  ;;  %27727 = vst [vmem:[#allocation69_spill] sm:$0xff] %v23879_v6  ;;  %v13096_v29 = vrot.slane %v13074_v50, %v22641_v47  ;;  %v13103_v25 = vrot.slane %v13075_v32, %v22641_v47  ;;  %v23889_v28 = vadd.f32 %v22578_v58, %v6600_v38  ;;  %v17676_v38 = vadd.s32 4294967288, %v23690_v46  ;;  %v27742_v6 = vld [vmem:[#allocation121_spill] sm:$0xff] }
 0x54c   : > { %v6604_v36 = vadd.f32 %v23663_v41, %v27724_v26  ;;  %v12977_v41 = vcombine.low %v8225_v44, %v8229_v60  ;;  %v23892_v33 = vadd.f32 %v22578_v58, %v6606_v18  ;;  %v23898_v60 = vsub.s32 %v17753_v43, %v27694_v0  ;;  %v6406_v22 = vpop.xlane.xlu0 %6405 }
 0x54d   : > { %27729 = vst [vmem:[#allocation19_spill] sm:$0xff] %v23889_v28  ;;  %v23901_v10 = vadd.f32 %v22578_v58, %v6610_v31  ;;  %v23904_v50 = vadd.f32 %v22578_v58, %v6608_v52  ;;  %v12984_v32 = vrot.slane %v12974_v55, %v22641_v47  ;;  %v12991_v35 = vrot.slane %v12975_v27, %v22641_v47  ;;  %v27736_v52 = vld [vmem:[#allocation9_spill] sm:$0xff]  ;;  %v6379_v61 = vpop.xlane.xlu1 %6378 }
 0x54e   : > { %27730 = vst [vmem:[#allocation67_spill] sm:$0xff] %v23892_v33  ;;  %v23895_v49 = vadd.f32 %v22578_v58, %v6604_v36  ;;  %27732 = vst [vmem:[#allocation73_spill] sm:$0xff] %v23898_v60  ;;  %v17711_v56 = vadd.s32 4294967248, %v23690_v46  ;;  %v12998_v36 = vrot.slane %v12976_v30, %v22641_v47  ;;  %v13005_v4 = vrot.slane %v12977_v41, %v22641_v47 }
 0x54f   : > { %6489 = vadd.xlane.f32.xlu0 %v6488_v2  ;;  %27733 = vst [vmem:[#allocation42_spill] sm:$0xff] %v23901_v10  ;;  %27734 = vst [vmem:[#allocation71_spill] sm:$0xff] %v23904_v50  ;;  %v23913_v43 = vsub.s32 %v17690_v13, %v27694_v0  ;;  %v13104_v31 = vcombine.low %v13082_v40, %v13089_v16  ;;  %v13105_v57 = vcombine.low %v13096_v29, %v13103_v25  ;;  %v27739_v16 = vld [vmem:[#allocation77_spill] sm:$0xff]  ;;  %v27740_v25 = vld [vmem:[#allocation60_spill] sm:$0xff] }
 0x550   : > { %27731 = vst [vmem:[#allocation44_spill] sm:$0xff] %v23895_v49  ;;  %v7785_v1 = vrot.slane %v27736_v52, %v22568_v63  ;;  %v7789_v18 = vrot.slane %v27736_v52, %v22585_v37  ;;  %v7793_v15 = vrot.slane %v27736_v52, %v22595_v17  ;;  %v7797_v53 = vrot.slane %v27736_v52, %v22598_v14 }
 0x551   : > { %27735 = vst [vmem:[#allocation48_spill] sm:$0xff] %v23913_v43  ;;  %v7801_v44 = vrot.slane %v27736_v52, %v22601_v5  ;;  %v13006_v26 = vcombine.low %v12984_v32, %v12991_v35  ;;  %v7805_v2 = vrot.slane %v27736_v52, %v27716_v39  ;;  %v7809_v55 = vrot.slane %v27736_v52, %v27717_v3  ;;  %v27741_v35 = vld [vmem:[#allocation58_spill] sm:$0xff] }
 0x552   : > { %v7813_v27 = vrot.slane %v27736_v52, %v27718_v24  ;;  %v23932_v13 = vsub.s32 %v17676_v38, %v27694_v0  ;;  %v23935_v30 = vsub.s32 %v17711_v56, %v27694_v0  ;;  %v17697_v41 = vadd.s32 4294967264, %v23690_v46 }
 0x553   : > { %v13007_v40 = vcombine.low %v12998_v36, %v13005_v4  ;;  %v6603_v29 = vadd.f32 %v6379_v61, %v27739_v16  ;;  %v6614_v32 = vadd.f32 %v6412_v42, %v27740_v25  ;;  %v6612_v23 = vadd.f32 %v6406_v22, %v27741_v35  ;;  %v27743_v36 = vld [vmem:[#allocation15_spill] sm:$0xff] }
 0x554   : > { %27737 = vst [vmem:[#allocation100_spill] sm:$0xff] %v23932_v13  ;;  %27738 = vst [vmem:[#allocation101_spill] sm:$0xff] %v23935_v30  ;;  %v6449_v60 = vsel %vm6139_vm2, %v27742_v6, 0.0  ;;  %v13112_v52 = vrot.slane %v13104_v31, %v22641_v47  ;;  %v13119_v38 = vrot.slane %v13105_v57, %v22641_v47  ;;  %v12337_v43 = vcombine.low %v7785_v1, %v7789_v18  ;;  %v23955_v57 = vpop.permute.xlu0 %17329 }
 0x555   : > { %v12338_v13 = vcombine.low %v7793_v15, %v7797_v53  ;;  %v13014_v56 = vrot.slane %v13006_v26, %v22641_v47  ;;  %v12339_v30 = vcombine.low %v7801_v44, %v7805_v2  ;;  %v12340_v50 = vcombine.low %v7809_v55, %v7813_v27  ;;  %27744 = vst [vmem:[#allocation102_spill] sm:$0xff] %v23955_v57  ;;  %v27749_v55 = vld [vmem:[#allocation122_spill] sm:$0xff] }
 0x556   : > { %v7721_v4 = vrot.slane %v27743_v36, %v22568_v63  ;;  %v13021_v42 = vrot.slane %v13007_v40, %v22641_v47  ;;  %v7725_v61 = vrot.slane %v27743_v36, %v22585_v37  ;;  %v7729_v6 = vrot.slane %v27743_v36, %v22595_v17 }
 0x557   : > { %v7733_v31 = vrot.slane %v27743_v36, %v22598_v14  ;;  %v7737_v1 = vrot.slane %v27743_v36, %v22601_v5  ;;  %v7741_v22 = vrot.slane %v27743_v36, %v27716_v39  ;;  %v7745_v18 = vrot.slane %v27743_v36, %v27717_v3 }
 0x558   : > { %v7749_v15 = vrot.slane %v27743_v36, %v27718_v24  ;;  %v23966_v53 = vadd.f32 %v22578_v58, %v6603_v29  ;;  %v23969_v44 = vadd.f32 %v22578_v58, %v6614_v32  ;;  %v23975_v26 = vsub.s32 %v17697_v41, %v27694_v0 }
 0x559   : > { %v17718_v2 = vadd.s32 4294967240, %v23690_v46  ;;  %v6443_v27 = vsel %vm6139_vm2, %v27749_v55, 0.0  ;;  %v13120_v40 = vcombine.low %v13112_v52, %v13119_v38  ;;  %v12347_v16 = vrot.slane %v12337_v43, %v22641_v47 }
 0x55a   : > { %27745 = vst [vmem:[#allocation46_spill] sm:$0xff] %v23966_v53  ;;  %27746 = vst [vmem:[#allocation52_spill] sm:$0xff] %v23969_v44  ;;  %v13022_v25 = vcombine.low %v13014_v56, %v13021_v42  ;;  %v12354_v29 = vrot.slane %v12338_v13, %v22641_v47  ;;  %v12361_v32 = vrot.slane %v12339_v30, %v22641_v47 }
 0x55b   : > { %27748 = vst [vmem:[#allocation56_spill] sm:$0xff] %v23975_v26  ;;  %v12368_v35 = vrot.slane %v12340_v50, %v22641_v47  ;;  %v12240_v36 = vcombine.low %v7729_v6, %v7733_v31  ;;  %v12241_v41 = vcombine.low %v7737_v1, %v7741_v22  ;;  %v12242_v57 = vcombine.low %v7745_v18, %v7749_v15  ;;  %v23984_v26 = vpop.permute.xlu1 %17287  ;;  %v23994_v50 = vpop.permute.xlu0 %17323 }
 0x55c   : > { %6450 = vadd.xlane.f32.xlu1 %v6449_v60  ;;  %v23972_v60 = vadd.f32 %v22578_v58, %v6612_v23  ;;  %v12239_v23 = vcombine.low %v7721_v4, %v7725_v61  ;;  %27750 = vst [vmem:[#allocation54_spill] sm:$0xff] %v23984_v26  ;;  %v8393_v55 = vrot.slane %v23594_v19, %v22568_v63  ;;  %27751 = vst [vmem:[#allocation9_spill] sm:$0xff] %v23994_v50 }
 0x55d   : > { %v8397_v43 = vrot.slane %v23594_v19, %v22585_v37  ;;  %v8401_v13 = vrot.slane %v23594_v19, %v22595_v17  ;;  %v8405_v30 = vrot.slane %v23594_v19, %v22598_v14  ;;  %v8409_v52 = vrot.slane %v23594_v19, %v22601_v5 }
 0x55e   : > { %27747 = vst [vmem:[#allocation50_spill] sm:$0xff] %v23972_v60  ;;  %v8413_v38 = vrot.slane %v23594_v19, %v27716_v39  ;;  %v8417_v56 = vrot.slane %v23594_v19, %v27717_v3  ;;  %v8421_v4 = vrot.slane %v23594_v19, %v27718_v24  ;;  %v8329_v42 = vrot.slane %v23615_v8, %v22568_v63 }
 0x55f   : > { %v8333_v61 = vrot.slane %v23615_v8, %v22585_v37  ;;  %v8337_v6 = vrot.slane %v23615_v8, %v22595_v17  ;;  %v8341_v31 = vrot.slane %v23615_v8, %v22598_v14  ;;  %v8345_v1 = vrot.slane %v23615_v8, %v22601_v5  ;;  %v6373_v15 = vpop.xlane.xlu1 %6372  ;;  %v6424_v60 = vpop.xlane.xlu0 %6423 }
 0x560   : > { %6444 = vadd.xlane.f32.xlu1 %v6443_v27  ;;  %v8349_v22 = vrot.slane %v23615_v8, %v27716_v39  ;;  %v8353_v19 = vrot.slane %v23615_v8, %v27717_v3  ;;  %v8357_v18 = vrot.slane %v23615_v8, %v27718_v24  ;;  %v12369_v27 = vcombine.low %v12347_v16, %v12354_v29  ;;  %v27752_v8 = vld [vmem:[#allocation75_spill] sm:$0xff] }
 0x561   : > { %v12370_v50 = vcombine.low %v12361_v32, %v12368_v35  ;;  %v12249_v26 = vrot.slane %v12239_v23, %v22641_v47  ;;  %v12256_v53 = vrot.slane %v12240_v36, %v22641_v47  ;;  %v12263_v44 = vrot.slane %v12241_v41, %v22641_v47  ;;  %v27753_v32 = vld [vmem:[#allocation64_spill] sm:$0xff] }
 0x562   : > { %v12270_v10 = vrot.slane %v12242_v57, %v22641_v47  ;;  %v13268_v49 = vcombine.low %v8393_v55, %v8397_v43  ;;  %v13269_v33 = vcombine.low %v8401_v13, %v8405_v30  ;;  %v13270_v28 = vcombine.low %v8409_v52, %v8413_v38 }
 0x563   : > { %v13271_v20 = vcombine.low %v8417_v56, %v8421_v4  ;;  %v13170_v48 = vcombine.low %v8329_v42, %v8333_v61  ;;  %v13171_v45 = vcombine.low %v8337_v6, %v8341_v31  ;;  %v6601_v7 = vadd.f32 %v6373_v15, %v27752_v8 }
 0x564   : > { %v13172_v16 = vcombine.low %v8345_v1, %v8349_v22  ;;  %v13173_v29 = vcombine.low %v8353_v19, %v8357_v18  ;;  %v6618_v35 = vadd.f32 %v6424_v60, %v27753_v32  ;;  %v24028_v23 = vsub.s32 %v17718_v2, %v27694_v0  ;;  %v24067_v19 = vpop.permute.xlu1 %17296  ;;  %v27760_v18 = vld [vmem:[#allocation62_spill] sm:$0xff]  ;;  %v27761_v32 = vld [vmem:[#allocation123_spill] sm:$0xff] }
 0x565   : > { %17413 = vperm.xlu0 %19740, %v13120_v40   ;;  %v17704_v40 = vadd.s32 4294967256, %v23690_v46  ;;  %v12377_v57 = vrot.slane %v12369_v27, %v22641_v47  ;;  %v12384_v36 = vrot.slane %v12370_v50, %v22641_v47  ;;  %v12271_v41 = vcombine.low %v12249_v26, %v12256_v53  ;;  %27759 = vst [vmem:[#allocation15_spill] sm:$0xff] %v24067_v19 }
 0x566   : > { %27754 = vst [vmem:[#allocation77_spill] sm:$0xff] %v24028_v23  ;;  %v12272_v55 = vcombine.low %v12263_v44, %v12270_v10  ;;  %v13278_v43 = vrot.slane %v13268_v49, %v22641_v47  ;;  %v13285_v13 = vrot.slane %v13269_v33, %v22641_v47  ;;  %v13292_v30 = vrot.slane %v13270_v28, %v22641_v47  ;;  %v27757_v33 = vld [vmem:[#allocation29_spill] sm:$0xff]  ;;  %v6418_v28 = vpop.xlane.xlu0 %6417 }
 0x567   : > { %v13299_v52 = vrot.slane %v13271_v20, %v22641_v47  ;;  %v13180_v60 = vrot.slane %v13170_v48, %v22641_v47  ;;  %v13187_v2 = vrot.slane %v13171_v45, %v22641_v47  ;;  %v24042_v38 = vsub.s32 %v17704_v40, %v27694_v0 }
 0x568   : > { %v13194_v10 = vrot.slane %v13172_v16, %v22641_v47  ;;  %v13201_v49 = vrot.slane %v13173_v29, %v22641_v47  ;;  %v7913_v53 = vrot.slane %v27757_v33, %v22568_v63  ;;  %v7917_v20 = vrot.slane %v27757_v33, %v22585_v37 }
 0x569   : > { %17407 = vperm.xlu0 %19740, %v13022_v25   ;;  %v24039_v25 = vadd.f32 %v22578_v58, %v6601_v7  ;;  %27756 = vst [vmem:[#allocation58_spill] sm:$0xff] %v24042_v38  ;;  %v7921_v48 = vrot.slane %v27757_v33, %v22595_v17  ;;  %v7925_v7 = vrot.slane %v27757_v33, %v22598_v14  ;;  %v24072_v27 = vsel %vm6139_vm2, %v23644_v12, 0.0 }
 0x56a   : > { %v24055_v45 = vadd.f32 %v22578_v58, %v6618_v35  ;;  %v12385_v44 = vcombine.low %v12377_v57, %v12384_v36  ;;  %v12279_v26 = vrot.slane %v12271_v41, %v22641_v47  ;;  %v12286_v50 = vrot.slane %v12272_v55, %v22641_v47  ;;  %v27762_v57 = vld [vmem:[#allocation124_spill] sm:$0xff] }
 0x56b   : > { %27755 = vst [vmem:[#allocation60_spill] sm:$0xff] %v24039_v25  ;;  %v13300_v56 = vcombine.low %v13278_v43, %v13285_v13  ;;  %v13301_v4 = vcombine.low %v13292_v30, %v13299_v52  ;;  %v13202_v42 = vcombine.low %v13180_v60, %v13187_v2  ;;  %v7929_v61 = vrot.slane %v27757_v33, %v22601_v5  ;;  %v27772_v25 = vld [vmem:[#allocation37_spill] sm:$0xff] }
 0x56c   : > { %27758 = vst [vmem:[#allocation121_spill] sm:$0xff] %v24055_v45  ;;  %v13203_v6 = vcombine.low %v13194_v10, %v13201_v49  ;;  %v7933_v31 = vrot.slane %v27757_v33, %v27716_v39  ;;  %v7937_v1 = vrot.slane %v27757_v33, %v27717_v3  ;;  %v7941_v22 = vrot.slane %v27757_v33, %v27718_v24  ;;  %v27763_v10 = vld [vmem:[#allocation31_spill] sm:$0xff] }
 0x56d   : > { %v6616_v15 = vadd.f32 %v6418_v28, %v27760_v18  ;;  %v12533_v8 = vcombine.low %v7913_v53, %v7917_v20  ;;  %v12534_v40 = vcombine.low %v7921_v48, %v7925_v7  ;;  %v12287_v16 = vcombine.low %v12279_v26, %v12286_v50  ;;  %v24106_v28 = vpop.permute.xlu1 %17290 }
 0x56e   : > { %v24076_v29 = vsel %vm6139_vm2, %v23650_v21, 0.0  ;;  %v24080_v35 = vsel %vm6139_vm2, %v27761_v32, 0.0  ;;  %v24084_v36 = vsel %vm6139_vm2, %v27762_v57, 0.0  ;;  %v17746_v41 = vadd.s32 4294967208, %v23690_v46  ;;  %27764 = vst [vmem:[#allocation122_spill] sm:$0xff] %v24106_v28 }
 0x56f   : > { %v17732_v12 = vadd.s32 4294967224, %v23690_v46  ;;  %v13308_v55 = vrot.slane %v13300_v56, %v22641_v47  ;;  %v13315_v43 = vrot.slane %v13301_v4, %v22641_v47  ;;  %v13210_v13 = vrot.slane %v13202_v42, %v22641_v47  ;;  %v27786_v46 = vld [vmem:[#allocation68_spill] sm:$0xff] }
 0x570   : > { %v13217_v21 = vrot.slane %v13203_v6, %v22641_v47  ;;  %v12535_v30 = vcombine.low %v7929_v61, %v7933_v31  ;;  %v12536_v52 = vcombine.low %v7937_v1, %v7941_v22  ;;  %v12543_v60 = vrot.slane %v12533_v8, %v22641_v47 }
 0x571   : > { %17368 = vperm.xlu1 %19741, %v12385_v44   ;;  %v12550_v2 = vrot.slane %v12534_v40, %v22641_v47  ;;  %v7849_v49 = vrot.slane %v27763_v10, %v22568_v63  ;;  %v7853_v33 = vrot.slane %v27763_v10, %v22585_v37  ;;  %v7857_v53 = vrot.slane %v27763_v10, %v22595_v17  ;;  %v24143_v38 = vpop.permute.xlu1 %17305 }
 0x572   : > { %v7861_v20 = vrot.slane %v27763_v10, %v22598_v14  ;;  %v7865_v48 = vrot.slane %v27763_v10, %v22601_v5  ;;  %v7869_v7 = vrot.slane %v27763_v10, %v27716_v39  ;;  %v7873_v44 = vrot.slane %v27763_v10, %v27717_v3  ;;  %27768 = vst [vmem:[#allocation62_spill] sm:$0xff] %v24143_v38 }
 0x573   : > { %v7877_v26 = vrot.slane %v27763_v10, %v27718_v24  ;;  %v8521_v50 = vrot.slane %v23647_v54, %v22568_v63  ;;  %v8525_v56 = vrot.slane %v23647_v54, %v22585_v37  ;;  %v8529_v4 = vrot.slane %v23647_v54, %v22595_v17 }
 0x574   : > { %v8533_v42 = vrot.slane %v23647_v54, %v22598_v14  ;;  %v8537_v61 = vrot.slane %v23647_v54, %v22601_v5  ;;  %v8541_v6 = vrot.slane %v23647_v54, %v27716_v39  ;;  %v12557_v31 = vrot.slane %v12535_v30, %v22641_v47 }
 0x575   : > { %17362 = vperm.xlu1 %19741, %v12287_v16   ;;  %v12564_v1 = vrot.slane %v12536_v52, %v22641_v47  ;;  %v8545_v22 = vrot.slane %v23647_v54, %v27717_v3  ;;  %v8549_v18 = vrot.slane %v23647_v54, %v27718_v24  ;;  %v24131_v8 = vadd.f32 %v22578_v58, %v6616_v15 }
 0x576   : > { %v24133_v40 = vcombine.low %v12543_v60, %v12550_v2  ;;  %v12435_v16 = vcombine.low %v7849_v49, %v7853_v33  ;;  %v12436_v32 = vcombine.low %v7857_v53, %v7861_v20  ;;  %v24136_v57 = vsub.s32 %v17746_v41, %v27694_v0 }
 0x577   : > { %27765 = vst [vmem:[#allocation75_spill] sm:$0xff] %v24131_v8  ;;  %v24138_v10 = vcombine.low %v13308_v55, %v13315_v43  ;;  %v12437_v30 = vcombine.low %v7865_v48, %v7869_v7  ;;  %v12438_v52 = vcombine.low %v7873_v44, %v7877_v26  ;;  %v24141_v19 = vsub.s32 %v17732_v12, %v27694_v0  ;;  %v6391_v7 = vpop.xlane.xlu1 %6390 }
 0x578   : > { %27766 = vst [vmem:[#allocation64_spill] sm:$0xff] %v24136_v57  ;;  %v13464_v28 = vcombine.low %v8521_v50, %v8525_v56  ;;  %v13465_v23 = vcombine.low %v8529_v4, %v8533_v42  ;;  %v13466_v54 = vcombine.low %v8537_v61, %v8541_v6  ;;  %v24145_v15 = vcombine.low %v13210_v13, %v13217_v21 }
 0x579   : > { %27767 = vst [vmem:[#allocation29_spill] sm:$0xff] %v24141_v19  ;;  %v24147_v60 = vcombine.low %v12557_v31, %v12564_v1  ;;  %v24151_v41 = vsel %vm6139_vm2, %v23693_v59, 0.0  ;;  %v13467_v55 = vcombine.low %v8545_v22, %v8549_v18  ;;  %v12445_v12 = vrot.slane %v12435_v16, %v22641_v47  ;;  %v27771_v22 = vld [vmem:[#allocation81_spill] sm:$0xff] }
 0x57a   : > { %27769 = vst [vmem:[#allocation123_spill] sm:$0xff] %v24151_v41  ;;  %v12452_v2 = vrot.slane %v12436_v32, %v22641_v47  ;;  %v24159_v49 = vsel %vm6139_vm2, %v23702_v51, 0.0  ;;  %v12459_v13 = vrot.slane %v12437_v30, %v22641_v47  ;;  %v12466_v21 = vrot.slane %v12438_v52, %v22641_v47 }
 0x57b   : > { %27770 = vst [vmem:[#allocation124_spill] sm:$0xff] %v24159_v49  ;;  %v8457_v59 = vrot.slane %v23657_v9, %v22568_v63  ;;  %v8461_v33 = vrot.slane %v23657_v9, %v22585_v37  ;;  %v13474_v53 = vrot.slane %v13464_v28, %v22641_v47  ;;  %v13481_v20 = vrot.slane %v13465_v23, %v22641_v47 }
 0x57c   : > { %v13488_v48 = vrot.slane %v13466_v54, %v22641_v47  ;;  %v8465_v51 = vrot.slane %v23657_v9, %v22595_v17  ;;  %v13495_v44 = vrot.slane %v13467_v55, %v22641_v47  ;;  %v8469_v26 = vrot.slane %v23657_v9, %v22598_v14 }
 0x57d   : > { %v8473_v50 = vrot.slane %v23657_v9, %v22601_v5  ;;  %v8477_v56 = vrot.slane %v23657_v9, %v27716_v39  ;;  %v8481_v23 = vrot.slane %v23657_v9, %v27717_v3  ;;  %v8485_v28 = vrot.slane %v23657_v9, %v27718_v24 }
 0x57e   : > { %v8649_v4 = vrot.slane %v23685_v11, %v22568_v63  ;;  %v8653_v42 = vrot.slane %v23685_v11, %v22585_v37  ;;  %v8657_v61 = vrot.slane %v23685_v11, %v22595_v17  ;;  %v8661_v6 = vrot.slane %v23685_v11, %v22598_v14 }
 0x57f   : > { %v8665_v31 = vrot.slane %v23685_v11, %v22601_v5  ;;  %v8669_v1 = vrot.slane %v23685_v11, %v27716_v39  ;;  %v6607_v9 = vadd.f32 %v6391_v7, %v27771_v22  ;;  %v12580_v18 = vrot.slane %v24147_v60, %v22641_v47 }
 0x580   : > { %v8673_v16 = vrot.slane %v23685_v11, %v27717_v3  ;;  %v8677_v32 = vrot.slane %v23685_v11, %v27718_v24  ;;  %v24202_v30 = vcombine.low %v12445_v12, %v12452_v2  ;;  %v24204_v52 = vcombine.low %v12459_v13, %v12466_v21 }
 0x581   : > { %v24206_v54 = vcombine.low %v13474_v53, %v13481_v20  ;;  %v13366_v55 = vcombine.low %v8457_v59, %v8461_v33  ;;  %v13497_v43 = vcombine.low %v13488_v48, %v13495_v44  ;;  %v13367_v38 = vcombine.low %v8465_v51, %v8469_v26 }
 0x582   : > { %v13368_v57 = vcombine.low %v8473_v50, %v8477_v56  ;;  %v13369_v7 = vcombine.low %v8481_v23, %v8485_v28  ;;  %v13660_v22 = vcombine.low %v8649_v4, %v8653_v42  ;;  %v13661_v19 = vcombine.low %v8657_v61, %v8661_v6 }
 0x583   : > { %v13662_v60 = vcombine.low %v8665_v31, %v8669_v1  ;;  %v8041_v8 = vrot.slane %v27772_v25, %v22568_v63  ;;  %v13663_v11 = vcombine.low %v8673_v16, %v8677_v32  ;;  %v8045_v12 = vrot.slane %v27772_v25, %v22585_v37 }
 0x584   : > { %v8049_v2 = vrot.slane %v27772_v25, %v22595_v17  ;;  %v8053_v13 = vrot.slane %v27772_v25, %v22598_v14  ;;  %v8057_v21 = vrot.slane %v27772_v25, %v22601_v5  ;;  %v8061_v59 = vrot.slane %v27772_v25, %v27716_v39 }
 0x585   : > { %v8065_v33 = vrot.slane %v27772_v25, %v27717_v3  ;;  %v12475_v53 = vrot.slane %v24202_v30, %v22641_v47  ;;  %v12482_v20 = vrot.slane %v24204_v52, %v22641_v47  ;;  %v13504_v48 = vrot.slane %v24206_v54, %v22641_v47 }
 0x586   : > { %v13376_v51 = vrot.slane %v13366_v55, %v22641_v47  ;;  %v13511_v44 = vrot.slane %v13497_v43, %v22641_v47  ;;  %v13383_v26 = vrot.slane %v13367_v38, %v22641_v47  ;;  %v13390_v50 = vrot.slane %v13368_v57, %v22641_v47 }
 0x587   : > { %v13397_v56 = vrot.slane %v13369_v7, %v22641_v47  ;;  %v13677_v23 = vrot.slane %v13661_v19, %v22641_v47  ;;  %v13684_v28 = vrot.slane %v13662_v60, %v22641_v47  ;;  %v13691_v4 = vrot.slane %v13663_v11, %v22641_v47  ;;  %v27773_v11 = vld [vmem:[#allocation126_spill] sm:$0xff] }
 0x588   : > { %6507 = vadd.xlane.f32.xlu0 %v24072_v27  ;;  %v8069_v27 = vrot.slane %v27772_v25, %v27718_v24  ;;  %v13670_v25 = vrot.slane %v13660_v22, %v22641_v47  ;;  %v12729_v42 = vcombine.low %v8041_v8, %v8045_v12  ;;  %v12730_v61 = vcombine.low %v8049_v2, %v8053_v13 }
 0x589   : > { %v12731_v6 = vcombine.low %v8057_v21, %v8061_v59  ;;  %v8585_v38 = vrot.slane %v23711_v62, %v22568_v63  ;;  %v8589_v57 = vrot.slane %v23711_v62, %v22585_v37  ;;  %v8597_v19 = vrot.slane %v23711_v62, %v22598_v14 }
 0x58a   : > { %v12732_v43 = vcombine.low %v8065_v33, %v8069_v27  ;;  %v8601_v31 = vrot.slane %v23711_v62, %v22601_v5  ;;  %v8605_v8 = vrot.slane %v23711_v62, %v27716_v39  ;;  %v8609_v1 = vrot.slane %v23711_v62, %v27717_v3 }
 0x58b   : > { %v8613_v16 = vrot.slane %v23711_v62, %v27718_v24  ;;  %v24257_v32 = vcombine.low %v13376_v51, %v13383_v26  ;;  %v24259_v30 = vcombine.low %v13390_v50, %v13397_v56  ;;  %v24261_v52 = vcombine.low %v13670_v25, %v13677_v23  ;;  %v24285_v50 = vpop.permute.xlu0 %17341 }
 0x58c   : > { %6501 = vadd.xlane.f32.xlu0 %v24076_v29  ;;  %v8593_v29 = vrot.slane %v23711_v62, %v22595_v17  ;;  %v24263_v54 = vcombine.low %v13684_v28, %v13691_v4  ;;  %v12739_v55 = vrot.slane %v12729_v42, %v22641_v47  ;;  %v12746_v7 = vrot.slane %v12730_v61, %v22641_v47  ;;  %v27775_v62 = vld [vmem:[#allocation35_spill] sm:$0xff] }
 0x58d   : > { %v12753_v22 = vrot.slane %v12731_v6, %v22641_v47  ;;  %v12760_v60 = vrot.slane %v12732_v43, %v22641_v47  ;;  %v24271_v12 = vsel %vm6139_vm2, %v27773_v11, 0.0  ;;  %v24275_v2 = vsel %vm6139_vm2, %v27775_v62, 0.0  ;;  %27780 = vst [vmem:[#allocation35_spill] sm:$0xff] %v24285_v50  ;;  %v27785_v62 = vld [vmem:[#allocation8_spill] sm:$0xff] }
 0x58e   : > { %27774 = vst [vmem:[#allocation31_spill] sm:$0xff] %v24271_v12  ;;  %27776 = vst [vmem:[#allocation81_spill] sm:$0xff] %v24275_v2  ;;  %v13562_v13 = vcombine.low %v8585_v38, %v8589_v57  ;;  %v13563_v21 = vcombine.low %v8593_v29, %v8597_v19  ;;  %v24278_v59 = vadd.f32 %v22578_v58, %v6607_v9 }
 0x58f   : > { %v27778_v33 = vrot.slane %v24133_v40, %v22641_v47  ;;  %v13564_v51 = vcombine.low %v8601_v31, %v8605_v8  ;;  %v13565_v26 = vcombine.low %v8609_v1, %v8613_v16  ;;  %v24287_v56 = vcombine.low %v12475_v53, %v12482_v20 }
 0x590   : > { %27777 = vst [vmem:[#allocation37_spill] sm:$0xff] %v24278_v59  ;;  %v24289_v25 = vcombine.low %v13504_v48, %v13511_v44  ;;  %v24301_v4 = vcombine.low %v12753_v22, %v12760_v60  ;;  %v13572_v53 = vrot.slane %v13562_v13, %v22641_v47  ;;  %v13579_v20 = vrot.slane %v13563_v21, %v22641_v47  ;;  %v27783_v48 = vld [vmem:[#allocation125_spill] sm:$0xff] }
 0x591   : > { %v24283_v27 = vcombine.low %v27778_v33, %v12580_v18  ;;  %27781 = vst [vmem:[#allocation128_spill] sm:$0xff] %v24287_v56  ;;  %v24299_v18 = vcombine.low %v12739_v55, %v12746_v7  ;;  %v7977_v44 = vrot.slane %v27783_v48, %v22568_v63  ;;  %v7981_v42 = vrot.slane %v27783_v48, %v22585_v37  ;;  %v24332_v7 = vpop.permute.xlu0 %17335 }
 0x592   : > { %27782 = vst [vmem:[#allocation129_spill] sm:$0xff] %v24289_v25  ;;  %v13586_v61 = vrot.slane %v13564_v51, %v22641_v47  ;;  %v13593_v6 = vrot.slane %v13565_v26, %v22641_v47  ;;  %v7985_v43 = vrot.slane %v27783_v48, %v22595_v17  ;;  %v7989_v38 = vrot.slane %v27783_v48, %v22598_v14 }
 0x593   : > { %27779 = vst [vmem:[#allocation126_spill] sm:$0xff] %v24283_v27  ;;  %v7993_v57 = vrot.slane %v27783_v48, %v22601_v5  ;;  %v7997_v29 = vrot.slane %v27783_v48, %v27716_v39  ;;  %v8001_v19 = vrot.slane %v27783_v48, %v27717_v3  ;;  %v8005_v31 = vrot.slane %v27783_v48, %v27718_v24 }
 0x594   : > { %v8777_v8 = vrot.slane %v23722_v34, %v22568_v63  ;;  %v8781_v1 = vrot.slane %v23722_v34, %v22585_v37  ;;  %v8785_v16 = vrot.slane %v23722_v34, %v22595_v17  ;;  %v8789_v55 = vrot.slane %v23722_v34, %v22598_v14  ;;  %27784 = vst [vmem:[#allocation125_spill] sm:$0xff] %v24332_v7 }
 0x595   : > { %v8793_v22 = vrot.slane %v23722_v34, %v22601_v5  ;;  %v8801_v60 = vrot.slane %v23722_v34, %v27717_v3  ;;  %v8805_v11 = vrot.slane %v23722_v34, %v27718_v24  ;;  %v8713_v13 = vrot.slane %v27785_v62, %v22568_v63  ;;  %v6436_v7 = vpop.xlane.xlu0 %6435 }
 0x596   : > { %v8717_v21 = vrot.slane %v27785_v62, %v22585_v37  ;;  %v8721_v33 = vrot.slane %v27785_v62, %v22595_v17  ;;  %v8725_v51 = vrot.slane %v27785_v62, %v22598_v14  ;;  %v8729_v26 = vrot.slane %v27785_v62, %v22601_v5 }
 0x597   : > { %v8733_v48 = vrot.slane %v27785_v62, %v27716_v39  ;;  %v8741_v28 = vrot.slane %v27785_v62, %v27718_v24  ;;  %v12769_v40 = vrot.slane %v24299_v18, %v22641_v47  ;;  %v13594_v23 = vcombine.low %v13572_v53, %v13579_v20 }
 0x598   : > { %v12631_v9 = vcombine.low %v7977_v44, %v7981_v42  ;;  %v12632_v50 = vcombine.low %v7985_v43, %v7989_v38  ;;  %v12633_v59 = vcombine.low %v7993_v57, %v7997_v29  ;;  %v12634_v45 = vcombine.low %v8001_v19, %v8005_v31  ;;  %v27788_v29 = vld [vmem:[#allocation66_spill] sm:$0xff] }
 0x599   : > { %6462 = vadd.xlane.f32.xlu1 %v24080_v35  ;;  %v8797_v35 = vrot.slane %v23722_v34, %v27716_v39  ;;  %v8737_v34 = vrot.slane %v27785_v62, %v27717_v3  ;;  %v13856_v25 = vcombine.low %v8777_v8, %v8781_v1  ;;  %v13857_v2 = vcombine.low %v8785_v16, %v8789_v55 }
 0x59a   : > { %v12776_v12 = vrot.slane %v24301_v4, %v22641_v47  ;;  %v13859_v41 = vcombine.low %v8801_v60, %v8805_v11  ;;  %v13758_v56 = vcombine.low %v8713_v13, %v8717_v21  ;;  %v13595_v62 = vcombine.low %v13586_v61, %v13593_v6 }
 0x59b   : > { %v13858_v49 = vcombine.low %v8793_v22, %v8797_v35  ;;  %v13759_v0 = vcombine.low %v8721_v33, %v8725_v51  ;;  %v13761_v27 = vcombine.low %v8737_v34, %v8741_v28  ;;  %v6622_v18 = vadd.f32 %v6436_v7, %v27786_v46  ;;  %v24421_v34 = vpop.permute.xlu1 %17299 }
 0x59c   : > { %v13602_v53 = vrot.slane %v13594_v23, %v22641_v47  ;;  %v12641_v20 = vrot.slane %v12631_v9, %v22641_v47  ;;  %v12648_v44 = vrot.slane %v12632_v50, %v22641_v47  ;;  %v12655_v42 = vrot.slane %v12633_v59, %v22641_v47  ;;  %v27787_v9 = vld [vmem:[#allocation11_spill] sm:$0xff]  ;;  %v6430_v50 = vpop.xlane.xlu0 %6429  ;;  %27794 = vst [vmem:[#allocation68_spill] sm:$0xff] %v24421_v34 }
 0x59d   : > { %6456 = vadd.xlane.f32.xlu1 %v24084_v36  ;;  %v13760_v36 = vcombine.low %v8729_v26, %v8733_v48  ;;  %v12662_v4 = vrot.slane %v12634_v45, %v22641_v47  ;;  %v13866_v43 = vrot.slane %v13856_v25, %v22641_v47  ;;  %v13873_v61 = vrot.slane %v13857_v2, %v22641_v47 }
 0x59e   : > { %v13880_v28 = vrot.slane %v13858_v49, %v22641_v47  ;;  %v13887_v46 = vrot.slane %v13859_v41, %v22641_v47  ;;  %v13768_v23 = vrot.slane %v13758_v56, %v22641_v47  ;;  %v8905_v6 = vrot.slane %v27787_v9, %v22568_v63 }
 0x59f   : > { %v13782_v59 = vrot.slane %v13760_v36, %v22641_v47  ;;  %v13789_v45 = vrot.slane %v13761_v27, %v22641_v47  ;;  %v8909_v25 = vrot.slane %v27787_v9, %v22585_v37  ;;  %v8913_v49 = vrot.slane %v27787_v9, %v22595_v17 }
 0x5a0   : > { %v8917_v41 = vrot.slane %v27787_v9, %v22598_v14  ;;  %v8921_v2 = vrot.slane %v27787_v9, %v22601_v5  ;;  %v8925_v56 = vrot.slane %v27787_v9, %v27716_v39  ;;  %v12663_v27 = vcombine.low %v12641_v20, %v12648_v44 }
 0x5a1   : > { %v8929_v38 = vrot.slane %v27787_v9, %v27717_v3  ;;  %v8933_v57 = vrot.slane %v27787_v9, %v27718_v24  ;;  %v6620_v19 = vadd.f32 %v6430_v50, %v27788_v29  ;;  %v12664_v31 = vcombine.low %v12655_v42, %v12662_v4  ;;  %v27797_v4 = vld [vmem:[#allocation7_spill] sm:$0xff]  ;;  %v6385_v50 = vpop.xlane.xlu1 %6384 }
 0x5a2   : > { %17425 = vperm.xlu0 %19740, %v24138_v10   ;;  %v13775_v10 = vrot.slane %v13759_v0, %v22641_v47  ;;  %v13609_v0 = vrot.slane %v13595_v62, %v22641_v47  ;;  %v13888_v8 = vcombine.low %v13866_v43, %v13873_v61  ;;  %v13889_v1 = vcombine.low %v13880_v28, %v13887_v46  ;;  %v27796_v62 = vld [vmem:[#allocation118_spill] sm:$0xff] }
 0x5a3   : > { %v27789_v16 = vrot.slane %v24259_v30, %v22641_v47  ;;  %v13791_v22 = vcombine.low %v13782_v59, %v13789_v45  ;;  %v14052_v35 = vcombine.low %v8905_v6, %v8909_v25  ;;  %v27791_v60 = vrot.slane %v24263_v54, %v22641_v47  ;;  %v27798_v46 = vld [vmem:[#allocation126_spill] sm:$0xff] }
 0x5a4   : > { %v13790_v7 = vcombine.low %v13768_v23, %v13775_v10  ;;  %v27792_v11 = vrot.slane %v24261_v52, %v22641_v47  ;;  %v24413_v21 = vcombine.low %v12769_v40, %v12776_v12  ;;  %v14053_v33 = vcombine.low %v8913_v49, %v8917_v41  ;;  %v27799_v49 = vld [vmem:[#allocation27_spill] sm:$0xff] }
 0x5a5   : > { %v14054_v30 = vcombine.low %v8921_v2, %v8925_v56  ;;  %v24416_v51 = vadd.f32 %v22578_v58, %v6622_v18  ;;  %v12671_v26 = vrot.slane %v12663_v27, %v22641_v47  ;;  %v14055_v48 = vcombine.low %v8929_v38, %v8933_v57 }
 0x5a6   : > { %17419 = vperm.xlu0 %19740, %v24145_v15   ;;  %v27790_v15 = vrot.slane %v24257_v32, %v22641_v47  ;;  %v24411_v13 = vcombine.low %v27792_v11, %v27791_v60  ;;  %v24418_v32 = vcombine.low %v13602_v53, %v13609_v0  ;;  %v24424_v54 = vadd.f32 %v22578_v58, %v6620_v19  ;;  %v27800_v19 = vld [vmem:[#allocation79_spill] sm:$0xff] }
 0x5a7   : > { %27793 = vst [vmem:[#allocation8_spill] sm:$0xff] %v24416_v51  ;;  %v12678_v52 = vrot.slane %v12664_v31, %v22641_v47  ;;  %v13896_v12 = vrot.slane %v13888_v8, %v22641_v47  ;;  %v13903_v40 = vrot.slane %v13889_v1, %v22641_v47  ;;  %v17774_v36 = vadd.s32 4294967176, %v27796_v62  ;;  %v27801_v8 = vld [vmem:[#allocation97_spill] sm:$0xff] }
 0x5a8   : > { %v24403_v55 = vcombine.low %v27790_v15, %v27789_v16  ;;  %27795 = vst [vmem:[#allocation11_spill] sm:$0xff] %v24424_v54  ;;  %v13798_v18 = vrot.slane %v13790_v7, %v22641_v47  ;;  %v13805_v53 = vrot.slane %v13791_v22, %v22641_v47  ;;  %v14062_v20 = vrot.slane %v14052_v35, %v22641_v47  ;;  %v27803_v16 = vld [vmem:[#allocation128_spill] sm:$0xff] }
 0x5a9   : > { %v14069_v44 = vrot.slane %v14053_v33, %v22641_v47  ;;  %v14076_v42 = vrot.slane %v14054_v30, %v22641_v47  ;;  %v8841_v43 = vrot.slane %v27797_v4, %v22568_v63  ;;  %v8845_v61 = vrot.slane %v27797_v4, %v22585_v37 }
 0x5aa   : > { %v17760_v28 = vadd.s32 4294967192, %v27796_v62  ;;  %v14083_v23 = vrot.slane %v14055_v48, %v22641_v47  ;;  %v8849_v9 = vrot.slane %v27797_v4, %v22595_v17  ;;  %v8853_v6 = vrot.slane %v27797_v4, %v22598_v14 }
 0x5ab   : > { %v8857_v10 = vrot.slane %v27797_v4, %v22601_v5  ;;  %v8861_v59 = vrot.slane %v27797_v4, %v27716_v39  ;;  %v8865_v45 = vrot.slane %v27797_v4, %v27717_v3  ;;  %v8869_v25 = vrot.slane %v27797_v4, %v27718_v24 }
 0x5ac   : > { %v9033_v41 = vrot.slane %v27799_v49, %v22568_v63  ;;  %v9037_v2 = vrot.slane %v27799_v49, %v22585_v37  ;;  %v9041_v56 = vrot.slane %v27799_v49, %v22595_v17  ;;  %v9045_v0 = vrot.slane %v27799_v49, %v22598_v14 }
 0x5ad   : > { %v9049_v27 = vrot.slane %v27799_v49, %v22601_v5  ;;  %v9053_v38 = vrot.slane %v27799_v49, %v27716_v39  ;;  %v9057_v57 = vrot.slane %v27799_v49, %v27717_v3  ;;  %v9061_v29 = vrot.slane %v27799_v49, %v27718_v24 }
 0x5ae   : > { %17380 = vperm.xlu1 %19741, %v27798_v46   ;;  %v6605_v31 = vadd.f32 %v6385_v50, %v27800_v19  ;;  %v24472_v1 = vsub.s32 %v17774_v36, %v27801_v8  ;;  %v24475_v15 = vcombine.low %v12671_v26, %v12678_v52  ;;  %v24477_v7 = vcombine.low %v13896_v12, %v13903_v40  ;;  %v27805_v26 = vld [vmem:[#allocation55_spill] sm:$0xff] }
 0x5af   : > { %v14084_v22 = vcombine.low %v14062_v20, %v14069_v44  ;;  %v14085_v35 = vcombine.low %v14076_v42, %v14083_v23  ;;  %v13954_v60 = vcombine.low %v8841_v43, %v8845_v61  ;;  %v13955_v11 = vcombine.low %v8849_v9, %v8853_v6 }
 0x5b0   : > { %27802 = vst [vmem:[#allocation66_spill] sm:$0xff] %v24472_v1  ;;  %v13956_v33 = vcombine.low %v8857_v10, %v8861_v59  ;;  %v13957_v30 = vcombine.low %v8865_v45, %v8869_v25  ;;  %v14248_v48 = vcombine.low %v9033_v41, %v9037_v2  ;;  %v14249_v62 = vcombine.low %v9041_v56, %v9045_v0  ;;  %v27806_v2 = vld [vmem:[#allocation116_spill] sm:$0xff] }
 0x5b1   : > { %v24480_v4 = vsub.s32 %v17760_v28, %v27801_v8  ;;  %v24482_v46 = vcombine.low %v13798_v18, %v13805_v53  ;;  %v14250_v36 = vcombine.low %v9049_v27, %v9053_v38  ;;  %v14251_v50 = vcombine.low %v9057_v57, %v9061_v29 }
 0x5b2   : > { %17374 = vperm.xlu1 %19741, %v27803_v16   ;;  %v8969_v52 = vrot.slane %v27805_v26, %v22568_v63  ;;  %v8973_v12 = vrot.slane %v27805_v26, %v22585_v37  ;;  %v8977_v40 = vrot.slane %v27805_v26, %v22595_v17  ;;  %v8981_v20 = vrot.slane %v27805_v26, %v22598_v14 }
 0x5b3   : > { %27804 = vst [vmem:[#allocation118_spill] sm:$0xff] %v24480_v4  ;;  %v14092_v44 = vrot.slane %v14084_v22, %v22641_v47  ;;  %v14099_v42 = vrot.slane %v14085_v35, %v22641_v47  ;;  %v13964_v18 = vrot.slane %v13954_v60, %v22641_v47  ;;  %v13971_v53 = vrot.slane %v13955_v11, %v22641_v47  ;;  %v24533_v22 = vpop.permute.xlu1 %17308 }
 0x5b4   : > { %v13978_v43 = vrot.slane %v13956_v33, %v22641_v47  ;;  %v13985_v61 = vrot.slane %v13957_v30, %v22641_v47  ;;  %v14258_v28 = vrot.slane %v14248_v48, %v22641_v47  ;;  %v14265_v23 = vrot.slane %v14249_v62, %v22641_v47  ;;  %27808 = vst [vmem:[#allocation126_spill] sm:$0xff] %v24533_v22 }
 0x5b5   : > { %v14272_v9 = vrot.slane %v14250_v36, %v22641_v47  ;;  %v14279_v6 = vrot.slane %v14251_v50, %v22641_v47  ;;  %v8985_v10 = vrot.slane %v27805_v26, %v22601_v5  ;;  %v8989_v59 = vrot.slane %v27805_v26, %v27716_v39 }
 0x5b6   : > { %v8993_v45 = vrot.slane %v27805_v26, %v27717_v3  ;;  %v8997_v25 = vrot.slane %v27805_v26, %v27718_v24  ;;  %v24510_v49 = vcombine.low %v8969_v52, %v8973_v12  ;;  %v24512_v41 = vcombine.low %v8977_v40, %v8981_v20  ;;  %v27809_v40 = vld [vmem:[#allocation30_spill] sm:$0xff] }
 0x5b7   : > { %v9161_v56 = vrot.slane %v27806_v2, %v22568_v63  ;;  %v9165_v0 = vrot.slane %v27806_v2, %v22585_v37  ;;  %v9169_v27 = vrot.slane %v27806_v2, %v22595_v17  ;;  %v9173_v38 = vrot.slane %v27806_v2, %v22598_v14 }
 0x5b8   : > { %v9177_v57 = vrot.slane %v27806_v2, %v22601_v5  ;;  %v9181_v29 = vrot.slane %v27806_v2, %v27716_v39  ;;  %v9185_v19 = vrot.slane %v27806_v2, %v27717_v3  ;;  %v9189_v8 = vrot.slane %v27806_v2, %v27718_v24 }
 0x5b9   : > { %v24531_v16 = vadd.f32 %v22578_v58, %v6605_v31  ;;  %v24535_v35 = vcombine.low %v14092_v44, %v14099_v42  ;;  %v24537_v60 = vcombine.low %v13964_v18, %v13971_v53  ;;  %v24539_v11 = vcombine.low %v13978_v43, %v13985_v61 }
 0x5ba   : > { %v24541_v33 = vcombine.low %v14258_v28, %v14265_v23  ;;  %v24543_v30 = vcombine.low %v14272_v9, %v14279_v6  ;;  %v14152_v48 = vcombine.low %v8985_v10, %v8989_v59  ;;  %v14153_v62 = vcombine.low %v8993_v45, %v8997_v25  ;;  %v27810_v23 = vld [vmem:[#allocation65_spill] sm:$0xff]  ;;  %v24569_v10 = vpop.permute.xlu1 %17302 }
 0x5bb   : > { %27807 = vst [vmem:[#allocation7_spill] sm:$0xff] %v24531_v16  ;;  %v14160_v36 = vrot.slane %v24510_v49, %v22641_v47  ;;  %v14167_v31 = vrot.slane %v24512_v41, %v22641_v47  ;;  %v14444_v50 = vcombine.low %v9161_v56, %v9165_v0  ;;  %v14445_v26 = vcombine.low %v9169_v27, %v9173_v38  ;;  %v27812_v27 = vld [vmem:[#allocation123_spill] sm:$0xff] }
 0x5bc   : > { %v14446_v52 = vcombine.low %v9177_v57, %v9181_v29  ;;  %v14447_v12 = vcombine.low %v9185_v19, %v9189_v8  ;;  %v9097_v20 = vrot.slane %v27809_v40, %v22568_v63  ;;  %v9101_v44 = vrot.slane %v27809_v40, %v22585_v37  ;;  %27811 = vst [vmem:[#allocation27_spill] sm:$0xff] %v24569_v10 }
 0x5bd   : > { %v9105_v42 = vrot.slane %v27809_v40, %v22595_v17  ;;  %v9109_v18 = vrot.slane %v27809_v40, %v22598_v14  ;;  %v9113_v53 = vrot.slane %v27809_v40, %v22601_v5  ;;  %v9117_v43 = vrot.slane %v27809_v40, %v27716_v39 }
 0x5be   : > { %v9121_v61 = vrot.slane %v27809_v40, %v27717_v3  ;;  %v9125_v28 = vrot.slane %v27809_v40, %v27718_v24  ;;  %v9289_v9 = vrot.slane %v27810_v23, %v22568_v63  ;;  %v9293_v6 = vrot.slane %v27810_v23, %v22585_v37  ;;  %v24590_v22 = vpop.xlane.xlu1 %6402 }
 0x5bf   : > { %v9297_v59 = vrot.slane %v27810_v23, %v22595_v17  ;;  %v9301_v45 = vrot.slane %v27810_v23, %v22598_v14  ;;  %v9305_v25 = vrot.slane %v27810_v23, %v22601_v5  ;;  %v9309_v49 = vrot.slane %v27810_v23, %v27716_v39 }
 0x5c0   : > { %v14174_v41 = vrot.slane %v14152_v48, %v22641_v47  ;;  %v14181_v2 = vrot.slane %v14153_v62, %v22641_v47  ;;  %v9313_v56 = vrot.slane %v27810_v23, %v27717_v3  ;;  %v9317_v0 = vrot.slane %v27810_v23, %v27718_v24 }
 0x5c1   : > { %v14454_v38 = vrot.slane %v14444_v50, %v22641_v47  ;;  %v14461_v57 = vrot.slane %v14445_v26, %v22641_v47  ;;  %v14468_v29 = vrot.slane %v14446_v52, %v22641_v47  ;;  %v14475_v19 = vrot.slane %v14447_v12, %v22641_v47 }
 0x5c2   : > { %v14346_v8 = vcombine.low %v9097_v20, %v9101_v44  ;;  %v14347_v48 = vcombine.low %v9105_v42, %v9109_v18  ;;  %v14348_v40 = vcombine.low %v9113_v53, %v9117_v43  ;;  %v14349_v62 = vcombine.low %v9121_v61, %v9125_v28  ;;  %v27813_v20 = vld [vmem:[#allocation124_spill] sm:$0xff]  ;;  %v24605_v28 = vpop.permute.xlu0 %17353 }
 0x5c3   : > { %v13994_v10 = vrot.slane %v24537_v60, %v22641_v47  ;;  %v14640_v23 = vcombine.low %v9289_v9, %v9293_v6  ;;  %v14641_v34 = vcombine.low %v9297_v59, %v9301_v45  ;;  %v14001_v50 = vrot.slane %v24539_v11, %v22641_v47  ;;  %27814 = vst [vmem:[#allocation79_spill] sm:$0xff] %v24605_v28 }
 0x5c4   : > { %v14288_v26 = vrot.slane %v24541_v33, %v22641_v47  ;;  %v14295_v52 = vrot.slane %v24543_v30, %v22641_v47  ;;  %v14643_v12 = vcombine.low %v9313_v56, %v9317_v0  ;;  %v14182_v44 = vcombine.low %v14160_v36, %v14167_v31  ;;  %v27815_v36 = vld [vmem:[#allocation16_spill] sm:$0xff] }
 0x5c5   : > { %6519 = vadd.xlane.f32.xlu0 %v27812_v27  ;;  %v14642_v27 = vcombine.low %v9305_v25, %v9309_v49  ;;  %v14183_v42 = vcombine.low %v14174_v41, %v14181_v2  ;;  %v14476_v18 = vcombine.low %v14454_v38, %v14461_v57  ;;  %v14477_v53 = vcombine.low %v14468_v29, %v14475_v19  ;;  %v24619_v49 = vpop.xlane.xlu1 %6396 }
 0x5c6   : > { %v14356_v60 = vrot.slane %v14346_v8, %v22641_v47  ;;  %v14363_v43 = vrot.slane %v14347_v48, %v22641_v47  ;;  %v14370_v61 = vrot.slane %v14348_v40, %v22641_v47  ;;  %v14377_v11 = vrot.slane %v14349_v62, %v22641_v47 }
 0x5c7   : > { %v14650_v33 = vrot.slane %v14640_v23, %v22641_v47  ;;  %v14657_v30 = vrot.slane %v14641_v34, %v22641_v47  ;;  %v14664_v9 = vrot.slane %v14642_v27, %v22641_v47  ;;  %v9225_v31 = vrot.slane %v27815_v36, %v22568_v63 }
 0x5c8   : > { %v14671_v6 = vrot.slane %v14643_v12, %v22641_v47  ;;  %v9229_v59 = vrot.slane %v27815_v36, %v22585_v37  ;;  %v9233_v45 = vrot.slane %v27815_v36, %v22595_v17  ;;  %v9237_v25 = vrot.slane %v27815_v36, %v22598_v14 }
 0x5c9   : > { %6513 = vadd.xlane.f32.xlu0 %v27813_v20  ;;  %v24621_v41 = vcombine.low %v13994_v10, %v14001_v50  ;;  %v24623_v34 = vcombine.low %v14288_v26, %v14295_v52  ;;  %v14190_v2 = vrot.slane %v14182_v44, %v22641_v47  ;;  %v14197_v56 = vrot.slane %v14183_v42, %v22641_v47  ;;  %v24637_v50 = vpop.permute.xlu0 %17347  ;;  %v27817_v26 = vld [vmem:[#allocation40_spill] sm:$0xff] }
 0x5ca   : > { %v14484_v0 = vrot.slane %v14476_v18, %v22641_v47  ;;  %v14491_v38 = vrot.slane %v14477_v53, %v22641_v47  ;;  %v14378_v57 = vcombine.low %v14356_v60, %v14363_v43  ;;  %v14379_v29 = vcombine.low %v14370_v61, %v14377_v11  ;;  %27816 = vst [vmem:[#allocation97_spill] sm:$0xff] %v24637_v50  ;;  %v24655_v43 = vpop.permute.xlu1 %17320 }
 0x5cb   : > { %v14672_v19 = vcombine.low %v14650_v33, %v14657_v30  ;;  %v9241_v8 = vrot.slane %v27815_v36, %v22601_v5  ;;  %v9245_v10 = vrot.slane %v27815_v36, %v27716_v39  ;;  %v9249_v48 = vrot.slane %v27815_v36, %v27717_v3  ;;  %27818 = vst [vmem:[#allocation128_spill] sm:$0xff] %v24655_v43 }
 0x5cc   : > { %v14673_v40 = vcombine.low %v14664_v9, %v14671_v6  ;;  %v9253_v62 = vrot.slane %v27815_v36, %v27718_v24  ;;  %v14542_v23 = vcombine.low %v9225_v31, %v9229_v59  ;;  %v14543_v27 = vcombine.low %v9233_v45, %v9237_v25 }
 0x5cd   : > { %v9417_v52 = vrot.slane %v27817_v26, %v22568_v63  ;;  %v9421_v12 = vrot.slane %v27817_v26, %v22585_v37  ;;  %v9425_v20 = vrot.slane %v27817_v26, %v22595_v17  ;;  %v9429_v44 = vrot.slane %v27817_v26, %v22598_v14  ;;  %v6448_v59 = vpop.xlane.xlu0 %6447 }
 0x5ce   : > { %v9433_v42 = vrot.slane %v27817_v26, %v22601_v5  ;;  %v9437_v18 = vrot.slane %v27817_v26, %v27716_v39  ;;  %v9441_v53 = vrot.slane %v27817_v26, %v27717_v3  ;;  %v9445_v60 = vrot.slane %v27817_v26, %v27718_v24 }
 0x5cf   : > { %v24657_v61 = vcombine.low %v14190_v2, %v14197_v56  ;;  %v24659_v11 = vcombine.low %v14484_v0, %v14491_v38  ;;  %v14386_v33 = vrot.slane %v14378_v57, %v22641_v47  ;;  %v14393_v30 = vrot.slane %v14379_v29, %v22641_v47  ;;  %v27819_v56 = vld [vmem:[#allocation31_spill] sm:$0xff] }
 0x5d0   : > { %v14680_v9 = vrot.slane %v14672_v19, %v22641_v47  ;;  %v14544_v36 = vcombine.low %v9241_v8, %v9245_v10  ;;  %v14545_v31 = vcombine.low %v9249_v48, %v9253_v62  ;;  %v14552_v6 = vrot.slane %v14542_v23, %v22641_v47  ;;  %v27820_v57 = vld [vmem:[#allocation19_spill] sm:$0xff]  ;;  %v27821_v62 = vld [vmem:[#allocation72_spill] sm:$0xff] }
 0x5d1   : > { %v14687_v45 = vrot.slane %v14673_v40, %v22641_v47  ;;  %v14559_v25 = vrot.slane %v14543_v27, %v22641_v47  ;;  %v14836_v26 = vcombine.low %v9417_v52, %v9421_v12  ;;  %v14837_v2 = vcombine.low %v9425_v20, %v9429_v44  ;;  %v24687_v20 = vpop.permute.xlu1 %17314 }
 0x5d2   : > { %v14838_v0 = vcombine.low %v9433_v42, %v9437_v18  ;;  %v14839_v38 = vcombine.low %v9441_v53, %v9445_v60  ;;  %v9353_v29 = vrot.slane %v27820_v57, %v22568_v63  ;;  %v9357_v19 = vrot.slane %v27820_v57, %v22585_v37  ;;  %27822 = vst [vmem:[#allocation55_spill] sm:$0xff] %v24687_v20  ;;  %v27823_v60 = vld [vmem:[#allocation81_spill] sm:$0xff] }
 0x5d3   : > { %v9361_v8 = vrot.slane %v27820_v57, %v22595_v17  ;;  %v9365_v10 = vrot.slane %v27820_v57, %v22598_v14  ;;  %v9369_v48 = vrot.slane %v27820_v57, %v22601_v5  ;;  %v9373_v40 = vrot.slane %v27820_v57, %v27716_v39 }
 0x5d4   : > { %v6626_v23 = vadd.f32 %v6448_v59, %v27821_v62  ;;  %v24681_v27 = vcombine.low %v14386_v33, %v14393_v30  ;;  %v9377_v52 = vrot.slane %v27820_v57, %v27717_v3  ;;  %v9381_v12 = vrot.slane %v27820_v57, %v27718_v24  ;;  %v6442_v57 = vpop.xlane.xlu0 %6441 }
 0x5d5   : > { %v24689_v44 = vcombine.low %v14680_v9, %v14687_v45  ;;  %v14566_v42 = vrot.slane %v14544_v36, %v22641_v47  ;;  %v14573_v18 = vrot.slane %v14545_v31, %v22641_v47  ;;  %v24693_v53 = vcombine.low %v14552_v6, %v14559_v25  ;;  %v27824_v36 = vld [vmem:[#allocation67_spill] sm:$0xff] }
 0x5d6   : > { %6474 = vadd.xlane.f32.xlu1 %v27819_v56  ;;  %v14846_v33 = vrot.slane %v14836_v26, %v22641_v47  ;;  %v14853_v30 = vrot.slane %v14837_v2, %v22641_v47  ;;  %v14860_v59 = vrot.slane %v14838_v0, %v22641_v47  ;;  %v14867_v56 = vrot.slane %v14839_v38, %v22641_v47  ;;  %v24708_v2 = vpop.xlane.xlu1 %6414 }
 0x5d7   : > { %v14738_v62 = vcombine.low %v9353_v29, %v9357_v19  ;;  %v14739_v9 = vcombine.low %v9361_v8, %v9365_v10  ;;  %v14740_v45 = vcombine.low %v9369_v48, %v9373_v40  ;;  %v9545_v43 = vrot.slane %v27824_v36, %v22568_v63  ;;  %27825 = vst [vmem:[#allocation116_spill] sm:$0xff] %v24708_v2  ;;  %v27827_v10 = vld [vmem:[#allocation70_spill] sm:$0xff] }
 0x5d8   : > { %v14741_v31 = vcombine.low %v9377_v52, %v9381_v12  ;;  %v9549_v6 = vrot.slane %v27824_v36, %v22585_v37  ;;  %v9553_v25 = vrot.slane %v27824_v36, %v22595_v17  ;;  %v9557_v26 = vrot.slane %v27824_v36, %v22598_v14  ;;  %v27828_v12 = vld [vmem:[#allocation129_spill] sm:$0xff] }
 0x5d9   : > { %v9561_v0 = vrot.slane %v27824_v36, %v22601_v5  ;;  %v9565_v38 = vrot.slane %v27824_v36, %v27716_v39  ;;  %v9569_v29 = vrot.slane %v27824_v36, %v27717_v3  ;;  %v9573_v19 = vrot.slane %v27824_v36, %v27718_v24 }
 0x5da   : > { %6468 = vadd.xlane.f32.xlu1 %v27823_v60  ;;  %v24719_v8 = vadd.f32 %v22578_v58, %v6626_v23  ;;  %v6624_v48 = vadd.f32 %v6442_v57, %v27827_v10  ;;  %v14575_v40 = vcombine.low %v14566_v42, %v14573_v18  ;;  %v14582_v52 = vrot.slane %v24693_v53, %v22641_v47  ;;  %v27829_v42 = vld [vmem:[#allocation44_spill] sm:$0xff] }
 0x5db   : > { %v14868_v60 = vcombine.low %v14846_v33, %v14853_v30  ;;  %v14869_v20 = vcombine.low %v14860_v59, %v14867_v56  ;;  %v14748_v28 = vrot.slane %v14738_v62, %v22641_v47  ;;  %v14755_v50 = vrot.slane %v14739_v9, %v22641_v47  ;;  %v24744_v62 = vpop.xlane.xlu1 %6408 }
 0x5dc   : > { %27826 = vst [vmem:[#allocation30_spill] sm:$0xff] %v24719_v8  ;;  %v14762_v1 = vrot.slane %v14740_v45, %v22641_v47  ;;  %v14769_v36 = vrot.slane %v14741_v31, %v22641_v47  ;;  %v15032_v23 = vcombine.low %v9545_v43, %v9549_v6  ;;  %v15033_v4 = vcombine.low %v9553_v25, %v9557_v26 }
 0x5dd   : > { %v15034_v16 = vcombine.low %v9561_v0, %v9565_v38  ;;  %v15035_v57 = vcombine.low %v9569_v29, %v9573_v19  ;;  %v9481_v18 = vrot.slane %v27829_v42, %v22568_v63  ;;  %v9485_v53 = vrot.slane %v27829_v42, %v22585_v37  ;;  %27831 = vst [vmem:[#allocation123_spill] sm:$0xff] %v24744_v62 }
 0x5de   : > { %v9489_v33 = vrot.slane %v27829_v42, %v22595_v17  ;;  %v9493_v30 = vrot.slane %v27829_v42, %v22598_v14  ;;  %v9497_v59 = vrot.slane %v27829_v42, %v22601_v5  ;;  %v9501_v43 = vrot.slane %v27829_v42, %v27716_v39 }
 0x5df   : > { %17437 = vperm.xlu0 %19740, %v27828_v12   ;;  %v24742_v56 = vadd.f32 %v22578_v58, %v6624_v48  ;;  %v14589_v9 = vrot.slane %v14575_v40, %v22641_v47  ;;  %v9505_v45 = vrot.slane %v27829_v42, %v27717_v3  ;;  %v9509_v31 = vrot.slane %v27829_v42, %v27718_v24  ;;  %v27832_v12 = vld [vmem:[#allocation42_spill] sm:$0xff] }
 0x5e0   : > { %v14876_v6 = vrot.slane %v14868_v60, %v22641_v47  ;;  %v14883_v25 = vrot.slane %v14869_v20, %v22641_v47  ;;  %v24754_v26 = vcombine.low %v14748_v28, %v14755_v50  ;;  %v24756_v0 = vcombine.low %v14762_v1, %v14769_v36 }
 0x5e1   : > { %27830 = vst [vmem:[#allocation65_spill] sm:$0xff] %v24742_v56  ;;  %v15042_v38 = vrot.slane %v15032_v23, %v22641_v47  ;;  %v15056_v29 = vrot.slane %v15034_v16, %v22641_v47  ;;  %v15063_v19 = vrot.slane %v15035_v57, %v22641_v47  ;;  %v14934_v10 = vcombine.low %v9481_v18, %v9485_v53  ;;  %v24779_v23 = vpop.permute.xlu1 %17332 }
 0x5e2   : > { %v14935_v48 = vcombine.low %v9489_v33, %v9493_v30  ;;  %v14936_v40 = vcombine.low %v9497_v59, %v9501_v43  ;;  %v9673_v60 = vrot.slane %v27832_v12, %v22568_v63  ;;  %v14937_v28 = vcombine.low %v9505_v45, %v9509_v31  ;;  %27833 = vst [vmem:[#allocation124_spill] sm:$0xff] %v24779_v23 }
 0x5e3   : > { %17431 = vperm.xlu0 %19740, %v24403_v55   ;;  %v15049_v55 = vrot.slane %v15033_v4, %v22641_v47  ;;  %v9677_v1 = vrot.slane %v27832_v12, %v22585_v37  ;;  %v9681_v50 = vrot.slane %v27832_v12, %v22595_v17  ;;  %v9685_v4 = vrot.slane %v27832_v12, %v22598_v14 }
 0x5e4   : > { %v9689_v16 = vrot.slane %v27832_v12, %v22601_v5  ;;  %v9693_v20 = vrot.slane %v27832_v12, %v27716_v39  ;;  %v9697_v36 = vrot.slane %v27832_v12, %v27717_v3  ;;  %v24781_v57 = vcombine.low %v14582_v52, %v14589_v9  ;;  %v27834_v52 = vld [vmem:[#allocation41_spill] sm:$0xff] }
 0x5e5   : > { %v24783_v42 = vcombine.low %v14876_v6, %v14883_v25  ;;  %v24789_v33 = vcombine.low %v15042_v38, %v15049_v55  ;;  %v24791_v30 = vcombine.low %v15056_v29, %v15063_v19  ;;  %v14944_v59 = vrot.slane %v14934_v10, %v22641_v47  ;;  %v27835_v29 = vld [vmem:[#allocation127_spill] sm:$0xff] }
 0x5e6   : > { %v14951_v43 = vrot.slane %v14935_v48, %v22641_v47  ;;  %v24799_v9 = vsel %vm6139_vm2, %v27834_v52, 0.0  ;;  %v14958_v45 = vrot.slane %v14936_v40, %v22641_v47  ;;  %v14965_v31 = vrot.slane %v14937_v28, %v22641_v47  ;;  %v27836_v28 = vld [vmem:[#allocation71_spill] sm:$0xff] }
 0x5e7   : > { %17449 = vperm.xlu0 %19740, %v24411_v13   ;;  %v9701_v13 = vrot.slane %v27832_v12, %v27718_v24  ;;  %v15228_v6 = vcombine.low %v9673_v60, %v9677_v1  ;;  %v15229_v25 = vcombine.low %v9681_v50, %v9685_v4  ;;  %v15230_v38 = vcombine.low %v9689_v16, %v9693_v20  ;;  %v24821_v50 = vpop.permute.xlu1 %17326  ;;  %v27838_v4 = vld [vmem:[#allocation39_spill] sm:$0xff] }
 0x5e8   : > { %v8169_v19 = vrot.slane %v27835_v29, %v22568_v63  ;;  %v8181_v10 = vrot.slane %v27835_v29, %v22598_v14  ;;  %v8185_v48 = vrot.slane %v27835_v29, %v22601_v5  ;;  %v8189_v40 = vrot.slane %v27835_v29, %v27716_v39  ;;  %27837 = vst [vmem:[#allocation16_spill] sm:$0xff] %v24821_v50 }
 0x5e9   : > { %v15231_v55 = vcombine.low %v9697_v36, %v9701_v13  ;;  %v8193_v12 = vrot.slane %v27835_v29, %v27717_v3  ;;  %v8197_v60 = vrot.slane %v27835_v29, %v27718_v24  ;;  %v9609_v1 = vrot.slane %v27836_v28, %v22568_v63 }
 0x5ea   : > { %v24827_v16 = vsel %vm6139_vm2, %v27838_v4, 0.0  ;;  %v9613_v20 = vrot.slane %v27836_v28, %v22585_v37  ;;  %v9617_v36 = vrot.slane %v27836_v28, %v22595_v17  ;;  %v9621_v13 = vrot.slane %v27836_v28, %v22598_v14 }
 0x5eb   : > { %17392 = vperm.xlu1 %19741, %v24413_v21   ;;  %17443 = vperm.xlu0 %19740, %v24418_v32   ;;  %v8173_v21 = vrot.slane %v27835_v29, %v22585_v37  ;;  %v8177_v32 = vrot.slane %v27835_v29, %v22595_v17  ;;  %v9625_v52 = vrot.slane %v27836_v28, %v22601_v5  ;;  %v24851_v8 = vpop.xlane.xlu1 %6426 }
 0x5ec   : > { %v9637_v29 = vrot.slane %v27836_v28, %v27718_v24  ;;  %v24843_v4 = vcombine.low %v14944_v59, %v14951_v43  ;;  %v24845_v18 = vcombine.low %v14958_v45, %v14965_v31  ;;  %v15238_v53 = vrot.slane %v15228_v6, %v22641_v47  ;;  %27839 = vst [vmem:[#allocation40_spill] sm:$0xff] %v24851_v8  ;;  %v27840_v6 = vld [vmem:[#allocation20_spill] sm:$0xff] }
 0x5ed   : > { %v15245_v23 = vrot.slane %v15229_v25, %v22641_v47  ;;  %v15252_v50 = vrot.slane %v15230_v38, %v22641_v47  ;;  %v15259_v62 = vrot.slane %v15231_v55, %v22641_v47  ;;  %v12925_v2 = vcombine.low %v8169_v19, %v8173_v21 }
 0x5ee   : > { %v12926_v56 = vcombine.low %v8177_v32, %v8181_v10  ;;  %v12927_v54 = vcombine.low %v8185_v48, %v8189_v40  ;;  %v15130_v59 = vcombine.low %v9609_v1, %v9613_v20  ;;  %v15131_v43 = vcombine.low %v9617_v36, %v9621_v13 }
 0x5ef   : > { %17386 = vperm.xlu1 %19741, %v24475_v15   ;;  %17461 = vperm.xlu0 %19740, %v24477_v7   ;;  %v9629_v15 = vrot.slane %v27836_v28, %v27716_v39  ;;  %v9633_v7 = vrot.slane %v27836_v28, %v27717_v3  ;;  %v12928_v28 = vcombine.low %v8193_v12, %v8197_v60 }
 0x5f0   : > { %v8105_v51 = vrot.slane %v27840_v6, %v22568_v63  ;;  %v8109_v25 = vrot.slane %v27840_v6, %v22585_v37  ;;  %v8113_v38 = vrot.slane %v27840_v6, %v22595_v17  ;;  %v8117_v55 = vrot.slane %v27840_v6, %v22598_v14 }
 0x5f1   : > { %v15132_v45 = vcombine.low %v9625_v52, %v9629_v15  ;;  %v15133_v31 = vcombine.low %v9633_v7, %v9637_v29  ;;  %v8125_v19 = vrot.slane %v27840_v6, %v27716_v39  ;;  %v15260_v21 = vcombine.low %v15238_v53, %v15245_v23  ;;  %v27843_v52 = vld [vmem:[#allocation83_spill] sm:$0xff] }
 0x5f2   : > { %v15261_v32 = vcombine.low %v15252_v50, %v15259_v62  ;;  %v8129_v10 = vrot.slane %v27840_v6, %v27717_v3  ;;  %v8133_v48 = vrot.slane %v27840_v6, %v27718_v24  ;;  %v12935_v40 = vrot.slane %v12925_v2, %v22641_v47  ;;  %v27841_v50 = vld [vmem:[#allocation85_spill] sm:$0xff] }
 0x5f3   : > { %17455 = vperm.xlu0 %19740, %v24482_v46   ;;  %v8121_v46 = vrot.slane %v27840_v6, %v22601_v5  ;;  %v12942_v12 = vrot.slane %v12926_v56, %v22641_v47  ;;  %v12949_v60 = vrot.slane %v12927_v54, %v22641_v47  ;;  %v12956_v1 = vrot.slane %v12928_v28, %v22641_v47  ;;  %v27844_v6 = vld [vmem:[#allocation18_spill] sm:$0xff] }
 0x5f4   : > { %v15140_v20 = vrot.slane %v15130_v59, %v22641_v47  ;;  %v15147_v62 = vrot.slane %v15131_v43, %v22641_v47  ;;  %v15154_v23 = vrot.slane %v15132_v45, %v22641_v47  ;;  %v15161_v53 = vrot.slane %v15133_v31, %v22641_v47 }
 0x5f5   : > { %v6611_v36 = vadd.f32 %v24590_v22, %v27841_v50  ;;  %v12827_v2 = vcombine.low %v8105_v51, %v8109_v25  ;;  %v12828_v13 = vcombine.low %v8113_v38, %v8117_v55  ;;  %v12829_v56 = vcombine.low %v8121_v46, %v8125_v19 }
 0x5f6   : > { %v6609_v54 = vadd.f32 %v24619_v49, %v27843_v52  ;;  %v15072_v15 = vrot.slane %v24789_v33, %v22641_v47  ;;  %v15079_v7 = vrot.slane %v24791_v30, %v22641_v47  ;;  %v12830_v29 = vcombine.low %v8129_v10, %v8133_v48 }
 0x5f7   : > { %17473 = vperm.xlu0 %19740, %v24535_v35   ;;  %v24881_v35 = vpop.xlane.xlu1 %6420  ;;  %v14974_v22 = vrot.slane %v24843_v4, %v22641_v47  ;;  %v14981_v51 = vrot.slane %v24845_v18, %v22641_v47  ;;  %v15268_v28 = vrot.slane %v15260_v21, %v22641_v47  ;;  %v15275_v59 = vrot.slane %v15261_v32, %v22641_v47 }
 0x5f8   : > { %27842 = vst [vmem:[#allocation31_spill] sm:$0xff] %v24881_v35  ;;  %v12957_v49 = vcombine.low %v12935_v40, %v12942_v12  ;;  %v12958_v43 = vcombine.low %v12949_v60, %v12956_v1  ;;  %v15162_v45 = vcombine.low %v15140_v20, %v15147_v62  ;;  %v15163_v33 = vcombine.low %v15154_v23, %v15161_v53 }
 0x5f9   : > { %v12837_v31 = vrot.slane %v12827_v2, %v22641_v47  ;;  %v12844_v30 = vrot.slane %v12828_v13, %v22641_v47  ;;  %v8297_v4 = vrot.slane %v27844_v6, %v22568_v63  ;;  %v12858_v25 = vrot.slane %v12830_v29, %v22641_v47 }
 0x5fa   : > { %v8301_v18 = vrot.slane %v27844_v6, %v22585_v37  ;;  %v8305_v38 = vrot.slane %v27844_v6, %v22595_v17  ;;  %v8309_v55 = vrot.slane %v27844_v6, %v22598_v14  ;;  %v8313_v19 = vrot.slane %v27844_v6, %v22601_v5 }
 0x5fb   : > { %17467 = vperm.xlu0 %19740, %v24621_v41   ;;  %v12851_v41 = vrot.slane %v12829_v56, %v22641_v47  ;;  %v24908_v46 = vpop.permute.xlu1 %17344  ;;  %v8317_v21 = vrot.slane %v27844_v6, %v27716_v39  ;;  %v8321_v32 = vrot.slane %v27844_v6, %v27717_v3  ;;  %v8325_v10 = vrot.slane %v27844_v6, %v27718_v24 }
 0x5fc   : > { %27845 = vst [vmem:[#allocation19_spill] sm:$0xff] %v24908_v46  ;;  %v24920_v48 = vadd.f32 %v22578_v58, %v6611_v36  ;;  %v24923_v40 = vadd.f32 %v22578_v58, %v6609_v54  ;;  %v27849_v12 = vrot.slane %v24754_v26, %v22641_v47  ;;  %v24933_v1 = vcombine.low %v15072_v15, %v15079_v7  ;;  %v27850_v54 = vld [vmem:[#allocation52_spill] sm:$0xff] }
 0x5fd   : > { %v24935_v20 = vcombine.low %v14974_v22, %v14981_v51  ;;  %v24937_v62 = vcombine.low %v15268_v28, %v15275_v59  ;;  %v12965_v23 = vrot.slane %v12957_v49, %v22641_v47  ;;  %v12972_v53 = vrot.slane %v12958_v43, %v22641_v47  ;;  %v24952_v51 = vpop.permute.xlu0 %17365 }
 0x5fe   : > { %27846 = vst [vmem:[#allocation72_spill] sm:$0xff] %v24920_v48  ;;  %27847 = vst [vmem:[#allocation81_spill] sm:$0xff] %v24923_v40  ;;  %v15170_v50 = vrot.slane %v15162_v45, %v22641_v47  ;;  %v15177_v36 = vrot.slane %v15163_v33, %v22641_v47  ;;  %v12860_v2 = vcombine.low %v12851_v41, %v12858_v25  ;;  %v27855_v25 = vld [vmem:[#allocation22_spill] sm:$0xff] }
 0x5ff   : > { %17485 = vperm.xlu0 %19740, %v24623_v34   ;;  %v27848_v34 = vrot.slane %v24756_v0, %v22641_v47  ;;  %v12859_v0 = vcombine.low %v12837_v31, %v12844_v30  ;;  %v13121_v26 = vcombine.low %v8297_v4, %v8301_v18  ;;  %v13122_v13 = vcombine.low %v8305_v38, %v8309_v55  ;;  %v24954_v28 = vpop.permute.xlu1 %17338  ;;  %v27853_v30 = vld [vmem:[#allocation21_spill] sm:$0xff] }
 0x600   : > { %v13123_v56 = vcombine.low %v8313_v19, %v8317_v21  ;;  %v13124_v52 = vcombine.low %v8321_v32, %v8325_v10  ;;  %v9801_v15 = vrot.slane %v27850_v54, %v22568_v63  ;;  %v9805_v7 = vrot.slane %v27850_v54, %v22585_v37  ;;  %27851 = vst [vmem:[#allocation67_spill] sm:$0xff] %v24952_v51 }
 0x601   : > { %v24931_v60 = vcombine.low %v27849_v12, %v27848_v34  ;;  %v9809_v29 = vrot.slane %v27850_v54, %v22595_v17  ;;  %v9813_v22 = vrot.slane %v27850_v54, %v22598_v14  ;;  %27852 = vst [vmem:[#allocation70_spill] sm:$0xff] %v24954_v28  ;;  %v9821_v59 = vrot.slane %v27850_v54, %v27716_v39  ;;  %v27865_v28 = vld [vmem:[#allocation43_spill] sm:$0xff] }
 0x602   : > { %v9825_v49 = vrot.slane %v27850_v54, %v27717_v3  ;;  %v9829_v43 = vrot.slane %v27850_v54, %v27718_v24  ;;  %v24964_v45 = vcombine.low %v12965_v23, %v12972_v53  ;;  %v24966_v33 = vcombine.low %v15170_v50, %v15177_v36  ;;  %v27857_v53 = vld [vmem:[#allocation50_spill] sm:$0xff] }
 0x603   : > { %17479 = vperm.xlu0 %19740, %v24657_v61   ;;  %v9817_v61 = vrot.slane %v27850_v54, %v22601_v5  ;;  %v12867_v31 = vrot.slane %v12859_v0, %v22641_v47  ;;  %v24971_v41 = vsel %vm6139_vm2, %v27853_v30, 0.0  ;;  %v12874_v6 = vrot.slane %v12860_v2, %v22641_v47 }
 0x604   : > { %27854 = vst [vmem:[#allocation129_spill] sm:$0xff] %v24971_v41  ;;  %v13131_v4 = vrot.slane %v13121_v26, %v22641_v47  ;;  %v8233_v18 = vrot.slane %v27855_v25, %v22568_v63  ;;  %v8237_v38 = vrot.slane %v27855_v25, %v22585_v37  ;;  %v13138_v55 = vrot.slane %v13122_v13, %v22641_v47  ;;  %v24995_v26 = vpop.permute.xlu0 %17359 }
 0x605   : > { %v13145_v19 = vrot.slane %v13123_v56, %v22641_v47  ;;  %v13152_v21 = vrot.slane %v13124_v52, %v22641_v47  ;;  %v8241_v32 = vrot.slane %v27855_v25, %v22595_v17  ;;  %v15424_v10 = vcombine.low %v9801_v15, %v9805_v7  ;;  %27858 = vst [vmem:[#allocation42_spill] sm:$0xff] %v24995_v26  ;;  %v27862_v26 = vld [vmem:[#allocation121_spill] sm:$0xff] }
 0x606   : > { %v15425_v34 = vcombine.low %v9809_v29, %v9813_v22  ;;  %v15426_v12 = vcombine.low %v9817_v61, %v9821_v59  ;;  %v15427_v23 = vcombine.low %v9825_v49, %v9829_v43  ;;  %v9737_v50 = vrot.slane %v27857_v53, %v22568_v63 }
 0x607   : > { %17497 = vperm.xlu0 %19740, %v24659_v11   ;;  %v24985_v11 = vpop.xlane.xlu1 %6438  ;;  %v9741_v36 = vrot.slane %v27857_v53, %v22585_v37  ;;  %v9745_v0 = vrot.slane %v27857_v53, %v22595_v17  ;;  %v9749_v2 = vrot.slane %v27857_v53, %v22598_v14  ;;  %v9753_v13 = vrot.slane %v27857_v53, %v22601_v5 }
 0x608   : > { %27856 = vst [vmem:[#allocation44_spill] sm:$0xff] %v24985_v11  ;;  %v9757_v56 = vrot.slane %v27857_v53, %v27716_v39  ;;  %v9761_v52 = vrot.slane %v27857_v53, %v27717_v3  ;;  %v9765_v54 = vrot.slane %v27857_v53, %v27718_v24  ;;  %v25006_v15 = vcombine.low %v12867_v31, %v12874_v6 }
 0x609   : > { %v25008_v7 = vcombine.low %v13131_v4, %v13138_v55  ;;  %v8245_v29 = vrot.slane %v27855_v25, %v22598_v14  ;;  %v25014_v22 = vcombine.low %v13145_v19, %v13152_v21  ;;  %v8253_v61 = vrot.slane %v27855_v25, %v27716_v39  ;;  %v6460_v4 = vpop.xlane.xlu0 %6459 }
 0x60a   : > { %v8257_v59 = vrot.slane %v27855_v25, %v27717_v3  ;;  %v8261_v49 = vrot.slane %v27855_v25, %v27718_v24  ;;  %v15434_v43 = vrot.slane %v15424_v10, %v22641_v47  ;;  %v15441_v31 = vrot.slane %v15425_v34, %v22641_v47 }
 0x60b   : > { %17491 = vperm.xlu0 %19740, %v24681_v27   ;;  %27859 = vst [vmem:[#allocation41_spill] sm:$0xff] %v25008_v7  ;;  %v8249_v27 = vrot.slane %v27855_v25, %v22601_v5  ;;  %27860 = vst [vmem:[#allocation127_spill] sm:$0xff] %v25014_v22  ;;  %v15448_v30 = vrot.slane %v15426_v12, %v22641_v47  ;;  %v15455_v6 = vrot.slane %v15427_v23, %v22641_v47  ;;  %v25026_v55 = vpop.xlane.xlu1 %6432 }
 0x60c   : > { %27861 = vst [vmem:[#allocation71_spill] sm:$0xff] %v25026_v55  ;;  %v15326_v19 = vcombine.low %v9737_v50, %v9741_v36  ;;  %v15327_v21 = vcombine.low %v9745_v0, %v9749_v2  ;;  %v15328_v53 = vcombine.low %v9753_v13, %v9757_v56  ;;  %v15329_v51 = vcombine.low %v9761_v52, %v9765_v54 }
 0x60d   : > { %v9929_v25 = vrot.slane %v27862_v26, %v22568_v63  ;;  %v9933_v10 = vrot.slane %v27862_v26, %v22585_v37  ;;  %v9937_v34 = vrot.slane %v27862_v26, %v22595_v17  ;;  %v9941_v12 = vrot.slane %v27862_v26, %v22598_v14 }
 0x60e   : > { %v9945_v23 = vrot.slane %v27862_v26, %v22601_v5  ;;  %v9953_v50 = vrot.slane %v27862_v26, %v27717_v3  ;;  %v9957_v36 = vrot.slane %v27862_v26, %v27718_v24  ;;  %v25045_v0 = vcombine.low %v8233_v18, %v8237_v38 }
 0x60f   : > { %17509 = vperm.xlu0 %19740, %v24689_v44   ;;  %v9949_v44 = vrot.slane %v27862_v26, %v27716_v39  ;;  %v25047_v2 = vcombine.low %v8241_v32, %v8245_v29  ;;  %v25049_v13 = vcombine.low %v8249_v27, %v8253_v61  ;;  %v25051_v56 = vcombine.low %v8257_v59, %v8261_v49  ;;  %v6454_v29 = vpop.xlane.xlu0 %6453  ;;  %v25063_v27 = vpop.permute.xlu1 %17356  ;;  %v27868_v59 = vld [vmem:[#allocation75_spill] sm:$0xff] }
 0x610   : > { %v15456_v52 = vcombine.low %v15434_v43, %v15441_v31  ;;  %v15457_v54 = vcombine.low %v15448_v30, %v15455_v6  ;;  %v15336_v46 = vrot.slane %v15326_v19, %v22641_v47  ;;  %v25058_v40 = vsel %vm6139_vm2, %v27865_v28, 0.0  ;;  %27867 = vst [vmem:[#allocation83_spill] sm:$0xff] %v25063_v27 }
 0x611   : > { %27863 = vst [vmem:[#allocation39_spill] sm:$0xff] %v25049_v13  ;;  %27864 = vst [vmem:[#allocation20_spill] sm:$0xff] %v25051_v56  ;;  %v15343_v18 = vrot.slane %v15327_v21, %v22641_v47  ;;  %v15350_v38 = vrot.slane %v15328_v53, %v22641_v47  ;;  %v15357_v32 = vrot.slane %v15329_v51, %v22641_v47  ;;  %v27869_v21 = vld [vmem:[#allocation23_spill] sm:$0xff] }
 0x612   : > { %27866 = vst [vmem:[#allocation85_spill] sm:$0xff] %v25058_v40  ;;  %v15620_v26 = vcombine.low %v9929_v25, %v9933_v10  ;;  %v15623_v61 = vcombine.low %v9953_v50, %v9957_v36  ;;  %v9865_v49 = vrot.slane %v27868_v59, %v22568_v63  ;;  %v9869_v28 = vrot.slane %v27868_v59, %v22585_v37  ;;  %v27871_v25 = vld [vmem:[#allocation76_spill] sm:$0xff] }
 0x613   : > { %6486 = vadd.xlane.f32.xlu1 %v24799_v9  ;;  %17503 = vperm.xlu0 %19740, %v24781_v57   ;;  %v15621_v9 = vcombine.low %v9937_v34, %v9941_v12  ;;  %v15622_v57 = vcombine.low %v9945_v23, %v9949_v44  ;;  %v9873_v43 = vrot.slane %v27868_v59, %v22595_v17  ;;  %v25085_v53 = vsel %vm6139_vm2, %v27869_v21, 0.0  ;;  %v27872_v34 = vld [vmem:[#allocation45_spill] sm:$0xff]  ;;  %v25094_v23 = vpop.permute.xlu0 %17377 }
 0x614   : > { %v9877_v31 = vrot.slane %v27868_v59, %v22598_v14  ;;  %v9881_v51 = vrot.slane %v27868_v59, %v22601_v5  ;;  %v9885_v30 = vrot.slane %v27868_v59, %v27716_v39  ;;  %v9889_v6 = vrot.slane %v27868_v59, %v27717_v3  ;;  %27870 = vst [vmem:[#allocation18_spill] sm:$0xff] %v25085_v53 }
 0x615   : > { %v9893_v19 = vrot.slane %v27868_v59, %v27718_v24  ;;  %v6630_v10 = vadd.f32 %v6460_v4, %v27871_v25  ;;  %27873 = vst [vmem:[#allocation52_spill] sm:$0xff] %v25094_v23  ;;  %v15464_v44 = vrot.slane %v15456_v52, %v22641_v47  ;;  %v15471_v50 = vrot.slane %v15457_v54, %v22641_v47  ;;  %v27881_v23 = vld [vmem:[#allocation30_spill] sm:$0xff] }
 0x616   : > { %v25098_v36 = vcombine.low %v15336_v46, %v15343_v18  ;;  %v25100_v59 = vcombine.low %v15350_v38, %v15357_v32  ;;  %v15630_v4 = vrot.slane %v15620_v26, %v22641_v47  ;;  %v15637_v21 = vrot.slane %v15621_v9, %v22641_v47  ;;  %v27875_v9 = vld [vmem:[#allocation74_spill] sm:$0xff] }
 0x617   : > { %6480 = vadd.xlane.f32.xlu1 %v24827_v16  ;;  %17521 = vperm.xlu0 %19740, %v24783_v42   ;;  %v15644_v25 = vrot.slane %v15622_v57, %v22641_v47  ;;  %v15651_v16 = vrot.slane %v15623_v61, %v22641_v47  ;;  %v25106_v42 = vpop.permute.xlu1 %17350  ;;  %v25109_v12 = vcombine.low %v9865_v49, %v9869_v28 }
 0x618   : > { %27874 = vst [vmem:[#allocation21_spill] sm:$0xff] %v25106_v42  ;;  %v25111_v52 = vcombine.low %v9873_v43, %v9877_v31  ;;  %v25113_v46 = vcombine.low %v9881_v51, %v9885_v30  ;;  %v25115_v54 = vcombine.low %v9889_v6, %v9893_v19  ;;  %v25126_v26 = vadd.f32 %v22578_v58, %v6630_v10  ;;  %v25143_v30 = vpop.permute.xlu0 %17371 }
 0x619   : > { %v25129_v57 = vadd.f32 %v6454_v29, %v27875_v9  ;;  %v25131_v61 = vcombine.low %v15464_v44, %v15471_v50  ;;  %v25139_v31 = vcombine.low %v15630_v4, %v15637_v21  ;;  %v25141_v51 = vcombine.low %v15644_v25, %v15651_v16  ;;  %27876 = vst [vmem:[#allocation22_spill] sm:$0xff] %v25143_v30  ;;  %v27878_v16 = vld [vmem:[#allocation8_spill] sm:$0xff] }
 0x61a   : > { %v15532_v29 = vrot.slane %v25109_v12, %v22641_v47  ;;  %v15539_v19 = vrot.slane %v25111_v52, %v22641_v47  ;;  %v15546_v10 = vrot.slane %v25113_v46, %v22641_v47  ;;  %v15553_v44 = vrot.slane %v25115_v54, %v22641_v47  ;;  %v27879_v54 = vld [vmem:[#allocation11_spill] sm:$0xff] }
 0x61b   : > { %17515 = vperm.xlu0 %19740, %v24931_v60   ;;  %v25145_v6 = vpop.xlane.xlu1 %6450  ;;  %v10057_v50 = vrot.slane %v27878_v16, %v22568_v63  ;;  %v10061_v4 = vrot.slane %v27878_v16, %v22585_v37  ;;  %v10069_v12 = vrot.slane %v27878_v16, %v22598_v14  ;;  %v10073_v21 = vrot.slane %v27878_v16, %v22601_v5 }
 0x61c   : > { %27877 = vst [vmem:[#allocation50_spill] sm:$0xff] %v25145_v6  ;;  %v10077_v25 = vrot.slane %v27878_v16, %v27716_v39  ;;  %v10081_v52 = vrot.slane %v27878_v16, %v27717_v3  ;;  %v10085_v46 = vrot.slane %v27878_v16, %v27718_v24  ;;  %v9993_v9 = vrot.slane %v27879_v54, %v22568_v63  ;;  %v25180_v18 = vpop.xlane.xlu0 %6471 }
 0x61d   : > { %v9997_v60 = vrot.slane %v27879_v54, %v22585_v37  ;;  %v10001_v49 = vrot.slane %v27879_v54, %v22595_v17  ;;  %v10005_v32 = vrot.slane %v27879_v54, %v22598_v14  ;;  %27880 = vst [vmem:[#allocation121_spill] sm:$0xff] %v25180_v18  ;;  %v10009_v38 = vrot.slane %v27879_v54, %v22601_v5 }
 0x61e   : > { %v10017_v28 = vrot.slane %v27879_v54, %v27717_v3  ;;  %v10021_v43 = vrot.slane %v27879_v54, %v27718_v24  ;;  %v10185_v30 = vrot.slane %v27881_v23, %v22568_v63  ;;  %v10189_v27 = vrot.slane %v27881_v23, %v22585_v37 }
 0x61f   : > { %17533 = vperm.xlu0 %19740, %v24933_v1   ;;  %v10065_v1 = vrot.slane %v27878_v16, %v22595_v17  ;;  %v10013_v16 = vrot.slane %v27879_v54, %v27716_v39  ;;  %v10197_v42 = vrot.slane %v27881_v23, %v22598_v14  ;;  %v25199_v6 = vpop.xlane.xlu1 %6444  ;;  %v10201_v55 = vrot.slane %v27881_v23, %v22601_v5 }
 0x620   : > { %27882 = vst [vmem:[#allocation43_spill] sm:$0xff] %v25199_v6  ;;  %v10205_v54 = vrot.slane %v27881_v23, %v27716_v39  ;;  %v10209_v11 = vrot.slane %v27881_v23, %v27717_v3  ;;  %v10213_v48 = vrot.slane %v27881_v23, %v27718_v24  ;;  %v15816_v35 = vcombine.low %v10057_v50, %v10061_v4  ;;  %v6466_v50 = vpop.xlane.xlu0 %6465 }
 0x621   : > { %v15817_v8 = vcombine.low %v10065_v1, %v10069_v12  ;;  %v15818_v53 = vcombine.low %v10073_v21, %v10077_v25  ;;  %v15819_v18 = vcombine.low %v10081_v52, %v10085_v46  ;;  %v15718_v40 = vcombine.low %v9993_v9, %v9997_v60 }
 0x622   : > { %v15719_v6 = vcombine.low %v10001_v49, %v10005_v32  ;;  %v15720_v41 = vcombine.low %v10009_v38, %v10013_v16  ;;  %v15721_v22 = vcombine.low %v10017_v28, %v10021_v43  ;;  %v15660_v7 = vrot.slane %v25139_v31, %v22641_v47 }
 0x623   : > { %17527 = vperm.xlu0 %19740, %v24935_v20   ;;  %v10193_v20 = vrot.slane %v27881_v23, %v22595_v17  ;;  %v15667_v13 = vrot.slane %v25141_v51, %v22641_v47  ;;  %v16012_v56 = vcombine.low %v10185_v30, %v10189_v27  ;;  %v15554_v4 = vcombine.low %v15532_v29, %v15539_v19  ;;  %v25219_v60 = vpop.permute.xlu1 %17368  ;;  %v27885_v51 = vld [vmem:[#allocation78_spill] sm:$0xff] }
 0x624   : > { %v15555_v1 = vcombine.low %v15546_v10, %v15553_v44  ;;  %v16014_v12 = vcombine.low %v10201_v55, %v10205_v54  ;;  %v16015_v21 = vcombine.low %v10209_v11, %v10213_v48  ;;  %v15833_v38 = vrot.slane %v15817_v8, %v22641_v47  ;;  %27883 = vst [vmem:[#allocation75_spill] sm:$0xff] %v25219_v60  ;;  %v27884_v11 = vld [vmem:[#allocation65_spill] sm:$0xff] }
 0x625   : > { %v16013_v23 = vcombine.low %v10193_v20, %v10197_v42  ;;  %v15840_v32 = vrot.slane %v15818_v53, %v22641_v47  ;;  %v15728_v27 = vrot.slane %v15718_v40, %v22641_v47  ;;  %v15735_v42 = vrot.slane %v15719_v6, %v22641_v47  ;;  %v25233_v53 = vpop.permute.xlu0 %17389 }
 0x626   : > { %v15742_v49 = vrot.slane %v15720_v41, %v22641_v47  ;;  %v15749_v48 = vrot.slane %v15721_v22, %v22641_v47  ;;  %v16022_v8 = vrot.slane %v16012_v56, %v22641_v47  ;;  %v10121_v55 = vrot.slane %v27884_v11, %v22568_v63 }
 0x627   : > { %17545 = vperm.xlu0 %19740, %v24937_v62   ;;  %v15826_v62 = vrot.slane %v15816_v35, %v22641_v47  ;;  %v16029_v35 = vrot.slane %v16013_v23, %v22641_v47  ;;  %v16036_v40 = vrot.slane %v16014_v12, %v22641_v47  ;;  %v16043_v41 = vrot.slane %v16015_v21, %v22641_v47 }
 0x628   : > { %17404 = vperm.xlu1 %19741, %v24964_v45   ;;  %v15847_v45 = vrot.slane %v15819_v18, %v22641_v47  ;;  %v10129_v22 = vrot.slane %v27884_v11, %v22595_v17  ;;  %v10137_v56 = vrot.slane %v27884_v11, %v22601_v5  ;;  %v10141_v18 = vrot.slane %v27884_v11, %v27716_v39 }
 0x629   : > { %v10145_v28 = vrot.slane %v27884_v11, %v27717_v3  ;;  %v10149_v43 = vrot.slane %v27884_v11, %v27718_v24  ;;  %v25251_v31 = vadd.f32 %v22578_v58, %v25129_v57  ;;  %v6632_v30 = vadd.f32 %v6466_v50, %v27885_v51  ;;  %v25263_v57 = vpop.permute.xlu1 %17362  ;;  %v25265_v12 = vpop.permute.xlu0 %17383 }
 0x62a   : > { %v27886_v6 = vrot.slane %v25100_v59, %v22641_v47  ;;  %v27887_v29 = vrot.slane %v25098_v36, %v22641_v47  ;;  %v15668_v10 = vcombine.low %v15660_v7, %v15667_v13  ;;  %v15562_v44 = vrot.slane %v15554_v4, %v22641_v47  ;;  %27888 = vst [vmem:[#allocation23_spill] sm:$0xff] %v25263_v57 }
 0x62b   : > { %17539 = vperm.xlu0 %19740, %v24966_v33   ;;  %v10125_v33 = vrot.slane %v27884_v11, %v22585_v37  ;;  %v15569_v25 = vrot.slane %v15555_v1, %v22641_v47  ;;  %v15848_v52 = vcombine.low %v15826_v62, %v15833_v38  ;;  %v15849_v46 = vcombine.low %v15840_v32, %v15847_v45 }
 0x62c   : > { %17398 = vperm.xlu1 %19741, %v25006_v15   ;;  %v10133_v15 = vrot.slane %v27884_v11, %v22598_v14  ;;  %v15374_v19 = vcombine.low %v27887_v29, %v27886_v6  ;;  %v15750_v9 = vcombine.low %v15728_v27, %v15735_v42  ;;  %v15751_v16 = vcombine.low %v15742_v49, %v15749_v48 }
 0x62d   : > { %v16044_v20 = vcombine.low %v16022_v8, %v16029_v35  ;;  %v15914_v54 = vcombine.low %v10121_v55, %v10125_v33  ;;  %v15916_v59 = vcombine.low %v10137_v56, %v10141_v18  ;;  %v15917_v50 = vcombine.low %v10145_v28, %v10149_v43  ;;  %v6463_v32 = vpop.xlane.xlu1 %6462  ;;  %v25290_v55 = vpop.xlane.xlu0 %6483 }
 0x62e   : > { %v15915_v23 = vcombine.low %v10129_v22, %v10133_v15  ;;  %v10313_v7 = vrot.slane %v25126_v26, %v22568_v63  ;;  %v10317_v13 = vrot.slane %v25126_v26, %v22585_v37  ;;  %v10321_v36 = vrot.slane %v25126_v26, %v22595_v17  ;;  %v27889_v22 = vld [vmem:[#allocation105_spill] sm:$0xff] }
 0x62f   : > { %17557 = vperm.xlu0 %19740, %v25131_v61   ;;  %v16045_v61 = vcombine.low %v16036_v40, %v16043_v41  ;;  %v10325_v4 = vrot.slane %v25126_v26, %v22598_v14  ;;  %v10329_v1 = vrot.slane %v25126_v26, %v22601_v5  ;;  %v10333_v21 = vrot.slane %v25126_v26, %v27716_v39 }
 0x630   : > { %v10337_v62 = vrot.slane %v25126_v26, %v27717_v3  ;;  %v10341_v38 = vrot.slane %v25126_v26, %v27718_v24  ;;  %v15570_v45 = vcombine.low %v15562_v44, %v15569_v25  ;;  %v15856_v27 = vrot.slane %v15848_v52, %v22641_v47 }
 0x631   : > { %v15863_v42 = vrot.slane %v15849_v46, %v22641_v47  ;;  %v15758_v49 = vrot.slane %v15750_v9, %v22641_v47  ;;  %v15765_v48 = vrot.slane %v15751_v16, %v22641_v47  ;;  %v16052_v8 = vrot.slane %v16044_v20, %v22641_v47 }
 0x632   : > { %v16059_v35 = vrot.slane %v16045_v61, %v22641_v47  ;;  %v15924_v11 = vrot.slane %v15914_v54, %v22641_v47  ;;  %v15931_v26 = vrot.slane %v15915_v23, %v22641_v47  ;;  %v15938_v33 = vrot.slane %v15916_v59, %v22641_v47  ;;  %v25316_v59 = vpop.xlane.xlu0 %6477 }
 0x633   : > { %17551 = vperm.xlu0 %19740, %v15374_v19   ;;  %v15945_v40 = vrot.slane %v15917_v50, %v22641_v47  ;;  %v16208_v41 = vcombine.low %v10313_v7, %v10317_v13  ;;  %v6631_v15 = vadd.f32 %v6463_v32, %v27889_v22  ;;  %v16209_v56 = vcombine.low %v10321_v36, %v10325_v4 }
 0x634   : > { %v16210_v18 = vcombine.low %v10329_v1, %v10333_v21  ;;  %v16211_v28 = vcombine.low %v10337_v62, %v10341_v38  ;;  %v10249_v43 = vrot.slane %v25251_v31, %v22568_v63  ;;  %v10253_v51 = vrot.slane %v25251_v31, %v22585_v37 }
 0x635   : > { %v10257_v6 = vrot.slane %v25251_v31, %v22595_v17  ;;  %v10261_v29 = vrot.slane %v25251_v31, %v22598_v14  ;;  %v10265_v19 = vrot.slane %v25251_v31, %v22601_v5  ;;  %v10273_v44 = vrot.slane %v25251_v31, %v27717_v3 }
 0x636   : > { %v10277_v25 = vrot.slane %v25251_v31, %v27718_v24  ;;  %v6770_v52 = vadd.f32 %v22578_v58, %v6632_v30  ;;  %v15864_v46 = vcombine.low %v15856_v27, %v15863_v42  ;;  %v15766_v9 = vcombine.low %v15758_v49, %v15765_v48  ;;  %v25330_v48 = vpop.permute.xlu0 %17401 }
 0x637   : > { %17569 = vperm.xlu0 %19740, %v15668_v10   ;;  %v10269_v10 = vrot.slane %v25251_v31, %v27716_v39  ;;  %v8441_v16 = vrot.slane %v27872_v34, %v22601_v5  ;;  %v6769_v20 = vadd.f32 %v22578_v58, %v6631_v15  ;;  %v16060_v61 = vcombine.low %v16052_v8, %v16059_v35 }
 0x638   : > { %v15946_v54 = vcombine.low %v15924_v11, %v15931_v26  ;;  %v15947_v23 = vcombine.low %v15938_v33, %v15945_v40  ;;  %v16218_v50 = vrot.slane %v16208_v41, %v22641_v47  ;;  %v16225_v7 = vrot.slane %v16209_v56, %v22641_v47 }
 0x639   : > { %v16232_v31 = vrot.slane %v16210_v18, %v22641_v47  ;;  %v16239_v30 = vrot.slane %v16211_v28, %v22641_v47  ;;  %v16110_v13 = vcombine.low %v10249_v43, %v10253_v51  ;;  %v16111_v36 = vcombine.low %v10257_v6, %v10261_v29 }
 0x63a   : > { %v16112_v4 = vcombine.low %v10265_v19, %v10269_v10  ;;  %v16113_v1 = vcombine.low %v10273_v44, %v10277_v25  ;;  %v10377_v21 = vrot.slane %v6770_v52, %v22568_v63  ;;  %v10381_v62 = vrot.slane %v6770_v52, %v22585_v37 }
 0x63b   : > { %17563 = vperm.xlu0 %19740, %v15570_v45   ;;  %v10385_v38 = vrot.slane %v6770_v52, %v22595_v17  ;;  %v10389_v32 = vrot.slane %v6770_v52, %v22598_v14  ;;  %v10345_v45 = vrot.slane %v6769_v20, %v22568_v63  ;;  %v10349_v27 = vrot.slane %v6769_v20, %v22585_v37 }
 0x63c   : > { %v10353_v42 = vrot.slane %v6769_v20, %v22595_v17  ;;  %v10357_v49 = vrot.slane %v6769_v20, %v22598_v14  ;;  %v10361_v8 = vrot.slane %v6769_v20, %v22601_v5  ;;  %v10365_v35 = vrot.slane %v6769_v20, %v27716_v39 }
 0x63d   : > { %v10369_v11 = vrot.slane %v6769_v20, %v27717_v3  ;;  %v10373_v26 = vrot.slane %v6769_v20, %v27718_v24  ;;  %v10393_v33 = vrot.slane %v6770_v52, %v22601_v5  ;;  %v10397_v40 = vrot.slane %v6770_v52, %v27716_v39 }
 0x63e   : > { %v10401_v41 = vrot.slane %v6770_v52, %v27717_v3  ;;  %v10405_v22 = vrot.slane %v6770_v52, %v27718_v24  ;;  %v15954_v15 = vrot.slane %v15946_v54, %v22641_v47  ;;  %v15961_v56 = vrot.slane %v15947_v23, %v22641_v47  ;;  %v25346_v54 = vpop.permute.xlu0 %17395 }
 0x63f   : > { %17581 = vperm.xlu0 %19740, %v15864_v46   ;;  %v16240_v18 = vcombine.low %v16218_v50, %v16225_v7  ;;  %v16241_v28 = vcombine.low %v16232_v31, %v16239_v30  ;;  %v16120_v43 = vrot.slane %v16110_v13, %v22641_v47  ;;  %v16127_v51 = vrot.slane %v16111_v36, %v22641_v47 }
 0x640   : > { %v16134_v6 = vrot.slane %v16112_v4, %v22641_v47  ;;  %v16141_v29 = vrot.slane %v16113_v1, %v22641_v47  ;;  %v16257_v19 = vcombine.low %v10345_v45, %v10349_v27  ;;  %v16258_v10 = vcombine.low %v10353_v42, %v10357_v49  ;;  %v27890_v42 = vld [vmem:[#allocation84_spill] sm:$0xff] }
 0x641   : > { %v16259_v44 = vcombine.low %v10361_v8, %v10365_v35  ;;  %v16260_v25 = vcombine.low %v10369_v11, %v10373_v26  ;;  %v16306_v52 = vcombine.low %v10377_v21, %v10381_v62  ;;  %v16307_v46 = vcombine.low %v10385_v38, %v10389_v32 }
 0x642   : > { %v16309_v20 = vcombine.low %v10401_v41, %v10405_v22  ;;  %v15962_v23 = vcombine.low %v15954_v15, %v15961_v56  ;;  %v8445_v50 = vrot.slane %v27872_v34, %v27716_v39  ;;  %v8449_v7 = vrot.slane %v27872_v34, %v27717_v3  ;;  %v6496_v8 = vpop.xlane.xlu0 %6495  ;;  %v27895_v41 = vld [vmem:[#allocation39_spill] sm:$0xff] }
 0x643   : > { %17575 = vperm.xlu0 %19740, %v15766_v9   ;;  %v16308_v9 = vcombine.low %v10393_v33, %v10397_v40  ;;  %v8453_v31 = vrot.slane %v27872_v34, %v27718_v24  ;;  %v16248_v30 = vrot.slane %v16240_v18, %v22641_v47  ;;  %v16255_v13 = vrot.slane %v16241_v28, %v22641_v47  ;;  %v27893_v33 = vld [vmem:[#allocation20_spill] sm:$0xff] }
 0x644   : > { %v16142_v36 = vcombine.low %v16120_v43, %v16127_v51  ;;  %v16143_v4 = vcombine.low %v16134_v6, %v16141_v29  ;;  %v16267_v1 = vrot.slane %v16257_v19, %v22641_v47  ;;  %v16281_v21 = vrot.slane %v16259_v44, %v22641_v47 }
 0x645   : > { %v16288_v62 = vrot.slane %v16260_v25, %v22641_v47  ;;  %v16316_v38 = vrot.slane %v16306_v52, %v22641_v47  ;;  %v16323_v32 = vrot.slane %v16307_v46, %v22641_v47  ;;  %v16330_v45 = vrot.slane %v16308_v9, %v22641_v47  ;;  %v27901_v46 = vld [vmem:[#allocation41_spill] sm:$0xff] }
 0x646   : > { %v16337_v27 = vrot.slane %v16309_v20, %v22641_v47  ;;  %v6638_v49 = vadd.f32 %v25290_v55, %v27890_v42  ;;  %v27891_v35 = vrot.slane %v25047_v2, %v22641_v47  ;;  %v27892_v11 = vrot.slane %v25045_v0, %v22641_v47  ;;  %v27902_v20 = vld [vmem:[#allocation127_spill] sm:$0xff]  ;;  %v27907_v42 = vld [vmem:[#allocation88_spill] sm:$0xff] }
 0x647   : > { %17593 = vperm.xlu0 %19740, %v16060_v61   ;;  %v16274_v61 = vrot.slane %v16258_v10, %v22641_v47  ;;  %v27894_v40 = vrot.slane %v27893_v33, %v22641_v47  ;;  %v27896_v22 = vrot.slane %v27895_v41, %v22641_v47  ;;  %v27897_v56 = vrot.slane %v27872_v34, %v22585_v37 }
 0x648   : > { %v13055_v26 = vcombine.low %v27892_v11, %v27891_v35  ;;  %v27898_v55 = vrot.slane %v27872_v34, %v22568_v63  ;;  %v16256_v28 = vcombine.low %v16248_v30, %v16255_v13  ;;  %v27899_v2 = vrot.slane %v27872_v34, %v22598_v14  ;;  %v27905_v13 = vld [vmem:[#allocation82_spill] sm:$0xff] }
 0x649   : > { %v13056_v15 = vcombine.low %v27896_v22, %v27894_v40  ;;  %v27900_v0 = vrot.slane %v27872_v34, %v22595_v17  ;;  %v13319_v51 = vcombine.low %v8441_v16, %v8445_v50  ;;  %v13320_v6 = vcombine.low %v8449_v7, %v8453_v31  ;;  %v25402_v34 = vpop.xlane.xlu1 %6456  ;;  %v27904_v7 = vld [vmem:[#allocation13_spill] sm:$0xff] }
 0x64a   : > { %v13317_v18 = vcombine.low %v27898_v55, %v27897_v56  ;;  %v16150_v29 = vrot.slane %v16142_v36, %v22641_v47  ;;  %v16157_v19 = vrot.slane %v16143_v4, %v22641_v47  ;;  %v16289_v10 = vcombine.low %v16267_v1, %v16274_v61  ;;  %27903 = vst [vmem:[#allocation76_spill] sm:$0xff] %v25402_v34  ;;  %v27906_v4 = vld [vmem:[#allocation129_spill] sm:$0xff] }
 0x64b   : > { %17587 = vperm.xlu0 %19740, %v15962_v23   ;;  %v13318_v43 = vcombine.low %v27900_v0, %v27899_v2  ;;  %v16290_v44 = vcombine.low %v16281_v21, %v16288_v62  ;;  %v16338_v25 = vcombine.low %v16316_v38, %v16323_v32  ;;  %v16339_v52 = vcombine.low %v16330_v45, %v16337_v27  ;;  %v6490_v62 = vpop.xlane.xlu0 %6489  ;;  %v27908_v22 = vld [vmem:[#allocation85_spill] sm:$0xff] }
 0x64c   : > { %v13161_v9 = vrot.slane %v27901_v46, %v22641_v47  ;;  %v13168_v23 = vrot.slane %v27902_v20, %v22641_v47  ;;  %v25400_v30 = vadd.f32 %v22578_v58, %v6638_v49  ;;  %v13063_v16 = vrot.slane %v13055_v26, %v22641_v47 }
 0x64d   : > { %v13070_v50 = vrot.slane %v13056_v15, %v22641_v47  ;;  %v25408_v31 = vsel %vm6139_vm2, %v27904_v7, 0.0  ;;  %v6636_v36 = vadd.f32 %v25316_v59, %v27905_v13  ;;  %v13327_v1 = vrot.slane %v13317_v18, %v22641_v47  ;;  %v27909_v15 = vld [vmem:[#allocation24_spill] sm:$0xff]  ;;  %v25442_v2 = vpop.permute.xlu1 %17380 }
 0x64e   : > { %v13334_v61 = vrot.slane %v13318_v43, %v22641_v47  ;;  %v13341_v21 = vrot.slane %v13319_v51, %v22641_v47  ;;  %v16158_v38 = vcombine.low %v16150_v29, %v16157_v19  ;;  %v16297_v32 = vrot.slane %v16289_v10, %v22641_v47  ;;  %27911 = vst [vmem:[#allocation74_spill] sm:$0xff] %v25442_v2 }
 0x64f   : > { %17605 = vperm.xlu0 %19740, %v16256_v28   ;;  %v16304_v45 = vrot.slane %v16290_v44, %v22641_v47  ;;  %v13348_v27 = vrot.slane %v13320_v6, %v22641_v47  ;;  %v6642_v49 = vadd.f32 %v6496_v8, %v27907_v42  ;;  %v16346_v59 = vrot.slane %v16338_v25, %v22641_v47  ;;  %v25440_v28 = vpop.permute.xlu0 %17413 }
 0x650   : > { %6498 = vadd.xlane.f32.xlu1 %v27906_v4  ;;  %v16353_v35 = vrot.slane %v16339_v52, %v22641_v47  ;;  %v25422_v11 = vcombine.low %v13161_v9, %v13168_v23  ;;  %v10569_v26 = vrot.slane %v25400_v30, %v22568_v63  ;;  %v10573_v33 = vrot.slane %v25400_v30, %v22585_v37 }
 0x651   : > { %v10577_v40 = vrot.slane %v25400_v30, %v22595_v17  ;;  %v10581_v41 = vrot.slane %v25400_v30, %v22598_v14  ;;  %v6774_v8 = vadd.f32 %v22578_v58, %v6636_v36  ;;  %v8361_v56 = vrot.slane %v27909_v15, %v22568_v63  ;;  %27910 = vst [vmem:[#allocation45_spill] sm:$0xff] %v25440_v28 }
 0x652   : > { %v8365_v55 = vrot.slane %v27909_v15, %v22585_v37  ;;  %v8369_v18 = vrot.slane %v27909_v15, %v22595_v17  ;;  %v16305_v0 = vcombine.low %v16297_v32, %v16304_v45  ;;  %v25444_v43 = vcombine.low %v13063_v16, %v13070_v50 }
 0x653   : > { %17599 = vperm.xlu0 %19740, %v16158_v38   ;;  %v25446_v51 = vcombine.low %v13327_v1, %v13334_v61  ;;  %v25448_v6 = vcombine.low %v13341_v21, %v13348_v27  ;;  %v6780_v29 = vadd.f32 %v22578_v58, %v6642_v49  ;;  %v16354_v19 = vcombine.low %v16346_v59, %v16353_v35  ;;  %v27912_v38 = vld [vmem:[#allocation86_spill] sm:$0xff]  ;;  %v25476_v45 = vpop.permute.xlu0 %17407  ;;  %v25478_v27 = vpop.permute.xlu1 %17374 }
 0x654   : > { %6492 = vadd.xlane.f32.xlu1 %v27908_v22  ;;  %v10585_v10 = vrot.slane %v25400_v30, %v22601_v5  ;;  %v10589_v44 = vrot.slane %v25400_v30, %v27716_v39  ;;  %v10593_v25 = vrot.slane %v25400_v30, %v27717_v3  ;;  %v10597_v52 = vrot.slane %v25400_v30, %v27718_v24 }
 0x655   : > { %v16600_v46 = vcombine.low %v10569_v26, %v10573_v33  ;;  %v16601_v9 = vcombine.low %v10577_v40, %v10581_v41  ;;  %v10505_v20 = vrot.slane %v6774_v8, %v22568_v63  ;;  %v10509_v23 = vrot.slane %v6774_v8, %v22585_v37  ;;  %27913 = vst [vmem:[#allocation8_spill] sm:$0xff] %v25476_v45 }
 0x656   : > { %v10513_v16 = vrot.slane %v6774_v8, %v22595_v17  ;;  %v10517_v50 = vrot.slane %v6774_v8, %v22598_v14  ;;  %v10521_v7 = vrot.slane %v6774_v8, %v22601_v5  ;;  %v10525_v13 = vrot.slane %v6774_v8, %v27716_v39  ;;  %27914 = vst [vmem:[#allocation11_spill] sm:$0xff] %v25478_v27 }
 0x657   : > { %17608 = vperm.xlu0 %19740, %v16305_v0   ;;  %v10529_v36 = vrot.slane %v6774_v8, %v27717_v3  ;;  %v10533_v4 = vrot.slane %v6774_v8, %v27718_v24  ;;  %v8373_v61 = vrot.slane %v27909_v15, %v22598_v14  ;;  %v8377_v21 = vrot.slane %v27909_v15, %v22601_v5 }
 0x658   : > { %v6640_v32 = vadd.f32 %v6490_v62, %v27912_v38  ;;  %v16602_v42 = vcombine.low %v10585_v10, %v10589_v44  ;;  %v16603_v49 = vcombine.low %v10593_v25, %v10597_v52  ;;  %v8381_v59 = vrot.slane %v27909_v15, %v27716_v39  ;;  %v27915_v25 = vld [vmem:[#allocation80_spill] sm:$0xff]  ;;  %v27916_v52 = vld [vmem:[#allocation121_spill] sm:$0xff] }
 0x659   : > { %v16610_v35 = vrot.slane %v16600_v46, %v22641_v47  ;;  %v16617_v26 = vrot.slane %v16601_v9, %v22641_v47  ;;  %v16502_v33 = vcombine.low %v10505_v20, %v10509_v23  ;;  %v16503_v40 = vcombine.low %v10513_v16, %v10517_v50  ;;  %v25495_v20 = vpop.xlane.xlu0 %6507 }
 0x65a   : > { %v16504_v41 = vcombine.low %v10521_v7, %v10525_v13  ;;  %v16505_v8 = vcombine.low %v10529_v36, %v10533_v4  ;;  %v10697_v62 = vrot.slane %v6780_v29, %v22568_v63  ;;  %v10701_v22 = vrot.slane %v6780_v29, %v22585_v37  ;;  %27917 = vst [vmem:[#allocation30_spill] sm:$0xff] %v25495_v20 }
 0x65b   : > { %17611 = vperm.xlu0 %19740, %v16354_v19   ;;  %v10705_v0 = vrot.slane %v6780_v29, %v22595_v17  ;;  %v10709_v19 = vrot.slane %v6780_v29, %v22598_v14  ;;  %v10713_v10 = vrot.slane %v6780_v29, %v22601_v5  ;;  %v10717_v44 = vrot.slane %v6780_v29, %v27716_v39 }
 0x65c   : > { %v6634_v46 = vadd.f32 %v27916_v52, %v27915_v25  ;;  %v25493_v9 = vadd.f32 %v22578_v58, %v6640_v32  ;;  %v10721_v16 = vrot.slane %v6780_v29, %v27717_v3  ;;  %v10725_v50 = vrot.slane %v6780_v29, %v27718_v24 }
 0x65d   : > { %v16624_v7 = vrot.slane %v16602_v42, %v22641_v47  ;;  %v16631_v13 = vrot.slane %v16603_v49, %v22641_v47  ;;  %v25503_v36 = vcombine.low %v16610_v35, %v16617_v26  ;;  %v16512_v4 = vrot.slane %v16502_v33, %v22641_v47 }
 0x65e   : > { %v16519_v38 = vrot.slane %v16503_v40, %v22641_v47  ;;  %v16526_v32 = vrot.slane %v16504_v41, %v22641_v47  ;;  %v16533_v25 = vrot.slane %v16505_v8, %v22641_v47  ;;  %v16796_v52 = vcombine.low %v10697_v62, %v10701_v22  ;;  %v27918_v8 = vld [vmem:[#allocation106_spill] sm:$0xff] }
 0x65f   : > { %v25497_v23 = vpop.xlane.xlu1 %6474  ;;  %v16797_v30 = vcombine.low %v10705_v0, %v10709_v19  ;;  %v16798_v1 = vcombine.low %v10713_v10, %v10717_v44  ;;  %v16799_v35 = vcombine.low %v10721_v16, %v10725_v50  ;;  %v25519_v26 = vcombine.low %v8361_v56, %v8365_v55  ;;  %v6502_v19 = vpop.xlane.xlu0 %6501 }
 0x660   : > { %v25524_v33 = vcombine.low %v8369_v18, %v8373_v61  ;;  %v25526_v40 = vcombine.low %v8377_v21, %v8381_v59  ;;  %v25529_v41 = vadd.f32 %v22578_v58, %v6634_v46  ;;  %v25532_v22 = vcombine.low %v16624_v7, %v16631_v13  ;;  %v27919_v7 = vld [vmem:[#allocation90_spill] sm:$0xff] }
 0x661   : > { %v25537_v56 = vcombine.low %v16512_v4, %v16519_v38  ;;  %v25539_v55 = vcombine.low %v16526_v32, %v16533_v25  ;;  %v16806_v18 = vrot.slane %v16796_v52, %v22641_v47  ;;  %v10633_v61 = vrot.slane %v25493_v9, %v22568_v63 }
 0x662   : > { %v16813_v59 = vrot.slane %v16797_v30, %v22641_v47  ;;  %v16820_v10 = vrot.slane %v16798_v1, %v22641_v47  ;;  %v10637_v44 = vrot.slane %v25493_v9, %v22585_v37  ;;  %v10641_v46 = vrot.slane %v25493_v9, %v22595_v17 }
 0x663   : > { %v6469_v49 = vpop.xlane.xlu1 %6468  ;;  %v10645_v16 = vrot.slane %v25493_v9, %v22598_v14  ;;  %v10649_v50 = vrot.slane %v25493_v9, %v22601_v5  ;;  %v6644_v13 = vadd.f32 %v6502_v19, %v27919_v7  ;;  %v27922_v60 = vrot.slane %v27909_v15, %v27718_v24 }
 0x664   : > { %v6633_v62 = vadd.f32 %v6469_v49, %v27918_v8  ;;  %v10653_v8 = vrot.slane %v25493_v9, %v27716_v39  ;;  %v16698_v29 = vcombine.low %v10633_v61, %v10637_v44  ;;  %v16828_v61 = vcombine.low %v16806_v18, %v16813_v59 }
 0x665   : > { %17416 = vperm.xlu1 %19741, %v25422_v11   ;;  %v16827_v11 = vrot.slane %v16799_v35, %v22641_v47  ;;  %v6782_v42 = vadd.f32 %v22578_v58, %v6644_v13  ;;  %v16699_v27 = vcombine.low %v10641_v46, %v10645_v16  ;;  %v27923_v57 = vrot.slane %v27909_v15, %v27717_v3 }
 0x666   : > { %v6771_v21 = vadd.f32 %v22578_v58, %v6633_v62  ;;  %v10657_v62 = vrot.slane %v25493_v9, %v27717_v3  ;;  %v16708_v16 = vrot.slane %v16698_v29, %v22641_v47 }
 0x667   : > { %v16829_v44 = vcombine.low %v16820_v10, %v16827_v11  ;;  %v10777_v18 = vrot.slane %v6782_v42, %v22601_v5  ;;  %v10781_v59 = vrot.slane %v6782_v42, %v27716_v39  ;;  %v10785_v29 = vrot.slane %v6782_v42, %v27717_v3  ;;  %v27920_v10 = vld [vmem:[#allocation107_spill] sm:$0xff] }
 0x668   : > { %v10409_v30 = vrot.slane %v6771_v21, %v22568_v63  ;;  %v10413_v1 = vrot.slane %v6771_v21, %v22585_v37  ;;  %v10417_v4 = vrot.slane %v6771_v21, %v22595_v17  ;;  %v10421_v38 = vrot.slane %v6771_v21, %v22598_v14 }
 0x669   : > { %17410 = vperm.xlu1 %19741, %v25444_v43   ;;  %v10425_v32 = vrot.slane %v6771_v21, %v22601_v5  ;;  %v10429_v25 = vrot.slane %v6771_v21, %v27716_v39  ;;  %v10433_v52 = vrot.slane %v6771_v21, %v27717_v3  ;;  %v10437_v49 = vrot.slane %v6771_v21, %v27718_v24 }
 0x66a   : > { %v16355_v35 = vcombine.low %v10409_v30, %v10413_v1  ;;  %v16356_v19 = vcombine.low %v10417_v4, %v10421_v38  ;;  %v10661_v43 = vrot.slane %v25493_v9, %v27718_v24  ;;  %v16647_v1 = vrot.slane %v25532_v22, %v22641_v47 }
 0x66b   : > { %v16357_v7 = vcombine.low %v10425_v32, %v10429_v25  ;;  %v16358_v0 = vcombine.low %v10433_v52, %v10437_v49  ;;  %v16542_v4 = vrot.slane %v25537_v56, %v22641_v47  ;;  %v16549_v9 = vrot.slane %v25539_v55, %v22641_v47 }
 0x66c   : > { %v16365_v2 = vrot.slane %v16355_v35, %v22641_v47  ;;  %v16372_v21 = vrot.slane %v16356_v19, %v22641_v47  ;;  %v16700_v32 = vcombine.low %v10649_v50, %v10653_v8  ;;  %v16701_v46 = vcombine.low %v10657_v62, %v10661_v43 }
 0x66d   : > { %v16379_v30 = vrot.slane %v16357_v7, %v22641_v47  ;;  %v16386_v38 = vrot.slane %v16358_v0, %v22641_v47  ;;  %v16715_v52 = vrot.slane %v16699_v27, %v22641_v47  ;;  %v10761_v22 = vrot.slane %v6782_v42, %v22568_v63 }
 0x66e   : > { %v16387_v13 = vcombine.low %v16365_v2, %v16372_v21  ;;  %v10765_v49 = vrot.slane %v6782_v42, %v22585_v37  ;;  %v10769_v0 = vrot.slane %v6782_v42, %v22595_v17  ;;  %v10773_v55 = vrot.slane %v6782_v42, %v22598_v14 }
 0x66f   : > { %v16388_v25 = vcombine.low %v16379_v30, %v16386_v38  ;;  %v10789_v27 = vrot.slane %v6782_v42, %v27718_v24  ;;  %v6635_v11 = vadd.f32 %v25497_v23, %v27920_v10  ;;  %v16722_v50 = vrot.slane %v16700_v32, %v22641_v47 }
 0x670   : > { %v16395_v56 = vrot.slane %v16387_v13, %v22641_v47  ;;  %v16729_v35 = vrot.slane %v16701_v46, %v22641_v47  ;;  %v10441_v8 = vrot.slane %v25529_v41, %v22568_v63  ;;  %v10445_v19 = vrot.slane %v25529_v41, %v22585_v37 }
 0x671   : > { %v16402_v2 = vrot.slane %v16388_v25, %v22641_v47  ;;  %v10449_v7 = vrot.slane %v25529_v41, %v22595_v17  ;;  %v10453_v42 = vrot.slane %v25529_v41, %v22598_v14  ;;  %v10457_v23 = vrot.slane %v25529_v41, %v22601_v5 }
 0x672   : > { %v10461_v43 = vrot.slane %v25529_v41, %v27716_v39  ;;  %v10465_v21 = vrot.slane %v25529_v41, %v27717_v3  ;;  %v10469_v30 = vrot.slane %v25529_v41, %v27718_v24  ;;  %v16894_v38 = vcombine.low %v10761_v22, %v10765_v49 }
 0x673   : > { %v16403_v62 = vcombine.low %v16395_v56, %v16402_v2  ;;  %v16895_v13 = vcombine.low %v10769_v0, %v10773_v55  ;;  %v16896_v32 = vcombine.low %v10777_v18, %v10781_v59  ;;  %v16897_v46 = vcombine.low %v10785_v29, %v10789_v27 }
 0x674   : > { %v6773_v25 = vadd.f32 %v22578_v58, %v6635_v11  ;;  %v27921_v56 = vrot.slane %v25503_v36, %v22641_v47  ;;  %v16550_v10 = vcombine.low %v16542_v4, %v16549_v9  ;;  %v25625_v34 = vcombine.low %v27923_v57, %v27922_v60 }
 0x675   : > { %17614 = vperm.xlu0 %19740, %v16403_v62   ;;  %v16836_v41 = vrot.slane %v16828_v61, %v22641_v47  ;;  %v16843_v22 = vrot.slane %v16829_v44, %v22641_v47  ;;  %v16730_v49 = vcombine.low %v16708_v16, %v16715_v52  ;;  %v16731_v0 = vcombine.low %v16722_v50, %v16729_v35 }
 0x676   : > { %v16648_v2 = vcombine.low %v27921_v56, %v16647_v1  ;;  %v16404_v55 = vcombine.low %v10441_v8, %v10445_v19  ;;  %v16405_v18 = vcombine.low %v10449_v7, %v10453_v42  ;;  %v16406_v59 = vcombine.low %v10457_v23, %v10461_v43  ;;  %v27924_v8 = vld [vmem:[#allocation49_spill] sm:$0xff] }
 0x677   : > { %v16407_v36 = vcombine.low %v10465_v21, %v10469_v30  ;;  %v16904_v1 = vrot.slane %v16894_v38, %v22641_v47  ;;  %v16911_v4 = vrot.slane %v16895_v13, %v22641_v47  ;;  %v16918_v9 = vrot.slane %v16896_v32, %v22641_v47 }
 0x678   : > { %v16925_v60 = vrot.slane %v16897_v46, %v22641_v47  ;;  %v10473_v57 = vrot.slane %v6773_v25, %v22568_v63  ;;  %v10477_v15 = vrot.slane %v6773_v25, %v22585_v37  ;;  %v10481_v61 = vrot.slane %v6773_v25, %v22595_v17 }
 0x679   : > { %17629 = vperm.xlu0 %19740, %v16648_v2   ;;  %v10485_v44 = vrot.slane %v6773_v25, %v22598_v14  ;;  %v10489_v16 = vrot.slane %v6773_v25, %v22601_v5  ;;  %v10493_v52 = vrot.slane %v6773_v25, %v27716_v39  ;;  %v10497_v29 = vrot.slane %v6773_v25, %v27717_v3 }
 0x67a   : > { %v10501_v27 = vrot.slane %v6773_v25, %v27718_v24  ;;  %v16844_v11 = vcombine.low %v16836_v41, %v16843_v22  ;;  %v13229_v50 = vrot.slane %v25519_v26, %v22641_v47  ;;  %v13236_v35 = vrot.slane %v25524_v33, %v22641_v47 }
 0x67b   : > { %v8553_v62 = vrot.slane %v27924_v8, %v22568_v63  ;;  %v16738_v19 = vrot.slane %v16730_v49, %v22641_v47  ;;  %v16745_v7 = vrot.slane %v16731_v0, %v22641_v47  ;;  %v16414_v42 = vrot.slane %v16404_v55, %v22641_v47 }
 0x67c   : > { %v16421_v23 = vrot.slane %v16405_v18, %v22641_v47  ;;  %v16926_v43 = vcombine.low %v16904_v1, %v16911_v4  ;;  %v16927_v21 = vcombine.low %v16918_v9, %v16925_v60  ;;  %v16428_v30 = vrot.slane %v16406_v59, %v22641_v47 }
 0x67d   : > { %17623 = vperm.xlu0 %19740, %v16550_v10   ;;  %v16435_v26 = vrot.slane %v16407_v36, %v22641_v47  ;;  %v16453_v38 = vcombine.low %v10473_v57, %v10477_v15  ;;  %v16454_v33 = vcombine.low %v10481_v61, %v10485_v44  ;;  %v16455_v13 = vcombine.low %v10489_v16, %v10493_v52  ;;  %v27927_v52 = vld [vmem:[#allocation89_spill] sm:$0xff] }
 0x67e   : > { %v16456_v32 = vcombine.low %v10497_v29, %v10501_v27  ;;  %v8557_v46 = vrot.slane %v27924_v8, %v22585_v37  ;;  %v8561_v25 = vrot.slane %v27924_v8, %v22595_v17  ;;  %v8565_v56 = vrot.slane %v27924_v8, %v22598_v14  ;;  %v27928_v29 = vld [vmem:[#allocation116_spill] sm:$0xff] }
 0x67f   : > { %v8569_v2 = vrot.slane %v27924_v8, %v22601_v5  ;;  %v16746_v10 = vcombine.low %v16738_v19, %v16745_v7  ;;  %v8573_v41 = vrot.slane %v27924_v8, %v27716_v39  ;;  %v8577_v22 = vrot.slane %v27924_v8, %v27717_v3  ;;  %v27929_v7 = vld [vmem:[#allocation26_spill] sm:$0xff] }
 0x680   : > { %v8581_v49 = vrot.slane %v27924_v8, %v27718_v24  ;;  %v16934_v0 = vrot.slane %v16926_v43, %v22641_v47  ;;  %v16941_v55 = vrot.slane %v16927_v21, %v22641_v47  ;;  %v16436_v18 = vcombine.low %v16414_v42, %v16421_v23 }
 0x681   : > { %17641 = vperm.xlu0 %19740, %v16844_v11   ;;  %v16437_v59 = vcombine.low %v16428_v30, %v16435_v26  ;;  %v16463_v36 = vrot.slane %v16453_v38, %v22641_v47  ;;  %v16470_v1 = vrot.slane %v16454_v33, %v22641_v47  ;;  %v16477_v4 = vrot.slane %v16455_v13, %v22641_v47 }
 0x682   : > { %v16484_v9 = vrot.slane %v16456_v32, %v22641_v47  ;;  %v27925_v60 = vrot.slane %v25448_v6, %v22641_v47  ;;  %v27926_v57 = vrot.slane %v25446_v51, %v22641_v47  ;;  %v13243_v61 = vrot.slane %v25526_v40, %v22641_v47  ;;  %v27930_v40 = vld [vmem:[#allocation53_spill] sm:$0xff] }
 0x683   : > { %v13250_v44 = vrot.slane %v25625_v34, %v22641_v47  ;;  %v13513_v16 = vcombine.low %v8553_v62, %v8557_v46  ;;  %v25687_v27 = vadd.f32 %v27928_v29, %v27927_v52  ;;  %v13514_v11 = vcombine.low %v8561_v25, %v8565_v56 }
 0x684   : > { %v25679_v15 = vcombine.low %v27926_v57, %v27925_v60  ;;  %v13515_v8 = vcombine.low %v8569_v2, %v8573_v41  ;;  %v13516_v6 = vcombine.low %v8577_v22, %v8581_v49  ;;  %v16444_v19 = vrot.slane %v16436_v18, %v22641_v47  ;;  %v27933_v18 = vld [vmem:[#allocation12_spill] sm:$0xff] }
 0x685   : > { %17635 = vperm.xlu0 %19740, %v16746_v10   ;;  %v25690_v51 = vcombine.low %v13229_v50, %v13236_v35  ;;  %v25694_v42 = vsel %vm6139_vm2, %v27929_v7, 0.0  ;;  %v25698_v34 = vsel %vm6139_vm2, %v27930_v40, 0.0  ;;  %v16942_v62 = vcombine.low %v16934_v0, %v16941_v55  ;;  %v27931_v50 = vld [vmem:[#allocation47_spill] sm:$0xff]  ;;  %v27932_v55 = vld [vmem:[#allocation18_spill] sm:$0xff] }
 0x686   : > { %v16451_v23 = vrot.slane %v16437_v59, %v22641_v47  ;;  %v16485_v43 = vcombine.low %v16463_v36, %v16470_v1  ;;  %v16486_v21 = vcombine.low %v16477_v4, %v16484_v9  ;;  %v25701_v30 = vcombine.low %v13243_v61, %v13250_v44  ;;  %v27934_v44 = vld [vmem:[#allocation87_spill] sm:$0xff] }
 0x687   : > { %v13523_v26 = vrot.slane %v13513_v16, %v22641_v47  ;;  %v8489_v35 = vrot.slane %v27931_v50, %v22568_v63  ;;  %v8493_v38 = vrot.slane %v27931_v50, %v22585_v37  ;;  %v13530_v33 = vrot.slane %v13514_v11, %v22641_v47  ;;  %v27935_v16 = vld [vmem:[#allocation123_spill] sm:$0xff] }
 0x688   : > { %v13537_v13 = vrot.slane %v13515_v8, %v22641_v47  ;;  %v13544_v32 = vrot.slane %v13516_v6, %v22641_v47  ;;  %v8497_v46 = vrot.slane %v27931_v50, %v22595_v17  ;;  %v8501_v25 = vrot.slane %v27931_v50, %v22598_v14 }
 0x689   : > { %17647 = vperm.xlu0 %19740, %v16942_v62   ;;  %v8505_v56 = vrot.slane %v27931_v50, %v22601_v5  ;;  %v8509_v2 = vrot.slane %v27931_v50, %v27716_v39  ;;  %v8513_v10 = vrot.slane %v27931_v50, %v27717_v3  ;;  %v16452_v41 = vcombine.low %v16444_v19, %v16451_v23 }
 0x68a   : > { %v16493_v22 = vrot.slane %v16485_v43, %v22641_v47  ;;  %v16500_v49 = vrot.slane %v16486_v21, %v22641_v47  ;;  %v8517_v0 = vrot.slane %v27931_v50, %v27718_v24  ;;  %v8681_v59 = vrot.slane %v27933_v18, %v22568_v63 }
 0x68b   : > { %v8685_v36 = vrot.slane %v27933_v18, %v22585_v37  ;;  %v8689_v1 = vrot.slane %v27933_v18, %v22595_v17  ;;  %v8693_v4 = vrot.slane %v27933_v18, %v22598_v14  ;;  %v8697_v9 = vrot.slane %v27933_v18, %v22601_v5 }
 0x68c   : > { %v8701_v60 = vrot.slane %v27933_v18, %v27716_v39  ;;  %v8705_v57 = vrot.slane %v27933_v18, %v27717_v3  ;;  %v8709_v61 = vrot.slane %v27933_v18, %v27718_v24  ;;  %v6613_v52 = vadd.f32 %v27935_v16, %v27934_v44 }
 0x68d   : > { %6510 = vadd.xlane.f32.xlu1 %v27932_v55  ;;  %17617 = vperm.xlu0 %19740, %v16452_v41   ;;  %v13259_v29 = vrot.slane %v25690_v51, %v22641_v47  ;;  %v13266_v11 = vrot.slane %v25701_v30, %v22641_v47  ;;  %v13545_v8 = vcombine.low %v13523_v26, %v13530_v33  ;;  %v27936_v55 = vld [vmem:[#allocation120_spill] sm:$0xff] }
 0x68e   : > { %v16501_v6 = vcombine.low %v16493_v22, %v16500_v49  ;;  %v13546_v19 = vcombine.low %v13537_v13, %v13544_v32  ;;  %v13415_v7 = vcombine.low %v8489_v35, %v8493_v38  ;;  %v13416_v40 = vcombine.low %v8497_v46, %v8501_v25 }
 0x68f   : > { %v13417_v62 = vcombine.low %v8505_v56, %v8509_v2  ;;  %v13418_v23 = vcombine.low %v8513_v10, %v8517_v0  ;;  %v13709_v43 = vcombine.low %v8681_v59, %v8685_v36  ;;  %v13710_v21 = vcombine.low %v8689_v1, %v8693_v4  ;;  %v27937_v4 = vld [vmem:[#allocation25_spill] sm:$0xff] }
 0x690   : > { %v13711_v50 = vcombine.low %v8697_v9, %v8701_v60  ;;  %v13712_v41 = vcombine.low %v8705_v57, %v8709_v61  ;;  %v8617_v51 = vrot.slane %v27936_v55, %v22568_v63  ;;  %v8621_v30 = vrot.slane %v27936_v55, %v22585_v37 }
 0x691   : > { %6504 = vadd.xlane.f32.xlu1 %v25408_v31  ;;  %17620 = vperm.xlu0 %19740, %v16501_v6   ;;  %v8625_v26 = vrot.slane %v27936_v55, %v22595_v17  ;;  %v8629_v35 = vrot.slane %v27936_v55, %v22598_v14  ;;  %v8633_v31 = vrot.slane %v27936_v55, %v22601_v5 }
 0x692   : > { %v8637_v38 = vrot.slane %v27936_v55, %v27716_v39  ;;  %v13553_v33 = vrot.slane %v13545_v8, %v22641_v47  ;;  %v13560_v13 = vrot.slane %v13546_v19, %v22641_v47  ;;  %v8641_v32 = vrot.slane %v27936_v55, %v27717_v3 }
 0x693   : > { %v8645_v46 = vrot.slane %v27936_v55, %v27718_v24  ;;  %v13425_v25 = vrot.slane %v13415_v7, %v22641_v47  ;;  %v13432_v56 = vrot.slane %v13416_v40, %v22641_v47  ;;  %v13439_v2 = vrot.slane %v13417_v62, %v22641_v47 }
 0x694   : > { %v13446_v10 = vrot.slane %v13418_v23, %v22641_v47  ;;  %v13719_v22 = vrot.slane %v13709_v43, %v22641_v47  ;;  %v13726_v49 = vrot.slane %v13710_v21, %v22641_v47  ;;  %v13733_v0 = vrot.slane %v13711_v50, %v22641_v47 }
 0x695   : > { %v13740_v18 = vrot.slane %v13712_v41, %v22641_v47  ;;  %v25775_v59 = vcombine.low %v8617_v51, %v8621_v30  ;;  %v13612_v36 = vcombine.low %v8625_v26, %v8629_v35  ;;  %v13613_v1 = vcombine.low %v8633_v31, %v8637_v38  ;;  %v27940_v35 = vld [vmem:[#allocation51_spill] sm:$0xff] }
 0x696   : > { %v8809_v9 = vrot.slane %v27937_v4, %v22568_v63  ;;  %v13614_v60 = vcombine.low %v8641_v32, %v8645_v46  ;;  %v8813_v57 = vrot.slane %v27937_v4, %v22585_v37  ;;  %v8817_v61 = vrot.slane %v27937_v4, %v22595_v17 }
 0x697   : > { %v8821_v44 = vrot.slane %v27937_v4, %v22598_v14  ;;  %v8825_v16 = vrot.slane %v27937_v4, %v22601_v5  ;;  %v8829_v8 = vrot.slane %v27937_v4, %v27716_v39  ;;  %v8833_v6 = vrot.slane %v27937_v4, %v27717_v3 }
 0x698   : > { %v8837_v19 = vrot.slane %v27937_v4, %v27718_v24  ;;  %v25795_v7 = vadd.f32 %v22578_v58, %v25687_v27  ;;  %v25798_v40 = vadd.f32 %v22578_v58, %v6613_v52  ;;  %v13267_v62 = vcombine.low %v13259_v29, %v13266_v11 }
 0x699   : > { %v25800_v23 = vcombine.low %v13553_v33, %v13560_v13  ;;  %v25802_v43 = vcombine.low %v13425_v25, %v13432_v56  ;;  %v25804_v21 = vcombine.low %v13439_v2, %v13446_v10  ;;  %v25806_v50 = vcombine.low %v13719_v22, %v13726_v49  ;;  %v27941_v2 = vld [vmem:[#allocation28_spill] sm:$0xff] }
 0x69a   : > { %27938 = vst [vmem:[#allocation65_spill] sm:$0xff] %v25795_v7  ;;  %27939 = vst [vmem:[#allocation78_spill] sm:$0xff] %v25798_v40  ;;  %v25808_v41 = vcombine.low %v13733_v0, %v13740_v18  ;;  %v13621_v55 = vrot.slane %v25775_v59, %v22641_v47  ;;  %v13628_v27 = vrot.slane %v13612_v36, %v22641_v47 }
 0x69b   : > { %v13635_v51 = vrot.slane %v13613_v1, %v22641_v47  ;;  %v13642_v52 = vrot.slane %v13614_v60, %v22641_v47  ;;  %v13905_v29 = vcombine.low %v8809_v9, %v8813_v57  ;;  %v13906_v11 = vcombine.low %v8817_v61, %v8821_v44 }
 0x69c   : > { %v13907_v30 = vcombine.low %v8825_v16, %v8829_v8  ;;  %v13908_v26 = vcombine.low %v8833_v6, %v8837_v19  ;;  %v8745_v31 = vrot.slane %v27940_v35, %v22568_v63  ;;  %v8749_v38 = vrot.slane %v27940_v35, %v22585_v37 }
 0x69d   : > { %v8753_v33 = vrot.slane %v27940_v35, %v22595_v17  ;;  %v8757_v13 = vrot.slane %v27940_v35, %v22598_v14  ;;  %v8761_v32 = vrot.slane %v27940_v35, %v22601_v5  ;;  %v8765_v46 = vrot.slane %v27940_v35, %v27716_v39 }
 0x69e   : > { %v8769_v25 = vrot.slane %v27940_v35, %v27717_v3  ;;  %v8773_v56 = vrot.slane %v27940_v35, %v27718_v24  ;;  %v8937_v10 = vrot.slane %v27941_v2, %v22568_v63  ;;  %v8941_v22 = vrot.slane %v27941_v2, %v22585_v37 }
 0x69f   : > { %v8945_v49 = vrot.slane %v27941_v2, %v22595_v17  ;;  %v8949_v0 = vrot.slane %v27941_v2, %v22598_v14  ;;  %v8953_v18 = vrot.slane %v27941_v2, %v22601_v5  ;;  %v8957_v59 = vrot.slane %v27941_v2, %v27716_v39 }
 0x6a0   : > { %v8961_v36 = vrot.slane %v27941_v2, %v27717_v3  ;;  %v8965_v1 = vrot.slane %v27941_v2, %v27718_v24  ;;  %v13915_v4 = vrot.slane %v13905_v29, %v22641_v47  ;;  %v13922_v9 = vrot.slane %v13906_v11, %v22641_v47 }
 0x6a1   : > { %v13929_v60 = vrot.slane %v13907_v30, %v22641_v47  ;;  %v13936_v57 = vrot.slane %v13908_v26, %v22641_v47  ;;  %v13807_v61 = vcombine.low %v8745_v31, %v8749_v38  ;;  %v13808_v44 = vcombine.low %v8753_v33, %v8757_v13 }
 0x6a2   : > { %17428 = vperm.xlu1 %19741, %v25679_v15   ;;  %v13809_v16 = vcombine.low %v8761_v32, %v8765_v46  ;;  %v13810_v8 = vcombine.low %v8769_v25, %v8773_v56  ;;  %v13455_v6 = vrot.slane %v25802_v43, %v22641_v47  ;;  %v13462_v19 = vrot.slane %v25804_v21, %v22641_v47 }
 0x6a3   : > { %v14101_v35 = vcombine.low %v8937_v10, %v8941_v22  ;;  %v14102_v15 = vcombine.low %v8945_v49, %v8949_v0  ;;  %v13749_v29 = vrot.slane %v25806_v50, %v22641_v47  ;;  %v13756_v11 = vrot.slane %v25808_v41, %v22641_v47  ;;  %v27942_v41 = vld [vmem:[#allocation57_spill] sm:$0xff] }
 0x6a4   : > { %v14103_v30 = vcombine.low %v8953_v18, %v8957_v59  ;;  %v14104_v26 = vcombine.low %v8961_v36, %v8965_v1  ;;  %v13643_v31 = vcombine.low %v13621_v55, %v13628_v27  ;;  %v13644_v38 = vcombine.low %v13635_v51, %v13642_v52 }
 0x6a5   : > { %v13937_v33 = vcombine.low %v13915_v4, %v13922_v9  ;;  %v13938_v13 = vcombine.low %v13929_v60, %v13936_v57  ;;  %v13817_v43 = vrot.slane %v13807_v61, %v22641_v47  ;;  %v13824_v32 = vrot.slane %v13808_v44, %v22641_v47 }
 0x6a6   : > { %17422 = vperm.xlu1 %19741, %v13267_v62   ;;  %v13831_v21 = vrot.slane %v13809_v16, %v22641_v47  ;;  %v13838_v46 = vrot.slane %v13810_v8, %v22641_v47  ;;  %v14111_v50 = vrot.slane %v14101_v35, %v22641_v47  ;;  %v14118_v25 = vrot.slane %v14102_v15, %v22641_v47 }
 0x6a7   : > { %v8873_v56 = vrot.slane %v27942_v41, %v22568_v63  ;;  %v8877_v62 = vrot.slane %v27942_v41, %v22585_v37  ;;  %v14125_v55 = vrot.slane %v14103_v30, %v22641_v47  ;;  %v14132_v27 = vrot.slane %v14104_v26, %v22641_v47 }
 0x6a8   : > { %v8881_v51 = vrot.slane %v27942_v41, %v22595_v17  ;;  %v8885_v52 = vrot.slane %v27942_v41, %v22598_v14  ;;  %v8889_v2 = vrot.slane %v27942_v41, %v22601_v5  ;;  %v8893_v10 = vrot.slane %v27942_v41, %v27716_v39 }
 0x6a9   : > { %v8897_v22 = vrot.slane %v27942_v41, %v27717_v3  ;;  %v8901_v49 = vrot.slane %v27942_v41, %v27718_v24  ;;  %v25884_v0 = vcombine.low %v13455_v6, %v13462_v19  ;;  %v25886_v18 = vcombine.low %v13749_v29, %v13756_v11  ;;  %v27944_v6 = vld [vmem:[#allocation115_spill] sm:$0xff] }
 0x6aa   : > { %v13651_v59 = vrot.slane %v13643_v31, %v22641_v47  ;;  %v13658_v36 = vrot.slane %v13644_v38, %v22641_v47  ;;  %v13945_v1 = vrot.slane %v13937_v33, %v22641_v47  ;;  %v13952_v4 = vrot.slane %v13938_v13, %v22641_v47 }
 0x6ab   : > { %27943 = vst [vmem:[#allocation105_spill] sm:$0xff] %v25886_v18  ;;  %v13839_v9 = vcombine.low %v13817_v43, %v13824_v32  ;;  %v13840_v60 = vcombine.low %v13831_v21, %v13838_v46  ;;  %v14133_v57 = vcombine.low %v14111_v50, %v14118_v25  ;;  %v14134_v61 = vcombine.low %v14125_v55, %v14132_v27 }
 0x6ac   : > { %v14003_v44 = vcombine.low %v8873_v56, %v8877_v62  ;;  %v14004_v16 = vcombine.low %v8881_v51, %v8885_v52  ;;  %v14005_v8 = vcombine.low %v8889_v2, %v8893_v10  ;;  %v14006_v35 = vcombine.low %v8897_v22, %v8901_v49  ;;  %v27947_v51 = vld [vmem:[#allocation33_spill] sm:$0xff] }
 0x6ad   : > { %v9065_v19 = vrot.slane %v27944_v6, %v22568_v63  ;;  %v9069_v15 = vrot.slane %v27944_v6, %v22585_v37  ;;  %v9073_v29 = vrot.slane %v27944_v6, %v22595_v17  ;;  %v9077_v11 = vrot.slane %v27944_v6, %v22598_v14 }
 0x6ae   : > { %v9081_v30 = vrot.slane %v27944_v6, %v22601_v5  ;;  %v9085_v26 = vrot.slane %v27944_v6, %v27716_v39  ;;  %v25904_v31 = vcombine.low %v13651_v59, %v13658_v36  ;;  %v25906_v38 = vcombine.low %v13945_v1, %v13952_v4 }
 0x6af   : > { %v9089_v33 = vrot.slane %v27944_v6, %v27717_v3  ;;  %v9093_v13 = vrot.slane %v27944_v6, %v27718_v24  ;;  %v13847_v43 = vrot.slane %v13839_v9, %v22641_v47  ;;  %v13854_v32 = vrot.slane %v13840_v60, %v22641_v47  ;;  %v27948_v9 = vld [vmem:[#allocation61_spill] sm:$0xff] }
 0x6b0   : > { %27945 = vst [vmem:[#allocation84_spill] sm:$0xff] %v25904_v31  ;;  %27946 = vst [vmem:[#allocation20_spill] sm:$0xff] %v25906_v38  ;;  %v14141_v21 = vrot.slane %v14133_v57, %v22641_v47  ;;  %v14013_v46 = vrot.slane %v14003_v44, %v22641_v47  ;;  %v14148_v50 = vrot.slane %v14134_v61, %v22641_v47 }
 0x6b1   : > { %v14020_v25 = vrot.slane %v14004_v16, %v22641_v47  ;;  %v14027_v41 = vrot.slane %v14005_v8, %v22641_v47  ;;  %v14034_v56 = vrot.slane %v14006_v35, %v22641_v47  ;;  %v14297_v62 = vcombine.low %v9065_v19, %v9069_v15 }
 0x6b2   : > { %v14298_v55 = vcombine.low %v9073_v29, %v9077_v11  ;;  %v14299_v27 = vcombine.low %v9081_v30, %v9085_v26  ;;  %v9001_v52 = vrot.slane %v27947_v51, %v22568_v63  ;;  %v14300_v2 = vcombine.low %v9089_v33, %v9093_v13  ;;  %v25948_v30 = vpop.permute.xlu1 %17392 }
 0x6b3   : > { %v9005_v10 = vrot.slane %v27947_v51, %v22585_v37  ;;  %v9009_v22 = vrot.slane %v27947_v51, %v22595_v17  ;;  %v9013_v49 = vrot.slane %v27947_v51, %v22598_v14  ;;  %v9017_v59 = vrot.slane %v27947_v51, %v22601_v5 }
 0x6b4   : > { %v9021_v36 = vrot.slane %v27947_v51, %v27716_v39  ;;  %v9025_v1 = vrot.slane %v27947_v51, %v27717_v3  ;;  %v9029_v4 = vrot.slane %v27947_v51, %v27718_v24  ;;  %v9193_v60 = vrot.slane %v27948_v9, %v22568_v63 }
 0x6b5   : > { %v9197_v57 = vrot.slane %v27948_v9, %v22585_v37  ;;  %v9201_v61 = vrot.slane %v27948_v9, %v22595_v17  ;;  %v9205_v44 = vrot.slane %v27948_v9, %v22598_v14  ;;  %v14035_v16 = vcombine.low %v14013_v46, %v14020_v25 }
 0x6b6   : > { %v14036_v8 = vcombine.low %v14027_v41, %v14034_v56  ;;  %v14307_v35 = vrot.slane %v14297_v62, %v22641_v47  ;;  %v14314_v6 = vrot.slane %v14298_v55, %v22641_v47  ;;  %v14321_v19 = vrot.slane %v14299_v27, %v22641_v47  ;;  %v27949_v55 = vld [vmem:[#allocation14_spill] sm:$0xff] }
 0x6b7   : > { %v14328_v15 = vrot.slane %v14300_v2, %v22641_v47  ;;  %v14199_v29 = vcombine.low %v9001_v52, %v9005_v10  ;;  %v14200_v11 = vcombine.low %v9009_v22, %v9013_v49  ;;  %v14201_v26 = vcombine.low %v9017_v59, %v9021_v36 }
 0x6b8   : > { %v14202_v33 = vcombine.low %v9025_v1, %v9029_v4  ;;  %v9209_v13 = vrot.slane %v27948_v9, %v22601_v5  ;;  %v9213_v46 = vrot.slane %v27948_v9, %v27716_v39  ;;  %v9217_v25 = vrot.slane %v27948_v9, %v27717_v3 }
 0x6b9   : > { %v9221_v41 = vrot.slane %v27948_v9, %v27718_v24  ;;  %v14493_v56 = vcombine.low %v9193_v60, %v9197_v57  ;;  %v14494_v62 = vcombine.low %v9201_v61, %v9205_v44  ;;  %v25960_v51 = vcombine.low %v13847_v43, %v13854_v32  ;;  %v27952_v32 = vld [vmem:[#allocation119_spill] sm:$0xff]  ;;  %v25978_v57 = vpop.permute.xlu1 %17386 }
 0x6ba   : > { %v25962_v52 = vcombine.low %v14141_v21, %v14148_v50  ;;  %v14043_v2 = vrot.slane %v14035_v16, %v22641_v47  ;;  %v14050_v10 = vrot.slane %v14036_v8, %v22641_v47  ;;  %v25966_v22 = vcombine.low %v14307_v35, %v14314_v6  ;;  %v27953_v61 = vld [vmem:[#allocation59_spill] sm:$0xff]  ;;  %v27954_v6 = vld [vmem:[#allocation93_spill] sm:$0xff] }
 0x6bb   : > { %27950 = vst [vmem:[#allocation39_spill] sm:$0xff] %v25960_v51  ;;  %v25968_v49 = vcombine.low %v14321_v19, %v14328_v15  ;;  %v14209_v59 = vrot.slane %v14199_v29, %v22641_v47  ;;  %v14216_v36 = vrot.slane %v14200_v11, %v22641_v47  ;;  %v14223_v1 = vrot.slane %v14201_v26, %v22641_v47  ;;  %v27955_v19 = vld [vmem:[#allocation40_spill] sm:$0xff]  ;;  %v27956_v29 = vld [vmem:[#allocation91_spill] sm:$0xff] }
 0x6bc   : > { %27951 = vst [vmem:[#allocation41_spill] sm:$0xff] %v25962_v52  ;;  %v14230_v4 = vrot.slane %v14202_v33, %v22641_v47  ;;  %v14495_v43 = vcombine.low %v9209_v13, %v9213_v46  ;;  %v14496_v50 = vcombine.low %v9217_v25, %v9221_v41  ;;  %v14503_v9 = vrot.slane %v14493_v56, %v22641_v47  ;;  %v27957_v11 = vld [vmem:[#allocation31_spill] sm:$0xff] }
 0x6bd   : > { %v14510_v60 = vrot.slane %v14494_v62, %v22641_v47  ;;  %v9129_v44 = vrot.slane %v27953_v61, %v22568_v63  ;;  %v9133_v16 = vrot.slane %v27953_v61, %v22585_v37  ;;  %v9137_v8 = vrot.slane %v27953_v61, %v22595_v17 }
 0x6be   : > { %v9141_v35 = vrot.slane %v27953_v61, %v22598_v14  ;;  %v25990_v15 = vadd.f32 %v27955_v19, %v27954_v6  ;;  %v25994_v26 = vadd.f32 %v27957_v11, %v27956_v29  ;;  %v25996_v33 = vcombine.low %v14043_v2, %v14050_v10  ;;  %v26014_v19 = vpop.xlane.xlu1 %6486 }
 0x6bf   : > { %v26002_v25 = vcombine.low %v14209_v59, %v14216_v36  ;;  %v26004_v41 = vcombine.low %v14223_v1, %v14230_v4  ;;  %v14517_v56 = vrot.slane %v14495_v43, %v22641_v47  ;;  %v14524_v62 = vrot.slane %v14496_v50, %v22641_v47  ;;  %27959 = vst [vmem:[#allocation13_spill] sm:$0xff] %v26014_v19  ;;  %v27960_v43 = vld [vmem:[#allocation34_spill] sm:$0xff] }
 0x6c0   : > { %27958 = vst [vmem:[#allocation127_spill] sm:$0xff] %v25996_v33  ;;  %v26008_v6 = vcombine.low %v14503_v9, %v14510_v60  ;;  %v9145_v2 = vrot.slane %v27953_v61, %v22601_v5  ;;  %v9149_v10 = vrot.slane %v27953_v61, %v27716_v39  ;;  %v9153_v59 = vrot.slane %v27953_v61, %v27717_v3 }
 0x6c1   : > { %v9157_v36 = vrot.slane %v27953_v61, %v27718_v24  ;;  %v14395_v1 = vcombine.low %v9129_v44, %v9133_v16  ;;  %v14396_v4 = vcombine.low %v9137_v8, %v9141_v35  ;;  %v9321_v50 = vrot.slane %v27960_v43, %v22568_v63  ;;  %v27961_v8 = vld [vmem:[#allocation63_spill] sm:$0xff] }
 0x6c2   : > { %v9325_v9 = vrot.slane %v27960_v43, %v22585_v37  ;;  %v9329_v60 = vrot.slane %v27960_v43, %v22595_v17  ;;  %v9333_v29 = vrot.slane %v27960_v43, %v22598_v14  ;;  %v9337_v11 = vrot.slane %v27960_v43, %v22601_v5  ;;  %v26052_v51 = vpop.xlane.xlu1 %6480 }
 0x6c3   : > { %v9341_v61 = vrot.slane %v27960_v43, %v27716_v39  ;;  %v9345_v44 = vrot.slane %v27960_v43, %v27717_v3  ;;  %v9349_v16 = vrot.slane %v27960_v43, %v27718_v24  ;;  %v9257_v35 = vrot.slane %v27961_v8, %v22568_v63 }
 0x6c4   : > { %v9261_v27 = vrot.slane %v27961_v8, %v22585_v37  ;;  %v9265_v21 = vrot.slane %v27961_v8, %v22595_v17  ;;  %v9269_v13 = vrot.slane %v27961_v8, %v22598_v14  ;;  %v9273_v46 = vrot.slane %v27961_v8, %v22601_v5 }
 0x6c5   : > { %v9277_v19 = vrot.slane %v27961_v8, %v27716_v39  ;;  %v9281_v43 = vrot.slane %v27961_v8, %v27717_v3  ;;  %v9285_v20 = vrot.slane %v27961_v8, %v27718_v24  ;;  %v14397_v33 = vcombine.low %v9145_v2, %v9149_v10 }
 0x6c6   : > { %v14398_v40 = vcombine.low %v9153_v59, %v9157_v36  ;;  %v14689_v7 = vcombine.low %v9321_v50, %v9325_v9  ;;  %v14690_v52 = vcombine.low %v9329_v60, %v9333_v29  ;;  %v14239_v38 = vrot.slane %v26002_v25, %v22641_v47 }
 0x6c7   : > { %v14246_v31 = vrot.slane %v26004_v41, %v22641_v47  ;;  %v14526_v18 = vcombine.low %v14517_v56, %v14524_v62  ;;  %v14533_v28 = vrot.slane %v26008_v6, %v22641_v47  ;;  %v14691_v45 = vcombine.low %v9337_v11, %v9341_v61 }
 0x6c8   : > { %v14692_v8 = vcombine.low %v9345_v44, %v9349_v16  ;;  %v14591_v2 = vcombine.low %v9257_v35, %v9261_v27  ;;  %v14592_v10 = vcombine.low %v9265_v21, %v9269_v13  ;;  %v14405_v59 = vrot.slane %v14395_v1, %v22641_v47  ;;  %v26080_v13 = vpop.permute.xlu1 %17404 }
 0x6c9   : > { %v14412_v36 = vrot.slane %v14396_v4, %v22641_v47  ;;  %v14593_v50 = vcombine.low %v9273_v46, %v9277_v19  ;;  %v14594_v25 = vcombine.low %v9281_v43, %v9285_v20  ;;  %v14419_v9 = vrot.slane %v14397_v33, %v22641_v47  ;;  %v27963_v4 = vld [vmem:[#allocation100_spill] sm:$0xff] }
 0x6ca   : > { %6522 = vadd.xlane.f32.xlu1 %v25694_v42  ;;  %v14426_v41 = vrot.slane %v14398_v40, %v22641_v47  ;;  %v14699_v56 = vrot.slane %v14689_v7, %v22641_v47  ;;  %v14706_v62 = vrot.slane %v14690_v52, %v22641_v47  ;;  %v27962_v42 = vld [vmem:[#allocation46_spill] sm:$0xff]  ;;  %v14713_v40 = vrot.slane %v14691_v45, %v22641_v47 }
 0x6cb   : > { %v9449_v6 = vrot.slane %v27962_v42, %v22568_v63  ;;  %v9453_v27 = vrot.slane %v27962_v42, %v22585_v37  ;;  %v9457_v21 = vrot.slane %v27962_v42, %v22595_v17  ;;  %v9461_v20 = vrot.slane %v27962_v42, %v22598_v14 }
 0x6cc   : > { %v14720_v7 = vrot.slane %v14692_v8, %v22641_v47  ;;  %v14601_v52 = vrot.slane %v14591_v2, %v22641_v47  ;;  %v14608_v33 = vrot.slane %v14592_v10, %v22641_v47  ;;  %v14615_v46 = vrot.slane %v14593_v50, %v22641_v47 }
 0x6cd   : > { %v14622_v19 = vrot.slane %v14594_v25, %v22641_v47  ;;  %v9465_v1 = vrot.slane %v27962_v42, %v22601_v5  ;;  %v17867_v45 = vrot.slane %v25978_v57, %v27963_v4  ;;  %v14540_v60 = vrot.slane %v14526_v18, %v22641_v47 }
 0x6ce   : > { %6516 = vadd.xlane.f32.xlu1 %v25698_v34  ;;  %v9469_v34 = vrot.slane %v27962_v42, %v27716_v39  ;;  %v9473_v29 = vrot.slane %v27962_v42, %v27717_v3  ;;  %v9477_v11 = vrot.slane %v27962_v42, %v27718_v24  ;;  %v14427_v61 = vcombine.low %v14405_v59, %v14412_v36 }
 0x6cf   : > { %v14428_v44 = vcombine.low %v14419_v9, %v14426_v41  ;;  %v14885_v16 = vcombine.low %v9449_v6, %v9453_v27  ;;  %v14886_v35 = vcombine.low %v9457_v21, %v9461_v20  ;;  %v26097_v43 = vadd.f32 %v22578_v58, %v25990_v15 }
 0x6d0   : > { %v14721_v8 = vcombine.low %v14699_v56, %v14706_v62  ;;  %v14722_v2 = vcombine.low %v14713_v40, %v14720_v7  ;;  %v14623_v57 = vcombine.low %v14601_v52, %v14608_v33  ;;  %v26101_v18 = vadd.f32 %v22578_v58, %v25994_v26  ;;  %v27969_v33 = vld [vmem:[#allocation48_spill] sm:$0xff] }
 0x6d1   : > { %v27964_v10 = vrot.slane %v25968_v49, %v22641_v47  ;;  %v27965_v59 = vrot.slane %v25966_v22, %v22641_v47  ;;  %v14624_v50 = vcombine.low %v14615_v46, %v14622_v19  ;;  %v14887_v25 = vcombine.low %v9465_v1, %v9469_v34  ;;  %v17399_v49 = vpop.permute.xlu1 %17398 }
 0x6d2   : > { %v27966_v15 = vrot.slane %v25265_v12, %v27952_v32  ;;  %v26115_v41 = vcombine.low %v14239_v38, %v14246_v31  ;;  %v26117_v26 = vcombine.low %v14533_v28, %v14540_v60  ;;  %v14888_v56 = vcombine.low %v9473_v29, %v9477_v11  ;;  %v27967_v28 = vld [vmem:[#allocation60_spill] sm:$0xff] }
 0x6d3   : > { %v26109_v36 = vcombine.low %v27965_v59, %v27964_v10  ;;  %v14435_v62 = vrot.slane %v14427_v61, %v22641_v47  ;;  %v14442_v22 = vrot.slane %v14428_v44, %v22641_v47  ;;  %v14895_v42 = vrot.slane %v14885_v16, %v22641_v47  ;;  %v27971_v11 = vld [vmem:[#allocation56_spill] sm:$0xff]  ;;  %v27972_v16 = vld [vmem:[#allocation58_spill] sm:$0xff] }
 0x6d4   : > { %v17868_v9 = vsel %vm17681_vm3, %v17867_v45, %v27966_v15  ;;  %v14902_v6 = vrot.slane %v14886_v35, %v22641_v47  ;;  %v14729_v27 = vrot.slane %v14721_v8, %v22641_v47  ;;  %v14736_v12 = vrot.slane %v14722_v2, %v22641_v47  ;;  %v27973_v2 = vld [vmem:[#allocation37_spill] sm:$0xff] }
 0x6d5   : > { %v14631_v31 = vrot.slane %v14623_v57, %v22641_v47  ;;  %v9385_v38 = vrot.slane %v27967_v28, %v22568_v63  ;;  %v27968_v21 = vrot.slane %v25233_v53, %v27949_v55  ;;  %v14638_v40 = vrot.slane %v14624_v50, %v22641_v47 }
 0x6d6   : > { %v14909_v7 = vrot.slane %v14887_v25, %v22641_v47  ;;  %v9389_v52 = vrot.slane %v27967_v28, %v22585_v37  ;;  %v17877_v46 = vrot.slane %v25948_v30, %v27969_v33  ;;  %v14916_v19 = vrot.slane %v14888_v56, %v22641_v47  ;;  %v27975_v33 = vld [vmem:[#allocation101_spill] sm:$0xff] }
 0x6d7   : > { %v17873_v20 = vsel %vm17688_vm4, %v27968_v21, %v17868_v9  ;;  %v9393_v1 = vrot.slane %v27967_v28, %v22595_v17  ;;  %v9397_v53 = vrot.slane %v27967_v28, %v22598_v14  ;;  %v26145_v45 = vcombine.low %v14895_v42, %v14902_v6 }
 0x6d8   : > { %v9401_v60 = vrot.slane %v27967_v28, %v22601_v5  ;;  %v9405_v29 = vrot.slane %v27967_v28, %v27716_v39  ;;  %v9409_v30 = vrot.slane %v27967_v28, %v27717_v3  ;;  %v17882_v61 = vrot.slane %v25346_v54, %v27971_v11 }
 0x6d9   : > { %v26143_v34 = vpop.xlane.xlu1 %6498  ;;  %v17878_v44 = vsel %vm17695_vm5, %v17877_v46, %v17873_v20  ;;  %v17887_v35 = vrot.slane %v17399_v49, %v27972_v16  ;;  %v9413_v8 = vrot.slane %v27967_v28, %v27718_v24  ;;  %v9577_v57 = vrot.slane %v27973_v2, %v22568_v63 }
 0x6da   : > { %27970 = vst [vmem:[#allocation82_spill] sm:$0xff] %v26143_v34  ;;  %v9581_v10 = vrot.slane %v27973_v2, %v22585_v37  ;;  %v9585_v59 = vrot.slane %v27973_v2, %v22595_v17  ;;  %v9589_v54 = vrot.slane %v27973_v2, %v22598_v14  ;;  %v9593_v50 = vrot.slane %v27973_v2, %v22601_v5 }
 0x6db   : > { %v9597_v25 = vrot.slane %v27973_v2, %v27716_v39  ;;  %v9601_v15 = vrot.slane %v27973_v2, %v27717_v3  ;;  %v9605_v9 = vrot.slane %v27973_v2, %v27718_v24  ;;  %v17883_v56 = vsel %vm17702_vm6, %v17882_v61, %v17878_v44 }
 0x6dc   : > { %v26178_v42 = vcombine.low %v14435_v62, %v14442_v22  ;;  %v26180_v6 = vcombine.low %v14729_v27, %v14736_v12  ;;  %v26182_v28 = vcombine.low %v14631_v31, %v14638_v40  ;;  %v17888_v21 = vsel %vm17709_vm7, %v17887_v35, %v17883_v56  ;;  %v26192_v12 = vpop.permute.xlu0 %17425  ;;  %v27981_v62 = vld [vmem:[#allocation32_spill] sm:$0xff] }
 0x6dd   : > { %v26176_v49 = vpop.xlane.xlu1 %6492  ;;  %v26185_v20 = vcombine.low %v14909_v7, %v14916_v19  ;;  %v14787_v46 = vcombine.low %v9385_v38, %v9389_v52  ;;  %v14788_v16 = vcombine.low %v9393_v1, %v9397_v53  ;;  %v17892_v2 = vrot.slane %v25330_v48, %v27975_v33  ;;  %v27976_v48 = vld [vmem:[#allocation7_spill] sm:$0xff]  ;;  %v27983_v33 = vld [vmem:[#allocation105_spill] sm:$0xff] }
 0x6de   : > { %27974 = vst [vmem:[#allocation129_spill] sm:$0xff] %v26176_v49  ;;  %v14789_v22 = vcombine.low %v9401_v60, %v9405_v29  ;;  %v14790_v27 = vcombine.low %v9409_v30, %v9413_v8  ;;  %v15081_v31 = vcombine.low %v9577_v57, %v9581_v10  ;;  %v15082_v40 = vcombine.low %v9585_v59, %v9589_v54  ;;  %v27977_v60 = vld [vmem:[#allocation77_spill] sm:$0xff] }
 0x6df   : > { %17440 = vperm.xlu1 %19741, %v25800_v23   ;;  %v15083_v7 = vcombine.low %v9593_v50, %v9597_v25  ;;  %v15084_v19 = vcombine.low %v9601_v15, %v9605_v9  ;;  %v17893_v38 = vsel %vm17716_vm8, %v17892_v2, %v17888_v21  ;;  %v9513_v1 = vrot.slane %v27976_v48, %v22568_v63  ;;  %v27978_v25 = vld [vmem:[#allocation117_spill] sm:$0xff] }
 0x6e0   : > { %v9517_v23 = vrot.slane %v27976_v48, %v22585_v37  ;;  %v9521_v53 = vrot.slane %v27976_v48, %v22595_v17  ;;  %v17897_v29 = vrot.slane %v26080_v13, %v27977_v60  ;;  %v9525_v30 = vrot.slane %v27976_v48, %v22598_v14  ;;  %v27980_v2 = vld [vmem:[#allocation29_spill] sm:$0xff] }
 0x6e1   : > { %v17417_v52 = vpop.permute.xlu1 %17416  ;;  %v9529_v61 = vrot.slane %v27976_v48, %v22601_v5  ;;  %v9533_v44 = vrot.slane %v27976_v48, %v27716_v39  ;;  %v14797_v35 = vrot.slane %v14787_v46, %v22641_v47  ;;  %v14804_v8 = vrot.slane %v14788_v16, %v22641_v47  ;;  %v17420_v46 = vpop.permute.xlu0 %17419 }
 0x6e2   : > { %v9537_v57 = vrot.slane %v27976_v48, %v27717_v3  ;;  %v9541_v13 = vrot.slane %v27976_v48, %v27718_v24  ;;  %v17898_v10 = vsel %vm17723_vm9, %v17897_v29, %v17893_v38  ;;  %v14811_v59 = vrot.slane %v14789_v22, %v22641_v47 }
 0x6e3   : > { %17434 = vperm.xlu1 %19741, %v25884_v0   ;;  %v14818_v54 = vrot.slane %v14790_v27, %v22641_v47  ;;  %v15091_v50 = vrot.slane %v15081_v31, %v22641_v47  ;;  %v27979_v0 = vld [vmem:[#allocation8_spill] sm:$0xff]  ;;  %v15098_v16 = vrot.slane %v15082_v40, %v22641_v47  ;;  %v15105_v56 = vrot.slane %v15083_v7, %v22641_v47  ;;  %v27982_v27 = vld [vmem:[#allocation45_spill] sm:$0xff] }
 0x6e4   : > { %v17902_v15 = vrot.slane %v27979_v0, %v27978_v25  ;;  %v15112_v21 = vrot.slane %v15084_v19, %v22641_v47  ;;  %v14983_v38 = vcombine.low %v9513_v1, %v9517_v23  ;;  %v14984_v29 = vcombine.low %v9521_v53, %v9525_v30  ;;  %v27984_v7 = vld [vmem:[#allocation64_spill] sm:$0xff]  ;;  %v27985_v1 = vld [vmem:[#allocation73_spill] sm:$0xff] }
 0x6e5   : > { %v17411_v9 = vpop.permute.xlu1 %17410  ;;  %v14985_v22 = vcombine.low %v9529_v61, %v9533_v44  ;;  %v17912_v60 = vrot.slane %v27982_v27, %v27981_v62  ;;  %v14932_v40 = vrot.slane %v26185_v20, %v22641_v47  ;;  %v14986_v0 = vcombine.low %v9537_v57, %v9541_v13  ;;  %v27986_v57 = vld [vmem:[#allocation84_spill] sm:$0xff]  ;;  %v27994_v27 = vld [vmem:[#allocation71_spill] sm:$0xff] }
 0x6e6   : > { %v17907_v48 = vrot.slane %v17411_v9, %v27980_v2  ;;  %v17903_v31 = vsel %vm17730_vm10, %v17902_v15, %v17898_v10  ;;  %v17917_v25 = vrot.slane %v17417_v52, %v27984_v7  ;;  %v14819_v4 = vcombine.low %v14797_v35, %v14804_v8  ;;  %v27988_v8 = vld [vmem:[#allocation72_spill] sm:$0xff] }
 0x6e7   : > { %17452 = vperm.xlu1 %19741, %v27983_v33   ;;  %v14820_v9 = vcombine.low %v14811_v59, %v14818_v54  ;;  %v17922_v23 = vrot.slane %v17420_v46, %v27985_v1  ;;  %v15113_v30 = vcombine.low %v15091_v50, %v15098_v16  ;;  %v15114_v61 = vcombine.low %v15105_v56, %v15112_v21  ;;  %v28008_v1 = vld [vmem:[#allocation127_spill] sm:$0xff] }
 0x6e8   : > { %v17908_v19 = vsel %vm17737_vm11, %v17907_v48, %v17903_v31  ;;  %v14993_v33 = vrot.slane %v14983_v38, %v22641_v47  ;;  %v15000_v10 = vrot.slane %v14984_v29, %v22641_v47  ;;  %v15007_v20 = vrot.slane %v14985_v22, %v22641_v47  ;;  %v27991_v48 = vld [vmem:[#allocation98_spill] sm:$0xff]  ;;  %v27992_v38 = vld [vmem:[#allocation44_spill] sm:$0xff]  ;;  %v27993_v22 = vld [vmem:[#allocation95_spill] sm:$0xff] }
 0x6e9   : > { %v17913_v53 = vsel %vm17744_vm12, %v17912_v60, %v17908_v19  ;;  %v15014_v35 = vrot.slane %v14986_v0, %v22641_v47  ;;  %v9705_v60 = vrot.slane %v27988_v8, %v22568_v63  ;;  %v9709_v13 = vrot.slane %v27988_v8, %v22585_v37  ;;  %v27996_v19 = vld [vmem:[#allocation50_spill] sm:$0xff] }
 0x6ea   : > { %v17918_v44 = vsel %vm17751_vm13, %v17917_v25, %v17913_v53  ;;  %v9713_v59 = vrot.slane %v27988_v8, %v22595_v17  ;;  %v9717_v54 = vrot.slane %v27988_v8, %v22598_v14  ;;  %v9721_v50 = vrot.slane %v27988_v8, %v22601_v5 }
 0x6eb   : > { %17446 = vperm.xlu1 %19741, %v27986_v57   ;;  %v26242_v52 = vsel %vm17758_vm14, %v17922_v23, %v17918_v44  ;;  %v9725_v25 = vrot.slane %v27988_v8, %v27716_v39  ;;  %v27989_v15 = vrot.slane %v26145_v45, %v22641_v47  ;;  %v14827_v56 = vrot.slane %v14819_v4, %v22641_v47  ;;  %v27997_v4 = vld [vmem:[#allocation20_spill] sm:$0xff] }
 0x6ec   : > { %27987 = vst [vmem:[#allocation88_spill] sm:$0xff] %v26242_v52  ;;  %v9729_v21 = vrot.slane %v27988_v8, %v27717_v3  ;;  %v9733_v46 = vrot.slane %v27988_v8, %v27718_v24  ;;  %v6623_v29 = vadd.f32 %v27992_v38, %v27991_v48  ;;  %v6621_v31 = vadd.f32 %v27994_v27, %v27993_v22  ;;  %v27998_v38 = vld [vmem:[#allocation81_spill] sm:$0xff] }
 0x6ed   : > { %v26260_v16 = vcombine.low %v27989_v15, %v14932_v40  ;;  %v14834_v0 = vrot.slane %v14820_v9, %v22641_v47  ;;  %v15121_v45 = vrot.slane %v15113_v30, %v22641_v47  ;;  %v27995_v40 = vld [vmem:[#allocation103_spill] sm:$0xff]  ;;  %v15128_v53 = vrot.slane %v15114_v61, %v22641_v47 }
 0x6ee   : > { %v6627_v23 = vadd.f32 %v27996_v19, %v27995_v40  ;;  %v26277_v44 = vcombine.low %v14993_v33, %v15000_v10  ;;  %v26279_v57 = vcombine.low %v15007_v20, %v15014_v35  ;;  %v15277_v8 = vcombine.low %v9705_v60, %v9709_v13 }
 0x6ef   : > { %27990 = vst [vmem:[#allocation85_spill] sm:$0xff] %v26260_v16  ;;  %17464 = vperm.xlu1 %19741, %v27997_v4   ;;  %v15278_v15 = vcombine.low %v9713_v59, %v9717_v54  ;;  %v15279_v48 = vcombine.low %v9721_v50, %v9725_v25  ;;  %v9641_v22 = vrot.slane %v27998_v38, %v22568_v63  ;;  %v27999_v59 = vld [vmem:[#allocation39_spill] sm:$0xff]  ;;  %v28012_v16 = vld [vmem:[#allocation76_spill] sm:$0xff] }
 0x6f0   : > { %v15280_v9 = vcombine.low %v9729_v21, %v9733_v46  ;;  %v9645_v30 = vrot.slane %v27998_v38, %v22585_v37  ;;  %v9649_v27 = vrot.slane %v27998_v38, %v22595_v17  ;;  %v9653_v61 = vrot.slane %v27998_v38, %v22598_v14  ;;  %v28003_v21 = vld [vmem:[#allocation99_spill] sm:$0xff] }
 0x6f1   : > { %v9657_v33 = vrot.slane %v27998_v38, %v22601_v5  ;;  %v9661_v10 = vrot.slane %v27998_v38, %v27716_v39  ;;  %v9665_v20 = vrot.slane %v27998_v38, %v27717_v3  ;;  %v9669_v35 = vrot.slane %v27998_v38, %v27718_v24  ;;  %v28004_v46 = vld [vmem:[#allocation43_spill] sm:$0xff] }
 0x6f2   : > { %v26298_v60 = vadd.f32 %v22578_v58, %v6623_v29  ;;  %v26301_v13 = vadd.f32 %v22578_v58, %v6621_v31  ;;  %v26304_v54 = vcombine.low %v14827_v56, %v14834_v0  ;;  %v26306_v50 = vcombine.low %v15121_v45, %v15128_v53 }
 0x6f3   : > { %17458 = vperm.xlu1 %19741, %v27999_v59   ;;  %v26309_v25 = vadd.f32 %v22578_v58, %v6627_v23  ;;  %v6625_v40 = vadd.f32 %v28004_v46, %v28003_v21  ;;  %v15023_v19 = vrot.slane %v26277_v44, %v22641_v47  ;;  %v15030_v29 = vrot.slane %v26279_v57, %v22641_v47  ;;  %v28005_v59 = vld [vmem:[#allocation41_spill] sm:$0xff] }
 0x6f4   : > { %28000 = vst [vmem:[#allocation24_spill] sm:$0xff] %v26304_v54  ;;  %28001 = vst [vmem:[#allocation86_spill] sm:$0xff] %v26306_v50  ;;  %v15287_v31 = vrot.slane %v15277_v8, %v22641_v47  ;;  %v15294_v4 = vrot.slane %v15278_v15, %v22641_v47  ;;  %v15301_v56 = vrot.slane %v15279_v48, %v22641_v47  ;;  %v28006_v21 = vld [vmem:[#allocation65_spill] sm:$0xff] }
 0x6f5   : > { %28002 = vst [vmem:[#allocation80_spill] sm:$0xff] %v26309_v25  ;;  %v15308_v0 = vrot.slane %v15280_v9, %v22641_v47  ;;  %v15179_v45 = vcombine.low %v9641_v22, %v9645_v30  ;;  %v15180_v23 = vcombine.low %v9649_v27, %v9653_v61  ;;  %v15181_v53 = vcombine.low %v9657_v33, %v9661_v10  ;;  %v28007_v27 = vld [vmem:[#allocation78_spill] sm:$0xff] }
 0x6f6   : > { %v15182_v38 = vcombine.low %v9665_v20, %v9669_v35  ;;  %v9833_v44 = vrot.slane %v28006_v21, %v22568_v63  ;;  %v9837_v57 = vrot.slane %v28006_v21, %v22585_v37  ;;  %v9841_v8 = vrot.slane %v28006_v21, %v22595_v17 }
 0x6f7   : > { %17476 = vperm.xlu1 %19741, %v28005_v59   ;;  %v9845_v15 = vrot.slane %v28006_v21, %v22598_v14  ;;  %v9849_v48 = vrot.slane %v28006_v21, %v22601_v5  ;;  %v9853_v22 = vrot.slane %v28006_v21, %v27716_v39  ;;  %v9857_v9 = vrot.slane %v28006_v21, %v27717_v3 }
 0x6f8   : > { %v9861_v30 = vrot.slane %v28006_v21, %v27718_v24  ;;  %v9769_v61 = vrot.slane %v28007_v27, %v22568_v63  ;;  %v9773_v33 = vrot.slane %v28007_v27, %v22585_v37  ;;  %v9777_v10 = vrot.slane %v28007_v27, %v22595_v17 }
 0x6f9   : > { %v9781_v20 = vrot.slane %v28007_v27, %v22598_v14  ;;  %v9785_v35 = vrot.slane %v28007_v27, %v22601_v5  ;;  %v9789_v46 = vrot.slane %v28007_v27, %v27716_v39  ;;  %v9793_v59 = vrot.slane %v28007_v27, %v27717_v3 }
 0x6fa   : > { %v9797_v21 = vrot.slane %v28007_v27, %v27718_v24  ;;  %v15309_v7 = vcombine.low %v15287_v31, %v15294_v4  ;;  %v15310_v2 = vcombine.low %v15301_v56, %v15308_v0  ;;  %v15189_v62 = vrot.slane %v15179_v45, %v22641_v47  ;;  %v28009_v0 = vld [vmem:[#allocation92_spill] sm:$0xff]  ;;  %v28010_v45 = vld [vmem:[#allocation30_spill] sm:$0xff] }
 0x6fb   : > { %17470 = vperm.xlu1 %19741, %v28008_v1   ;;  %v15196_v11 = vrot.slane %v15180_v23, %v22641_v47  ;;  %v15203_v32 = vrot.slane %v15181_v53, %v22641_v47  ;;  %v15210_v55 = vrot.slane %v15182_v38, %v22641_v47  ;;  %v15473_v49 = vcombine.low %v9833_v44, %v9837_v57  ;;  %v6520_v1 = vpop.xlane.xlu0 %6519  ;;  %v28011_v53 = vld [vmem:[#allocation104_spill] sm:$0xff] }
 0x6fc   : > { %v15474_v34 = vcombine.low %v9841_v8, %v9845_v15  ;;  %v15475_v52 = vcombine.low %v9849_v48, %v9853_v22  ;;  %v15476_v50 = vcombine.low %v9857_v9, %v9861_v30  ;;  %v15375_v54 = vcombine.low %v9769_v61, %v9773_v33  ;;  %v28014_v9 = vld [vmem:[#allocation96_spill] sm:$0xff] }
 0x6fd   : > { %v15376_v25 = vcombine.low %v9777_v10, %v9781_v20  ;;  %v26360_v27 = vadd.f32 %v22578_v58, %v6625_v40  ;;  %v26362_v31 = vcombine.low %v15023_v19, %v15030_v29  ;;  %v15377_v4 = vcombine.low %v9785_v35, %v9789_v46 }
 0x6fe   : > { %v15378_v56 = vcombine.low %v9793_v59, %v9797_v21  ;;  %v6646_v23 = vadd.f32 %v28010_v45, %v28009_v0  ;;  %v6629_v38 = vadd.f32 %v28012_v16, %v28011_v53  ;;  %v15317_v44 = vrot.slane %v15309_v7, %v22641_v47 }
 0x6ff   : > { %17488 = vperm.xlu1 %19741, %v26109_v36   ;;  %v15324_v57 = vrot.slane %v15310_v2, %v22641_v47  ;;  %v15211_v8 = vcombine.low %v15189_v62, %v15196_v11  ;;  %v15212_v40 = vcombine.low %v15203_v32, %v15210_v55  ;;  %v15483_v15 = vrot.slane %v15473_v49, %v22641_v47 }
 0x700   : > { %v15490_v19 = vrot.slane %v15474_v34, %v22641_v47  ;;  %v15497_v29 = vrot.slane %v15475_v52, %v22641_v47  ;;  %v15504_v48 = vrot.slane %v15476_v50, %v22641_v47  ;;  %v15385_v22 = vrot.slane %v15375_v54, %v22641_v47  ;;  %v28013_v52 = vld [vmem:[#allocation69_spill] sm:$0xff]  ;;  %v6514_v50 = vpop.xlane.xlu0 %6513 }
 0x701   : > { %v15392_v16 = vrot.slane %v15376_v25, %v22641_v47  ;;  %v15399_v36 = vrot.slane %v15377_v4, %v22641_v47  ;;  %v15406_v7 = vrot.slane %v15378_v56, %v22641_v47  ;;  %v9961_v11 = vrot.slane %v26097_v43, %v22568_v63 }
 0x702   : > { %v9965_v55 = vrot.slane %v26097_v43, %v22585_v37  ;;  %v9969_v32 = vrot.slane %v26097_v43, %v22595_v17  ;;  %v9973_v34 = vrot.slane %v26097_v43, %v22598_v14  ;;  %v9977_v49 = vrot.slane %v26097_v43, %v22601_v5 }
 0x703   : > { %17482 = vperm.xlu1 %19741, %v26115_v41   ;;  %v9981_v62 = vrot.slane %v26097_v43, %v27716_v39  ;;  %v26393_v2 = vadd.f32 %v22578_v58, %v6646_v23  ;;  %v26398_v41 = vadd.f32 %v22578_v58, %v6629_v38  ;;  %v26400_v25 = vcombine.low %v15317_v44, %v15324_v57 }
 0x704   : > { %v6650_v30 = vadd.f32 %v6520_v1, %v28014_v9  ;;  %v15219_v61 = vrot.slane %v15211_v8, %v22641_v47  ;;  %v15226_v33 = vrot.slane %v15212_v40, %v22641_v47  ;;  %v26405_v10 = vcombine.low %v15483_v15, %v15490_v19  ;;  %v26420_v0 = vpop.permute.xlu0 %17437  ;;  %v28017_v40 = vld [vmem:[#allocation94_spill] sm:$0xff] }
 0x705   : > { %v26407_v20 = vcombine.low %v15497_v29, %v15504_v48  ;;  %v26409_v35 = vcombine.low %v15385_v22, %v15392_v16  ;;  %v26411_v46 = vcombine.low %v15399_v36, %v15406_v7  ;;  %v9985_v59 = vrot.slane %v26097_v43, %v27717_v3  ;;  %28015 = vst [vmem:[#allocation121_spill] sm:$0xff] %v26420_v0  ;;  %v28019_v36 = vld [vmem:[#allocation10_spill] sm:$0xff]  ;;  %v28020_v7 = vld [vmem:[#allocation13_spill] sm:$0xff] }
 0x706   : > { %v9989_v21 = vrot.slane %v26097_v43, %v27718_v24  ;;  %v15669_v1 = vcombine.low %v9961_v11, %v9965_v55  ;;  %v15670_v4 = vcombine.low %v9969_v32, %v9973_v34  ;;  %v26418_v56 = vcombine.low %v9977_v49, %v9981_v62 }
 0x707   : > { %17500 = vperm.xlu1 %19741, %v26117_v26   ;;  %v9897_v45 = vrot.slane %v26101_v18, %v22568_v63  ;;  %v9901_v23 = vrot.slane %v26101_v18, %v22585_v37  ;;  %v9905_v53 = vrot.slane %v26101_v18, %v22595_v17  ;;  %v9909_v26 = vrot.slane %v26101_v18, %v22598_v14 }
 0x708   : > { %v9913_v43 = vrot.slane %v26101_v18, %v22601_v5  ;;  %v9917_v38 = vrot.slane %v26101_v18, %v27716_v39  ;;  %v9921_v44 = vrot.slane %v26101_v18, %v27717_v3  ;;  %v9925_v57 = vrot.slane %v26101_v18, %v27718_v24  ;;  %v26461_v9 = vpop.permute.xlu0 %17431 }
 0x709   : > { %v26439_v8 = vadd.f32 %v22578_v58, %v6650_v30  ;;  %v26442_v15 = vadd.f32 %v6514_v50, %v28017_v40  ;;  %v26444_v19 = vcombine.low %v15219_v61, %v15226_v33  ;;  %v15513_v29 = vrot.slane %v26405_v10, %v22641_v47  ;;  %28021 = vst [vmem:[#allocation107_spill] sm:$0xff] %v26461_v9 }
 0x70a   : > { %v15520_v48 = vrot.slane %v26407_v20, %v22641_v47  ;;  %v15415_v22 = vrot.slane %v26409_v35, %v22641_v47  ;;  %v15422_v18 = vrot.slane %v26411_v46, %v22641_v47  ;;  %v15672_v16 = vcombine.low %v9985_v59, %v9989_v21 }
 0x70b   : > { %28016 = vst [vmem:[#allocation106_spill] sm:$0xff] %v26439_v8  ;;  %28018 = vst [vmem:[#allocation90_spill] sm:$0xff] %v26442_v15  ;;  %17494 = vperm.xlu1 %19741, %v26178_v42   ;;  %v6639_v11 = vadd.f32 %v28020_v7, %v28019_v36  ;;  %v15679_v55 = vrot.slane %v15669_v1, %v22641_v47  ;;  %v15686_v32 = vrot.slane %v15670_v4, %v22641_v47 }
 0x70c   : > { %v15693_v42 = vrot.slane %v26418_v56, %v22641_v47  ;;  %v15571_v34 = vcombine.low %v9897_v45, %v9901_v23  ;;  %v15572_v49 = vcombine.low %v9905_v53, %v9909_v26  ;;  %v15573_v62 = vcombine.low %v9913_v43, %v9917_v38  ;;  %v26504_v7 = vpop.permute.xlu0 %17449 }
 0x70d   : > { %v15574_v50 = vcombine.low %v9921_v44, %v9925_v57  ;;  %v10089_v30 = vrot.slane %v26298_v60, %v22568_v63  ;;  %v10093_v61 = vrot.slane %v26298_v60, %v22585_v37  ;;  %v10097_v33 = vrot.slane %v26298_v60, %v22595_v17  ;;  %28022 = vst [vmem:[#allocation49_spill] sm:$0xff] %v26504_v7 }
 0x70e   : > { %v10101_v10 = vrot.slane %v26298_v60, %v22598_v14  ;;  %v10105_v20 = vrot.slane %v26298_v60, %v22601_v5  ;;  %v10109_v35 = vrot.slane %v26298_v60, %v27716_v39  ;;  %v10113_v46 = vrot.slane %v26298_v60, %v27717_v3 }
 0x70f   : > { %17512 = vperm.xlu1 %19741, %v26180_v6   ;;  %v10117_v59 = vrot.slane %v26298_v60, %v27718_v24  ;;  %v10025_v21 = vrot.slane %v26301_v13, %v22568_v63  ;;  %v10029_v1 = vrot.slane %v26301_v13, %v22585_v37  ;;  %v10033_v6 = vrot.slane %v26301_v13, %v22595_v17 }
 0x710   : > { %v10037_v4 = vrot.slane %v26301_v13, %v22598_v14  ;;  %v10041_v56 = vrot.slane %v26301_v13, %v22601_v5  ;;  %v10045_v45 = vrot.slane %v26301_v13, %v27716_v39  ;;  %v10049_v60 = vrot.slane %v26301_v13, %v27717_v3 }
 0x711   : > { %v10053_v23 = vrot.slane %v26301_v13, %v27718_v24  ;;  %v15700_v53 = vrot.slane %v15672_v16, %v22641_v47  ;;  %v26497_v26 = vcombine.low %v15679_v55, %v15686_v32  ;;  %v15581_v43 = vrot.slane %v15571_v34, %v22641_v47 }
 0x712   : > { %v15588_v38 = vrot.slane %v15572_v49, %v22641_v47  ;;  %v15595_v44 = vrot.slane %v15573_v62, %v22641_v47  ;;  %v15602_v57 = vrot.slane %v15574_v50, %v22641_v47  ;;  %v15865_v40 = vcombine.low %v10089_v30, %v10093_v61  ;;  %v28023_v62 = vld [vmem:[#allocation108_spill] sm:$0xff] }
 0x713   : > { %17506 = vperm.xlu1 %19741, %v26182_v28   ;;  %v15866_v36 = vcombine.low %v10097_v33, %v10101_v10  ;;  %v26506_v54 = vcombine.low %v15513_v29, %v15520_v48  ;;  %v15867_v13 = vcombine.low %v10105_v20, %v10109_v35  ;;  %v15868_v16 = vcombine.low %v10113_v46, %v10117_v59  ;;  %v28024_v48 = vld [vmem:[#allocation85_spill] sm:$0xff]  ;;  %v28025_v20 = vld [vmem:[#allocation80_spill] sm:$0xff] }
 0x714   : > { %v15767_v55 = vcombine.low %v10025_v21, %v10029_v1  ;;  %v26508_v32 = vcombine.low %v15415_v22, %v15422_v18  ;;  %v15768_v34 = vcombine.low %v10033_v6, %v10037_v4  ;;  %v15769_v9 = vcombine.low %v10041_v56, %v10045_v45  ;;  %v26538_v6 = vpop.permute.xlu0 %17443 }
 0x715   : > { %v15770_v49 = vcombine.low %v10049_v60, %v10053_v23  ;;  %v26511_v28 = vadd.f32 %v22578_v58, %v6639_v11  ;;  %v6637_v50 = vadd.f32 %v26052_v51, %v28023_v62  ;;  %v26517_v61 = vcombine.low %v15693_v42, %v15700_v53  ;;  %28026 = vst [vmem:[#allocation89_spill] sm:$0xff] %v26538_v6  ;;  %v28028_v23 = vld [vmem:[#allocation24_spill] sm:$0xff]  ;;  %v28029_v6 = vld [vmem:[#allocation86_spill] sm:$0xff] }
 0x716   : > { %v26515_v30 = vpop.xlane.xlu1 %6510  ;;  %v26522_v22 = vcombine.low %v15581_v43, %v15588_v38  ;;  %v26524_v18 = vcombine.low %v15595_v44, %v15602_v57  ;;  %v15875_v33 = vrot.slane %v15865_v40, %v22641_v47  ;;  %v15882_v11 = vrot.slane %v15866_v36, %v22641_v47 }
 0x717   : > { %17524 = vperm.xlu1 %19741, %v28024_v48   ;;  %v15889_v10 = vrot.slane %v15867_v13, %v22641_v47  ;;  %v15896_v51 = vrot.slane %v15868_v16, %v22641_v47  ;;  %v15777_v42 = vrot.slane %v15767_v55, %v22641_v47  ;;  %v10217_v35 = vrot.slane %v28025_v20, %v22568_v63 }
 0x718   : > { %v15784_v46 = vrot.slane %v15768_v34, %v22641_v47  ;;  %v15791_v59 = vrot.slane %v15769_v9, %v22641_v47  ;;  %v15798_v21 = vrot.slane %v15770_v49, %v22641_v47  ;;  %v10221_v1 = vrot.slane %v28025_v20, %v22585_v37 }
 0x719   : > { %v10225_v56 = vrot.slane %v28025_v20, %v22595_v17  ;;  %v10229_v45 = vrot.slane %v28025_v20, %v22598_v14  ;;  %v10233_v60 = vrot.slane %v28025_v20, %v22601_v5  ;;  %v10237_v9 = vrot.slane %v28025_v20, %v27716_v39 }
 0x71a   : > { %v26540_v4 = vpop.xlane.xlu1 %6504  ;;  %v10241_v53 = vrot.slane %v28025_v20, %v27717_v3  ;;  %v10245_v43 = vrot.slane %v28025_v20, %v27718_v24  ;;  %v10153_v38 = vrot.slane %v26360_v27, %v22568_v63  ;;  %v10157_v44 = vrot.slane %v26360_v27, %v22585_v37 }
 0x71b   : > { %28027 = vst [vmem:[#allocation116_spill] sm:$0xff] %v26540_v4  ;;  %17518 = vperm.xlu1 %19741, %v28028_v23   ;;  %v10161_v57 = vrot.slane %v26360_v27, %v22595_v17  ;;  %v10165_v40 = vrot.slane %v26360_v27, %v22598_v14  ;;  %v10169_v36 = vrot.slane %v26360_v27, %v22601_v5 }
 0x71c   : > { %v10173_v13 = vrot.slane %v26360_v27, %v27716_v39  ;;  %v15897_v16 = vcombine.low %v15875_v33, %v15882_v11  ;;  %v15898_v55 = vcombine.low %v15889_v10, %v15896_v51  ;;  %v10177_v34 = vrot.slane %v26360_v27, %v27717_v3  ;;  %v26577_v51 = vpop.permute.xlu0 %17461 }
 0x71d   : > { %v10181_v49 = vrot.slane %v26360_v27, %v27718_v24  ;;  %v15799_v48 = vcombine.low %v15777_v42, %v15784_v46  ;;  %v15800_v20 = vcombine.low %v15791_v59, %v15798_v21  ;;  %v16061_v23 = vcombine.low %v10217_v35, %v10221_v1  ;;  %28030 = vst [vmem:[#allocation26_spill] sm:$0xff] %v26577_v51 }
 0x71e   : > { %v17429_v62 = vpop.permute.xlu1 %17428  ;;  %v16062_v29 = vcombine.low %v10225_v56, %v10229_v45  ;;  %v26572_v7 = vadd.f32 %v22578_v58, %v6637_v50  ;;  %v15716_v33 = vrot.slane %v26517_v61, %v22641_v47  ;;  %v16063_v11 = vcombine.low %v10233_v60, %v10237_v9  ;;  %v28031_v45 = vld [vmem:[#allocation118_spill] sm:$0xff] }
 0x71f   : > { %17536 = vperm.xlu1 %19741, %v28029_v6   ;;  %v16064_v10 = vcombine.low %v10241_v53, %v10245_v43  ;;  %v15611_v27 = vrot.slane %v26522_v22, %v22641_v47  ;;  %v15963_v0 = vcombine.low %v10153_v38, %v10157_v44  ;;  %v15964_v42 = vcombine.low %v10161_v57, %v10165_v40  ;;  %v28032_v57 = vld [vmem:[#allocation66_spill] sm:$0xff] }
 0x720   : > { %v15965_v46 = vcombine.low %v10169_v36, %v10173_v13  ;;  %v15618_v35 = vrot.slane %v26524_v18, %v22641_v47  ;;  %v15905_v50 = vrot.slane %v15897_v16, %v22641_v47  ;;  %v15912_v59 = vrot.slane %v15898_v55, %v22641_v47  ;;  %v28033_v36 = vld [vmem:[#allocation88_spill] sm:$0xff]  ;;  %v26606_v55 = vpop.permute.xlu0 %17455 }
 0x721   : > { %v15966_v21 = vcombine.low %v10177_v34, %v10181_v49  ;;  %v15807_v61 = vrot.slane %v15799_v48, %v22641_v47  ;;  %v15814_v6 = vrot.slane %v15800_v20, %v22641_v47  ;;  %v16071_v56 = vrot.slane %v16061_v23, %v22641_v47  ;;  %28034 = vst [vmem:[#allocation53_spill] sm:$0xff] %v26606_v55  ;;  %v28036_v20 = vld [vmem:[#allocation110_spill] sm:$0xff] }
 0x722   : > { %v17423_v1 = vpop.permute.xlu1 %17422  ;;  %v16078_v22 = vrot.slane %v16062_v29, %v22641_v47  ;;  %v16085_v18 = vrot.slane %v16063_v11, %v22641_v47  ;;  %v16092_v9 = vrot.slane %v16064_v10, %v22641_v47  ;;  %v10281_v53 = vrot.slane %v26398_v41, %v22568_v63  ;;  %v28037_v23 = vld [vmem:[#allocation82_spill] sm:$0xff] }
 0x723   : > { %v17927_v60 = vrot.slane %v17423_v1, %v28031_v45  ;;  %17530 = vperm.xlu1 %19741, %v26362_v31   ;;  %v15973_v43 = vrot.slane %v15963_v0, %v22641_v47  ;;  %v15980_v38 = vrot.slane %v15964_v42, %v22641_v47  ;;  %v15987_v44 = vrot.slane %v15965_v46, %v22641_v47 }
 0x724   : > { %v10285_v29 = vrot.slane %v26398_v41, %v22585_v37  ;;  %v17937_v40 = vrot.slane %v17429_v62, %v28032_v57  ;;  %v15994_v13 = vrot.slane %v15966_v21, %v22641_v47  ;;  %v10289_v16 = vrot.slane %v26398_v41, %v22595_v17 }
 0x725   : > { %v17928_v31 = vsel %vm17765_vm15, %v17927_v60, %v28033_v36  ;;  %v28035_v0 = vrot.slane %v26192_v12, %v28013_v52  ;;  %v10293_v49 = vrot.slane %v26398_v41, %v22598_v14  ;;  %v10297_v62 = vrot.slane %v26398_v41, %v22601_v5  ;;  %v28043_v52 = vld [vmem:[#allocation129_spill] sm:$0xff] }
 0x726   : > { %v10301_v48 = vrot.slane %v26398_v41, %v27716_v39  ;;  %v6643_v11 = vadd.f32 %v28037_v23, %v28036_v20  ;;  %v28039_v12 = vrot.slane %v26497_v26, %v22641_v47  ;;  %v26629_v46 = vcombine.low %v15611_v27, %v15618_v35 }
 0x727   : > { %v17933_v34 = vsel %vm17772_vm0, %v28035_v0, %v17928_v31  ;;  %17548 = vperm.xlu1 %19741, %v26400_v25   ;;  %v26631_v21 = vcombine.low %v15905_v50, %v15912_v59  ;;  %v26633_v1 = vcombine.low %v15807_v61, %v15814_v6  ;;  %v26635_v60 = vcombine.low %v16071_v56, %v16078_v22  ;;  %v26659_v56 = vpop.permute.xlu0 %17473 }
 0x728   : > { %v26621_v10 = vsel %vm17779_vm1, %v17937_v40, %v17933_v34  ;;  %v26627_v42 = vcombine.low %v28039_v12, %v15716_v33  ;;  %v26637_v36 = vcombine.low %v16085_v18, %v16092_v9  ;;  %v26639_v31 = vcombine.low %v15973_v43, %v15980_v38  ;;  %28041 = vst [vmem:[#allocation12_spill] sm:$0xff] %v26659_v56  ;;  %v28042_v56 = vld [vmem:[#allocation109_spill] sm:$0xff] }
 0x729   : > { %28038 = vst [vmem:[#allocation47_spill] sm:$0xff] %v26621_v10  ;;  %28040 = vst [vmem:[#allocation18_spill] sm:$0xff] %v26633_v1  ;;  %v26641_v40 = vcombine.low %v15987_v44, %v15994_v13  ;;  %v10305_v25 = vrot.slane %v26398_v41, %v27717_v3  ;;  %v10309_v26 = vrot.slane %v26398_v41, %v27718_v24 }
 0x72a   : > { %v16159_v33 = vcombine.low %v10281_v53, %v10285_v29  ;;  %v16160_v27 = vcombine.low %v10289_v16, %v10293_v49  ;;  %v26647_v35 = vcombine.low %v10297_v62, %v10301_v48  ;;  %v10601_v50 = vrot.slane %v26511_v28, %v22568_v63 }
 0x72b   : > { %v6781_v59 = vadd.f32 %v22578_v58, %v6643_v11  ;;  %17542 = vperm.xlu1 %19741, %v26444_v19   ;;  %v10605_v61 = vrot.slane %v26511_v28, %v22585_v37  ;;  %v10609_v6 = vrot.slane %v26511_v28, %v22595_v17  ;;  %v10613_v41 = vrot.slane %v26511_v28, %v22598_v14  ;;  %v26695_v57 = vpop.permute.xlu0 %17467 }
 0x72c   : > { %v10617_v22 = vrot.slane %v26511_v28, %v22601_v5  ;;  %v10621_v18 = vrot.slane %v26511_v28, %v27716_v39  ;;  %v10625_v19 = vrot.slane %v26511_v28, %v27717_v3  ;;  %v10629_v9 = vrot.slane %v26511_v28, %v27718_v24 }
 0x72d   : > { %v10537_v53 = vrot.slane %v26572_v7, %v22568_v63  ;;  %v10541_v43 = vrot.slane %v26572_v7, %v22585_v37  ;;  %v10545_v38 = vrot.slane %v26572_v7, %v22595_v17  ;;  %v10549_v44 = vrot.slane %v26572_v7, %v22598_v14 }
 0x72e   : > { %v10553_v29 = vrot.slane %v26572_v7, %v22601_v5  ;;  %v10557_v13 = vrot.slane %v26572_v7, %v27716_v39  ;;  %v10561_v28 = vrot.slane %v26572_v7, %v27717_v3  ;;  %v10565_v16 = vrot.slane %v26572_v7, %v27718_v24 }
 0x72f   : > { %17560 = vperm.xlu1 %19741, %v26506_v54   ;;  %v10729_v0 = vrot.slane %v6781_v59, %v22568_v63  ;;  %v10733_v34 = vrot.slane %v6781_v59, %v22585_v37  ;;  %v10737_v49 = vrot.slane %v6781_v59, %v22595_v17  ;;  %v10741_v62 = vrot.slane %v6781_v59, %v22598_v14 }
 0x730   : > { %v10745_v48 = vrot.slane %v6781_v59, %v22601_v5  ;;  %v10749_v20 = vrot.slane %v6781_v59, %v27716_v39  ;;  %v10753_v23 = vrot.slane %v6781_v59, %v27717_v3  ;;  %v10757_v11 = vrot.slane %v6781_v59, %v27718_v24 }
 0x731   : > { %v16162_v12 = vcombine.low %v10305_v25, %v10309_v26  ;;  %v16169_v7 = vrot.slane %v16159_v33, %v22641_v47  ;;  %v16649_v54 = vcombine.low %v10601_v50, %v10605_v61  ;;  %v16650_v10 = vcombine.low %v10609_v6, %v10613_v41 }
 0x732   : > { %v6641_v45 = vadd.f32 %v28043_v52, %v28042_v56  ;;  %v16176_v51 = vrot.slane %v16160_v27, %v22641_v47  ;;  %v16651_v55 = vcombine.low %v10617_v22, %v10621_v18  ;;  %v16652_v8 = vcombine.low %v10625_v19, %v10629_v9 }
 0x733   : > { %17554 = vperm.xlu1 %19741, %v26508_v32   ;;  %v16551_v4 = vcombine.low %v10537_v53, %v10541_v43  ;;  %v16552_v15 = vcombine.low %v10545_v38, %v10549_v44  ;;  %v16553_v1 = vcombine.low %v10553_v29, %v10557_v13  ;;  %v16554_v59 = vcombine.low %v10561_v28, %v10565_v16  ;;  %v26716_v53 = vpop.permute.xlu0 %17485 }
 0x734   : > { %v16845_v25 = vcombine.low %v10729_v0, %v10733_v34  ;;  %v16846_v26 = vcombine.low %v10737_v49, %v10741_v62  ;;  %v16847_v33 = vcombine.low %v10745_v48, %v10749_v20  ;;  %v16848_v50 = vcombine.low %v10753_v23, %v10757_v11 }
 0x735   : > { %v16183_v61 = vrot.slane %v26647_v35, %v22641_v47  ;;  %v16190_v6 = vrot.slane %v16162_v12, %v22641_v47  ;;  %v16659_v52 = vrot.slane %v16649_v54, %v22641_v47  ;;  %v16666_v27 = vrot.slane %v16650_v10, %v22641_v47 }
 0x736   : > { %v6779_v41 = vadd.f32 %v22578_v58, %v6641_v45  ;;  %v26707_v32 = vcombine.low %v16169_v7, %v16176_v51  ;;  %v16673_v56 = vrot.slane %v16651_v55, %v22641_v47  ;;  %v16680_v22 = vrot.slane %v16652_v8, %v22641_v47 }
 0x737   : > { %17572 = vperm.xlu1 %19741, %v26627_v42   ;;  %v16561_v18 = vrot.slane %v16551_v4, %v22641_v47  ;;  %v16568_v35 = vrot.slane %v16552_v15, %v22641_v47  ;;  %v16575_v19 = vrot.slane %v16553_v1, %v22641_v47  ;;  %v16582_v9 = vrot.slane %v16554_v59, %v22641_v47 }
 0x738   : > { %v16855_v45 = vrot.slane %v16845_v25, %v22641_v47  ;;  %v16862_v51 = vrot.slane %v16846_v26, %v22641_v47  ;;  %v16869_v55 = vrot.slane %v16847_v33, %v22641_v47  ;;  %v16876_v8 = vrot.slane %v16848_v50, %v22641_v47  ;;  %v28044_v25 = vld [vmem:[#allocation112_spill] sm:$0xff] }
 0x739   : > { %v16101_v10 = vrot.slane %v26635_v60, %v22641_v47  ;;  %v16108_v15 = vrot.slane %v26637_v36, %v22641_v47  ;;  %v16192_v4 = vcombine.low %v16183_v61, %v16190_v6  ;;  %v16681_v42 = vcombine.low %v16659_v52, %v16666_v27 }
 0x73a   : > { %v10665_v1 = vrot.slane %v6779_v41, %v22568_v63  ;;  %v10669_v43 = vrot.slane %v6779_v41, %v22585_v37  ;;  %v10673_v38 = vrot.slane %v6779_v41, %v22595_v17  ;;  %v10677_v44 = vrot.slane %v6779_v41, %v22598_v14 }
 0x73b   : > { %17566 = vperm.xlu1 %19741, %v26629_v46   ;;  %v16003_v29 = vrot.slane %v26639_v31, %v22641_v47  ;;  %v16010_v60 = vrot.slane %v26641_v40, %v22641_v47  ;;  %v16199_v36 = vrot.slane %v26707_v32, %v22641_v47  ;;  %v16682_v13 = vcombine.low %v16673_v56, %v16680_v22  ;;  %v26741_v31 = vpop.permute.xlu0 %17479  ;;  %v28045_v22 = vld [vmem:[#allocation18_spill] sm:$0xff] }
 0x73c   : > { %v16583_v28 = vcombine.low %v16561_v18, %v16568_v35  ;;  %v16584_v16 = vcombine.low %v16575_v19, %v16582_v9  ;;  %v16877_v0 = vcombine.low %v16855_v45, %v16862_v51  ;;  %v16878_v34 = vcombine.low %v16869_v55, %v16876_v8  ;;  %v28046_v45 = vld [vmem:[#allocation90_spill] sm:$0xff] }
 0x73d   : > { %v10681_v49 = vrot.slane %v6779_v41, %v22601_v5  ;;  %v10685_v62 = vrot.slane %v6779_v41, %v27716_v39  ;;  %v10689_v46 = vrot.slane %v6779_v41, %v27717_v3  ;;  %v10693_v48 = vrot.slane %v6779_v41, %v27718_v24 }
 0x73e   : > { %v16206_v40 = vrot.slane %v16192_v4, %v22641_v47  ;;  %v16689_v20 = vrot.slane %v16681_v42, %v22641_v47  ;;  %v16747_v23 = vcombine.low %v10665_v1, %v10669_v43  ;;  %v16748_v11 = vcombine.low %v10673_v38, %v10677_v44 }
 0x73f   : > { %17584 = vperm.xlu1 %19741, %v26631_v21   ;;  %v10825_v12 = vrot.slane %v26393_v2, %v22568_v63  ;;  %v10829_v7 = vrot.slane %v26393_v2, %v22585_v37  ;;  %v10833_v54 = vrot.slane %v26393_v2, %v22595_v17  ;;  %v10837_v59 = vrot.slane %v26393_v2, %v22598_v14  ;;  %v26776_v55 = vpop.permute.xlu0 %17497 }
 0x740   : > { %v6647_v26 = vadd.f32 %v26515_v30, %v28044_v25  ;;  %v16696_v33 = vrot.slane %v16682_v13, %v22641_v47  ;;  %v16591_v50 = vrot.slane %v16583_v28, %v22641_v47  ;;  %v16598_v21 = vrot.slane %v16584_v16, %v22641_v47  ;;  %v28047_v13 = vld [vmem:[#allocation111_spill] sm:$0xff] }
 0x741   : > { %v16885_v61 = vrot.slane %v16877_v0, %v22641_v47  ;;  %v16892_v6 = vrot.slane %v16878_v34, %v22641_v47  ;;  %v16749_v52 = vcombine.low %v10681_v49, %v10685_v62  ;;  %v16750_v27 = vcombine.low %v10689_v46, %v10693_v48 }
 0x742   : > { %v16757_v41 = vrot.slane %v16747_v23, %v22641_v47  ;;  %v16764_v32 = vrot.slane %v16748_v11, %v22641_v47  ;;  %v10841_v56 = vrot.slane %v26393_v2, %v22601_v5  ;;  %v10845_v30 = vrot.slane %v26393_v2, %v27716_v39 }
 0x743   : > { %17578 = vperm.xlu1 %19741, %v28045_v22   ;;  %v10849_v18 = vrot.slane %v26393_v2, %v27717_v3  ;;  %v10853_v35 = vrot.slane %v26393_v2, %v27718_v24  ;;  %v16992_v19 = vcombine.low %v10825_v12, %v10829_v7  ;;  %v16993_v9 = vcombine.low %v10833_v54, %v10837_v59  ;;  %v28048_v2 = vld [vmem:[#allocation116_spill] sm:$0xff]  ;;  %v26799_v11 = vpop.permute.xlu0 %17491 }
 0x744   : > { %v26774_v51 = vadd.f32 %v22578_v58, %v28046_v45  ;;  %v6785_v8 = vadd.f32 %v22578_v58, %v6647_v26  ;;  %v16109_v4 = vcombine.low %v16101_v10, %v16108_v15  ;;  %v16011_v42 = vcombine.low %v16003_v29, %v16010_v60  ;;  %v28049_v26 = vld [vmem:[#allocation106_spill] sm:$0xff] }
 0x745   : > { %v16207_v1 = vcombine.low %v16199_v36, %v16206_v40  ;;  %v16697_v43 = vcombine.low %v16689_v20, %v16696_v33  ;;  %v26779_v38 = vcombine.low %v16591_v50, %v16598_v21  ;;  %v16771_v44 = vrot.slane %v16749_v52, %v22641_v47 }
 0x746   : > { %v6645_v28 = vadd.f32 %v28048_v2, %v28047_v13  ;;  %v16778_v16 = vrot.slane %v16750_v27, %v22641_v47  ;;  %v26785_v0 = vcombine.low %v16757_v41, %v16764_v32  ;;  %v16994_v34 = vcombine.low %v10841_v56, %v10845_v30 }
 0x747   : > { %17596 = vperm.xlu1 %19741, %v16109_v4   ;;  %v26787_v49 = vcombine.low %v16885_v61, %v16892_v6  ;;  %v16995_v62 = vcombine.low %v10849_v18, %v10853_v35  ;;  %v17002_v10 = vrot.slane %v16992_v19, %v22641_v47  ;;  %v17009_v15 = vrot.slane %v16993_v9, %v22641_v47 }
 0x748   : > { %v10857_v29 = vrot.slane %v6785_v8, %v22568_v63  ;;  %v10861_v60 = vrot.slane %v6785_v8, %v22585_v37  ;;  %v10865_v36 = vrot.slane %v6785_v8, %v22595_v17  ;;  %v10869_v46 = vrot.slane %v6785_v8, %v22598_v14 }
 0x749   : > { %v10873_v48 = vrot.slane %v6785_v8, %v22601_v5  ;;  %v10877_v40 = vrot.slane %v6785_v8, %v27716_v39  ;;  %v10881_v20 = vrot.slane %v6785_v8, %v27717_v3  ;;  %v10885_v23 = vrot.slane %v6785_v8, %v27718_v24 }
 0x74a   : > { %v6783_v12 = vadd.f32 %v22578_v58, %v6645_v28  ;;  %v26802_v7 = vcombine.low %v16771_v44, %v16778_v16  ;;  %v16787_v54 = vrot.slane %v26785_v0, %v22641_v47  ;;  %v17016_v59 = vrot.slane %v16994_v34, %v22641_v47 }
 0x74b   : > { %17590 = vperm.xlu1 %19741, %v16011_v42   ;;  %v17023_v25 = vrot.slane %v16995_v62, %v22641_v47  ;;  %v10953_v33 = vrot.slane %v28049_v26, %v22568_v63  ;;  %v10957_v50 = vrot.slane %v28049_v26, %v22585_v37  ;;  %v10961_v21 = vrot.slane %v28049_v26, %v22595_v17  ;;  %v26830_v42 = vpop.permute.xlu0 %17509 }
 0x74c   : > { %v26814_v61 = vcombine.low %v17002_v10, %v17009_v15  ;;  %v10965_v6 = vrot.slane %v28049_v26, %v22598_v14  ;;  %v10969_v52 = vrot.slane %v28049_v26, %v22601_v5  ;;  %v10973_v27 = vrot.slane %v28049_v26, %v27716_v39 }
 0x74d   : > { %v17041_v41 = vcombine.low %v10857_v29, %v10861_v60  ;;  %v17042_v32 = vcombine.low %v10865_v36, %v10869_v46  ;;  %v17043_v56 = vcombine.low %v10873_v48, %v10877_v40  ;;  %v17044_v30 = vcombine.low %v10881_v20, %v10885_v23 }
 0x74e   : > { %v10793_v22 = vrot.slane %v6783_v12, %v22568_v63  ;;  %v10797_v18 = vrot.slane %v6783_v12, %v22585_v37  ;;  %v10801_v35 = vrot.slane %v6783_v12, %v22595_v17  ;;  %v10805_v19 = vrot.slane %v6783_v12, %v22598_v14 }
 0x74f   : > { %17602 = vperm.xlu1 %19741, %v16207_v1   ;;  %v10809_v9 = vrot.slane %v6783_v12, %v22601_v5  ;;  %v10813_v45 = vrot.slane %v6783_v12, %v27716_v39  ;;  %v10817_v8 = vrot.slane %v6783_v12, %v27717_v3  ;;  %v10821_v4 = vrot.slane %v6783_v12, %v27718_v24 }
 0x750   : > { %v16794_v44 = vrot.slane %v26802_v7, %v22641_v47  ;;  %v17025_v13 = vcombine.low %v17016_v59, %v17023_v25  ;;  %v10977_v2 = vrot.slane %v28049_v26, %v27717_v3  ;;  %v10981_v1 = vrot.slane %v28049_v26, %v27718_v24 }
 0x751   : > { %v17032_v28 = vrot.slane %v26814_v61, %v22641_v47  ;;  %v17051_v16 = vrot.slane %v17041_v41, %v22641_v47  ;;  %v17188_v34 = vcombine.low %v10953_v33, %v10957_v50  ;;  %v17189_v62 = vcombine.low %v10961_v21, %v10965_v6  ;;  %v26858_v50 = vpop.permute.xlu0 %17503 }
 0x752   : > { %v17058_v10 = vrot.slane %v17042_v32, %v22641_v47  ;;  %v17065_v15 = vrot.slane %v17043_v56, %v22641_v47  ;;  %v17072_v29 = vrot.slane %v17044_v30, %v22641_v47  ;;  %v16943_v60 = vcombine.low %v10793_v22, %v10797_v18  ;;  %v28051_v18 = vld [vmem:[#allocation113_spill] sm:$0xff] }
 0x753   : > { %17632 = vperm.xlu1 %19741, %v16697_v43   ;;  %v6523_v36 = vpop.xlane.xlu1 %6522  ;;  %v16944_v46 = vcombine.low %v10801_v35, %v10805_v19  ;;  %v16945_v48 = vcombine.low %v10809_v9, %v10813_v45  ;;  %v16946_v40 = vcombine.low %v10817_v8, %v10821_v4  ;;  %v17190_v20 = vcombine.low %v10969_v52, %v10973_v27  ;;  %v28050_v27 = vld [vmem:[#allocation114_spill] sm:$0xff] }
 0x754   : > { %v17191_v23 = vcombine.low %v10977_v2, %v10981_v1  ;;  %v10889_v12 = vrot.slane %v26774_v51, %v22568_v63  ;;  %v10893_v7 = vrot.slane %v26774_v51, %v22585_v37  ;;  %v10897_v59 = vrot.slane %v26774_v51, %v22595_v17 }
 0x755   : > { %v10901_v25 = vrot.slane %v26774_v51, %v22598_v14  ;;  %v10905_v43 = vrot.slane %v26774_v51, %v22601_v5  ;;  %v10909_v26 = vrot.slane %v26774_v51, %v27716_v39  ;;  %v10913_v33 = vrot.slane %v26774_v51, %v27717_v3 }
 0x756   : > { %v17073_v21 = vcombine.low %v17051_v16, %v17058_v10  ;;  %v17074_v61 = vcombine.low %v17065_v15, %v17072_v29  ;;  %v16953_v6 = vrot.slane %v16943_v60, %v22641_v47  ;;  %v10917_v52 = vrot.slane %v26774_v51, %v27718_v24  ;;  %v28052_v60 = vld [vmem:[#allocation14_spill] sm:$0xff] }
 0x757   : > { %v6651_v41 = vadd.f32 %v6523_v36, %v28050_v27  ;;  %17626 = vperm.xlu1 %19741, %v26779_v38   ;;  %v6517_v32 = vpop.xlane.xlu1 %6516  ;;  %v16960_v56 = vrot.slane %v16944_v46, %v22641_v47  ;;  %v16967_v30 = vrot.slane %v16945_v48, %v22641_v47  ;;  %v16974_v22 = vrot.slane %v16946_v40, %v22641_v47  ;;  %v28053_v36 = vld [vmem:[#allocation121_spill] sm:$0xff]  ;;  %v28054_v48 = vld [vmem:[#allocation119_spill] sm:$0xff]  ;;  %v28058_v27 = vld [vmem:[#allocation100_spill] sm:$0xff] }
 0x758   : > { %v6649_v35 = vadd.f32 %v6517_v32, %v28051_v18  ;;  %v17039_v19 = vrot.slane %v17025_v13, %v22641_v47  ;;  %v17198_v9 = vrot.slane %v17188_v34, %v22641_v47  ;;  %v17205_v45 = vrot.slane %v17189_v62, %v22641_v47  ;;  %v28055_v40 = vld [vmem:[#allocation107_spill] sm:$0xff] }
 0x759   : > { %v17212_v51 = vrot.slane %v17190_v20, %v22641_v47  ;;  %v17219_v8 = vrot.slane %v17191_v23, %v22641_v47  ;;  %v26874_v38 = vcombine.low %v10889_v12, %v10893_v7  ;;  %v26876_v4 = vcombine.low %v10897_v59, %v10901_v25  ;;  %v28056_v23 = vld [vmem:[#allocation56_spill] sm:$0xff]  ;;  %v28057_v12 = vld [vmem:[#allocation89_spill] sm:$0xff]  ;;  %v26891_v59 = vpop.permute.xlu0 %17521 }
 0x75a   : > { %v17081_v2 = vrot.slane %v17073_v21, %v22641_v47  ;;  %v17088_v1 = vrot.slane %v17074_v61, %v22641_v47  ;;  %v17092_v16 = vcombine.low %v10905_v43, %v10909_v26  ;;  %v17093_v10 = vcombine.low %v10913_v33, %v10917_v52 }
 0x75b   : > { %v26881_v13 = vadd.f32 %v22578_v58, %v6651_v41  ;;  %v6787_v34 = vadd.f32 %v22578_v58, %v6649_v35  ;;  %17644 = vperm.xlu1 %19741, %v26787_v49   ;;  %v17441_v62 = vpop.permute.xlu1 %17440  ;;  %v16975_v15 = vcombine.low %v16953_v6, %v16960_v56  ;;  %v16976_v29 = vcombine.low %v16967_v30, %v16974_v22 }
 0x75c   : > { %v17951_v46 = vrot.slane %v28053_v36, %v28052_v60  ;;  %v17942_v20 = vrot.slane %v28055_v40, %v28054_v48  ;;  %v17961_v7 = vrot.slane %v28057_v12, %v28056_v23  ;;  %v16795_v58 = vcombine.low %v16787_v54, %v16794_v44  ;;  %v28061_v40 = vld [vmem:[#allocation49_spill] sm:$0xff] }
 0x75d   : > { %v17040_v25 = vcombine.low %v17032_v28, %v17039_v19  ;;  %v26896_v49 = vcombine.low %v17198_v9, %v17205_v45  ;;  %v26898_v43 = vcombine.low %v17212_v51, %v17219_v8  ;;  %v17100_v26 = vrot.slane %v26874_v38, %v22641_v47  ;;  %v26919_v9 = vpop.permute.xlu0 %17515  ;;  %v28059_v45 = vld [vmem:[#allocation48_spill] sm:$0xff] }
 0x75e   : > { %v17089_v33 = vcombine.low %v17081_v2, %v17088_v1  ;;  %v17107_v21 = vrot.slane %v26876_v4, %v22641_v47  ;;  %v17114_v61 = vrot.slane %v17092_v16, %v22641_v47  ;;  %v17121_v6 = vrot.slane %v17093_v10, %v22641_v47 }
 0x75f   : > { %17638 = vperm.xlu1 %19741, %v16795_v58   ;;  %v17435_v52 = vpop.permute.xlu1 %17434  ;;  %v16983_v0 = vrot.slane %v16975_v15, %v22641_v47  ;;  %v16990_v54 = vrot.slane %v16976_v29, %v22641_v47  ;;  %v10921_v44 = vrot.slane %v6787_v34, %v22568_v63  ;;  %v10985_v28 = vrot.slane %v26881_v13, %v22568_v63 }
 0x760   : > { %v17946_v41 = vrot.slane %v17435_v52, %v28058_v27  ;;  %v10925_v32 = vrot.slane %v6787_v34, %v22585_v37  ;;  %v10929_v56 = vrot.slane %v6787_v34, %v22595_v17  ;;  %v10933_v30 = vrot.slane %v6787_v34, %v22598_v14 }
 0x761   : > { %v10937_v22 = vrot.slane %v6787_v34, %v22601_v5  ;;  %v10941_v18 = vrot.slane %v6787_v34, %v27716_v39  ;;  %v10945_v35 = vrot.slane %v6787_v34, %v27717_v3  ;;  %v10949_v19 = vrot.slane %v6787_v34, %v27718_v24 }
 0x762   : > { %v17956_v63 = vrot.slane %v17441_v62, %v28059_v45  ;;  %v17947_v51 = vsel %vm17681_vm3, %v17946_v41, %v17942_v20  ;;  %v10989_v8 = vrot.slane %v26881_v13, %v22585_v37  ;;  %v10993_v38 = vrot.slane %v26881_v13, %v22595_v17 }
 0x763   : > { %v17952_v4 = vsel %vm17688_vm4, %v17951_v46, %v17947_v51  ;;  %v17453_v2 = vpop.permute.xlu1 %17452  ;;  %17653 = vperm.xlu1 %19741, %v17040_v25   ;;  %v10997_v1 = vrot.slane %v26881_v13, %v22598_v14  ;;  %v11001_v16 = vrot.slane %v26881_v13, %v22601_v5  ;;  %v11005_v10 = vrot.slane %v26881_v13, %v27716_v39  ;;  %v28060_v46 = vld [vmem:[#allocation101_spill] sm:$0xff] }
 0x764   : > { %v17957_v34 = vsel %vm17695_vm5, %v17956_v63, %v17952_v4  ;;  %v17139_v62 = vcombine.low %v10921_v44, %v10925_v32  ;;  %v11009_v37 = vrot.slane %v26881_v13, %v27717_v3  ;;  %v11013_v17 = vrot.slane %v26881_v13, %v27718_v24  ;;  %v26946_v13 = vpop.permute.xlu0 %17533 }
 0x765   : > { %v17962_v15 = vsel %vm17702_vm6, %v17961_v7, %v17957_v34  ;;  %v17140_v29 = vcombine.low %v10929_v56, %v10933_v30  ;;  %v17141_v36 = vcombine.low %v10937_v22, %v10941_v18  ;;  %v17142_v14 = vcombine.low %v10945_v35, %v10949_v19  ;;  %v28062_v7 = vld [vmem:[#allocation58_spill] sm:$0xff]  ;;  %v28066_v34 = vld [vmem:[#allocation32_spill] sm:$0xff] }
 0x766   : > { %v17971_v5 = vrot.slane %v28061_v40, %v28060_v46  ;;  %v17228_v39 = vrot.slane %v26896_v49, %v22641_v47  ;;  %v17235_v20 = vrot.slane %v26898_v43, %v22641_v47  ;;  %v16991_v3 = vcombine.low %v16983_v0, %v16990_v54  ;;  %v28064_v0 = vld [vmem:[#allocation53_spill] sm:$0xff] }
 0x767   : > { %v17447_v12 = vpop.permute.xlu1 %17446  ;;  %17656 = vperm.xlu1 %19741, %v17089_v33   ;;  %v17122_v58 = vcombine.low %v17100_v26, %v17107_v21  ;;  %v17123_v25 = vcombine.low %v17114_v61, %v17121_v6  ;;  %v17237_v24 = vcombine.low %v10985_v28, %v10989_v8  ;;  %v17238_v44 = vcombine.low %v10993_v38, %v10997_v1  ;;  %v28063_v33 = vld [vmem:[#allocation117_spill] sm:$0xff] }
 0x768   : > { %v17966_v52 = vrot.slane %v17447_v12, %v28062_v7  ;;  %v17239_v41 = vcombine.low %v11001_v16, %v11005_v10  ;;  %v17240_v32 = vcombine.low %v11009_v37, %v11013_v17  ;;  %v17149_v56 = vrot.slane %v17139_v62, %v22641_v47  ;;  %v28065_v21 = vld [vmem:[#allocation77_spill] sm:$0xff]  ;;  %v26966_v16 = vpop.permute.xlu0 %17527  ;;  %v28067_v62 = vld [vmem:[#allocation26_spill] sm:$0xff] }
 0x769   : > { %v17156_v49 = vrot.slane %v17140_v29, %v22641_v47  ;;  %v17163_v30 = vrot.slane %v17141_v36, %v22641_v47  ;;  %v17170_v43 = vrot.slane %v17142_v14, %v22641_v47  ;;  %v17981_v26 = vrot.slane %v28064_v0, %v28063_v33  ;;  %v28068_v17 = vld [vmem:[#allocation29_spill] sm:$0xff] }
 0x76a   : > { %v17976_v61 = vrot.slane %v17453_v2, %v28065_v21  ;;  %v17967_v6 = vsel %vm17709_vm7, %v17966_v52, %v17962_v15  ;;  %v17236_v22 = vcombine.low %v17228_v39, %v17235_v20  ;;  %v17130_v18 = vrot.slane %v17122_v58, %v22641_v47  ;;  %v28069_v39 = vld [vmem:[#allocation64_spill] sm:$0xff] }
 0x76b   : > { %v17972_v54 = vsel %vm17716_vm8, %v17971_v5, %v17967_v6  ;;  %v17465_v28 = vpop.permute.xlu1 %17464  ;;  %17650 = vperm.xlu1 %19741, %v16991_v3   ;;  %v17137_v35 = vrot.slane %v17123_v25, %v22641_v47  ;;  %v17247_v63 = vrot.slane %v17237_v24, %v22641_v47  ;;  %v17254_v51 = vrot.slane %v17238_v44, %v22641_v47  ;;  %v28070_v3 = vld [vmem:[#allocation73_spill] sm:$0xff] }
 0x76c   : > { %v17977_v19 = vsel %vm17723_vm9, %v17976_v61, %v17972_v54  ;;  %v17261_v8 = vrot.slane %v17239_v41, %v22641_v47  ;;  %v17171_v4 = vcombine.low %v17149_v56, %v17156_v49  ;;  %v17172_v2 = vcombine.low %v17163_v30, %v17170_v43  ;;  %v26978_v52 = vpop.permute.xlu0 %17545  ;;  %v28071_v43 = vld [vmem:[#allocation118_spill] sm:$0xff] }
 0x76d   : > { %v17982_v38 = vsel %vm17730_vm10, %v17981_v26, %v17977_v19  ;;  %v17268_v1 = vrot.slane %v17240_v32, %v22641_v47  ;;  %v17991_v37 = vrot.slane %v28067_v62, %v28066_v34  ;;  %v17138_v29 = vcombine.low %v17130_v18, %v17137_v35  ;;  %v28073_v26 = vld [vmem:[#allocation12_spill] sm:$0xff] }
 0x76e   : > { %v17179_v36 = vrot.slane %v17171_v4, %v22641_v47  ;;  %v17186_v14 = vrot.slane %v17172_v2, %v22641_v47  ;;  %v17269_v40 = vcombine.low %v17247_v63, %v17254_v51  ;;  %v17996_v20 = vrot.slane %v17465_v28, %v28069_v39  ;;  %v28074_v28 = vld [vmem:[#allocation66_spill] sm:$0xff]  ;;  %v28075_v51 = vld [vmem:[#allocation47_spill] sm:$0xff] }
 0x76f   : > { %v17459_v10 = vpop.permute.xlu1 %17458  ;;  %17665 = vperm.xlu1 %19741, %v17236_v22   ;;  %v17270_v5 = vcombine.low %v17261_v8, %v17268_v1  ;;  %v18001_v58 = vrot.slane %v26695_v57, %v28070_v3  ;;  %v28072_v57 = vld [vmem:[#allocation69_spill] sm:$0xff]  ;;  %v18021_v4 = vrot.slane %v26741_v31, %v28054_v48 }
 0x770   : > { %v17986_v15 = vrot.slane %v17459_v10, %v28068_v17  ;;  %v17187_v32 = vcombine.low %v17179_v36, %v17186_v14  ;;  %v17277_v56 = vrot.slane %v17269_v40, %v22641_v47  ;;  %v18011_v61 = vrot.slane %v28073_v26, %v28072_v57  ;;  %v26987_v54 = vpop.permute.xlu0 %17539 }
 0x771   : > { %v17284_v49 = vrot.slane %v17270_v5, %v22641_v47  ;;  %v18030_v10 = vrot.slane %v26716_v53, %v28052_v60  ;;  %v18050_v53 = vrot.slane %v26776_v55, %v28060_v46  ;;  %v18070_v55 = vrot.slane %v26830_v42, %v28066_v34 }
 0x772   : > { %v17987_v12 = vsel %vm17737_vm11, %v17986_v15, %v17982_v38  ;;  %v18040_v15 = vrot.slane %v26799_v11, %v28056_v23  ;;  %v18060_v11 = vrot.slane %v26858_v50, %v28063_v33  ;;  %v18080_v26 = vrot.slane %v26919_v9, %v28070_v3 }
 0x773   : > { %v17992_v25 = vsel %vm17744_vm12, %v17991_v37, %v17987_v12  ;;  %v17477_v24 = vpop.permute.xlu1 %17476  ;;  %17659 = vperm.xlu1 %19741, %v17138_v29   ;;  %v17285_v6 = vcombine.low %v17277_v56, %v17284_v49 }
 0x774   : > { %v17997_v44 = vsel %vm17751_vm13, %v17996_v20, %v17992_v25  ;;  %v18016_v22 = vrot.slane %v17477_v24, %v28074_v28  ;;  %v26999_v2 = vpop.permute.xlu0 %17557 }
 0x775   : > { %v18002_v41 = vsel %vm17758_vm14, %v18001_v58, %v17997_v44 }
 0x777   : > { %v17471_v30 = vpop.permute.xlu1 %17470  ;;  %17662 = vperm.xlu1 %19741, %v17187_v32  }
 0x778   : > { %v18006_v0 = vrot.slane %v17471_v30, %v28071_v43  ;;  %v17552_v40 = vpop.permute.xlu0 %17551 }
 0x77a   : > { %v18007_v18 = vsel %vm17765_vm15, %v18006_v0, %v18002_v41 }
 0x77b   : > { %v18012_v35 = vsel %vm17772_vm0, %v18011_v61, %v18007_v18  ;;  %v17489_v19 = vpop.permute.xlu1 %17488  ;;  %17668 = vperm.xlu1 %19741, %v17285_v6  }
 0x77c   : > { %v26993_v63 = vsel %vm17779_vm1, %v18016_v22, %v18012_v35  ;;  %v18035_v62 = vrot.slane %v17489_v19, %v28059_v45  ;;  %v27019_v44 = vpop.permute.xlu0 %17569 }
 0x77d   : > { %v18335_v8 = vcombine.low %v28075_v51, %v26993_v63 }
 0x77f   : > { %v17483_v38 = vpop.permute.xlu1 %17482 }
 0x780   : > { %v18025_v1 = vrot.slane %v17483_v38, %v28058_v27  ;;  %v17564_v30 = vpop.permute.xlu0 %17563  ;;  %v18090_v38 = vrot.slane %v26891_v59, %v28072_v57  ;;  %v18109_v59 = vrot.slane %v26946_v13, %v28052_v60  ;;  %v18129_v13 = vrot.slane %v26978_v52, %v28060_v46 }
 0x782   : > { %v18026_v37 = vsel %vm17681_vm3, %v18025_v1, %v18021_v4 }
 0x783   : > { %v18031_v29 = vsel %vm17688_vm4, %v18030_v10, %v18026_v37  ;;  %v17501_v36 = vpop.permute.xlu1 %17500 }
 0x784   : > { %v18036_v14 = vsel %vm17695_vm5, %v18035_v62, %v18031_v29  ;;  %v18055_v12 = vrot.slane %v17501_v36, %v28065_v21  ;;  %v27033_v19 = vpop.permute.xlu0 %17581  ;;  %v18100_v29 = vrot.slane %v26966_v16, %v28054_v48 }
 0x785   : > { %v18041_v31 = vsel %vm17702_vm6, %v18040_v15, %v18036_v14 }
 0x787   : > { %v17495_v5 = vpop.permute.xlu1 %17494 }
 0x788   : > { %v18045_v20 = vrot.slane %v17495_v5, %v28062_v7  ;;  %v27044_v37 = vpop.permute.xlu0 %17575  ;;  %v18119_v5 = vrot.slane %v26987_v54, %v28056_v23 }
 0x78a   : > { %v18046_v58 = vsel %vm17709_vm7, %v18045_v20, %v18041_v31 }
 0x78b   : > { %v18051_v25 = vsel %vm17716_vm8, %v18050_v53, %v18046_v58  ;;  %v17513_v24 = vpop.permute.xlu1 %17512 }
 0x78c   : > { %v18056_v41 = vsel %vm17723_vm9, %v18055_v12, %v18051_v25  ;;  %v18075_v0 = vrot.slane %v17513_v24, %v28069_v39  ;;  %v27056_v12 = vpop.permute.xlu0 %17593 }
 0x78d   : > { %v18061_v32 = vsel %vm17730_vm10, %v18060_v11, %v18056_v41 }
 0x78f   : > { %v17507_v56 = vpop.permute.xlu1 %17506 }
 0x790   : > { %v18065_v49 = vrot.slane %v17507_v56, %v28068_v17  ;;  %v27063_v24 = vpop.permute.xlu0 %17587 }
 0x792   : > { %v18066_v50 = vsel %vm17737_vm11, %v18065_v49, %v18061_v32  ;;  %v18139_v32 = vrot.slane %v17552_v40, %v28063_v33 }
 0x793   : > { %v18071_v61 = vsel %vm17744_vm12, %v18070_v55, %v18066_v50  ;;  %v17525_v6 = vpop.permute.xlu1 %17524 }
 0x794   : > { %v18076_v22 = vsel %vm17751_vm13, %v18075_v0, %v18071_v61  ;;  %v18095_v4 = vrot.slane %v17525_v6, %v28074_v28  ;;  %v18149_v61 = vrot.slane %v26999_v2, %v28066_v34 }
 0x795   : > { %v18081_v18 = vsel %vm17758_vm14, %v18080_v26, %v18076_v22  ;;  %v27071_v26 = vpop.permute.xlu0 %17605 }
 0x797   : > { %v17519_v35 = vpop.permute.xlu1 %17518 }
 0x798   : > { %v18085_v42 = vrot.slane %v17519_v35, %v28071_v43 }
 0x79a   : > { %v18086_v1 = vsel %vm17765_vm15, %v18085_v42, %v18081_v18  ;;  %v27080_v42 = vpop.permute.xlu0 %17599 }
 0x79b   : > { %v18091_v9 = vsel %vm17772_vm0, %v18090_v38, %v18086_v1  ;;  %v17537_v10 = vpop.permute.xlu1 %17536  ;;  %v18159_v38 = vrot.slane %v17564_v30, %v28070_v3 }
 0x79c   : > { %v27042_v62 = vsel %vm17779_vm1, %v18095_v4, %v18091_v9  ;;  %v18114_v14 = vrot.slane %v17537_v10, %v28059_v45  ;;  %v18169_v9 = vrot.slane %v27019_v44, %v28072_v57 }
 0x79f   : > { %v17531_v15 = vpop.permute.xlu1 %17530 }
 0x7a0   : > { %v18104_v36 = vrot.slane %v17531_v15, %v28058_v27 }
 0x7a2   : > { %v18105_v31 = vsel %vm17681_vm3, %v18104_v36, %v18100_v29 }
 0x7a3   : > { %v18110_v20 = vsel %vm17688_vm4, %v18109_v59, %v18105_v31  ;;  %v17549_v53 = vpop.permute.xlu1 %17548  ;;  %v27090_v59 = vpop.permute.xlu0 %17608 }
 0x7a4   : > { %v18115_v58 = vsel %vm17695_vm5, %v18114_v14, %v18110_v20  ;;  %v18134_v41 = vrot.slane %v17549_v53, %v28065_v21 }
 0x7a5   : > { %v18120_v16 = vsel %vm17702_vm6, %v18119_v5, %v18115_v58  ;;  %v28076_v58 = vld [vmem:[#allocation70_spill] sm:$0xff] }
 0x7a7   : > { %v17543_v11 = vpop.permute.xlu1 %17542  ;;  %v27097_v5 = vpop.permute.xlu0 %17611 }
 0x7a8   : > { %v18124_v25 = vrot.slane %v17543_v11, %v28062_v7 }
 0x7aa   : > { %v18125_v54 = vsel %vm17709_vm7, %v18124_v25, %v18120_v16  ;;  %v17788_v16 = vrot.slane %v28076_v58, %v28058_v27  ;;  %v28084_v58 = vld [vmem:[#allocation97_spill] sm:$0xff] }
 0x7ab   : > { %v18130_v56 = vsel %vm17716_vm8, %v18129_v13, %v18125_v54  ;;  %v17561_v49 = vpop.permute.xlu1 %17560  ;;  %v27101_v20 = vpop.permute.xlu0 %17614  ;;  %v28077_v13 = vld [vmem:[#allocation125_spill] sm:$0xff] }
 0x7ac   : > { %v18135_v55 = vsel %vm17723_vm9, %v18134_v41, %v18130_v56  ;;  %v18154_v6 = vrot.slane %v17561_v49, %v28069_v39  ;;  %v17784_v41 = vrot.slane %v28077_v13, %v28054_v48  ;;  %v28078_v49 = vld [vmem:[#allocation122_spill] sm:$0xff] }
 0x7ad   : > { %v18140_v0 = vsel %vm17730_vm10, %v18139_v32, %v18135_v55  ;;  %v17680_v55 = vrot.slane %v28078_v49, %v28058_v27  ;;  %v28086_v49 = vld [vmem:[#allocation68_spill] sm:$0xff] }
 0x7ae   : > { %v17789_v32 = vsel %vm17681_vm3, %v17788_v16, %v17784_v41  ;;  %v17803_v16 = vrot.slane %v28084_v58, %v28056_v23  ;;  %v28085_v41 = vld [vmem:[#allocation15_spill] sm:$0xff] }
 0x7af   : > { %v17555_v50 = vpop.permute.xlu1 %17554  ;;  %v17630_v25 = vpop.permute.xlu0 %17629 }
 0x7b0   : > { %v18144_v52 = vrot.slane %v17555_v50, %v28068_v17 }
 0x7b2   : > { %v18145_v22 = vsel %vm17737_vm11, %v18144_v52, %v18140_v0  ;;  %v28079_v0 = vld [vmem:[#allocation35_spill] sm:$0xff]  ;;  %v18179_v52 = vrot.slane %v27044_v37, %v28054_v48 }
 0x7b3   : > { %v18150_v40 = vsel %vm17744_vm12, %v18149_v61, %v18145_v22  ;;  %v17573_v18 = vpop.permute.xlu1 %17572  ;;  %v17793_v50 = vrot.slane %v28079_v0, %v28052_v60  ;;  %v28080_v61 = vld [vmem:[#allocation54_spill] sm:$0xff]  ;;  %v28087_v0 = vld [vmem:[#allocation27_spill] sm:$0xff] }
 0x7b4   : > { %v18155_v35 = vsel %vm17751_vm13, %v18154_v6, %v18150_v40  ;;  %v18174_v10 = vrot.slane %v17573_v18, %v28074_v28  ;;  %v17675_v6 = vrot.slane %v28080_v61, %v28054_v48  ;;  %v17624_v40 = vpop.permute.xlu0 %17623 }
 0x7b5   : > { %v18160_v2 = vsel %vm17758_vm14, %v18159_v38, %v18155_v35  ;;  %v17794_v22 = vsel %vm17688_vm4, %v17793_v50, %v17789_v32  ;;  %v28081_v35 = vld [vmem:[#allocation19_spill] sm:$0xff]  ;;  %v17708_v50 = vrot.slane %v28087_v0, %v28062_v7 }
 0x7b6   : > { %v17798_v38 = vrot.slane %v28081_v35, %v28059_v45  ;;  %v18198_v35 = vrot.slane %v27063_v24, %v28056_v23  ;;  %v28092_v0 = vld [vmem:[#allocation23_spill] sm:$0xff] }
 0x7b7   : > { %v17567_v4 = vpop.permute.xlu1 %17566 }
 0x7b8   : > { %v18164_v1 = vrot.slane %v17567_v4, %v28071_v43  ;;  %v18188_v4 = vrot.slane %v27033_v19, %v28052_v60 }
 0x7ba   : > { %v18165_v15 = vsel %vm17765_vm15, %v18164_v1, %v18160_v2  ;;  %v28082_v2 = vld [vmem:[#allocation38_spill] sm:$0xff] }
 0x7bb   : > { %v18170_v29 = vsel %vm17772_vm0, %v18169_v9, %v18165_v15  ;;  %v17585_v36 = vpop.permute.xlu1 %17584  ;;  %v17682_v9 = vsel %vm17681_vm3, %v17680_v55, %v17675_v6  ;;  %v17687_v37 = vrot.slane %v28082_v2, %v28052_v60  ;;  %v28083_v15 = vld [vmem:[#allocation21_spill] sm:$0xff]  ;;  %v17701_v55 = vrot.slane %v28086_v49, %v28056_v23 }
 0x7bc   : > { %v27093_v14 = vsel %vm17779_vm1, %v18174_v10, %v18170_v29  ;;  %v17799_v10 = vsel %vm17695_vm5, %v17798_v38, %v17794_v22  ;;  %v17808_v29 = vrot.slane %v28083_v15, %v28062_v7  ;;  %v18193_v13 = vrot.slane %v17585_v36, %v28059_v45  ;;  %v17642_v36 = vpop.permute.xlu0 %17641  ;;  %v28089_v15 = vld [vmem:[#allocation62_spill] sm:$0xff] }
 0x7bd   : > { %v18336_v30 = vcombine.low %v27042_v62, %v27093_v14  ;;  %v17689_v32 = vsel %vm17688_vm4, %v17687_v37, %v17682_v9  ;;  %v17804_v61 = vsel %vm17702_vm6, %v17803_v16, %v17799_v10  ;;  %v18258_v6 = vrot.slane %v17624_v40, %v28054_v48 }
 0x7be   : > { %v18267_v48 = vrot.slane %v17630_v25, %v28052_v60  ;;  %v18208_v16 = vrot.slane %v27056_v12, %v28060_v46 }
 0x7bf   : > { %v17579_v31 = vpop.permute.xlu1 %17578 }
 0x7c0   : > { %v18183_v54 = vrot.slane %v17579_v31, %v28058_v27  ;;  %v17636_v25 = vpop.permute.xlu0 %17635 }
 0x7c2   : > { %v18184_v18 = vsel %vm17681_vm3, %v18183_v54, %v18179_v52  ;;  %v17694_v54 = vrot.slane %v28085_v41, %v28059_v45 }
 0x7c3   : > { %v27099_v44 = vpop.permute.xlu1 %17596  ;;  %v18189_v31 = vsel %vm17688_vm4, %v18188_v4, %v18184_v18  ;;  %v17809_v18 = vsel %vm17709_vm7, %v17808_v29, %v17804_v61  ;;  %v28088_v4 = vld [vmem:[#allocation79_spill] sm:$0xff]  ;;  %v17715_v29 = vrot.slane %v28089_v15, %v28060_v46 }
 0x7c4   : > { %v17696_v38 = vsel %vm17695_vm5, %v17694_v54, %v17689_v32  ;;  %v18213_v12 = vrot.slane %v27099_v44, %v28065_v21 }
 0x7c5   : > { %v17703_v2 = vsel %vm17702_vm6, %v17701_v55, %v17696_v38 }
 0x7c7   : > { %v17591_v53 = vpop.permute.xlu1 %17590 }
 0x7c8   : > { %v18203_v22 = vrot.slane %v17591_v53, %v28062_v7  ;;  %v17710_v53 = vsel %vm17709_vm7, %v17708_v50, %v17703_v2  ;;  %v17828_v50 = vrot.slane %v28092_v0, %v28068_v17  ;;  %v28100_v0 = vld [vmem:[#allocation11_spill] sm:$0xff] }
 0x7c9   : > { %v17717_v54 = vsel %vm17716_vm8, %v17715_v29, %v17710_v53  ;;  %v28097_v29 = vld [vmem:[#allocation36_spill] sm:$0xff] }
 0x7cb   : > { %v27105_v11 = vpop.permute.xlu1 %17602 }
 0x7cf   : > { %v17633_v56 = vpop.permute.xlu1 %17632 }
 0x7d3   : > { %v17627_v1 = vpop.permute.xlu1 %17626 }
 0x7d4   : > { %v18262_v19 = vrot.slane %v17627_v1, %v28058_v27  ;;  %v18194_v27 = vsel %vm17695_vm5, %v18193_v13, %v18189_v31  ;;  %v17813_v1 = vrot.slane %v28088_v4, %v28060_v46  ;;  %v28090_v31 = vld [vmem:[#allocation83_spill] sm:$0xff]  ;;  %v18272_v13 = vrot.slane %v17633_v56, %v28059_v45  ;;  %v28093_v56 = vld [vmem:[#allocation42_spill] sm:$0xff]  ;;  %v28095_v4 = vld [vmem:[#allocation17_spill] sm:$0xff] }
 0x7d5   : > { %v18199_v40 = vsel %vm17702_vm6, %v18198_v35, %v18194_v27  ;;  %v17818_v58 = vrot.slane %v28090_v31, %v28065_v21  ;;  %v18277_v27 = vrot.slane %v17636_v25, %v28056_v23  ;;  %v17743_v31 = vrot.slane %v28097_v29, %v28066_v34 }
 0x7d6   : > { %v18263_v9 = vsel %vm17681_vm3, %v18262_v19, %v18258_v6  ;;  %v17814_v10 = vsel %vm17716_vm8, %v17813_v1, %v17809_v18  ;;  %v18204_v24 = vsel %vm17709_vm7, %v18203_v22, %v18199_v40  ;;  %v28091_v19 = vld [vmem:[#allocation126_spill] sm:$0xff]  ;;  %v17823_v6 = vrot.slane %v28093_v56, %v28063_v33  ;;  %v28094_v18 = vld [vmem:[#allocation55_spill] sm:$0xff] }
 0x7d7   : > { %v27143_v52 = vpop.permute.xlu1 %17644  ;;  %v18268_v60 = vsel %vm17688_vm4, %v18267_v48, %v18263_v9  ;;  %v17722_v41 = vrot.slane %v28091_v19, %v28065_v21  ;;  %v17819_v32 = vsel %vm17723_vm9, %v17818_v58, %v17814_v10  ;;  %v18209_v49 = vsel %vm17716_vm8, %v18208_v16, %v18204_v24 }
 0x7d8   : > { %v18273_v61 = vsel %vm17695_vm5, %v18272_v13, %v18268_v60  ;;  %v17736_v35 = vrot.slane %v28094_v18, %v28068_v17  ;;  %v18214_v38 = vsel %vm17723_vm9, %v18213_v12, %v18209_v49  ;;  %v17729_v1 = vrot.slane %v28095_v4, %v28063_v33  ;;  %v28098_v60 = vld [vmem:[#allocation75_spill] sm:$0xff]  ;;  %v17648_v13 = vpop.permute.xlu0 %17647 }
 0x7d9   : > { %v17724_v22 = vsel %vm17723_vm9, %v17722_v41, %v17717_v54  ;;  %v17824_v44 = vsel %vm17730_vm10, %v17823_v6, %v17819_v32  ;;  %v18278_v9 = vsel %vm17702_vm6, %v18277_v27, %v18273_v61  ;;  %v18223_v48 = vrot.slane %v27105_v11, %v28068_v17 }
 0x7da   : > { %v17829_v23 = vsel %vm17737_vm11, %v17828_v50, %v17824_v44  ;;  %v17731_v10 = vsel %vm17730_vm10, %v17729_v1, %v17724_v22  ;;  %v18287_v24 = vrot.slane %v17642_v36, %v28060_v46  ;;  %v17838_v25 = vrot.slane %v28098_v60, %v28069_v39  ;;  %v28099_v36 = vld [vmem:[#allocation128_spill] sm:$0xff] }
 0x7db   : > { %v17639_v37 = vpop.permute.xlu1 %17638  ;;  %v18292_v46 = vrot.slane %v27143_v52, %v28065_v21  ;;  %v17750_v41 = vrot.slane %v28099_v36, %v28069_v39  ;;  %v18228_v32 = vrot.slane %v27071_v26, %v28066_v34  ;;  %v17848_v50 = vrot.slane %v28100_v0, %v28071_v43  ;;  %v28102_v26 = vld [vmem:[#allocation16_spill] sm:$0xff] }
 0x7dc   : > { %v18282_v45 = vrot.slane %v17639_v37, %v28062_v7  ;;  %v18218_v7 = vrot.slane %v27080_v42, %v28063_v33  ;;  %v28096_v37 = vld [vmem:[#allocation67_spill] sm:$0xff]  ;;  %v17738_v42 = vsel %vm17737_vm11, %v17736_v35, %v17731_v10  ;;  %v18297_v52 = vrot.slane %v17648_v13, %v28063_v33  ;;  %v28103_v35 = vld [vmem:[#allocation9_spill] sm:$0xff] }
 0x7dd   : > { %v17833_v53 = vrot.slane %v28096_v37, %v28066_v34  ;;  %v17745_v54 = vsel %vm17744_vm12, %v17743_v31, %v17738_v42  ;;  %v17764_v22 = vrot.slane %v28102_v26, %v28071_v43  ;;  %v18233_v18 = vrot.slane %v27090_v59, %v28069_v39 }
 0x7de   : > { %v18283_v40 = vsel %vm17709_vm7, %v18282_v45, %v18278_v9  ;;  %v18219_v15 = vsel %vm17730_vm10, %v18218_v7, %v18214_v38  ;;  %v28101_v45 = vld [vmem:[#allocation22_spill] sm:$0xff]  ;;  %v17752_v27 = vsel %vm17751_vm13, %v17750_v41, %v17745_v54  ;;  %v17757_v38 = vrot.slane %v28103_v35, %v28070_v3  ;;  %v28104_v7 = vld [vmem:[#allocation52_spill] sm:$0xff] }
 0x7df   : > { %v27175_v55 = vpop.permute.xlu1 %17653  ;;  %v17834_v58 = vsel %vm17744_vm12, %v17833_v53, %v17829_v23  ;;  %v18288_v11 = vsel %vm17716_vm8, %v18287_v24, %v18283_v40  ;;  %v18224_v19 = vsel %vm17737_vm11, %v18223_v48, %v18219_v15  ;;  %v17843_v21 = vrot.slane %v28101_v45, %v28070_v3  ;;  %v17618_v48 = vpop.permute.xlu0 %17617  ;;  %v28105_v53 = vld [vmem:[#allocation102_spill] sm:$0xff] }
 0x7e0   : > { %v17839_v49 = vsel %vm17751_vm13, %v17838_v25, %v17834_v58  ;;  %v18293_v12 = vsel %vm17723_vm9, %v18292_v46, %v18288_v11  ;;  %v18229_v56 = vsel %vm17744_vm12, %v18228_v32, %v18224_v19  ;;  %v17853_v9 = vrot.slane %v28104_v7, %v28072_v57  ;;  %v28107_v11 = vld [vmem:[#allocation124_spill] sm:$0xff] }
 0x7e1   : > { %v18298_v4 = vsel %vm17730_vm10, %v18297_v52, %v18293_v12  ;;  %v18234_v1 = vsel %vm17751_vm13, %v18233_v18, %v18229_v56  ;;  %v17759_v23 = vsel %vm17758_vm14, %v17757_v38, %v17752_v27  ;;  %v18238_v59 = vrot.slane %v27097_v5, %v28070_v3  ;;  %v28106_v5 = vld [vmem:[#allocation74_spill] sm:$0xff] }
 0x7e2   : > { %v18307_v40 = vrot.slane %v27175_v55, %v28066_v34  ;;  %v17771_v10 = vrot.slane %v28105_v53, %v28072_v57  ;;  %v17766_v24 = vsel %vm17765_vm15, %v17764_v22, %v17759_v23  ;;  %v17858_v58 = vrot.slane %v28106_v5, %v28074_v28 }
 0x7e3   : > { %v17657_v2 = vpop.permute.xlu1 %17656  ;;  %v18239_v42 = vsel %vm17758_vm14, %v18238_v59, %v18234_v1  ;;  %v18243_v34 = vrot.slane %v27101_v20, %v28071_v43  ;;  %v18248_v36 = vrot.slane %v17618_v48, %v28072_v57  ;;  %v17621_v20 = vpop.permute.xlu0 %17620 }
 0x7e4   : > { %v18312_v55 = vrot.slane %v17657_v2, %v28069_v39  ;;  %v17773_v60 = vsel %vm17772_vm0, %v17771_v10, %v17766_v24 }
 0x7e5   : > { %v18244_v46 = vsel %vm17765_vm15, %v18243_v34, %v18239_v42 }
 0x7e6   : > { %v18249_v0 = vsel %vm17772_vm0, %v18248_v36, %v18244_v46 }
 0x7e7   : > { %v17651_v16 = vpop.permute.xlu1 %17650 }
 0x7e8   : > { %v18302_v61 = vrot.slane %v17651_v16, %v28068_v17  ;;  %v17844_v17 = vsel %vm17758_vm14, %v17843_v21, %v17839_v49  ;;  %v17778_v16 = vrot.slane %v28107_v11, %v28074_v28 }
 0x7e9   : > { %v17849_v33 = vsel %vm17765_vm15, %v17848_v50, %v17844_v17 }
 0x7ea   : > { %v18303_v44 = vsel %vm17737_vm11, %v18302_v61, %v18298_v4  ;;  %v17854_v15 = vsel %vm17772_vm0, %v17853_v9, %v17849_v33  ;;  %v17780_v2 = vsel %vm17779_vm1, %v17778_v16, %v17773_v60  ;;  %v18351_v61 = vrot.slane %v18335_v8, %v22641_v47 }
 0x7eb   : > { %v17666_v6 = vpop.permute.xlu1 %17665  ;;  %v18308_v29 = vsel %vm17744_vm12, %v18307_v40, %v18303_v44  ;;  %v17859_v13 = vsel %vm17779_vm1, %v17858_v58, %v17854_v15 }
 0x7ec   : > { %v18313_v19 = vsel %vm17751_vm13, %v18312_v55, %v18308_v29  ;;  %v18334_v54 = vcombine.low %v17780_v2, %v17859_v13  ;;  %v18327_v32 = vrot.slane %v17666_v6, %v28072_v57 }
 0x7ee   : > { %v18344_v52 = vrot.slane %v18334_v54, %v22641_v47 }
 0x7ef   : > { %v17660_v37 = vpop.permute.xlu1 %17659 }
 0x7f0   : > { %v18317_v31 = vrot.slane %v17660_v37, %v28070_v3  ;;  %v18366_v6 = vcombine.low %v18344_v52, %v18351_v61 }
 0x7f2   : > { %v18318_v39 = vsel %vm17758_vm14, %v18317_v31, %v18313_v19  ;;  %v18374_v51 = vrot.slane %v18366_v6, %v22641_v47 }
 0x7f3   : > { %v17663_v25 = vpop.permute.xlu1 %17662 }
 0x7f4   : > { %v18322_v3 = vrot.slane %v17663_v25, %v28071_v43  ;;  %v18253_v43 = vrot.slane %v17621_v20, %v28074_v28 }
 0x7f6   : > { %v18323_v41 = vsel %vm17765_vm15, %v18322_v3, %v18318_v39  ;;  %v18254_v45 = vsel %vm17779_vm1, %v18253_v43, %v18249_v0 }
 0x7f7   : > { %v17669_v49 = vpop.permute.xlu1 %17668  ;;  %v18328_v12 = vsel %vm17772_vm0, %v18327_v32, %v18323_v41 }
 0x7f8   : > { %v18332_v50 = vrot.slane %v17669_v49, %v28074_v28  ;;  %v18358_v28 = vrot.slane %v18336_v30, %v22641_v47 }
 0x7fa   : > { %v18333_v57 = vsel %vm17779_vm1, %v18332_v50, %v18328_v12 }
 0x7fb   : > { %v18337_v21 = vcombine.low %v18254_v45, %v18333_v57 }
 0x7fd   : > { %v18365_v56 = vrot.slane %v18337_v21, %v22641_v47 }
 0x7ff   : > { %v18367_v63 = vcombine.low %v18358_v28, %v18365_v56 }
 0x801   : > { %v18381_v8 = vrot.slane %v18367_v63, %v22641_v47 }
 0x803   : > { %v18382_v27 = vcombine.low %v18374_v51, %v18381_v8 }
 0x805   : > { %18384 = vst [vmem:[%s511_s26] sm:$0xff] %v18382_v27 }
 0x806   : > { %19902 = shalt.err (!%p19899_p3)
}
 0x807   : > { %s19903_s1 = scalar_lea.hbm %s18398_s23, 128  ;;  %s19907_s26 = scalar_lea.hbm %s27338_s14, 256 }
 0x808   : > { %p19904_p4 = scmp.ne.s32.totalorder %s18398_s23, %s19903_s1  ;;  %p19908_p9 = scmp.lt.s32.totalorder %s18398_s23, %s27338_s14 }
 0x809   : > { %p19909_p10 = scmp.lt.s32.totalorder %s19907_s26, %s19903_s1 }
 0x80a   : > { %p19905_p7 = pnand %p19904_p4, %p20067_p5 }
 0x80b   : > { %p19910_p11 = por %p19909_p10, %p19908_p9 }
 0x80c   : > { %p19906_p8 = pneg %p19905_p7 }
 0x80e   : > { %p19911_p12 = pnand %p19910_p11, %p19906_p8 }
 0x810   : > { %19914 = shalt.err (!%p19911_p12)
}
 0x811   : > { %19699 = dma.vmem_to_hbm [thread:$0]  (%p20067_p5), %s18401_s30, 128, %s18398_s23, %s18386_s22  }
 0x812 PF: > { %p19705_p13 = scmp.ge.s32.totalorder %s19949_s18, 2  ;;  %s18412_s0 = sand.u32 1, %s19937_s15  }
 0x813   : > { %s18413_s4 = scalar_lea.sflag [#allocation4], %s18412_s0 }
 0x814   : > { %p19702_p0 = pnand %p19705_p13, %p20071_p6 }
 0x816   : > { %p19703_p1 = pneg %p19702_p0 }
 0x818   : > { %19932 = dma.done.wait (%p19703_p1), %s18413_s4, 128  }
 0x819   : > { %19934 = vsyncadd (%p19703_p1), %s18413_s4, 4294967168  ;;  %s28108_s1 = sld [smem:[#allocation6_spill]]  ;;  %p26_p2 = scmp.ge.s32.totalorder %s20055_s20, 4  }
 0x81a   : > { %s28109_s15 = smov %s19941_s16  ;;  %s28110_s16 = smov %s19945_s17 }
 0x81b   : > { %s28112_s18 = smov %s20055_s20  ;;  %28 = sbr.rel (!%p26_p2) target bundleno = 7 (0x7), region = 120 }
 0x81f   : > { %s28111_s17 = smov %s28108_s1 }
 0x820   :  { %18418 = vsyncpa [#allocation4], 1 }
 0x821   :  { %18420 = vsyncpa [#allocation4 + $0x1], 1 }

</bundles_post_ra>
